<compile_context>
chip_gen: v7x
topology: tpu7x:2x2x1
jax: 0.10.0
libtpu: 0.0.40
codegen_flags: <defaults>
</compile_context>

<pallas_src>
import jax
import jax.numpy as jnp
from jax.experimental import pallas as pl
from jax.experimental.pallas import tpu as pltpu

NC = 3
NDF = 64
LRELU_SLOPE = 0.2
BN_EPS = 1e-5
VMEM_LIMIT = 32 * 1024 * 1024


# --------------------------------------------------------------------------- #
# Kernels
# --------------------------------------------------------------------------- #
def _conv_lrelu_kernel(x_ref, w_ref, o_ref):
    """Layer 1: im2col-GEMM conv + LeakyReLU(0.2). bf16 in, f32 acc, bf16 out."""
    y = jnp.dot(x_ref[...], w_ref[...], preferred_element_type=jnp.float32)
    y = jnp.where(y > 0, y, LRELU_SLOPE * y)
    o_ref[...] = y.astype(o_ref.dtype)


def _conv_bn_lrelu_kernel(x_ref, w_ref, g_ref, b_ref, o_ref):
    """Conv (im2col GEMM) + training-mode BatchNorm + LeakyReLU(0.2).

    BN stats (biased, over the full M = N*Ho*Wo axis) computed in one pass on
    the f32 accumulator: mean = E[y], var = E[y^2] - mean^2.
    """
    y = jnp.dot(x_ref[...], w_ref[...], preferred_element_type=jnp.float32)
    inv_m = 1.0 / y.shape[0]
    mean = jnp.sum(y, axis=0, keepdims=True) * inv_m
    var = jnp.sum(y * y, axis=0, keepdims=True) * inv_m - mean * mean
    y = (y - mean) * jax.lax.rsqrt(var + BN_EPS)
    y = y * g_ref[...] + b_ref[...]
    y = jnp.where(y > 0, y, LRELU_SLOPE * y)
    o_ref[...] = y.astype(o_ref.dtype)


def _conv_bn_lrelu_head_kernel(x_ref, w_ref, g_ref, b_ref, w5_ref, sel_ref, o_ref):
    """Layer 4 (conv + BN + LeakyReLU) fused with the final 4x4 valid conv
    (Cout=1) and sigmoid.

    x_ref:   (M4, 4096) bf16 im2col patches of layer 4 (M4 = N*4*4)
    w_ref:   (4096, 512) bf16
    g/b_ref: (1, 512) f32 BN affine
    w5_ref:  (M4, 512) f32 -- final-conv tap weights broadcast per row
    sel_ref: (N, M4) f32 one-hot row->image selector (segment sum via tiny MXU dot)
    o_ref:   (N, 1) f32 sigmoid probabilities
    """
    y = jnp.dot(x_ref[...], w_ref[...], preferred_element_type=jnp.float32)
    inv_m = 1.0 / y.shape[0]
    mean = jnp.sum(y, axis=0, keepdims=True) * inv_m
    var = jnp.sum(y * y, axis=0, keepdims=True) * inv_m - mean * mean
    y = (y - mean) * jax.lax.rsqrt(var + BN_EPS)
    y = y * g_ref[...] + b_ref[...]
    a = jnp.where(y > 0, y, LRELU_SLOPE * y)

    # Final conv: per-image sum over all 16 spatial taps x 512 channels.
    prod = a * w5_ref[...]                                               # VPU
    per_img = jnp.dot(sel_ref[...], prod, preferred_element_type=jnp.float32)
    z = jnp.sum(per_img, axis=1, keepdims=True)                          # (N, 1)
    den = 1.0 + jnp.exp(-z)
    o_ref[...] = jnp.clip(pl.reciprocal(den, approx=True), 0.0, 1.0)     # sigmoid


# --------------------------------------------------------------------------- #
# pallas_call wrappers
# --------------------------------------------------------------------------- #
def _conv1(cols, w1p):
    """Layer 1: M-tiled grid, parallel semantics (uses both TCs on v7x)."""
    M, K = cols.shape
    Cp = w1p.shape[1]
    tm = 512 if M % 512 == 0 else M
    return pl.pallas_call(
        _conv_lrelu_kernel,
        out_shape=jax.ShapeDtypeStruct((M, Cp), jnp.bfloat16),
        grid=(M // tm,),
        in_specs=[pl.BlockSpec((tm, K), lambda i: (i, 0)),
                  pl.BlockSpec((K, Cp), lambda i: (0, 0))],
        out_specs=pl.BlockSpec((tm, Cp), lambda i: (i, 0)),
        compiler_params=pltpu.CompilerParams(
            dimension_semantics=("parallel",),
            vmem_limit_bytes=VMEM_LIMIT),
    )(cols, w1p)


def _conv_bn(cols, w, g, b):
    """BN layers: whole-M (batch stats couple all rows), everything VMEM-resident."""
    M, _ = cols.shape
    C = w.shape[1]
    return pl.pallas_call(
        _conv_bn_lrelu_kernel,
        out_shape=jax.ShapeDtypeStruct((M, C), jnp.bfloat16),
        in_specs=[pl.BlockSpec(memory_space=pltpu.MemorySpace.VMEM)] * 4,
        out_specs=pl.BlockSpec(memory_space=pltpu.MemorySpace.VMEM),
        compiler_params=pltpu.CompilerParams(vmem_limit_bytes=VMEM_LIMIT),
    )(cols, w, g, b)


def _conv_bn_head(cols, w, g, b, w5b, sel):
    n = sel.shape[0]
    return pl.pallas_call(
        _conv_bn_lrelu_head_kernel,
        out_shape=jax.ShapeDtypeStruct((n, 1), jnp.float32),
        in_specs=[pl.BlockSpec(memory_space=pltpu.MemorySpace.VMEM)] * 6,
        out_specs=pl.BlockSpec(memory_space=pltpu.MemorySpace.VMEM),
        compiler_params=pltpu.CompilerParams(vmem_limit_bytes=VMEM_LIMIT),
    )(cols, w, g, b, w5b, sel)


# --------------------------------------------------------------------------- #
# Wrapper-side layout plumbing (pure XLA, all bf16)
# --------------------------------------------------------------------------- #
def _im2col_nhwc(x, kh, kw, stride, pad):
    """NHWC im2col with tap-major K ordering: k = (ki*kw + kj)*C + c."""
    N, H, W, C = x.shape
    xp = jnp.pad(x, ((0, 0), (pad, pad), (pad, pad), (0, 0)))
    Ho = (H + 2 * pad - kh) // stride + 1
    Wo = (W + 2 * pad - kw) // stride + 1
    taps = []
    for i in range(kh):
        for j in range(kw):
            taps.append(xp[:, i:i + stride * Ho:stride, j:j + stride * Wo:stride, :])
    col = jnp.stack(taps, axis=3)                        # (N, Ho, Wo, kh*kw, C)
    col = col.reshape(N * Ho * Wo, kh * kw * C)
    return col, Ho, Wo


def _to_mat(w):
    """PyTorch (Cout, Cin, kh, kw) -> (kh*kw*Cin, Cout), matching _im2col_nhwc."""
    co, ci, kh, kw = w.shape
    return jnp.transpose(w, (2, 3, 1, 0)).reshape(kh * kw * ci, co)


def init_params(key):
    """Deterministic DCGAN-style init (N(0, 0.02) conv weights, fresh BN)."""
    shapes = [(NDF, NC, 4, 4), (NDF * 2, NDF, 4, 4), (NDF * 4, NDF * 2, 4, 4),
              (NDF * 8, NDF * 4, 4, 4), (1, NDF * 8, 4, 4)]
    keys = jax.random.split(key, len(shapes))
    ws = [0.02 * jax.random.normal(k, s, jnp.float32) for k, s in zip(keys, shapes)]

    w1 = _to_mat(ws[0])                                             # (48, 64)
    params = {
        # zero-pad Cout 64 -> 128: lane-dense layer-1 output store
        "w1p": jnp.pad(w1, ((0, 0), (0, 128 - NDF))).astype(jnp.bfloat16),
        "w2": _to_mat(ws[1]).astype(jnp.bfloat16),                  # (1024, 128)
        "w3": _to_mat(ws[2]).astype(jnp.bfloat16),                  # (2048, 256)
        "w4": _to_mat(ws[3]).astype(jnp.bfloat16),                  # (4096, 512)
        # final 4x4 valid conv, Cout=1: (kh, kw, Cin)-major -> (16, 512), f32
        "w5p": jnp.transpose(ws[4][0], (1, 2, 0)).reshape(16, NDF * 8),
    }
    for name, c in (("2", NDF * 2), ("3", NDF * 4), ("4", NDF * 8)):
        params["g" + name] = jnp.ones((1, c), jnp.float32)
        params["b" + name] = jnp.zeros((1, c), jnp.float32)
    return params


def discriminator_forward(x_nchw, p):
    N = x_nchw.shape[0]
    x = jnp.transpose(x_nchw, (0, 2, 3, 1)).astype(jnp.bfloat16)    # NHWC, bf16

    # layer 1: Conv(3->64, 4, s2, p1) + LeakyReLU   (no BN, M-parallel grid)
    cols, Ho, Wo = _im2col_nhwc(x, 4, 4, 2, 1)
    h = _conv1(cols, p["w1p"]).reshape(N, Ho, Wo, 128)[..., :NDF]

    # layer 2: Conv(64->128) + BN + LeakyReLU
    cols, Ho, Wo = _im2col_nhwc(h, 4, 4, 2, 1)
    h = _conv_bn(cols, p["w2"], p["g2"], p["b2"]).reshape(N, Ho, Wo, NDF * 2)

    # layer 3: Conv(128->256) + BN + LeakyReLU
    cols, Ho, Wo = _im2col_nhwc(h, 4, 4, 2, 1)
    h = _conv_bn(cols, p["w3"], p["g3"], p["b3"]).reshape(N, Ho, Wo, NDF * 4)

    # layer 4 + final Conv(512->1, 4, valid) + Sigmoid, fused in one kernel
    cols, Ho, Wo = _im2col_nhwc(h, 4, 4, 2, 1)                      # (N*16, 4096)
    w5b = jnp.tile(p["w5p"], (N, 1))                                # (N*16, 512)
    ids = jnp.arange(N * Ho * Wo) // (Ho * Wo)
    sel = (ids[None, :] == jnp.arange(N)[:, None]).astype(jnp.float32)
    out = _conv_bn_head(cols, p["w4"], p["g4"], p["b4"], w5b, sel)
    return out                                                      # == view(-1, 1)


if __name__ == "__main__":
    key = jax.random.PRNGKey(0)
    k_x, k_p = jax.random.split(key)
    # DCGAN discriminator needs 64x64 spatial input so the final 4x4 valid conv
    # produces a 1x1 map. Small batch keeps everything tiny.
    x = jax.random.normal(k_x, (2, NC, 64, 64), jnp.float32)
    params = init_params(k_p)

    fwd = jax.jit(discriminator_forward)
    out = jax.block_until_ready(fwd(x, params))

    assert out.shape == (2, 1), out.shape
    assert bool(jnp.all(jnp.isfinite(out)))
    assert bool(jnp.all((out >= 0.0) & (out <= 1.0)))  # sigmoid range
    print("KERNEL_OK")
</pallas_src>

<mosaic_0001>
module attributes {stable_mosaic.version = 11 : i64} {
  func.func @_conv_lrelu_kernel(%arg0: i32, %arg1: memref<512x48xbf16, #tpu.memory_space<vmem>>, %arg2: memref<48x128xbf16, #tpu.memory_space<vmem>>, %arg3: memref<512x128xbf16, #tpu.memory_space<vmem>>) attributes {dimension_semantics = [#tpu.dimension_semantics<parallel>], iteration_bounds = array<i64: 4>, scalar_prefetch = 0 : i64, scratch_operands = 0 : i64, tpu.core_type = #tpu.core_type<tc>, window_params = [{transform_indices = @transform_0, window_bounds = array<i64: 512, 48>}, {pipeline_mode = #tpu.pipeline_mode<synchronous>, transform_indices = @transform_1, window_bounds = array<i64: 48, 128>}, {transform_indices = @transform_2, window_bounds = array<i64: 512, 128>}]} {
    %c0 = arith.constant 0 : index
    %c0_0 = arith.constant 0 : index
    %0 = vector.load %arg1[%c0, %c0_0] : memref<512x48xbf16, #tpu.memory_space<vmem>>, vector<512x48xbf16>
    %c0_1 = arith.constant 0 : index
    %c0_2 = arith.constant 0 : index
    %1 = vector.load %arg2[%c0_1, %c0_2] : memref<48x128xbf16, #tpu.memory_space<vmem>>, vector<48x128xbf16>
    %cst = arith.constant dense<0.000000e+00> : vector<512x128xf32>
    %2 = tpu.matmul %0, %1, %cst {dimension_numbers = #tpu.dot_dimension_numbers<[1], [0], [0], [1], [0, 0, 1, 1], [], []>} : vector<512x48xbf16>, vector<48x128xbf16>, vector<512x128xf32> -> vector<512x128xf32>
    %cst_3 = arith.constant 0.000000e+00 : f32
    %3 = vector.broadcast %cst_3 : f32 to vector<512x128xf32>
    %4 = arith.cmpf ogt, %2, %3 : vector<512x128xf32>
    %cst_4 = arith.constant 2.000000e-01 : f32
    %5 = vector.broadcast %cst_4 : f32 to vector<512x128xf32>
    %6 = arith.mulf %5, %2 : vector<512x128xf32>
    %7 = arith.select %4, %2, %6 : vector<512x128xi1>, vector<512x128xf32>
    %8 = arith.truncf %7 : vector<512x128xf32> to vector<512x128xbf16>
    %c0_5 = arith.constant 0 : index
    %c0_6 = arith.constant 0 : index
    %9 = vector.load %arg3[%c0_5, %c0_6] : memref<512x128xbf16, #tpu.memory_space<vmem>>, vector<512x128xbf16>
    tpu.vector_store %arg3[%c0_5, %c0_6], %8 {strides = array<i32>} : memref<512x128xbf16, #tpu.memory_space<vmem>>, vector<512x128xbf16>,
    return
  }
  func.func @transform_0(%arg0: i32) -> (i32, i32) {
    %c0_i32 = arith.constant 0 : i32
    %c0_i32_0 = arith.constant 0 : i32
    return %arg0, %c0_i32 : i32, i32
  }
  func.func @transform_1(%arg0: i32) -> (i32, i32) {
    %c0_i32 = arith.constant 0 : i32
    %c0_i32_0 = arith.constant 0 : i32
    %c0_i32_1 = arith.constant 0 : i32
    return %c0_i32, %c0_i32_0 : i32, i32
  }
  func.func @transform_2(%arg0: i32) -> (i32, i32) {
    %c0_i32 = arith.constant 0 : i32
    %c0_i32_0 = arith.constant 0 : i32
    return %arg0, %c0_i32 : i32, i32
  }
}

module attributes {stable_mosaic.version = 11 : i64} {
  func.func @_conv_bn_lrelu_kernel(%arg0: memref<512x1024xbf16, #tpu.memory_space<vmem>>, %arg1: memref<1024x128xbf16, #tpu.memory_space<vmem>>, %arg2: memref<1x128xf32, #tpu.memory_space<vmem>>, %arg3: memref<1x128xf32, #tpu.memory_space<vmem>>, %arg4: memref<512x128xbf16, #tpu.memory_space<vmem>>) attributes {dimension_semantics = [], scalar_prefetch = 0 : i64, scratch_operands = 0 : i64, tpu.core_type = #tpu.core_type<tc>} {
    %c0 = arith.constant 0 : index
    %c0_0 = arith.constant 0 : index
    %0 = vector.load %arg0[%c0, %c0_0] : memref<512x1024xbf16, #tpu.memory_space<vmem>>, vector<512x1024xbf16>
    %c0_1 = arith.constant 0 : index
    %c0_2 = arith.constant 0 : index
    %1 = vector.load %arg1[%c0_1, %c0_2] : memref<1024x128xbf16, #tpu.memory_space<vmem>>, vector<1024x128xbf16>
    %cst = arith.constant dense<0.000000e+00> : vector<512x128xf32>
    %2 = tpu.matmul %0, %1, %cst {dimension_numbers = #tpu.dot_dimension_numbers<[1], [0], [0], [1], [0, 0, 1, 1], [], []>} : vector<512x1024xbf16>, vector<1024x128xbf16>, vector<512x128xf32> -> vector<512x128xf32>
    %cst_3 = arith.constant dense<0.000000e+00> : vector<128xf32>
    %3 = vector.multi_reduction <add>, %2, %cst_3 [0] : vector<512x128xf32> to vector<128xf32>
    %4 = vector.shape_cast %3 : vector<128xf32> to vector<1x128xf32>
    %cst_4 = arith.constant 0.001953125 : f32
    %5 = vector.broadcast %cst_4 : f32 to vector<1x128xf32>
    %6 = arith.mulf %4, %5 : vector<1x128xf32>
    %7 = arith.mulf %2, %2 : vector<512x128xf32>
    %cst_5 = arith.constant dense<0.000000e+00> : vector<128xf32>
    %8 = vector.multi_reduction <add>, %7, %cst_5 [0] : vector<512x128xf32> to vector<128xf32>
    %9 = vector.shape_cast %8 : vector<128xf32> to vector<1x128xf32>
    %cst_6 = arith.constant 0.001953125 : f32
    %10 = vector.broadcast %cst_6 : f32 to vector<1x128xf32>
    %11 = arith.mulf %9, %10 : vector<1x128xf32>
    %12 = arith.mulf %6, %6 : vector<1x128xf32>
    %13 = arith.subf %11, %12 : vector<1x128xf32>
    %14 = vector.broadcast %6 : vector<1x128xf32> to vector<512x128xf32>
    %15 = arith.subf %2, %14 : vector<512x128xf32>
    %cst_7 = arith.constant 9.99999974E-6 : f32
    %16 = vector.broadcast %cst_7 : f32 to vector<1x128xf32>
    %17 = arith.addf %13, %16 : vector<1x128xf32>
    %18 = math.rsqrt %17 : vector<1x128xf32>
    %19 = vector.broadcast %18 : vector<1x128xf32> to vector<512x128xf32>
    %20 = arith.mulf %15, %19 : vector<512x128xf32>
    %c0_8 = arith.constant 0 : index
    %c0_9 = arith.constant 0 : index
    %21 = vector.load %arg2[%c0_8, %c0_9] : memref<1x128xf32, #tpu.memory_space<vmem>>, vector<1x128xf32>
    %22 = vector.broadcast %21 : vector<1x128xf32> to vector<512x128xf32>
    %23 = arith.mulf %20, %22 : vector<512x128xf32>
    %c0_10 = arith.constant 0 : index
    %c0_11 = arith.constant 0 : index
    %24 = vector.load %arg3[%c0_10, %c0_11] : memref<1x128xf32, #tpu.memory_space<vmem>>, vector<1x128xf32>
    %25 = vector.broadcast %24 : vector<1x128xf32> to vector<512x128xf32>
    %26 = arith.addf %23, %25 : vector<512x128xf32>
    %cst_12 = arith.constant 0.000000e+00 : f32
    %27 = vector.broadcast %cst_12 : f32 to vector<512x128xf32>
    %28 = arith.cmpf ogt, %26, %27 : vector<512x128xf32>
    %cst_13 = arith.constant 2.000000e-01 : f32
    %29 = vector.broadcast %cst_13 : f32 to vector<512x128xf32>
    %30 = arith.mulf %29, %26 : vector<512x128xf32>
    %31 = arith.select %28, %26, %30 : vector<512x128xi1>, vector<512x128xf32>
    %32 = arith.truncf %31 : vector<512x128xf32> to vector<512x128xbf16>
    %c0_14 = arith.constant 0 : index
    %c0_15 = arith.constant 0 : index
    %33 = vector.load %arg4[%c0_14, %c0_15] : memref<512x128xbf16, #tpu.memory_space<vmem>>, vector<512x128xbf16>
    tpu.vector_store %arg4[%c0_14, %c0_15], %32 {strides = array<i32>} : memref<512x128xbf16, #tpu.memory_space<vmem>>, vector<512x128xbf16>,
    return
  }
}

module attributes {stable_mosaic.version = 11 : i64} {
  func.func @_conv_bn_lrelu_kernel(%arg0: memref<128x2048xbf16, #tpu.memory_space<vmem>>, %arg1: memref<2048x256xbf16, #tpu.memory_space<vmem>>, %arg2: memref<1x256xf32, #tpu.memory_space<vmem>>, %arg3: memref<1x256xf32, #tpu.memory_space<vmem>>, %arg4: memref<128x256xbf16, #tpu.memory_space<vmem>>) attributes {dimension_semantics = [], scalar_prefetch = 0 : i64, scratch_operands = 0 : i64, tpu.core_type = #tpu.core_type<tc>} {
    %c0 = arith.constant 0 : index
    %c0_0 = arith.constant 0 : index
    %0 = vector.load %arg0[%c0, %c0_0] : memref<128x2048xbf16, #tpu.memory_space<vmem>>, vector<128x2048xbf16>
    %c0_1 = arith.constant 0 : index
    %c0_2 = arith.constant 0 : index
    %1 = vector.load %arg1[%c0_1, %c0_2] : memref<2048x256xbf16, #tpu.memory_space<vmem>>, vector<2048x256xbf16>
    %cst = arith.constant dense<0.000000e+00> : vector<128x256xf32>
    %2 = tpu.matmul %0, %1, %cst {dimension_numbers = #tpu.dot_dimension_numbers<[1], [0], [0], [1], [0, 0, 1, 1], [], []>} : vector<128x2048xbf16>, vector<2048x256xbf16>, vector<128x256xf32> -> vector<128x256xf32>
    %cst_3 = arith.constant dense<0.000000e+00> : vector<256xf32>
    %3 = vector.multi_reduction <add>, %2, %cst_3 [0] : vector<128x256xf32> to vector<256xf32>
    %4 = vector.shape_cast %3 : vector<256xf32> to vector<1x256xf32>
    %cst_4 = arith.constant 7.812500e-03 : f32
    %5 = vector.broadcast %cst_4 : f32 to vector<1x256xf32>
    %6 = arith.mulf %4, %5 : vector<1x256xf32>
    %7 = arith.mulf %2, %2 : vector<128x256xf32>
    %cst_5 = arith.constant dense<0.000000e+00> : vector<256xf32>
    %8 = vector.multi_reduction <add>, %7, %cst_5 [0] : vector<128x256xf32> to vector<256xf32>
    %9 = vector.shape_cast %8 : vector<256xf32> to vector<1x256xf32>
    %cst_6 = arith.constant 7.812500e-03 : f32
    %10 = vector.broadcast %cst_6 : f32 to vector<1x256xf32>
    %11 = arith.mulf %9, %10 : vector<1x256xf32>
    %12 = arith.mulf %6, %6 : vector<1x256xf32>
    %13 = arith.subf %11, %12 : vector<1x256xf32>
    %14 = vector.broadcast %6 : vector<1x256xf32> to vector<128x256xf32>
    %15 = arith.subf %2, %14 : vector<128x256xf32>
    %cst_7 = arith.constant 9.99999974E-6 : f32
    %16 = vector.broadcast %cst_7 : f32 to vector<1x256xf32>
    %17 = arith.addf %13, %16 : vector<1x256xf32>
    %18 = math.rsqrt %17 : vector<1x256xf32>
    %19 = vector.broadcast %18 : vector<1x256xf32> to vector<128x256xf32>
    %20 = arith.mulf %15, %19 : vector<128x256xf32>
    %c0_8 = arith.constant 0 : index
    %c0_9 = arith.constant 0 : index
    %21 = vector.load %arg2[%c0_8, %c0_9] : memref<1x256xf32, #tpu.memory_space<vmem>>, vector<1x256xf32>
    %22 = vector.broadcast %21 : vector<1x256xf32> to vector<128x256xf32>
    %23 = arith.mulf %20, %22 : vector<128x256xf32>
    %c0_10 = arith.constant 0 : index
    %c0_11 = arith.constant 0 : index
    %24 = vector.load %arg3[%c0_10, %c0_11] : memref<1x256xf32, #tpu.memory_space<vmem>>, vector<1x256xf32>
    %25 = vector.broadcast %24 : vector<1x256xf32> to vector<128x256xf32>
    %26 = arith.addf %23, %25 : vector<128x256xf32>
    %cst_12 = arith.constant 0.000000e+00 : f32
    %27 = vector.broadcast %cst_12 : f32 to vector<128x256xf32>
    %28 = arith.cmpf ogt, %26, %27 : vector<128x256xf32>
    %cst_13 = arith.constant 2.000000e-01 : f32
    %29 = vector.broadcast %cst_13 : f32 to vector<128x256xf32>
    %30 = arith.mulf %29, %26 : vector<128x256xf32>
    %31 = arith.select %28, %26, %30 : vector<128x256xi1>, vector<128x256xf32>
    %32 = arith.truncf %31 : vector<128x256xf32> to vector<128x256xbf16>
    %c0_14 = arith.constant 0 : index
    %c0_15 = arith.constant 0 : index
    %33 = vector.load %arg4[%c0_14, %c0_15] : memref<128x256xbf16, #tpu.memory_space<vmem>>, vector<128x256xbf16>
    tpu.vector_store %arg4[%c0_14, %c0_15], %32 {strides = array<i32>} : memref<128x256xbf16, #tpu.memory_space<vmem>>, vector<128x256xbf16>,
    return
  }
}

module attributes {stable_mosaic.version = 11 : i64} {
  func.func @_conv_bn_lrelu_head_kernel(%arg0: memref<32x4096xbf16, #tpu.memory_space<vmem>>, %arg1: memref<4096x512xbf16, #tpu.memory_space<vmem>>, %arg2: memref<1x512xf32, #tpu.memory_space<vmem>>, %arg3: memref<1x512xf32, #tpu.memory_space<vmem>>, %arg4: memref<32x512xf32, #tpu.memory_space<vmem>>, %arg5: memref<2x32xf32, #tpu.memory_space<vmem>>, %arg6: memref<2x1xf32, #tpu.memory_space<vmem>>) attributes {dimension_semantics = [], scalar_prefetch = 0 : i64, scratch_operands = 0 : i64, tpu.core_type = #tpu.core_type<tc>} {
    %c0 = arith.constant 0 : index
    %c0_0 = arith.constant 0 : index
    %0 = vector.load %arg0[%c0, %c0_0] : memref<32x4096xbf16, #tpu.memory_space<vmem>>, vector<32x4096xbf16>
    %c0_1 = arith.constant 0 : index
    %c0_2 = arith.constant 0 : index
    %1 = vector.load %arg1[%c0_1, %c0_2] : memref<4096x512xbf16, #tpu.memory_space<vmem>>, vector<4096x512xbf16>
    %cst = arith.constant dense<0.000000e+00> : vector<32x512xf32>
    %2 = tpu.matmul %0, %1, %cst {dimension_numbers = #tpu.dot_dimension_numbers<[1], [0], [0], [1], [0, 0, 1, 1], [], []>} : vector<32x4096xbf16>, vector<4096x512xbf16>, vector<32x512xf32> -> vector<32x512xf32>
    %cst_3 = arith.constant dense<0.000000e+00> : vector<512xf32>
    %3 = vector.multi_reduction <add>, %2, %cst_3 [0] : vector<32x512xf32> to vector<512xf32>
    %4 = vector.shape_cast %3 : vector<512xf32> to vector<1x512xf32>
    %cst_4 = arith.constant 3.125000e-02 : f32
    %5 = vector.broadcast %cst_4 : f32 to vector<1x512xf32>
    %6 = arith.mulf %4, %5 : vector<1x512xf32>
    %7 = arith.mulf %2, %2 : vector<32x512xf32>
    %cst_5 = arith.constant dense<0.000000e+00> : vector<512xf32>
    %8 = vector.multi_reduction <add>, %7, %cst_5 [0] : vector<32x512xf32> to vector<512xf32>
    %9 = vector.shape_cast %8 : vector<512xf32> to vector<1x512xf32>
    %cst_6 = arith.constant 3.125000e-02 : f32
    %10 = vector.broadcast %cst_6 : f32 to vector<1x512xf32>
    %11 = arith.mulf %9, %10 : vector<1x512xf32>
    %12 = arith.mulf %6, %6 : vector<1x512xf32>
    %13 = arith.subf %11, %12 : vector<1x512xf32>
    %14 = vector.broadcast %6 : vector<1x512xf32> to vector<32x512xf32>
    %15 = arith.subf %2, %14 : vector<32x512xf32>
    %cst_7 = arith.constant 9.99999974E-6 : f32
    %16 = vector.broadcast %cst_7 : f32 to vector<1x512xf32>
    %17 = arith.addf %13, %16 : vector<1x512xf32>
    %18 = math.rsqrt %17 : vector<1x512xf32>
    %19 = vector.broadcast %18 : vector<1x512xf32> to vector<32x512xf32>
    %20 = arith.mulf %15, %19 : vector<32x512xf32>
    %c0_8 = arith.constant 0 : index
    %c0_9 = arith.constant 0 : index
    %21 = vector.load %arg2[%c0_8, %c0_9] : memref<1x512xf32, #tpu.memory_space<vmem>>, vector<1x512xf32>
    %22 = vector.broadcast %21 : vector<1x512xf32> to vector<32x512xf32>
    %23 = arith.mulf %20, %22 : vector<32x512xf32>
    %c0_10 = arith.constant 0 : index
    %c0_11 = arith.constant 0 : index
    %24 = vector.load %arg3[%c0_10, %c0_11] : memref<1x512xf32, #tpu.memory_space<vmem>>, vector<1x512xf32>
    %25 = vector.broadcast %24 : vector<1x512xf32> to vector<32x512xf32>
    %26 = arith.addf %23, %25 : vector<32x512xf32>
    %cst_12 = arith.constant 0.000000e+00 : f32
    %27 = vector.broadcast %cst_12 : f32 to vector<32x512xf32>
    %28 = arith.cmpf ogt, %26, %27 : vector<32x512xf32>
    %cst_13 = arith.constant 2.000000e-01 : f32
    %29 = vector.broadcast %cst_13 : f32 to vector<32x512xf32>
    %30 = arith.mulf %29, %26 : vector<32x512xf32>
    %31 = arith.select %28, %26, %30 : vector<32x512xi1>, vector<32x512xf32>
    %c0_14 = arith.constant 0 : index
    %c0_15 = arith.constant 0 : index
    %32 = vector.load %arg4[%c0_14, %c0_15] : memref<32x512xf32, #tpu.memory_space<vmem>>, vector<32x512xf32>
    %33 = arith.mulf %31, %32 : vector<32x512xf32>
    %c0_16 = arith.constant 0 : index
    %c0_17 = arith.constant 0 : index
    %34 = vector.load %arg5[%c0_16, %c0_17] : memref<2x32xf32, #tpu.memory_space<vmem>>, vector<2x32xf32>
    %cst_18 = arith.constant dense<0.000000e+00> : vector<2x512xf32>
    %35 = tpu.matmul %34, %33, %cst_18 {dimension_numbers = #tpu.dot_dimension_numbers<[1], [0], [0], [1], [0, 0, 1, 1], [], []>} : vector<2x32xf32>, vector<32x512xf32>, vector<2x512xf32> -> vector<2x512xf32>
    %cst_19 = arith.constant dense<0.000000e+00> : vector<2xf32>
    %36 = vector.multi_reduction <add>, %35, %cst_19 [1] : vector<2x512xf32> to vector<2xf32>
    %37 = vector.shape_cast %36 : vector<2xf32> to vector<2x1xf32>
    %cst_20 = arith.constant 0.000000e+00 : f32
    %38 = vector.broadcast %cst_20 : f32 to vector<2x1xf32>
    %39 = arith.subf %38, %37 : vector<2x1xf32>
    %40 = math.exp %39 : vector<2x1xf32>
    %cst_21 = arith.constant 1.000000e+00 : f32
    %41 = vector.broadcast %cst_21 : f32 to vector<2x1xf32>
    %42 = arith.addf %41, %40 : vector<2x1xf32>
    %43 = tpu.reciprocal %42 {approx = true} : vector<2x1xf32> -> vector<2x1xf32>
    %cst_22 = arith.constant 0.000000e+00 : f32
    %cst_23 = arith.constant 1.000000e+00 : f32
    %44 = vector.broadcast %cst_22 : f32 to vector<2x1xf32>
    %45 = arith.maximumf %44, %43 : vector<2x1xf32>
    %46 = vector.broadcast %cst_23 : f32 to vector<2x1xf32>
    %47 = arith.minimumf %46, %45 : vector<2x1xf32>
    %c0_24 = arith.constant 0 : index
    %c0_25 = arith.constant 0 : index
    %48 = vector.load %arg6[%c0_24, %c0_25] : memref<2x1xf32, #tpu.memory_space<vmem>>, vector<2x1xf32>
    tpu.vector_store %arg6[%c0_24, %c0_25], %47 {strides = array<i32>} : memref<2x1xf32, #tpu.memory_space<vmem>>, vector<2x1xf32>,
    return
  }
}

</mosaic_0001>

<bundles_post_ra>
// kernel: discriminator_forward.4
= control target key start
LH: loop header
LB: loop body
LE: loop exit
PB: predicated region body
PF: predicated region fallthrough
CT: control target
= control target key end

     0   :  { %s1924_s9 = smov 0   ;;  %s2064_s0 = inlined_call_operand.vmem [shape: bf16[2048,48], index: 0, kind: input, shape index: {}]   ;;  %s2065_s1 = inlined_call_operand.vmem [shape: bf16[48,128], index: 1, kind: input, shape index: {}]   ;;  %s2066_s2 = inlined_call_operand.vmem [shape: bf16[2048,128], index: 2, kind: output, shape index: {}]  }
   0x1 LB: > { %s1350_s10 = sadd.s32 4294967295, %s1907_s9   ;;  %p1354_p0 = scmp.ge.s32.totalorder %s1907_s9, 1  ;;  %s1907_s9 = sphi %s1924_s9, %s12_s9  }
   0x2   : > { %p113_p1 = scmp.lt.s32.totalorder %s1907_s9, 5 }
   0x4   : > { %p114_p2 = pnand %p1354_p0, %p113_p1 }
   0x5   : > { %v1866_v0 = vld [vmem:[%s2065_s1] sm:$0xff] (!%p114_p2)   ;;  %s1355_s13 = sshll.u32 (!%p114_p2), %s1350_s10, 6  ;;  %v1867_v1 = vld [vmem:[%s2065_s1 + $0x8] sm:$0xff] (!%p114_p2)   ;;  %v1868_v2 = vld [vmem:[%s2065_s1 + $0x10] sm:$0xff] (!%p114_p2)   ;;  %vm396_vm0 = vcmask (!%p114_p2), 392192  }
   0x6   : > { %117 = sbr.rel (%p114_p2) target bundleno = 297 (0x129), region = 28  ;;  %p136_p3 = scmp.lt.s32.totalorder (!%p114_p2), %s1355_s13, 255  ;;  %1782 = vmatprep.subr.bf16.mxu0 (!%p114_p2), %v1866_v0  ;;  %1852 = vmatprep.subr.bf16.mxu1 (!%p114_p2), %v1866_v0 }
   0x7   : > { %1783 = vmatpush3.bf16.msra.mxu0 (!%p114_p2), %v1866_v0  ;;  %1855 = vmatpush3.bf16.msra.mxu1 (!%p114_p2), %v1866_v0 }
   0x8   : > { %1784 = vmatprep.subr.bf16.mxu0 (!%p114_p2), %v1867_v1  ;;  %1853 = vmatprep.subr.bf16.mxu1 (!%p114_p2), %v1867_v1 }
   0xb   : > { %1785 = vmatpush3.bf16.msra.mxu0 (!%p114_p2), %v1867_v1  ;;  %1856 = vmatpush3.bf16.msra.mxu1 (!%p114_p2), %v1867_v1 }
   0xc   : > { %1786 = vmatprep.subr.bf16.mxu0 (!%p114_p2), %v1868_v2  ;;  %1854 = vmatprep.subr.bf16.mxu1 (!%p114_p2), %v1868_v2 }
   0xd   : > { %s2068_s13 = smov (!%p136_p3, %s1355_s13), 255 }
   0xe   : > { %s1356_s18 = sshll.u32 %s2068_s13, 2 }
   0xf   : > { %s1949_s21 = scalar_lea.vmem %s2064_s0, %s1356_s18  ;;  %1787 = vmatpush3.bf16.msra.mxu0 %v1868_v2  ;;  %1857 = vmatpush3.bf16.msra.mxu1 %v1868_v2  ;;  %s2020_s24 = scalar_lea.vmem %s2066_s2, %s1356_s18 }
  0x10   : > { %v1869_v3 = vld [vmem:[%s1949_s21] sm:$0xff]   ;;  %v1871_v5 = vld [vmem:[%s1949_s21 + $0x8] sm:$0xff]   ;;  %v1873_v7 = vld [vmem:[%s1949_s21 + $0x10] sm:$0xff]  }
  0x11   : > { %v1870_v4 = vld [vmem:[%s1949_s21 + $0x80] sm:$0xff]   ;;  %1788 = vmatprep.mubr.msk.bf16.mxu0 %vm396_vm0, %v1869_v3  ;;  %v1872_v6 = vld [vmem:[%s1949_s21 + $0x88] sm:$0xff]   ;;  %v1874_v8 = vld [vmem:[%s1949_s21 + $0x90] sm:$0xff]  }
  0x12   : > { %1820 = vmatprep.mubr.msk.bf16.mxu1 %vm396_vm0, %v1870_v4  ;;  %1789 = vmatmul.mubr.msk.bf16.vlgmr.msra.gmra.mrb[0].mxu0 %vm396_vm0, %v1871_v5  ;;  %v1875_v9 = vld [vmem:[%s1949_s21 + $0x18] sm:$0xff]   ;;  %v1877_v11 = vld [vmem:[%s1949_s21 + $0x20] sm:$0xff]   ;;  %v1879_v13 = vld [vmem:[%s1949_s21 + $0x28] sm:$0xff]  }
  0x13   : > { %1821 = vmatmul.mubr.msk.bf16.vlgmr.msra.gmra.mrb[0].mxu1 %vm396_vm0, %v1872_v6  ;;  %1792 = vmatprep.mubr.msk.bf16.mxu0 %vm396_vm0, %v1873_v7  ;;  %v1876_v10 = vld [vmem:[%s1949_s21 + $0x98] sm:$0xff]   ;;  %v1878_v12 = vld [vmem:[%s1949_s21 + $0xa0] sm:$0xff]   ;;  %v1880_v14 = vld [vmem:[%s1949_s21 + $0xa8] sm:$0xff]  }
  0x14   : > { %1824 = vmatprep.mubr.msk.bf16.mxu1 %vm396_vm0, %v1874_v8  ;;  %v1881_v15 = vld [vmem:[%s1949_s21 + $0x30] sm:$0xff]   ;;  %v1883_v17 = vld [vmem:[%s1949_s21 + $0x38] sm:$0xff]   ;;  %v1885_v19 = vld [vmem:[%s1949_s21 + $0x40] sm:$0xff]  }
  0x15   : > { %v1882_v16 = vld [vmem:[%s1949_s21 + $0xb0] sm:$0xff]   ;;  %v1884_v18 = vld [vmem:[%s1949_s21 + $0xb8] sm:$0xff]   ;;  %v1886_v20 = vld [vmem:[%s1949_s21 + $0xc0] sm:$0xff]  }
  0x16   : > { %v1887_v21 = vld [vmem:[%s1949_s21 + $0x48] sm:$0xff]   ;;  %v1889_v23 = vld [vmem:[%s1949_s21 + $0x50] sm:$0xff]   ;;  %v1891_v25 = vld [vmem:[%s1949_s21 + $0x58] sm:$0xff]  }
  0x17   : > { %v1888_v22 = vld [vmem:[%s1949_s21 + $0xc8] sm:$0xff]   ;;  %v1890_v24 = vld [vmem:[%s1949_s21 + $0xd0] sm:$0xff]   ;;  %v1892_v26 = vld [vmem:[%s1949_s21 + $0xd8] sm:$0xff]  }
  0x18   : > { %v1893_v27 = vld [vmem:[%s1949_s21 + $0x60] sm:$0xff]   ;;  %v1895_v29 = vld [vmem:[%s1949_s21 + $0x68] sm:$0xff]   ;;  %v1897_v31 = vld [vmem:[%s1949_s21 + $0x70] sm:$0xff]  }
  0x19   : > { %v1894_v28 = vld [vmem:[%s1949_s21 + $0xe0] sm:$0xff]   ;;  %v1896_v30 = vld [vmem:[%s1949_s21 + $0xe8] sm:$0xff]   ;;  %v1898_v32 = vld [vmem:[%s1949_s21 + $0xf0] sm:$0xff]  }
  0x1a   : > { %1793 = vmatmul.mubr.msk.bf16.gmra.mrb[4].mxu0 %vm396_vm0, %v1875_v9  ;;  %v1899_v33 = vld [vmem:[%s1949_s21 + $0x78] sm:$0xff]  }
  0x1b   : > { %1825 = vmatmul.mubr.msk.bf16.gmra.mrb[4].mxu1 %vm396_vm0, %v1876_v10  ;;  %1796 = vmatprep.mubr.msk.bf16.mxu0 %vm396_vm0, %v1877_v11  ;;  %v1900_v34 = vld [vmem:[%s1949_s21 + $0xf8] sm:$0xff]  }
  0x1c   : > { %1828 = vmatprep.mubr.msk.bf16.mxu1 %vm396_vm0, %v1878_v12 }
  0x22   : > { %1797 = vmatmul.mubr.msk.bf16.gmra.mrb[8].mxu0 %vm396_vm0, %v1879_v13 }
  0x23   : > { %1829 = vmatmul.mubr.msk.bf16.gmra.mrb[8].mxu1 %vm396_vm0, %v1880_v14  ;;  %1800 = vmatprep.mubr.msk.bf16.mxu0 %vm396_vm0, %v1881_v15 }
  0x24   : > { %1832 = vmatprep.mubr.msk.bf16.mxu1 %vm396_vm0, %v1882_v16 }
  0x2a   : > { %1801 = vmatmul.mubr.msk.bf16.gmra.mrb[12].mxu0 %vm396_vm0, %v1883_v17 }
  0x2b   : > { %1833 = vmatmul.mubr.msk.bf16.gmra.mrb[12].mxu1 %vm396_vm0, %v1884_v18  ;;  %1804 = vmatprep.mubr.msk.bf16.mxu0 %vm396_vm0, %v1885_v19 }
  0x2c   : > { %1836 = vmatprep.mubr.msk.bf16.mxu1 %vm396_vm0, %v1886_v20 }
  0x32   : > { %1805 = vmatmul.mubr.msk.bf16.gmra.mrb[16].mxu0 %vm396_vm0, %v1887_v21 }
  0x33   : > { %1837 = vmatmul.mubr.msk.bf16.gmra.mrb[16].mxu1 %vm396_vm0, %v1888_v22  ;;  %1808 = vmatprep.mubr.msk.bf16.mxu0 %vm396_vm0, %v1889_v23 }
  0x34   : > { %1840 = vmatprep.mubr.msk.bf16.mxu1 %vm396_vm0, %v1890_v24 }
  0x3a   : > { %1809 = vmatmul.mubr.msk.bf16.gmra.mrb[20].mxu0 %vm396_vm0, %v1891_v25 }
  0x3b   : > { %1841 = vmatmul.mubr.msk.bf16.gmra.mrb[20].mxu1 %vm396_vm0, %v1892_v26  ;;  %1812 = vmatprep.mubr.msk.bf16.mxu0 %vm396_vm0, %v1893_v27 }
  0x3c   : > { %1844 = vmatprep.mubr.msk.bf16.mxu1 %vm396_vm0, %v1894_v28 }
  0x42   : > { %1813 = vmatmul.mubr.msk.bf16.gmra.mrb[24].mxu0 %vm396_vm0, %v1895_v29 }
  0x43   : > { %1845 = vmatmul.mubr.msk.bf16.gmra.mrb[24].mxu1 %vm396_vm0, %v1896_v30  ;;  %1816 = vmatprep.mubr.msk.bf16.mxu0 %vm396_vm0, %v1897_v31 }
  0x44   : > { %1848 = vmatprep.mubr.msk.bf16.mxu1 %vm396_vm0, %v1898_v32 }
  0x4a   : > { %1817 = vmatmul.mubr.msk.bf16.gmra.mrb[28].mxu0 %vm396_vm0, %v1899_v33 }
  0x4b   : > { %1849 = vmatmul.mubr.msk.bf16.gmra.mrb[28].mxu1 %vm396_vm0, %v1900_v34 }
  0xe5   : > { %v1790_v35 = vpop.f32.mrb[0].mxu0 }
  0xe6   : > { %v1822_v36 = vpop.f32.mrb[0].mxu1  ;;  %vm784_vm1 = vcmp.gt.f32.partialorder %v1790_v35, 0.0  ;;  %v848_v37 = vmul.f32 0.2, %v1790_v35  ;;  %v527_v39 = vpop.f32.mrb[1].mxu0 }
  0xe7   : > { %v880_v38 = vmul.f32 0.2, %v1822_v36  ;;  %vm816_vm2 = vcmp.gt.f32.partialorder %v1822_v36, 0.0  ;;  %v655_v40 = vpop.f32.mrb[1].mxu1  ;;  %v846_v41 = vmul.f32 0.2, %v527_v39 }
  0xe8   : > { %v1791_v42 = vpop.f32.mrb[2].mxu0  ;;  %v1823_v43 = vpop.f32.mrb[2].mxu1  ;;  %v912_v44 = vsel %vm784_vm1, %v1790_v35, %v848_v37  ;;  %v878_v45 = vmul.f32 0.2, %v655_v40  ;;  %vm782_vm4 = vcmp.gt.f32.partialorder %v527_v39, 0.0  ;;  %vm814_vm6 = vcmp.gt.f32.partialorder %v655_v40, 0.0 }
  0xe9   : > { %vm785_vm3 = vcmp.gt.f32.partialorder %v1791_v42, 0.0  ;;  %v849_v46 = vmul.f32 0.2, %v1791_v42  ;;  %v944_v47 = vsel %vm816_vm2, %v1822_v36, %v880_v38  ;;  %vm817_vm5 = vcmp.gt.f32.partialorder %v1823_v43, 0.0  ;;  %v530_v49 = vpop.f32.mrb[3].mxu0  ;;  %v658_v50 = vpop.f32.mrb[3].mxu1 }
  0xea   : > { %v881_v48 = vmul.f32 0.2, %v1823_v43  ;;  %vm783_vm7 = vcmp.gt.f32.partialorder %v530_v49, 0.0  ;;  %v847_v52 = vmul.f32 0.2, %v530_v49  ;;  %vm815_vm8 = vcmp.gt.f32.partialorder %v658_v50, 0.0 }
  0xeb   : > { %v913_v51 = vsel %vm785_vm3, %v1791_v42, %v849_v46  ;;  %v879_v55 = vmul.f32 0.2, %v658_v50  ;;  %v910_v56 = vsel %vm782_vm4, %v527_v39, %v846_v41  ;;  %v942_v61 = vsel %vm814_vm6, %v655_v40, %v878_v45 }
  0xec   : > { %v1564_v53 = vpack.c.bf16 %v913_v51, %v912_v44  ;;  %v945_v54 = vsel %vm817_vm5, %v1823_v43, %v881_v48  ;;  %v911_v58 = vsel %vm783_vm7, %v530_v49, %v847_v52 }
  0xed   : > { %v1644_v57 = vpack.c.bf16 %v945_v54, %v944_v47  ;;  %v1794_v59 = vpop.f32.mrb[4].mxu0  ;;  %v1559_v62 = vpack.c.bf16 %v911_v58, %v910_v56  ;;  %v943_v63 = vsel %vm815_vm8, %v658_v50, %v879_v55 }
  0xee   : > { %v1826_v60 = vpop.f32.mrb[4].mxu1  ;;  %1716 = vst [vmem:[%s2020_s24 + $0x8] sm:$0xff] %v1564_v53   ;;  %v852_v0 = vmul.f32 0.2, %v1794_v59  ;;  %v543_v1 = vpop.f32.mrb[5].mxu0  ;;  %v1639_v3 = vpack.c.bf16 %v943_v63, %v942_v61  ;;  %vm788_vm9 = vcmp.gt.f32.partialorder %v1794_v59, 0.0 }
  0xef   : > { %v671_v2 = vpop.f32.mrb[5].mxu1  ;;  %1732 = vst [vmem:[%s2020_s24 + $0x88] sm:$0xff] %v1644_v57   ;;  %v884_v4 = vmul.f32 0.2, %v1826_v60  ;;  %v1795_v5 = vpop.f32.mrb[6].mxu0  ;;  %1560 = vst [vmem:[%s2020_s24] sm:$0xff] %v1559_v62   ;;  %vm820_vm10 = vcmp.gt.f32.partialorder %v1826_v60, 0.0 }
  0xf0   : > { %v1827_v6 = vpop.f32.mrb[6].mxu1  ;;  %v850_v7 = vmul.f32 0.2, %v543_v1  ;;  %v882_v8 = vmul.f32 0.2, %v671_v2  ;;  %v546_v9 = vpop.f32.mrb[7].mxu0  ;;  %v916_v12 = vsel %vm788_vm9, %v1794_v59, %v852_v0 }
  0xf1   : > { %1731 = vst [vmem:[%s2020_s24 + $0x80] sm:$0xff] %v1639_v3   ;;  %vm786_vm11 = vcmp.gt.f32.partialorder %v543_v1, 0.0  ;;  %vm789_vm12 = vcmp.gt.f32.partialorder %v1795_v5, 0.0  ;;  %v853_v10 = vmul.f32 0.2, %v1795_v5  ;;  %vm821_vm13 = vcmp.gt.f32.partialorder %v1827_v6, 0.0 }
  0xf2   : > { %v674_v11 = vpop.f32.mrb[7].mxu1  ;;  %vm818_vm14 = vcmp.gt.f32.partialorder %v671_v2, 0.0  ;;  %v885_v13 = vmul.f32 0.2, %v1827_v6  ;;  %vm787_vm15 = vcmp.gt.f32.partialorder %v546_v9, 0.0  ;;  %v948_v17 = vsel %vm820_vm10, %v1826_v60, %v884_v4 }
  0xf3   : > { %v917_v14 = vsel %vm789_vm12, %v1795_v5, %v853_v10  ;;  %v851_v15 = vmul.f32 0.2, %v546_v9  ;;  %vm819_vm0 = vcmp.gt.f32.partialorder %v674_v11, 0.0  ;;  %v883_v16 = vmul.f32 0.2, %v674_v11 }
  0xf4   : > { %v914_v18 = vsel %vm786_vm11, %v543_v1, %v850_v7  ;;  %v1574_v19 = vpack.c.bf16 %v917_v14, %v916_v12  ;;  %v949_v20 = vsel %vm821_vm13, %v1827_v6, %v885_v13  ;;  %v946_v21 = vsel %vm818_vm14, %v671_v2, %v882_v8 }
  0xf5   : > { %v1654_v22 = vpack.c.bf16 %v949_v20, %v948_v17  ;;  %v915_v23 = vsel %vm787_vm15, %v546_v9, %v851_v15  ;;  %v947_v24 = vsel %vm819_vm0, %v674_v11, %v883_v16  ;;  %v1798_v25 = vpop.f32.mrb[8].mxu0 }
  0xf6   : > { %v1830_v26 = vpop.f32.mrb[8].mxu1  ;;  %1718 = vst [vmem:[%s2020_s24 + $0x18] sm:$0xff] %v1574_v19   ;;  %v1569_v27 = vpack.c.bf16 %v915_v23, %v914_v18  ;;  %v1649_v28 = vpack.c.bf16 %v947_v24, %v946_v21  ;;  %vm792_vm1 = vcmp.gt.f32.partialorder %v1798_v25, 0.0  ;;  %v856_v29 = vmul.f32 0.2, %v1798_v25  ;;  %v559_v30 = vpop.f32.mrb[9].mxu0 }
  0xf7   : > { %v687_v31 = vpop.f32.mrb[9].mxu1  ;;  %1734 = vst [vmem:[%s2020_s24 + $0x98] sm:$0xff] %v1654_v22   ;;  %vm824_vm2 = vcmp.gt.f32.partialorder %v1830_v26, 0.0  ;;  %v888_v32 = vmul.f32 0.2, %v1830_v26  ;;  %v1799_v35 = vpop.f32.mrb[10].mxu0 }
  0xf8   : > { %1717 = vst [vmem:[%s2020_s24 + $0x10] sm:$0xff] %v1569_v27   ;;  %1733 = vst [vmem:[%s2020_s24 + $0x90] sm:$0xff] %v1649_v28   ;;  %v854_v33 = vmul.f32 0.2, %v559_v30  ;;  %v886_v34 = vmul.f32 0.2, %v687_v31  ;;  %v920_v37 = vsel %vm792_vm1, %v1798_v25, %v856_v29 }
  0xf9   : > { %v1831_v36 = vpop.f32.mrb[10].mxu1  ;;  %vm790_vm3 = vcmp.gt.f32.partialorder %v559_v30, 0.0  ;;  %vm793_vm4 = vcmp.gt.f32.partialorder %v1799_v35, 0.0  ;;  %v857_v38 = vmul.f32 0.2, %v1799_v35  ;;  %v562_v39 = vpop.f32.mrb[11].mxu0  ;;  %v952_v45 = vsel %vm824_vm2, %v1830_v26, %v888_v32 }
  0xfa   : > { %v690_v40 = vpop.f32.mrb[11].mxu1  ;;  %vm822_vm5 = vcmp.gt.f32.partialorder %v687_v31, 0.0  ;;  %vm825_vm6 = vcmp.gt.f32.partialorder %v1831_v36, 0.0  ;;  %v889_v41 = vmul.f32 0.2, %v1831_v36  ;;  %vm791_vm7 = vcmp.gt.f32.partialorder %v562_v39, 0.0 }
  0xfb   : > { %v921_v42 = vsel %vm793_vm4, %v1799_v35, %v857_v38  ;;  %v855_v43 = vmul.f32 0.2, %v562_v39  ;;  %vm823_vm8 = vcmp.gt.f32.partialorder %v690_v40, 0.0  ;;  %v887_v44 = vmul.f32 0.2, %v690_v40 }
  0xfc   : > { %v918_v46 = vsel %vm790_vm3, %v559_v30, %v854_v33  ;;  %v1584_v47 = vpack.c.bf16 %v921_v42, %v920_v37  ;;  %v953_v48 = vsel %vm825_vm6, %v1831_v36, %v889_v41  ;;  %v950_v49 = vsel %vm822_vm5, %v687_v31, %v886_v34 }
  0xfd   : > { %v1664_v50 = vpack.c.bf16 %v953_v48, %v952_v45  ;;  %v919_v51 = vsel %vm791_vm7, %v562_v39, %v855_v43  ;;  %v951_v52 = vsel %vm823_vm8, %v690_v40, %v887_v44  ;;  %v1802_v53 = vpop.f32.mrb[12].mxu0 }
  0xfe   : > { %v1834_v54 = vpop.f32.mrb[12].mxu1  ;;  %1720 = vst [vmem:[%s2020_s24 + $0x28] sm:$0xff] %v1584_v47   ;;  %v1579_v55 = vpack.c.bf16 %v919_v51, %v918_v46  ;;  %v1659_v56 = vpack.c.bf16 %v951_v52, %v950_v49  ;;  %vm796_vm9 = vcmp.gt.f32.partialorder %v1802_v53, 0.0  ;;  %v860_v57 = vmul.f32 0.2, %v1802_v53  ;;  %v575_v58 = vpop.f32.mrb[13].mxu0 }
  0xff   : > { %v703_v59 = vpop.f32.mrb[13].mxu1  ;;  %1736 = vst [vmem:[%s2020_s24 + $0xa8] sm:$0xff] %v1664_v50   ;;  %vm828_vm10 = vcmp.gt.f32.partialorder %v1834_v54, 0.0  ;;  %v892_v60 = vmul.f32 0.2, %v1834_v54  ;;  %v1803_v63 = vpop.f32.mrb[14].mxu0 }
 0x100   : > { %1719 = vst [vmem:[%s2020_s24 + $0x20] sm:$0xff] %v1579_v55   ;;  %1735 = vst [vmem:[%s2020_s24 + $0xa0] sm:$0xff] %v1659_v56   ;;  %v858_v61 = vmul.f32 0.2, %v575_v58  ;;  %v890_v62 = vmul.f32 0.2, %v703_v59  ;;  %v924_v1 = vsel %vm796_vm9, %v1802_v53, %v860_v57 }
 0x101   : > { %v1835_v0 = vpop.f32.mrb[14].mxu1  ;;  %vm794_vm11 = vcmp.gt.f32.partialorder %v575_v58, 0.0  ;;  %vm797_vm12 = vcmp.gt.f32.partialorder %v1803_v63, 0.0  ;;  %v861_v2 = vmul.f32 0.2, %v1803_v63  ;;  %v578_v3 = vpop.f32.mrb[15].mxu0  ;;  %v956_v9 = vsel %vm828_vm10, %v1834_v54, %v892_v60 }
 0x102   : > { %v706_v4 = vpop.f32.mrb[15].mxu1  ;;  %vm826_vm13 = vcmp.gt.f32.partialorder %v703_v59, 0.0  ;;  %vm829_vm14 = vcmp.gt.f32.partialorder %v1835_v0, 0.0  ;;  %v893_v5 = vmul.f32 0.2, %v1835_v0  ;;  %vm795_vm15 = vcmp.gt.f32.partialorder %v578_v3, 0.0 }
 0x103   : > { %v925_v6 = vsel %vm797_vm12, %v1803_v63, %v861_v2  ;;  %v859_v7 = vmul.f32 0.2, %v578_v3  ;;  %vm827_vm0 = vcmp.gt.f32.partialorder %v706_v4, 0.0  ;;  %v891_v8 = vmul.f32 0.2, %v706_v4 }
 0x104   : > { %v922_v10 = vsel %vm794_vm11, %v575_v58, %v858_v61  ;;  %v1594_v11 = vpack.c.bf16 %v925_v6, %v924_v1  ;;  %v957_v12 = vsel %vm829_vm14, %v1835_v0, %v893_v5  ;;  %v954_v13 = vsel %vm826_vm13, %v703_v59, %v890_v62 }
 0x105   : > { %v1674_v14 = vpack.c.bf16 %v957_v12, %v956_v9  ;;  %v923_v15 = vsel %vm795_vm15, %v578_v3, %v859_v7  ;;  %v955_v16 = vsel %vm827_vm0, %v706_v4, %v891_v8  ;;  %v1806_v17 = vpop.f32.mrb[16].mxu0 }
 0x106   : > { %v1838_v18 = vpop.f32.mrb[16].mxu1  ;;  %1722 = vst [vmem:[%s2020_s24 + $0x38] sm:$0xff] %v1594_v11   ;;  %v1589_v19 = vpack.c.bf16 %v923_v15, %v922_v10  ;;  %v1669_v20 = vpack.c.bf16 %v955_v16, %v954_v13  ;;  %vm800_vm1 = vcmp.gt.f32.partialorder %v1806_v17, 0.0  ;;  %v864_v21 = vmul.f32 0.2, %v1806_v17  ;;  %v591_v22 = vpop.f32.mrb[17].mxu0 }
 0x107   : > { %v719_v23 = vpop.f32.mrb[17].mxu1  ;;  %1738 = vst [vmem:[%s2020_s24 + $0xb8] sm:$0xff] %v1674_v14   ;;  %vm832_vm2 = vcmp.gt.f32.partialorder %v1838_v18, 0.0  ;;  %v896_v24 = vmul.f32 0.2, %v1838_v18  ;;  %v1807_v27 = vpop.f32.mrb[18].mxu0 }
 0x108   : > { %1721 = vst [vmem:[%s2020_s24 + $0x30] sm:$0xff] %v1589_v19   ;;  %1737 = vst [vmem:[%s2020_s24 + $0xb0] sm:$0xff] %v1669_v20   ;;  %v862_v25 = vmul.f32 0.2, %v591_v22  ;;  %v894_v26 = vmul.f32 0.2, %v719_v23  ;;  %v928_v29 = vsel %vm800_vm1, %v1806_v17, %v864_v21 }
 0x109   : > { %v1839_v28 = vpop.f32.mrb[18].mxu1  ;;  %vm798_vm3 = vcmp.gt.f32.partialorder %v591_v22, 0.0  ;;  %vm801_vm4 = vcmp.gt.f32.partialorder %v1807_v27, 0.0  ;;  %v865_v30 = vmul.f32 0.2, %v1807_v27  ;;  %v594_v31 = vpop.f32.mrb[19].mxu0  ;;  %v960_v37 = vsel %vm832_vm2, %v1838_v18, %v896_v24 }
 0x10a   : > { %v722_v32 = vpop.f32.mrb[19].mxu1  ;;  %vm830_vm5 = vcmp.gt.f32.partialorder %v719_v23, 0.0  ;;  %vm833_vm6 = vcmp.gt.f32.partialorder %v1839_v28, 0.0  ;;  %v897_v33 = vmul.f32 0.2, %v1839_v28  ;;  %vm799_vm7 = vcmp.gt.f32.partialorder %v594_v31, 0.0 }
 0x10b   : > { %v929_v34 = vsel %vm801_vm4, %v1807_v27, %v865_v30  ;;  %v863_v35 = vmul.f32 0.2, %v594_v31  ;;  %vm831_vm8 = vcmp.gt.f32.partialorder %v722_v32, 0.0  ;;  %v895_v36 = vmul.f32 0.2, %v722_v32 }
 0x10c   : > { %v926_v38 = vsel %vm798_vm3, %v591_v22, %v862_v25  ;;  %v1604_v39 = vpack.c.bf16 %v929_v34, %v928_v29  ;;  %v961_v40 = vsel %vm833_vm6, %v1839_v28, %v897_v33  ;;  %v958_v41 = vsel %vm830_vm5, %v719_v23, %v894_v26 }
 0x10d   : > { %v1684_v42 = vpack.c.bf16 %v961_v40, %v960_v37  ;;  %v927_v43 = vsel %vm799_vm7, %v594_v31, %v863_v35  ;;  %v959_v44 = vsel %vm831_vm8, %v722_v32, %v895_v36  ;;  %v1810_v45 = vpop.f32.mrb[20].mxu0 }
 0x10e   : > { %v1842_v46 = vpop.f32.mrb[20].mxu1  ;;  %1724 = vst [vmem:[%s2020_s24 + $0x48] sm:$0xff] %v1604_v39   ;;  %v1599_v47 = vpack.c.bf16 %v927_v43, %v926_v38  ;;  %v1679_v48 = vpack.c.bf16 %v959_v44, %v958_v41  ;;  %vm804_vm9 = vcmp.gt.f32.partialorder %v1810_v45, 0.0  ;;  %v868_v49 = vmul.f32 0.2, %v1810_v45  ;;  %v607_v50 = vpop.f32.mrb[21].mxu0 }
 0x10f   : > { %v735_v51 = vpop.f32.mrb[21].mxu1  ;;  %1740 = vst [vmem:[%s2020_s24 + $0xc8] sm:$0xff] %v1684_v42   ;;  %vm836_vm10 = vcmp.gt.f32.partialorder %v1842_v46, 0.0  ;;  %v900_v52 = vmul.f32 0.2, %v1842_v46  ;;  %v1811_v55 = vpop.f32.mrb[22].mxu0 }
 0x110   : > { %1723 = vst [vmem:[%s2020_s24 + $0x40] sm:$0xff] %v1599_v47   ;;  %1739 = vst [vmem:[%s2020_s24 + $0xc0] sm:$0xff] %v1679_v48   ;;  %v866_v53 = vmul.f32 0.2, %v607_v50  ;;  %v898_v54 = vmul.f32 0.2, %v735_v51  ;;  %v932_v57 = vsel %vm804_vm9, %v1810_v45, %v868_v49 }
 0x111   : > { %v1843_v56 = vpop.f32.mrb[22].mxu1  ;;  %vm802_vm11 = vcmp.gt.f32.partialorder %v607_v50, 0.0  ;;  %vm805_vm12 = vcmp.gt.f32.partialorder %v1811_v55, 0.0  ;;  %v869_v58 = vmul.f32 0.2, %v1811_v55  ;;  %v610_v59 = vpop.f32.mrb[23].mxu0  ;;  %v964_v1 = vsel %vm836_vm10, %v1842_v46, %v900_v52 }
 0x112   : > { %v738_v60 = vpop.f32.mrb[23].mxu1  ;;  %vm834_vm13 = vcmp.gt.f32.partialorder %v735_v51, 0.0  ;;  %vm837_vm14 = vcmp.gt.f32.partialorder %v1843_v56, 0.0  ;;  %v901_v61 = vmul.f32 0.2, %v1843_v56  ;;  %vm803_vm15 = vcmp.gt.f32.partialorder %v610_v59, 0.0 }
 0x113   : > { %v933_v62 = vsel %vm805_vm12, %v1811_v55, %v869_v58  ;;  %v867_v63 = vmul.f32 0.2, %v610_v59  ;;  %vm835_vm0 = vcmp.gt.f32.partialorder %v738_v60, 0.0  ;;  %v899_v0 = vmul.f32 0.2, %v738_v60 }
 0x114   : > { %v930_v2 = vsel %vm802_vm11, %v607_v50, %v866_v53  ;;  %v1614_v3 = vpack.c.bf16 %v933_v62, %v932_v57  ;;  %v965_v4 = vsel %vm837_vm14, %v1843_v56, %v901_v61  ;;  %v962_v5 = vsel %vm834_vm13, %v735_v51, %v898_v54 }
 0x115   : > { %v1694_v6 = vpack.c.bf16 %v965_v4, %v964_v1  ;;  %v931_v7 = vsel %vm803_vm15, %v610_v59, %v867_v63  ;;  %v963_v8 = vsel %vm835_vm0, %v738_v60, %v899_v0  ;;  %v1814_v9 = vpop.f32.mrb[24].mxu0 }
 0x116   : > { %v1846_v10 = vpop.f32.mrb[24].mxu1  ;;  %1726 = vst [vmem:[%s2020_s24 + $0x58] sm:$0xff] %v1614_v3   ;;  %v1609_v11 = vpack.c.bf16 %v931_v7, %v930_v2  ;;  %v1689_v12 = vpack.c.bf16 %v963_v8, %v962_v5  ;;  %vm808_vm1 = vcmp.gt.f32.partialorder %v1814_v9, 0.0  ;;  %v872_v13 = vmul.f32 0.2, %v1814_v9  ;;  %v623_v14 = vpop.f32.mrb[25].mxu0 }
 0x117   : > { %v751_v15 = vpop.f32.mrb[25].mxu1  ;;  %1742 = vst [vmem:[%s2020_s24 + $0xd8] sm:$0xff] %v1694_v6   ;;  %vm840_vm2 = vcmp.gt.f32.partialorder %v1846_v10, 0.0  ;;  %v904_v16 = vmul.f32 0.2, %v1846_v10  ;;  %v1815_v19 = vpop.f32.mrb[26].mxu0 }
 0x118   : > { %1725 = vst [vmem:[%s2020_s24 + $0x50] sm:$0xff] %v1609_v11   ;;  %1741 = vst [vmem:[%s2020_s24 + $0xd0] sm:$0xff] %v1689_v12   ;;  %v870_v17 = vmul.f32 0.2, %v623_v14  ;;  %v902_v18 = vmul.f32 0.2, %v751_v15  ;;  %v936_v21 = vsel %vm808_vm1, %v1814_v9, %v872_v13 }
 0x119   : > { %v1847_v20 = vpop.f32.mrb[26].mxu1  ;;  %vm806_vm3 = vcmp.gt.f32.partialorder %v623_v14, 0.0  ;;  %vm809_vm4 = vcmp.gt.f32.partialorder %v1815_v19, 0.0  ;;  %v873_v22 = vmul.f32 0.2, %v1815_v19  ;;  %v626_v23 = vpop.f32.mrb[27].mxu0  ;;  %v968_v29 = vsel %vm840_vm2, %v1846_v10, %v904_v16 }
 0x11a   : > { %v754_v24 = vpop.f32.mrb[27].mxu1  ;;  %vm838_vm5 = vcmp.gt.f32.partialorder %v751_v15, 0.0  ;;  %vm841_vm6 = vcmp.gt.f32.partialorder %v1847_v20, 0.0  ;;  %v905_v25 = vmul.f32 0.2, %v1847_v20  ;;  %vm807_vm7 = vcmp.gt.f32.partialorder %v626_v23, 0.0 }
 0x11b   : > { %v937_v26 = vsel %vm809_vm4, %v1815_v19, %v873_v22  ;;  %v871_v27 = vmul.f32 0.2, %v626_v23  ;;  %vm839_vm8 = vcmp.gt.f32.partialorder %v754_v24, 0.0  ;;  %v903_v28 = vmul.f32 0.2, %v754_v24 }
 0x11c   : > { %v934_v30 = vsel %vm806_vm3, %v623_v14, %v870_v17  ;;  %v1624_v31 = vpack.c.bf16 %v937_v26, %v936_v21  ;;  %v969_v32 = vsel %vm841_vm6, %v1847_v20, %v905_v25  ;;  %v966_v33 = vsel %vm838_vm5, %v751_v15, %v902_v18 }
 0x11d   : > { %v1704_v34 = vpack.c.bf16 %v969_v32, %v968_v29  ;;  %v935_v35 = vsel %vm807_vm7, %v626_v23, %v871_v27  ;;  %v967_v36 = vsel %vm839_vm8, %v754_v24, %v903_v28  ;;  %v1818_v37 = vpop.f32.mrb[28].mxu0 }
 0x11e   : > { %v1850_v38 = vpop.f32.mrb[28].mxu1  ;;  %1728 = vst [vmem:[%s2020_s24 + $0x68] sm:$0xff] %v1624_v31   ;;  %v1619_v39 = vpack.c.bf16 %v935_v35, %v934_v30  ;;  %v1699_v40 = vpack.c.bf16 %v967_v36, %v966_v33  ;;  %vm812_vm9 = vcmp.gt.f32.partialorder %v1818_v37, 0.0  ;;  %v876_v41 = vmul.f32 0.2, %v1818_v37  ;;  %v639_v42 = vpop.f32.mrb[29].mxu0 }
 0x11f   : > { %v767_v43 = vpop.f32.mrb[29].mxu1  ;;  %1744 = vst [vmem:[%s2020_s24 + $0xe8] sm:$0xff] %v1704_v34   ;;  %vm844_vm10 = vcmp.gt.f32.partialorder %v1850_v38, 0.0  ;;  %v908_v44 = vmul.f32 0.2, %v1850_v38  ;;  %v1819_v47 = vpop.f32.mrb[30].mxu0 }
 0x120   : > { %1727 = vst [vmem:[%s2020_s24 + $0x60] sm:$0xff] %v1619_v39   ;;  %1743 = vst [vmem:[%s2020_s24 + $0xe0] sm:$0xff] %v1699_v40   ;;  %v874_v45 = vmul.f32 0.2, %v639_v42  ;;  %v906_v46 = vmul.f32 0.2, %v767_v43  ;;  %v940_v49 = vsel %vm812_vm9, %v1818_v37, %v876_v41 }
 0x121   : > { %v1851_v48 = vpop.f32.mrb[30].mxu1  ;;  %vm810_vm11 = vcmp.gt.f32.partialorder %v639_v42, 0.0  ;;  %vm813_vm12 = vcmp.gt.f32.partialorder %v1819_v47, 0.0  ;;  %v877_v50 = vmul.f32 0.2, %v1819_v47  ;;  %v642_v51 = vpop.f32.mrb[31].mxu0  ;;  %v972_v57 = vsel %vm844_vm10, %v1850_v38, %v908_v44 }
 0x122   : > { %v770_v52 = vpop.f32.mrb[31].mxu1  ;;  %vm842_vm13 = vcmp.gt.f32.partialorder %v767_v43, 0.0  ;;  %vm845_vm14 = vcmp.gt.f32.partialorder %v1851_v48, 0.0  ;;  %v909_v53 = vmul.f32 0.2, %v1851_v48  ;;  %vm811_vm15 = vcmp.gt.f32.partialorder %v642_v51, 0.0 }
 0x123   : > { %v941_v54 = vsel %vm813_vm12, %v1819_v47, %v877_v50  ;;  %v875_v55 = vmul.f32 0.2, %v642_v51  ;;  %vm843_vm0 = vcmp.gt.f32.partialorder %v770_v52, 0.0  ;;  %v907_v56 = vmul.f32 0.2, %v770_v52 }
 0x124   : > { %v938_v58 = vsel %vm810_vm11, %v639_v42, %v874_v45  ;;  %v1634_v59 = vpack.c.bf16 %v941_v54, %v940_v49  ;;  %v973_v60 = vsel %vm845_vm14, %v1851_v48, %v909_v53  ;;  %v970_v61 = vsel %vm842_vm13, %v767_v43, %v906_v46 }
 0x125   : > { %v1714_v62 = vpack.c.bf16 %v973_v60, %v972_v57  ;;  %v939_v63 = vsel %vm811_vm15, %v642_v51, %v875_v55  ;;  %v971_v0 = vsel %vm843_vm0, %v770_v52, %v907_v56 }
 0x126   : > { %1730 = vst [vmem:[%s2020_s24 + $0x78] sm:$0xff] %v1634_v59   ;;  %v1629_v1 = vpack.c.bf16 %v939_v63, %v938_v58  ;;  %v1709_v2 = vpack.c.bf16 %v971_v0, %v970_v61 }
 0x127   : > { %1746 = vst [vmem:[%s2020_s24 + $0xf8] sm:$0xff] %v1714_v62  }
 0x128   : > { %1729 = vst [vmem:[%s2020_s24 + $0x70] sm:$0xff] %v1629_v1   ;;  %1745 = vst [vmem:[%s2020_s24 + $0xf0] sm:$0xff] %v1709_v2  }
 0x129 PF: > { %s12_s9 = sadd.s32 1, %s1907_s9  }
 0x12a   : > { %p9_p4 = scmp.ge.s32.totalorder %s12_s9, 6  }
 0x12c   :  { %11 = sbr.rel (!%p9_p4) target bundleno = 1 (0x1), region = 58 }

// kernel: discriminator_forward.5
= control target key start
LH: loop header
LB: loop body
LE: loop exit
PB: predicated region body
PF: predicated region fallthrough
CT: control target
= control target key end

     0   :  { %v5244_v0 = vmov 0   ;;  %s8266_s1 = inlined_call_operand.vmem [shape: bf16[1024,128], index: 1, kind: input, shape index: {}]   ;;  %s8267_s0 = inlined_call_operand.vmem [shape: bf16[512,1024], index: 0, kind: input, shape index: {}]   ;;  %s8268_s2 = inlined_call_operand.vmem [shape: f32[1,128], index: 2, kind: input, shape index: {}]   ;;  %s8269_s3 = inlined_call_operand.vmem [shape: f32[1,128], index: 3, kind: input, shape index: {}]   ;;  %s8270_s4 = inlined_call_operand.vmem [shape: bf16[512,128], index: 4, kind: output, shape index: {}]  }
   0x1   :  { %2066 = vmatprep.subr.bf16.mxu1 %v5244_v0  ;;  %2644 = vmatprep.subr.bf16.mxu0 %v5244_v0  ;;  %v5178_v1 = vld [vmem:[%s8266_s1] sm:$0xff]   ;;  %v5180_v3 = vld [vmem:[%s8266_s1 + $0x8] sm:$0xff]   ;;  %v5182_v5 = vld [vmem:[%s8266_s1 + $0x10] sm:$0xff]  }
   0x2   :  { %v5179_v2 = vld [vmem:[%s8266_s1 + $0x100] sm:$0xff]   ;;  %2067 = vmatpush1.bf16.msra.mxu1 %v5178_v1  ;;  %v5181_v4 = vld [vmem:[%s8266_s1 + $0x108] sm:$0xff]   ;;  %v5183_v6 = vld [vmem:[%s8266_s1 + $0x110] sm:$0xff]  }
   0x3   :  { %2645 = vmatpush1.bf16.msra.mxu0 %v5179_v2  ;;  %2068 = vmatprep.subr.bf16.mxu1 %v5244_v0  ;;  %v5184_v7 = vld [vmem:[%s8266_s1 + $0x18] sm:$0xff]   ;;  %v5186_v9 = vld [vmem:[%s8266_s1 + $0x20] sm:$0xff]   ;;  %v5188_v11 = vld [vmem:[%s8266_s1 + $0x28] sm:$0xff]  }
   0x4   :  { %2646 = vmatprep.subr.bf16.mxu0 %v5244_v0  ;;  %v5185_v8 = vld [vmem:[%s8266_s1 + $0x118] sm:$0xff]   ;;  %v5187_v10 = vld [vmem:[%s8266_s1 + $0x120] sm:$0xff]   ;;  %v5189_v12 = vld [vmem:[%s8266_s1 + $0x128] sm:$0xff]  }
   0x5   :  { %v5190_v13 = vld [vmem:[%s8266_s1 + $0x30] sm:$0xff]   ;;  %v5192_v15 = vld [vmem:[%s8266_s1 + $0x38] sm:$0xff]   ;;  %v5194_v17 = vld [vmem:[%s8266_s1 + $0x40] sm:$0xff]  }
   0x6   :  { %2069 = vmatpush1.bf16.msra.mxu1 %v5180_v3  ;;  %v5191_v14 = vld [vmem:[%s8266_s1 + $0x130] sm:$0xff]   ;;  %v5193_v16 = vld [vmem:[%s8266_s1 + $0x138] sm:$0xff]   ;;  %v5195_v18 = vld [vmem:[%s8266_s1 + $0x140] sm:$0xff]  }
   0x7   :  { %2647 = vmatpush1.bf16.msra.mxu0 %v5181_v4  ;;  %2070 = vmatprep.subr.bf16.mxu1 %v5244_v0  ;;  %v5345_v19 = vld [vmem:[%s8267_s0] sm:$0xff]  ;;  %v5355_v21 = vld [vmem:[%s8267_s0 + $0x10] sm:$0xff]  ;;  %v5196_v24 = vld [vmem:[%s8266_s1 + $0x48] sm:$0xff]  }
   0x8   :  { %2648 = vmatprep.subr.bf16.mxu0 %v5244_v0  ;;  %v5350_v20 = vld [vmem:[%s8267_s0 + $0x20] sm:$0xff]  ;;  %v5362_v23 = vld [vmem:[%s8267_s0 + $0x30] sm:$0xff]  ;;  %v5197_v26 = vld [vmem:[%s8266_s1 + $0x148] sm:$0xff]  }
   0x9   :  { %v4217_v22 = vcombine.high %v5345_v19, %v5350_v20  ;;  %v4221_v25 = vcombine.high %v5355_v21, %v5362_v23  ;;  %v5198_v27 = vld [vmem:[%s8266_s1 + $0x50] sm:$0xff]   ;;  %v5200_v29 = vld [vmem:[%s8266_s1 + $0x58] sm:$0xff]   ;;  %v5202_v31 = vld [vmem:[%s8266_s1 + $0x60] sm:$0xff]   ;;  %v4216_v42 = vcombine.low %v5345_v19, %v5350_v20  ;;  %v4220_v44 = vcombine.low %v5355_v21, %v5362_v23 }
   0xa   :  { %2071 = vmatpush1.bf16.msra.mxu1 %v5182_v5  ;;  %v5199_v28 = vld [vmem:[%s8266_s1 + $0x150] sm:$0xff]   ;;  %v5201_v30 = vld [vmem:[%s8266_s1 + $0x158] sm:$0xff]   ;;  %v5203_v32 = vld [vmem:[%s8266_s1 + $0x160] sm:$0xff]  }
   0xb   :  { %2649 = vmatpush1.bf16.msra.mxu0 %v5183_v6  ;;  %2072 = vmatprep.subr.bf16.mxu1 %v5244_v0  ;;  %v5204_v33 = vld [vmem:[%s8266_s1 + $0x68] sm:$0xff]   ;;  %v5206_v35 = vld [vmem:[%s8266_s1 + $0x70] sm:$0xff]   ;;  %v5208_v37 = vld [vmem:[%s8266_s1 + $0x78] sm:$0xff]  }
   0xc   :  { %2650 = vmatprep.subr.bf16.mxu0 %v5244_v0  ;;  %2098 = vmatprep.mubr.bf16.mxu1 %v4217_v22  ;;  %v5205_v34 = vld [vmem:[%s8266_s1 + $0x168] sm:$0xff]   ;;  %v5207_v36 = vld [vmem:[%s8266_s1 + $0x170] sm:$0xff]   ;;  %v5209_v38 = vld [vmem:[%s8266_s1 + $0x178] sm:$0xff]  }
   0xd   :  { %2676 = vmatprep.mubr.bf16.mxu0 %v4221_v25  ;;  %v26_v39 = vld [vmem:[%s8267_s0 + $0x40] sm:$0xff]  ;;  %v28_v41 = vld [vmem:[%s8267_s0 + $0x50] sm:$0xff]  ;;  %v5212_v51 = vld [vmem:[%s8266_s1 + $0x88] sm:$0xff]  }
   0xe   :  { %2073 = vmatpush1.bf16.msra.mxu1 %v5184_v7  ;;  %v30_v40 = vld [vmem:[%s8267_s0 + $0x60] sm:$0xff]  ;;  %v32_v43 = vld [vmem:[%s8267_s0 + $0x70] sm:$0xff]  ;;  %v5213_v52 = vld [vmem:[%s8266_s1 + $0x188] sm:$0xff]  }
   0xf   :  { %2651 = vmatpush1.bf16.msra.mxu0 %v5185_v8  ;;  %2074 = vmatprep.subr.bf16.mxu1 %v5244_v0  ;;  %v5210_v45 = vld [vmem:[%s8266_s1 + $0x80] sm:$0xff]   ;;  %v4225_v47 = vcombine.high %v26_v39, %v30_v40  ;;  %v4229_v48 = vcombine.high %v28_v41, %v32_v43  ;;  %v36_v53 = vld [vmem:[%s8267_s0 + $0x90] sm:$0xff]  ;;  %v4224_v55 = vcombine.low %v26_v39, %v30_v40  ;;  %v5216_v2 = vld [vmem:[%s8266_s1 + $0x98] sm:$0xff]  }
  0x10   :  { %2652 = vmatprep.subr.bf16.mxu0 %v5244_v0  ;;  %v5211_v46 = vld [vmem:[%s8266_s1 + $0x180] sm:$0xff]   ;;  %v40_v54 = vld [vmem:[%s8267_s0 + $0xb0] sm:$0xff]  ;;  %v4228_v56 = vcombine.low %v28_v41, %v32_v43  ;;  %v5217_v3 = vld [vmem:[%s8266_s1 + $0x198] sm:$0xff]  }
  0x11   :  { %v34_v49 = vld [vmem:[%s8267_s0 + $0x80] sm:$0xff]  ;;  %v4237_v58 = vcombine.high %v36_v53, %v40_v54  ;;  %v5214_v59 = vld [vmem:[%s8266_s1 + $0x90] sm:$0xff]   ;;  %v4236_v6 = vcombine.low %v36_v53, %v40_v54  ;;  %v5229_v39 = vld [vmem:[%s8266_s1 + $0x1c8] sm:$0xff]  }
  0x12   :  { %2075 = vmatpush1.bf16.msra.mxu1 %v5186_v9  ;;  %v38_v50 = vld [vmem:[%s8267_s0 + $0xa0] sm:$0xff]  ;;  %v5215_v60 = vld [vmem:[%s8266_s1 + $0x190] sm:$0xff]   ;;  %v5232_v54 = vld [vmem:[%s8266_s1 + $0xd8] sm:$0xff]  }
  0x13   :  { %2653 = vmatpush1.bf16.msra.mxu0 %v5187_v10  ;;  %2076 = vmatprep.subr.bf16.mxu1 %v5244_v0  ;;  %v4233_v57 = vcombine.high %v34_v49, %v38_v50  ;;  %v42_v61 = vld [vmem:[%s8267_s0 + $0xc0] sm:$0xff]  ;;  %v44_v63 = vld [vmem:[%s8267_s0 + $0xd0] sm:$0xff]  ;;  %v4232_v4 = vcombine.low %v34_v49, %v38_v50 }
  0x14   :  { %2654 = vmatprep.subr.bf16.mxu0 %v5244_v0  ;;  %v46_v62 = vld [vmem:[%s8267_s0 + $0xe0] sm:$0xff]  ;;  %v48_v1 = vld [vmem:[%s8267_s0 + $0xf0] sm:$0xff] }
  0x15   :  { %v5218_v5 = vld [vmem:[%s8266_s1 + $0xa0] sm:$0xff]   ;;  %v4241_v7 = vcombine.high %v42_v61, %v46_v62  ;;  %v4245_v9 = vcombine.high %v44_v63, %v48_v1  ;;  %v5222_v20 = vld [vmem:[%s8266_s1 + $0xb0] sm:$0xff]  }
  0x16   :  { %2077 = vmatpush1.bf16.msra.mxu1 %v5188_v11  ;;  %v5219_v8 = vld [vmem:[%s8266_s1 + $0x1a0] sm:$0xff]   ;;  %v5223_v21 = vld [vmem:[%s8266_s1 + $0x1b0] sm:$0xff]  }
  0x17   :  { %2655 = vmatpush1.bf16.msra.mxu0 %v5189_v12  ;;  %2078 = vmatprep.subr.bf16.mxu1 %v5244_v0  ;;  %v50_v10 = vld [vmem:[%s8267_s0 + $0x100] sm:$0xff]  ;;  %v52_v12 = vld [vmem:[%s8267_s0 + $0x110] sm:$0xff] }
  0x18   :  { %2656 = vmatprep.subr.bf16.mxu0 %v5244_v0  ;;  %v54_v11 = vld [vmem:[%s8267_s0 + $0x120] sm:$0xff]  ;;  %v60_v25 = vld [vmem:[%s8267_s0 + $0x150] sm:$0xff] }
  0x19   :  { %v58_v22 = vld [vmem:[%s8267_s0 + $0x140] sm:$0xff]  ;;  %v80_v49 = vld [vmem:[%s8267_s0 + $0x1f0] sm:$0xff] }
  0x1a   :  { %2079 = vmatpush1.bf16.msra.mxu1 %v5190_v13  ;;  %v56_v13 = vld [vmem:[%s8267_s0 + $0x130] sm:$0xff]  ;;  %v62_v23 = vld [vmem:[%s8267_s0 + $0x160] sm:$0xff] }
  0x1b   :  { %2657 = vmatpush1.bf16.msra.mxu0 %v5191_v14  ;;  %2080 = vmatprep.subr.bf16.mxu1 %v5244_v0  ;;  %v5220_v14 = vld [vmem:[%s8266_s1 + $0xa8] sm:$0xff]   ;;  %v4253_v19 = vcombine.high %v52_v12, %v56_v13  ;;  %v4256_v40 = vcombine.low %v58_v22, %v62_v23 }
  0x1c   :  { %2658 = vmatprep.subr.bf16.mxu0 %v5244_v0 }
  0x1e   :  { %2081 = vmatpush1.bf16.msra.mxu1 %v5192_v15  ;;  %v5221_v15 = vld [vmem:[%s8266_s1 + $0x1a8] sm:$0xff]  }
  0x1f   :  { %2659 = vmatpush1.bf16.msra.mxu0 %v5193_v16  ;;  %2082 = vmatprep.subr.bf16.mxu1 %v5244_v0  ;;  %v4240_v16 = vcombine.low %v42_v61, %v46_v62 }
  0x20   :  { %2660 = vmatprep.subr.bf16.mxu0 %v5244_v0 }
  0x22   :  { %2083 = vmatpush1.bf16.msra.mxu1 %v5194_v17  ;;  %v4244_v17 = vcombine.low %v44_v63, %v48_v1  ;;  %v90_v1 = vld [vmem:[%s8267_s0 + $0x240] sm:$0xff] }
  0x23   :  { %2661 = vmatpush1.bf16.msra.mxu0 %v5195_v18  ;;  %2084 = vmatprep.subr.bf16.mxu1 %v5244_v0  ;;  %v4249_v18 = vcombine.high %v50_v10, %v54_v11 }
  0x24   :  { %2662 = vmatprep.subr.bf16.mxu0 %v5244_v0 }
  0x26   :  { %2085 = vmatpush1.bf16.msra.mxu1 %v5196_v24  ;;  %v5224_v24 = vld [vmem:[%s8266_s1 + $0xb8] sm:$0xff]  }
  0x27   :  { %2663 = vmatpush1.bf16.msra.mxu0 %v5197_v26  ;;  %2086 = vmatprep.subr.bf16.mxu1 %v5244_v0  ;;  %v64_v26 = vld [vmem:[%s8267_s0 + $0x170] sm:$0xff] }
  0x28   :  { %2664 = vmatprep.subr.bf16.mxu0 %v5244_v0  ;;  %v4260_v41 = vcombine.low %v60_v25, %v64_v26 }
  0x2a   :  { %2087 = vmatpush1.bf16.msra.mxu1 %v5198_v27  ;;  %v5225_v27 = vld [vmem:[%s8266_s1 + $0x1b8] sm:$0xff]  }
  0x2b   :  { %2665 = vmatpush1.bf16.msra.mxu0 %v5199_v28  ;;  %2088 = vmatprep.subr.bf16.mxu1 %v5244_v0  ;;  %v4248_v28 = vcombine.low %v50_v10, %v54_v11  ;;  %v5235_v10 = vld [vmem:[%s8266_s1 + $0x1e0] sm:$0xff]  }
  0x2c   :  { %2666 = vmatprep.subr.bf16.mxu0 %v5244_v0  ;;  %v98_v11 = vld [vmem:[%s8267_s0 + $0x280] sm:$0xff] }
  0x2e   :  { %2089 = vmatpush1.bf16.msra.mxu1 %v5200_v29  ;;  %v4252_v29 = vcombine.low %v52_v12, %v56_v13  ;;  %v102_v12 = vld [vmem:[%s8267_s0 + $0x2a0] sm:$0xff]  ;;  %v100_v13 = vld [vmem:[%s8267_s0 + $0x290] sm:$0xff] }
  0x2f   :  { %2667 = vmatpush1.bf16.msra.mxu0 %v5201_v30  ;;  %2090 = vmatprep.subr.bf16.mxu1 %v5244_v0  ;;  %v4257_v30 = vcombine.high %v58_v22, %v62_v23  ;;  %v112_v22 = vld [vmem:[%s8267_s0 + $0x2f0] sm:$0xff]  ;;  %v4296_v23 = vcombine.low %v98_v11, %v102_v12 }
  0x30   :  { %2668 = vmatprep.subr.bf16.mxu0 %v5244_v0 }
  0x32   :  { %2091 = vmatpush1.bf16.msra.mxu1 %v5202_v31  ;;  %v4261_v31 = vcombine.high %v60_v25, %v64_v26 }
  0x33   :  { %2669 = vmatpush1.bf16.msra.mxu0 %v5203_v32  ;;  %2092 = vmatprep.subr.bf16.mxu1 %v5244_v0  ;;  %v5226_v32 = vld [vmem:[%s8266_s1 + $0xc0] sm:$0xff]  }
  0x34   :  { %2670 = vmatprep.subr.bf16.mxu0 %v5244_v0 }
  0x36   :  { %2093 = vmatpush1.bf16.msra.mxu1 %v5204_v33  ;;  %v5227_v33 = vld [vmem:[%s8266_s1 + $0x1c0] sm:$0xff]  }
  0x37   :  { %2671 = vmatpush1.bf16.msra.mxu0 %v5205_v34  ;;  %2094 = vmatprep.subr.bf16.mxu1 %v5244_v0  ;;  %v66_v34 = vld [vmem:[%s8267_s0 + $0x180] sm:$0xff] }
  0x38   :  { %2672 = vmatprep.subr.bf16.mxu0 %v5244_v0 }
  0x3a   :  { %2095 = vmatpush1.bf16.msra.mxu1 %v5206_v35  ;;  %v70_v35 = vld [vmem:[%s8267_s0 + $0x1a0] sm:$0xff] }
  0x3b   :  { %2673 = vmatpush1.bf16.msra.mxu0 %v5207_v36  ;;  %2096 = vmatprep.subr.bf16.mxu1 %v5244_v0  ;;  %v5228_v36 = vld [vmem:[%s8266_s1 + $0xc8] sm:$0xff]   ;;  %v4264_v50 = vcombine.low %v66_v34, %v70_v35 }
  0x3c   :  { %2674 = vmatprep.subr.bf16.mxu0 %v5244_v0 }
  0x3e   :  { %2097 = vmatpush1.bf16.msra.mxu1 %v5208_v37  ;;  %v68_v37 = vld [vmem:[%s8267_s0 + $0x190] sm:$0xff] }
  0x3f   :  { %2675 = vmatpush1.bf16.msra.mxu0 %v5209_v38  ;;  %2355 = vmatprep.subr.bf16.mxu1 %v5244_v0  ;;  %v72_v38 = vld [vmem:[%s8267_s0 + $0x1b0] sm:$0xff] }
  0x40   :  { %2933 = vmatprep.subr.bf16.mxu0 %v5244_v0  ;;  %v4269_v43 = vcombine.high %v68_v37, %v72_v38 }
  0x41   :  { %2099 = vmatmul.mubr.bf16.vlgmr.msra.gmra.mrb[0].mxu1 %v4216_v42  ;;  %v4265_v42 = vcombine.high %v66_v34, %v70_v35 }
  0x42   :  { %2677 = vmatmul.mubr.bf16.vlgmr.msra.gmra.mrb[0].mxu0 %v4220_v44  ;;  %2356 = vmatpush1.bf16.msra.mxu1 %v5210_v45  ;;  %v5230_v44 = vld [vmem:[%s8266_s1 + $0xd0] sm:$0xff]  }
  0x43   :  { %2934 = vmatpush1.bf16.msra.mxu0 %v5211_v46  ;;  %2106 = vmatprep.mubr.bf16.mxu1 %v4225_v47  ;;  %v5231_v45 = vld [vmem:[%s8266_s1 + $0x1d0] sm:$0xff]   ;;  %v74_v46 = vld [vmem:[%s8267_s0 + $0x1c0] sm:$0xff] }
  0x44   :  { %2684 = vmatprep.mubr.bf16.mxu0 %v4229_v48  ;;  %2357 = vmatprep.subr.bf16.mxu1 %v5244_v0  ;;  %v78_v47 = vld [vmem:[%s8267_s0 + $0x1e0] sm:$0xff]  ;;  %v76_v48 = vld [vmem:[%s8267_s0 + $0x1d0] sm:$0xff] }
  0x45   :  { %2935 = vmatprep.subr.bf16.mxu0 %v5244_v0  ;;  %v4277_v53 = vcombine.high %v76_v48, %v80_v49  ;;  %v4276_v61 = vcombine.low %v76_v48, %v80_v49  ;;  %v134_v48 = vld [vmem:[%s8267_s0 + $0x3a0] sm:$0xff]  ;;  %v132_v49 = vld [vmem:[%s8267_s0 + $0x390] sm:$0xff] }
  0x46   :  { %2358 = vmatpush1.bf16.msra.mxu1 %v5212_v51  ;;  %v4268_v51 = vcombine.low %v68_v37, %v72_v38  ;;  %v122_v37 = vld [vmem:[%s8267_s0 + $0x340] sm:$0xff] }
  0x47   :  { %2936 = vmatpush1.bf16.msra.mxu0 %v5213_v52  ;;  %2359 = vmatprep.subr.bf16.mxu1 %v5244_v0  ;;  %v4273_v52 = vcombine.high %v74_v46, %v78_v47  ;;  %v126_v38 = vld [vmem:[%s8267_s0 + $0x360] sm:$0xff] }
  0x48   :  { %2937 = vmatprep.subr.bf16.mxu0 %v5244_v0 }
  0x49   :  { %2107 = vmatmul.mubr.bf16.gmra.mrb[4].mxu1 %v4224_v55  ;;  %v5233_v55 = vld [vmem:[%s8266_s1 + $0x1d8] sm:$0xff]  }
  0x4a   :  { %2685 = vmatmul.mubr.bf16.gmra.mrb[4].mxu0 %v4228_v56  ;;  %2114 = vmatprep.mubr.bf16.mxu1 %v4233_v57  ;;  %v82_v56 = vld [vmem:[%s8267_s0 + $0x200] sm:$0xff] }
  0x4b   :  { %2692 = vmatprep.mubr.bf16.mxu0 %v4237_v58  ;;  %2360 = vmatpush1.bf16.msra.mxu1 %v5214_v59  ;;  %v86_v57 = vld [vmem:[%s8267_s0 + $0x220] sm:$0xff]  ;;  %v84_v58 = vld [vmem:[%s8267_s0 + $0x210] sm:$0xff] }
  0x4c   :  { %2938 = vmatpush1.bf16.msra.mxu0 %v5215_v60  ;;  %2361 = vmatprep.subr.bf16.mxu1 %v5244_v0  ;;  %v88_v59 = vld [vmem:[%s8267_s0 + $0x230] sm:$0xff]  ;;  %v4272_v60 = vcombine.low %v74_v46, %v78_v47  ;;  %v4281_v62 = vcombine.high %v82_v56, %v86_v57  ;;  %v130_v47 = vld [vmem:[%s8267_s0 + $0x380] sm:$0xff] }
  0x4d   :  { %2939 = vmatprep.subr.bf16.mxu0 %v5244_v0  ;;  %v4285_v63 = vcombine.high %v84_v58, %v88_v59  ;;  %v5239_v46 = vld [vmem:[%s8266_s1 + $0x1f0] sm:$0xff]  }
  0x4f   :  { %2362 = vmatpush1.bf16.msra.mxu1 %v5216_v2  ;;  %v94_v2 = vld [vmem:[%s8267_s0 + $0x260] sm:$0xff] }
  0x50   :  { %2940 = vmatpush1.bf16.msra.mxu0 %v5217_v3  ;;  %2363 = vmatprep.subr.bf16.mxu1 %v5244_v0  ;;  %v92_v3 = vld [vmem:[%s8267_s0 + $0x250] sm:$0xff] }
  0x51   :  { %2115 = vmatmul.mubr.bf16.gmra.mrb[8].mxu1 %v4232_v4  ;;  %2941 = vmatprep.subr.bf16.mxu0 %v5244_v0  ;;  %v96_v4 = vld [vmem:[%s8267_s0 + $0x270] sm:$0xff] }
  0x52   :  { %2693 = vmatmul.mubr.bf16.gmra.mrb[8].mxu0 %v4236_v6  ;;  %2122 = vmatprep.mubr.bf16.mxu1 %v4241_v7  ;;  %v4284_v6 = vcombine.low %v84_v58, %v88_v59  ;;  %v4289_v7 = vcombine.high %v90_v1, %v94_v2  ;;  %v4328_v58 = vcombine.low %v130_v47, %v134_v48 }
  0x53   :  { %2700 = vmatprep.mubr.bf16.mxu0 %v4245_v9  ;;  %2364 = vmatpush1.bf16.msra.mxu1 %v5218_v5  ;;  %v4280_v5 = vcombine.low %v82_v56, %v86_v57  ;;  %v5234_v9 = vld [vmem:[%s8266_s1 + $0xe0] sm:$0xff]   ;;  %v140_v57 = vld [vmem:[%s8267_s0 + $0x3d0] sm:$0xff] }
  0x54   :  { %2942 = vmatpush1.bf16.msra.mxu0 %v5219_v8  ;;  %2365 = vmatprep.subr.bf16.mxu1 %v5244_v0  ;;  %v4293_v8 = vcombine.high %v92_v3, %v96_v4  ;;  %v142_v56 = vld [vmem:[%s8267_s0 + $0x3e0] sm:$0xff] }
  0x55   :  { %2943 = vmatprep.subr.bf16.mxu0 %v5244_v0 }
  0x57   :  { %2366 = vmatpush1.bf16.msra.mxu1 %v5220_v14  ;;  %v104_v14 = vld [vmem:[%s8267_s0 + $0x2b0] sm:$0xff] }
  0x58   :  { %2944 = vmatpush1.bf16.msra.mxu0 %v5221_v15  ;;  %2367 = vmatprep.subr.bf16.mxu1 %v5244_v0  ;;  %v4288_v15 = vcombine.low %v90_v1, %v94_v2  ;;  %v146_v1 = vld [vmem:[%s8267_s0 + $0x400] sm:$0xff] }
  0x59   :  { %2123 = vmatmul.mubr.bf16.gmra.mrb[12].mxu1 %v4240_v16  ;;  %2945 = vmatprep.subr.bf16.mxu0 %v5244_v0  ;;  %v4292_v16 = vcombine.low %v92_v3, %v96_v4  ;;  %v150_v2 = vld [vmem:[%s8267_s0 + $0x420] sm:$0xff]  ;;  %v148_v3 = vld [vmem:[%s8267_s0 + $0x410] sm:$0xff] }
  0x5a   :  { %2701 = vmatmul.mubr.bf16.gmra.mrb[12].mxu0 %v4244_v17  ;;  %2130 = vmatprep.mubr.bf16.mxu1 %v4249_v18  ;;  %v4297_v17 = vcombine.high %v98_v11, %v102_v12  ;;  %v4301_v18 = vcombine.high %v100_v13, %v104_v14  ;;  %v152_v4 = vld [vmem:[%s8267_s0 + $0x430] sm:$0xff] }
  0x5b   :  { %2708 = vmatprep.mubr.bf16.mxu0 %v4253_v19  ;;  %2368 = vmatpush1.bf16.msra.mxu1 %v5222_v20  ;;  %v106_v19 = vld [vmem:[%s8267_s0 + $0x2c0] sm:$0xff]  ;;  %v156_v11 = vld [vmem:[%s8267_s0 + $0x450] sm:$0xff] }
  0x5c   :  { %2946 = vmatpush1.bf16.msra.mxu0 %v5223_v21  ;;  %2369 = vmatprep.subr.bf16.mxu1 %v5244_v0  ;;  %v110_v20 = vld [vmem:[%s8267_s0 + $0x2e0] sm:$0xff]  ;;  %v108_v21 = vld [vmem:[%s8267_s0 + $0x2d0] sm:$0xff] }
  0x5d   :  { %2947 = vmatprep.subr.bf16.mxu0 %v5244_v0  ;;  %v4305_v25 = vcombine.high %v106_v19, %v110_v20  ;;  %v4309_v26 = vcombine.high %v108_v21, %v112_v22  ;;  %v4308_v34 = vcombine.low %v108_v21, %v112_v22  ;;  %v160_v12 = vld [vmem:[%s8267_s0 + $0x470] sm:$0xff] }
  0x5e   :  { %v4356_v22 = vcombine.low %v156_v11, %v160_v12 }
  0x5f   :  { %2370 = vmatpush1.bf16.msra.mxu1 %v5224_v24  ;;  %v4300_v24 = vcombine.low %v100_v13, %v104_v14  ;;  %v4344_v13 = vcombine.low %v146_v1, %v150_v2  ;;  %v4348_v14 = vcombine.low %v148_v3, %v152_v4 }
  0x60   :  { %2948 = vmatpush1.bf16.msra.mxu0 %v5225_v27  ;;  %2371 = vmatprep.subr.bf16.mxu1 %v5244_v0  ;;  %v5236_v27 = vld [vmem:[%s8266_s1 + $0xe8] sm:$0xff]  }
  0x61   :  { %2131 = vmatmul.mubr.bf16.gmra.mrb[16].mxu1 %v4248_v28  ;;  %2949 = vmatprep.subr.bf16.mxu0 %v5244_v0  ;;  %v5237_v28 = vld [vmem:[%s8266_s1 + $0x1e8] sm:$0xff]  }
  0x62   :  { %2709 = vmatmul.mubr.bf16.gmra.mrb[16].mxu0 %v4252_v29  ;;  %2138 = vmatprep.mubr.bf16.mxu1 %v4257_v30  ;;  %v114_v29 = vld [vmem:[%s8267_s0 + $0x300] sm:$0xff] }
  0x63   :  { %2716 = vmatprep.mubr.bf16.mxu0 %v4261_v31  ;;  %2372 = vmatpush1.bf16.msra.mxu1 %v5226_v32  ;;  %v118_v30 = vld [vmem:[%s8267_s0 + $0x320] sm:$0xff]  ;;  %v116_v31 = vld [vmem:[%s8267_s0 + $0x310] sm:$0xff] }
  0x64   :  { %2950 = vmatpush1.bf16.msra.mxu0 %v5227_v33  ;;  %2373 = vmatprep.subr.bf16.mxu1 %v5244_v0  ;;  %v120_v32 = vld [vmem:[%s8267_s0 + $0x330] sm:$0xff]  ;;  %v4304_v33 = vcombine.low %v106_v19, %v110_v20  ;;  %v4313_v35 = vcombine.high %v114_v29, %v118_v30 }
  0x65   :  { %2951 = vmatprep.subr.bf16.mxu0 %v5244_v0  ;;  %v164_v19 = vld [vmem:[%s8267_s0 + $0x490] sm:$0xff] }
  0x66   :  { %v168_v20 = vld [vmem:[%s8267_s0 + $0x4b0] sm:$0xff] }
  0x67   :  { %2374 = vmatpush1.bf16.msra.mxu1 %v5228_v36  ;;  %v4317_v36 = vcombine.high %v116_v31, %v120_v32 }
  0x68   :  { %2952 = vmatpush1.bf16.msra.mxu0 %v5229_v39  ;;  %2375 = vmatprep.subr.bf16.mxu1 %v5244_v0  ;;  %v124_v39 = vld [vmem:[%s8267_s0 + $0x350] sm:$0xff] }
  0x69   :  { %2139 = vmatmul.mubr.bf16.gmra.mrb[20].mxu1 %v4256_v40  ;;  %2953 = vmatprep.subr.bf16.mxu0 %v5244_v0  ;;  %v128_v40 = vld [vmem:[%s8267_s0 + $0x370] sm:$0xff] }
  0x6a   :  { %2717 = vmatmul.mubr.bf16.gmra.mrb[20].mxu0 %v4260_v41  ;;  %2146 = vmatprep.mubr.bf16.mxu1 %v4265_v42  ;;  %v4312_v41 = vcombine.low %v114_v29, %v118_v30  ;;  %v4316_v42 = vcombine.low %v116_v31, %v120_v32  ;;  %v4364_v30 = vcombine.low %v164_v19, %v168_v20 }
  0x6b   :  { %2724 = vmatprep.mubr.bf16.mxu0 %v4269_v43  ;;  %2376 = vmatpush1.bf16.msra.mxu1 %v5230_v44  ;;  %v4321_v43 = vcombine.high %v122_v37, %v126_v38  ;;  %v4325_v44 = vcombine.high %v124_v39, %v128_v40 }
  0x6c   :  { %2954 = vmatpush1.bf16.msra.mxu0 %v5231_v45  ;;  %2377 = vmatprep.subr.bf16.mxu1 %v5244_v0  ;;  %v5238_v45 = vld [vmem:[%s8266_s1 + $0xf0] sm:$0xff]  }
  0x6d   :  { %2955 = vmatprep.subr.bf16.mxu0 %v5244_v0 }
  0x6f   :  { %2378 = vmatpush1.bf16.msra.mxu1 %v5232_v54 }
  0x70   :  { %2956 = vmatpush1.bf16.msra.mxu0 %v5233_v55  ;;  %2379 = vmatprep.subr.bf16.mxu1 %v5244_v0  ;;  %v138_v55 = vld [vmem:[%s8267_s0 + $0x3c0] sm:$0xff] }
  0x71   :  { %2147 = vmatmul.mubr.bf16.gmra.mrb[24].mxu1 %v4264_v50  ;;  %2957 = vmatprep.subr.bf16.mxu0 %v5244_v0  ;;  %v136_v50 = vld [vmem:[%s8267_s0 + $0x3b0] sm:$0xff] }
  0x72   :  { %2725 = vmatmul.mubr.bf16.gmra.mrb[24].mxu0 %v4268_v51  ;;  %2154 = vmatprep.mubr.bf16.mxu1 %v4273_v52  ;;  %v4320_v51 = vcombine.low %v122_v37, %v126_v38  ;;  %v4324_v52 = vcombine.low %v124_v39, %v128_v40  ;;  %v4333_v54 = vcombine.high %v132_v49, %v136_v50 }
  0x73   :  { %2732 = vmatprep.mubr.bf16.mxu0 %v4277_v53  ;;  %2380 = vmatpush1.bf16.msra.mxu1 %v5234_v9  ;;  %v4329_v53 = vcombine.high %v130_v47, %v134_v48  ;;  %v4332_v59 = vcombine.low %v132_v49, %v136_v50  ;;  %v154_v9 = vld [vmem:[%s8267_s0 + $0x440] sm:$0xff] }
  0x74   :  { %2958 = vmatpush1.bf16.msra.mxu0 %v5235_v10  ;;  %2381 = vmatprep.subr.bf16.mxu1 %v5244_v0  ;;  %v158_v10 = vld [vmem:[%s8267_s0 + $0x460] sm:$0xff] }
  0x75   :  { %2959 = vmatprep.subr.bf16.mxu0 %v5244_v0  ;;  %v4352_v21 = vcombine.low %v154_v9, %v158_v10  ;;  %v194_v49 = vld [vmem:[%s8267_s0 + $0x580] sm:$0xff] }
  0x76   :  { %v198_v50 = vld [vmem:[%s8267_s0 + $0x5a0] sm:$0xff] }
  0x77   :  { %2382 = vmatpush1.bf16.msra.mxu1 %v5236_v27  ;;  %v172_v27 = vld [vmem:[%s8267_s0 + $0x4d0] sm:$0xff] }
  0x78   :  { %2960 = vmatpush1.bf16.msra.mxu0 %v5237_v28  ;;  %2383 = vmatprep.subr.bf16.mxu1 %v5244_v0  ;;  %v176_v28 = vld [vmem:[%s8267_s0 + $0x4f0] sm:$0xff] }
  0x79   :  { %2155 = vmatmul.mubr.bf16.gmra.mrb[28].mxu1 %v4272_v60  ;;  %2961 = vmatprep.subr.bf16.mxu0 %v5244_v0  ;;  %v4337_v60 = vcombine.high %v138_v55, %v142_v56  ;;  %v4373_v32 = vcombine.high %v172_v27, %v176_v28  ;;  %v4372_v38 = vcombine.low %v172_v27, %v176_v28  ;;  %v236_v27 = vld [vmem:[%s8267_s0 + $0x6d0] sm:$0xff] }
  0x7a   :  { %2733 = vmatmul.mubr.bf16.gmra.mrb[28].mxu0 %v4276_v61  ;;  %2162 = vmatprep.mubr.bf16.mxu1 %v4281_v62  ;;  %v5240_v62 = vld [vmem:[%s8266_s1 + $0xf8] sm:$0xff]   ;;  %v240_v28 = vld [vmem:[%s8267_s0 + $0x6f0] sm:$0xff] }
  0x7b   :  { %2740 = vmatprep.mubr.bf16.mxu0 %v4285_v63  ;;  %2384 = vmatpush1.bf16.msra.mxu1 %v5238_v45  ;;  %v5241_v63 = vld [vmem:[%s8266_s1 + $0x1f8] sm:$0xff]  }
  0x7c   :  { %2962 = vmatpush1.bf16.msra.mxu0 %v5239_v46  ;;  %2385 = vmatprep.subr.bf16.mxu1 %v5244_v0 }
  0x7d   :  { %2963 = vmatprep.subr.bf16.mxu0 %v5244_v0  ;;  %v144_v0 = vld [vmem:[%s8267_s0 + $0x3f0] sm:$0xff] }
  0x7e   :  { %v4341_v61 = vcombine.high %v140_v57, %v144_v0 }
  0x7f   :  { %2386 = vmatpush1.bf16.msra.mxu1 %v5240_v62 }
  0x80   :  { %2964 = vmatpush1.bf16.msra.mxu0 %v5241_v63 }
  0x81   :  { %2163 = vmatmul.mubr.bf16.gmra.mrb[32].mxu1 %v4280_v5  ;;  %v4336_v5 = vcombine.low %v138_v55, %v142_v56  ;;  %v4393_v55 = vcombine.high %v194_v49, %v198_v50 }
  0x82   :  { %2741 = vmatmul.mubr.bf16.gmra.mrb[32].mxu0 %v4284_v6  ;;  %2170 = vmatprep.mubr.bf16.mxu1 %v4289_v7  ;;  %v4340_v6 = vcombine.low %v140_v57, %v144_v0  ;;  %v4345_v7 = vcombine.high %v146_v1, %v150_v2  ;;  %v202_v57 = vld [vmem:[%s8267_s0 + $0x5c0] sm:$0xff] }
  0x83   :  { %2748 = vmatprep.mubr.bf16.mxu0 %v4293_v8  ;;  %v4349_v8 = vcombine.high %v148_v3, %v152_v4  ;;  %v206_v0 = vld [vmem:[%s8267_s0 + $0x5e0] sm:$0xff]  ;;  %v212_v3 = vld [vmem:[%s8267_s0 + $0x610] sm:$0xff] }
  0x84   :  { %v4401_v62 = vcombine.high %v202_v57, %v206_v0  ;;  %v210_v1 = vld [vmem:[%s8267_s0 + $0x600] sm:$0xff]  ;;  %v216_v4 = vld [vmem:[%s8267_s0 + $0x630] sm:$0xff] }
  0x85   :  { %v214_v2 = vld [vmem:[%s8267_s0 + $0x620] sm:$0xff] }
  0x89   :  { %2171 = vmatmul.mubr.bf16.gmra.mrb[36].mxu1 %v4288_v15  ;;  %v4353_v15 = vcombine.high %v154_v9, %v158_v10  ;;  %v218_v9 = vld [vmem:[%s8267_s0 + $0x640] sm:$0xff] }
  0x8a   :  { %2749 = vmatmul.mubr.bf16.gmra.mrb[36].mxu0 %v4292_v16  ;;  %2178 = vmatprep.mubr.bf16.mxu1 %v4297_v17  ;;  %v4357_v16 = vcombine.high %v156_v11, %v160_v12  ;;  %v162_v17 = vld [vmem:[%s8267_s0 + $0x480] sm:$0xff]  ;;  %v220_v11 = vld [vmem:[%s8267_s0 + $0x650] sm:$0xff] }
  0x8b   :  { %2756 = vmatprep.mubr.bf16.mxu0 %v4301_v18  ;;  %v166_v18 = vld [vmem:[%s8267_s0 + $0x4a0] sm:$0xff]  ;;  %v224_v12 = vld [vmem:[%s8267_s0 + $0x670] sm:$0xff] }
  0x8c   :  { %v4360_v29 = vcombine.low %v162_v17, %v166_v18  ;;  %v222_v10 = vld [vmem:[%s8267_s0 + $0x660] sm:$0xff] }
  0x91   :  { %2179 = vmatmul.mubr.bf16.gmra.mrb[40].mxu1 %v4296_v23  ;;  %v4361_v23 = vcombine.high %v162_v17, %v166_v18  ;;  %v226_v17 = vld [vmem:[%s8267_s0 + $0x680] sm:$0xff] }
  0x92   :  { %2757 = vmatmul.mubr.bf16.gmra.mrb[40].mxu0 %v4300_v24  ;;  %2186 = vmatprep.mubr.bf16.mxu1 %v4305_v25  ;;  %v4365_v24 = vcombine.high %v164_v19, %v168_v20  ;;  %v170_v25 = vld [vmem:[%s8267_s0 + $0x4c0] sm:$0xff]  ;;  %v228_v19 = vld [vmem:[%s8267_s0 + $0x690] sm:$0xff] }
  0x93   :  { %2764 = vmatprep.mubr.bf16.mxu0 %v4309_v26  ;;  %v174_v26 = vld [vmem:[%s8267_s0 + $0x4e0] sm:$0xff]  ;;  %v232_v20 = vld [vmem:[%s8267_s0 + $0x6b0] sm:$0xff] }
  0x94   :  { %v4369_v31 = vcombine.high %v170_v25, %v174_v26  ;;  %v4368_v37 = vcombine.low %v170_v25, %v174_v26  ;;  %v230_v18 = vld [vmem:[%s8267_s0 + $0x6a0] sm:$0xff] }
  0x95   :  { %v234_v25 = vld [vmem:[%s8267_s0 + $0x6c0] sm:$0xff] }
  0x96   :  { %v238_v26 = vld [vmem:[%s8267_s0 + $0x6e0] sm:$0xff] }
  0x99   :  { %2187 = vmatmul.mubr.bf16.gmra.mrb[44].mxu1 %v4304_v33  ;;  %v178_v33 = vld [vmem:[%s8267_s0 + $0x500] sm:$0xff] }
  0x9a   :  { %2765 = vmatmul.mubr.bf16.gmra.mrb[44].mxu0 %v4308_v34  ;;  %2194 = vmatprep.mubr.bf16.mxu1 %v4313_v35  ;;  %v182_v34 = vld [vmem:[%s8267_s0 + $0x520] sm:$0xff]  ;;  %v180_v35 = vld [vmem:[%s8267_s0 + $0x510] sm:$0xff] }
  0x9b   :  { %2772 = vmatprep.mubr.bf16.mxu0 %v4317_v36  ;;  %v184_v36 = vld [vmem:[%s8267_s0 + $0x530] sm:$0xff]  ;;  %v4377_v39 = vcombine.high %v178_v33, %v182_v34  ;;  %v4376_v45 = vcombine.low %v178_v33, %v182_v34  ;;  %v242_v33 = vld [vmem:[%s8267_s0 + $0x700] sm:$0xff] }
  0x9c   :  { %v4381_v40 = vcombine.high %v180_v35, %v184_v36  ;;  %v4380_v46 = vcombine.low %v180_v35, %v184_v36  ;;  %v246_v34 = vld [vmem:[%s8267_s0 + $0x720] sm:$0xff]  ;;  %v244_v35 = vld [vmem:[%s8267_s0 + $0x710] sm:$0xff] }
  0x9d   :  { %v248_v36 = vld [vmem:[%s8267_s0 + $0x730] sm:$0xff] }
  0xa1   :  { %2195 = vmatmul.mubr.bf16.gmra.mrb[48].mxu1 %v4312_v41  ;;  %v186_v41 = vld [vmem:[%s8267_s0 + $0x540] sm:$0xff] }
  0xa2   :  { %2773 = vmatmul.mubr.bf16.gmra.mrb[48].mxu0 %v4316_v42  ;;  %2202 = vmatprep.mubr.bf16.mxu1 %v4321_v43  ;;  %v190_v42 = vld [vmem:[%s8267_s0 + $0x560] sm:$0xff]  ;;  %v188_v43 = vld [vmem:[%s8267_s0 + $0x550] sm:$0xff] }
  0xa3   :  { %2780 = vmatprep.mubr.bf16.mxu0 %v4325_v44  ;;  %v192_v44 = vld [vmem:[%s8267_s0 + $0x570] sm:$0xff]  ;;  %v4385_v47 = vcombine.high %v186_v41, %v190_v42 }
  0xa4   :  { %v4389_v48 = vcombine.high %v188_v43, %v192_v44 }
  0xa9   :  { %2203 = vmatmul.mubr.bf16.gmra.mrb[52].mxu1 %v4320_v51  ;;  %v196_v51 = vld [vmem:[%s8267_s0 + $0x590] sm:$0xff] }
  0xaa   :  { %2781 = vmatmul.mubr.bf16.gmra.mrb[52].mxu0 %v4324_v52  ;;  %2210 = vmatprep.mubr.bf16.mxu1 %v4329_v53  ;;  %v200_v52 = vld [vmem:[%s8267_s0 + $0x5b0] sm:$0xff]  ;;  %v4384_v53 = vcombine.low %v186_v41, %v190_v42  ;;  %v250_v41 = vld [vmem:[%s8267_s0 + $0x740] sm:$0xff] }
  0xab   :  { %2788 = vmatprep.mubr.bf16.mxu0 %v4333_v54  ;;  %v4388_v54 = vcombine.low %v188_v43, %v192_v44  ;;  %v4397_v56 = vcombine.high %v196_v51, %v200_v52  ;;  %v254_v42 = vld [vmem:[%s8267_s0 + $0x760] sm:$0xff]  ;;  %v252_v43 = vld [vmem:[%s8267_s0 + $0x750] sm:$0xff] }
  0xac   :  { %v256_v44 = vld [vmem:[%s8267_s0 + $0x770] sm:$0xff] }
  0xb1   :  { %2211 = vmatmul.mubr.bf16.gmra.mrb[56].mxu1 %v4328_v58  ;;  %v204_v58 = vld [vmem:[%s8267_s0 + $0x5d0] sm:$0xff] }
  0xb2   :  { %2789 = vmatmul.mubr.bf16.gmra.mrb[56].mxu0 %v4332_v59  ;;  %2218 = vmatprep.mubr.bf16.mxu1 %v4337_v60  ;;  %v208_v59 = vld [vmem:[%s8267_s0 + $0x5f0] sm:$0xff]  ;;  %v4392_v60 = vcombine.low %v194_v49, %v198_v50  ;;  %v258_v49 = vld [vmem:[%s8267_s0 + $0x780] sm:$0xff] }
  0xb3   :  { %2796 = vmatprep.mubr.bf16.mxu0 %v4341_v61  ;;  %v4396_v61 = vcombine.low %v196_v51, %v200_v52  ;;  %v4405_v63 = vcombine.high %v204_v58, %v208_v59  ;;  %v262_v50 = vld [vmem:[%s8267_s0 + $0x7a0] sm:$0xff]  ;;  %v260_v51 = vld [vmem:[%s8267_s0 + $0x790] sm:$0xff] }
  0xb4   :  { %v264_v52 = vld [vmem:[%s8267_s0 + $0x7b0] sm:$0xff] }
  0xb9   :  { %2219 = vmatmul.mubr.bf16.gmra.mrb[60].mxu1 %v4336_v5  ;;  %v4400_v5 = vcombine.low %v202_v57, %v206_v0  ;;  %v266_v57 = vld [vmem:[%s8267_s0 + $0x7c0] sm:$0xff] }
  0xba   :  { %2797 = vmatmul.mubr.bf16.gmra.mrb[60].mxu0 %v4340_v6  ;;  %2226 = vmatprep.mubr.bf16.mxu1 %v4345_v7  ;;  %v4404_v6 = vcombine.low %v204_v58, %v208_v59  ;;  %v4409_v7 = vcombine.high %v210_v1, %v214_v2  ;;  %v270_v0 = vld [vmem:[%s8267_s0 + $0x7e0] sm:$0xff]  ;;  %v268_v58 = vld [vmem:[%s8267_s0 + $0x7d0] sm:$0xff] }
  0xbb   :  { %2804 = vmatprep.mubr.bf16.mxu0 %v4349_v8  ;;  %v4413_v8 = vcombine.high %v212_v3, %v216_v4  ;;  %v272_v59 = vld [vmem:[%s8267_s0 + $0x7f0] sm:$0xff] }
  0xc1   :  { %2227 = vmatmul.mubr.bf16.gmra.mrb[64].mxu1 %v4344_v13  ;;  %v4408_v13 = vcombine.low %v210_v1, %v214_v2  ;;  %v19_v1 = vld [vmem:[%s8267_s0 + $0x8] sm:$0xff] }
  0xc2   :  { %2805 = vmatmul.mubr.bf16.gmra.mrb[64].mxu0 %v4348_v14  ;;  %2234 = vmatprep.mubr.bf16.mxu1 %v4353_v15  ;;  %v4412_v14 = vcombine.low %v212_v3, %v216_v4  ;;  %v4417_v15 = vcombine.high %v218_v9, %v222_v10  ;;  %v23_v2 = vld [vmem:[%s8267_s0 + $0x28] sm:$0xff]  ;;  %v21_v3 = vld [vmem:[%s8267_s0 + $0x18] sm:$0xff] }
  0xc3   :  { %2812 = vmatprep.mubr.bf16.mxu0 %v4357_v16  ;;  %v4421_v16 = vcombine.high %v220_v11, %v224_v12  ;;  %v25_v4 = vld [vmem:[%s8267_s0 + $0x38] sm:$0xff] }
  0xc9   :  { %2235 = vmatmul.mubr.bf16.gmra.mrb[68].mxu1 %v4352_v21  ;;  %v4416_v21 = vcombine.low %v218_v9, %v222_v10  ;;  %v27_v9 = vld [vmem:[%s8267_s0 + $0x48] sm:$0xff] }
  0xca   :  { %2813 = vmatmul.mubr.bf16.gmra.mrb[68].mxu0 %v4356_v22  ;;  %2242 = vmatprep.mubr.bf16.mxu1 %v4361_v23  ;;  %v4420_v22 = vcombine.low %v220_v11, %v224_v12  ;;  %v4425_v23 = vcombine.high %v226_v17, %v230_v18  ;;  %v31_v10 = vld [vmem:[%s8267_s0 + $0x68] sm:$0xff]  ;;  %v29_v11 = vld [vmem:[%s8267_s0 + $0x58] sm:$0xff] }
  0xcb   :  { %2820 = vmatprep.mubr.bf16.mxu0 %v4365_v24  ;;  %v4429_v24 = vcombine.high %v228_v19, %v232_v20  ;;  %v33_v12 = vld [vmem:[%s8267_s0 + $0x78] sm:$0xff] }
  0xd1   :  { %2243 = vmatmul.mubr.bf16.gmra.mrb[72].mxu1 %v4360_v29  ;;  %v4424_v29 = vcombine.low %v226_v17, %v230_v18  ;;  %v35_v17 = vld [vmem:[%s8267_s0 + $0x88] sm:$0xff] }
  0xd2   :  { %2821 = vmatmul.mubr.bf16.gmra.mrb[72].mxu0 %v4364_v30  ;;  %2250 = vmatprep.mubr.bf16.mxu1 %v4369_v31  ;;  %v4428_v30 = vcombine.low %v228_v19, %v232_v20  ;;  %v4433_v31 = vcombine.high %v234_v25, %v238_v26  ;;  %v39_v18 = vld [vmem:[%s8267_s0 + $0xa8] sm:$0xff]  ;;  %v37_v19 = vld [vmem:[%s8267_s0 + $0x98] sm:$0xff] }
  0xd3   :  { %2828 = vmatprep.mubr.bf16.mxu0 %v4373_v32  ;;  %v4437_v32 = vcombine.high %v236_v27, %v240_v28  ;;  %v41_v20 = vld [vmem:[%s8267_s0 + $0xb8] sm:$0xff] }
  0xd9   :  { %2251 = vmatmul.mubr.bf16.gmra.mrb[76].mxu1 %v4368_v37  ;;  %v4432_v37 = vcombine.low %v234_v25, %v238_v26  ;;  %v43_v25 = vld [vmem:[%s8267_s0 + $0xc8] sm:$0xff] }
  0xda   :  { %2829 = vmatmul.mubr.bf16.gmra.mrb[76].mxu0 %v4372_v38  ;;  %2258 = vmatprep.mubr.bf16.mxu1 %v4377_v39  ;;  %v4436_v38 = vcombine.low %v236_v27, %v240_v28  ;;  %v4441_v39 = vcombine.high %v242_v33, %v246_v34  ;;  %v47_v26 = vld [vmem:[%s8267_s0 + $0xe8] sm:$0xff]  ;;  %v45_v27 = vld [vmem:[%s8267_s0 + $0xd8] sm:$0xff] }
  0xdb   :  { %2836 = vmatprep.mubr.bf16.mxu0 %v4381_v40  ;;  %v4445_v40 = vcombine.high %v244_v35, %v248_v36  ;;  %v49_v28 = vld [vmem:[%s8267_s0 + $0xf8] sm:$0xff] }
  0xe1   :  { %2259 = vmatmul.mubr.bf16.gmra.mrb[80].mxu1 %v4376_v45  ;;  %v4440_v45 = vcombine.low %v242_v33, %v246_v34  ;;  %v51_v33 = vld [vmem:[%s8267_s0 + $0x108] sm:$0xff] }
  0xe2   :  { %2837 = vmatmul.mubr.bf16.gmra.mrb[80].mxu0 %v4380_v46  ;;  %2266 = vmatprep.mubr.bf16.mxu1 %v4385_v47  ;;  %v4444_v46 = vcombine.low %v244_v35, %v248_v36  ;;  %v4449_v47 = vcombine.high %v250_v41, %v254_v42  ;;  %v55_v34 = vld [vmem:[%s8267_s0 + $0x128] sm:$0xff]  ;;  %v53_v35 = vld [vmem:[%s8267_s0 + $0x118] sm:$0xff] }
  0xe3   :  { %2844 = vmatprep.mubr.bf16.mxu0 %v4389_v48  ;;  %v4453_v48 = vcombine.high %v252_v43, %v256_v44  ;;  %v57_v36 = vld [vmem:[%s8267_s0 + $0x138] sm:$0xff] }
  0xe9   :  { %2267 = vmatmul.mubr.bf16.gmra.mrb[84].mxu1 %v4384_v53  ;;  %v4448_v53 = vcombine.low %v250_v41, %v254_v42  ;;  %v59_v41 = vld [vmem:[%s8267_s0 + $0x148] sm:$0xff] }
  0xea   :  { %2845 = vmatmul.mubr.bf16.gmra.mrb[84].mxu0 %v4388_v54  ;;  %2274 = vmatprep.mubr.bf16.mxu1 %v4393_v55  ;;  %v4452_v54 = vcombine.low %v252_v43, %v256_v44  ;;  %v4457_v55 = vcombine.high %v258_v49, %v262_v50  ;;  %v63_v42 = vld [vmem:[%s8267_s0 + $0x168] sm:$0xff]  ;;  %v61_v43 = vld [vmem:[%s8267_s0 + $0x158] sm:$0xff] }
  0xeb   :  { %2852 = vmatprep.mubr.bf16.mxu0 %v4397_v56  ;;  %v4461_v56 = vcombine.high %v260_v51, %v264_v52  ;;  %v65_v44 = vld [vmem:[%s8267_s0 + $0x178] sm:$0xff] }
  0xf1   :  { %2275 = vmatmul.mubr.bf16.gmra.mrb[88].mxu1 %v4392_v60  ;;  %v4456_v60 = vcombine.low %v258_v49, %v262_v50  ;;  %v67_v49 = vld [vmem:[%s8267_s0 + $0x188] sm:$0xff] }
  0xf2   :  { %2853 = vmatmul.mubr.bf16.gmra.mrb[88].mxu0 %v4396_v61  ;;  %2282 = vmatprep.mubr.bf16.mxu1 %v4401_v62  ;;  %v4460_v61 = vcombine.low %v260_v51, %v264_v52  ;;  %v4465_v62 = vcombine.high %v266_v57, %v270_v0  ;;  %v71_v50 = vld [vmem:[%s8267_s0 + $0x1a8] sm:$0xff]  ;;  %v69_v51 = vld [vmem:[%s8267_s0 + $0x198] sm:$0xff] }
  0xf3   :  { %2860 = vmatprep.mubr.bf16.mxu0 %v4405_v63  ;;  %v4469_v63 = vcombine.high %v268_v58, %v272_v59  ;;  %v73_v52 = vld [vmem:[%s8267_s0 + $0x1b8] sm:$0xff] }
  0xf9   :  { %2283 = vmatmul.mubr.bf16.gmra.mrb[92].mxu1 %v4400_v5  ;;  %v4464_v5 = vcombine.low %v266_v57, %v270_v0  ;;  %v75_v57 = vld [vmem:[%s8267_s0 + $0x1c8] sm:$0xff] }
  0xfa   :  { %2861 = vmatmul.mubr.bf16.gmra.mrb[92].mxu0 %v4404_v6  ;;  %2290 = vmatprep.mubr.bf16.mxu1 %v4409_v7  ;;  %v4468_v6 = vcombine.low %v268_v58, %v272_v59  ;;  %v4219_v7 = vcombine.high %v19_v1, %v23_v2  ;;  %v79_v0 = vld [vmem:[%s8267_s0 + $0x1e8] sm:$0xff]  ;;  %v77_v58 = vld [vmem:[%s8267_s0 + $0x1d8] sm:$0xff] }
  0xfb   :  { %2868 = vmatprep.mubr.bf16.mxu0 %v4413_v8  ;;  %v4223_v8 = vcombine.high %v21_v3, %v25_v4  ;;  %v81_v59 = vld [vmem:[%s8267_s0 + $0x1f8] sm:$0xff] }
 0x101   :  { %2291 = vmatmul.mubr.bf16.gmra.mrb[96].mxu1 %v4408_v13  ;;  %v4218_v13 = vcombine.low %v19_v1, %v23_v2  ;;  %v83_v1 = vld [vmem:[%s8267_s0 + $0x208] sm:$0xff] }
 0x102   :  { %2869 = vmatmul.mubr.bf16.gmra.mrb[96].mxu0 %v4412_v14  ;;  %2298 = vmatprep.mubr.bf16.mxu1 %v4417_v15  ;;  %v4222_v14 = vcombine.low %v21_v3, %v25_v4  ;;  %v4227_v15 = vcombine.high %v27_v9, %v31_v10  ;;  %v87_v2 = vld [vmem:[%s8267_s0 + $0x228] sm:$0xff]  ;;  %v85_v3 = vld [vmem:[%s8267_s0 + $0x218] sm:$0xff] }
 0x103   :  { %2876 = vmatprep.mubr.bf16.mxu0 %v4421_v16  ;;  %v4231_v16 = vcombine.high %v29_v11, %v33_v12  ;;  %v89_v4 = vld [vmem:[%s8267_s0 + $0x238] sm:$0xff] }
 0x109   :  { %2299 = vmatmul.mubr.bf16.gmra.mrb[100].mxu1 %v4416_v21  ;;  %v4226_v21 = vcombine.low %v27_v9, %v31_v10  ;;  %v91_v9 = vld [vmem:[%s8267_s0 + $0x248] sm:$0xff] }
 0x10a   :  { %2877 = vmatmul.mubr.bf16.gmra.mrb[100].mxu0 %v4420_v22  ;;  %2306 = vmatprep.mubr.bf16.mxu1 %v4425_v23  ;;  %v4230_v22 = vcombine.low %v29_v11, %v33_v12  ;;  %v4235_v23 = vcombine.high %v35_v17, %v39_v18  ;;  %v95_v10 = vld [vmem:[%s8267_s0 + $0x268] sm:$0xff]  ;;  %v93_v11 = vld [vmem:[%s8267_s0 + $0x258] sm:$0xff] }
 0x10b   :  { %2884 = vmatprep.mubr.bf16.mxu0 %v4429_v24  ;;  %v4239_v24 = vcombine.high %v37_v19, %v41_v20  ;;  %v97_v12 = vld [vmem:[%s8267_s0 + $0x278] sm:$0xff] }
 0x111   :  { %2307 = vmatmul.mubr.bf16.gmra.mrb[104].mxu1 %v4424_v29  ;;  %v4234_v29 = vcombine.low %v35_v17, %v39_v18  ;;  %v99_v17 = vld [vmem:[%s8267_s0 + $0x288] sm:$0xff] }
 0x112   :  { %2885 = vmatmul.mubr.bf16.gmra.mrb[104].mxu0 %v4428_v30  ;;  %2314 = vmatprep.mubr.bf16.mxu1 %v4433_v31  ;;  %v4238_v30 = vcombine.low %v37_v19, %v41_v20  ;;  %v4243_v31 = vcombine.high %v43_v25, %v47_v26  ;;  %v103_v18 = vld [vmem:[%s8267_s0 + $0x2a8] sm:$0xff]  ;;  %v101_v19 = vld [vmem:[%s8267_s0 + $0x298] sm:$0xff] }
 0x113   :  { %2892 = vmatprep.mubr.bf16.mxu0 %v4437_v32  ;;  %v4247_v32 = vcombine.high %v45_v27, %v49_v28  ;;  %v105_v20 = vld [vmem:[%s8267_s0 + $0x2b8] sm:$0xff] }
 0x119   :  { %2315 = vmatmul.mubr.bf16.gmra.mrb[108].mxu1 %v4432_v37  ;;  %v4242_v37 = vcombine.low %v43_v25, %v47_v26  ;;  %v107_v25 = vld [vmem:[%s8267_s0 + $0x2c8] sm:$0xff] }
 0x11a   :  { %2893 = vmatmul.mubr.bf16.gmra.mrb[108].mxu0 %v4436_v38  ;;  %2322 = vmatprep.mubr.bf16.mxu1 %v4441_v39  ;;  %v4246_v38 = vcombine.low %v45_v27, %v49_v28  ;;  %v4251_v39 = vcombine.high %v51_v33, %v55_v34  ;;  %v111_v26 = vld [vmem:[%s8267_s0 + $0x2e8] sm:$0xff]  ;;  %v109_v27 = vld [vmem:[%s8267_s0 + $0x2d8] sm:$0xff] }
 0x11b   :  { %2900 = vmatprep.mubr.bf16.mxu0 %v4445_v40  ;;  %v4255_v40 = vcombine.high %v53_v35, %v57_v36  ;;  %v113_v28 = vld [vmem:[%s8267_s0 + $0x2f8] sm:$0xff] }
 0x121   :  { %2323 = vmatmul.mubr.bf16.gmra.mrb[112].mxu1 %v4440_v45  ;;  %v4250_v45 = vcombine.low %v51_v33, %v55_v34  ;;  %v115_v33 = vld [vmem:[%s8267_s0 + $0x308] sm:$0xff] }
 0x122   :  { %2901 = vmatmul.mubr.bf16.gmra.mrb[112].mxu0 %v4444_v46  ;;  %2330 = vmatprep.mubr.bf16.mxu1 %v4449_v47  ;;  %v4254_v46 = vcombine.low %v53_v35, %v57_v36  ;;  %v4259_v47 = vcombine.high %v59_v41, %v63_v42  ;;  %v119_v34 = vld [vmem:[%s8267_s0 + $0x328] sm:$0xff]  ;;  %v117_v35 = vld [vmem:[%s8267_s0 + $0x318] sm:$0xff] }
 0x123   :  { %2908 = vmatprep.mubr.bf16.mxu0 %v4453_v48  ;;  %v4263_v48 = vcombine.high %v61_v43, %v65_v44  ;;  %v121_v36 = vld [vmem:[%s8267_s0 + $0x338] sm:$0xff] }
 0x129   :  { %2331 = vmatmul.mubr.bf16.gmra.mrb[116].mxu1 %v4448_v53  ;;  %v4258_v53 = vcombine.low %v59_v41, %v63_v42  ;;  %v123_v41 = vld [vmem:[%s8267_s0 + $0x348] sm:$0xff] }
 0x12a   :  { %2909 = vmatmul.mubr.bf16.gmra.mrb[116].mxu0 %v4452_v54  ;;  %2338 = vmatprep.mubr.bf16.mxu1 %v4457_v55  ;;  %v4262_v54 = vcombine.low %v61_v43, %v65_v44  ;;  %v4267_v55 = vcombine.high %v67_v49, %v71_v50  ;;  %v127_v42 = vld [vmem:[%s8267_s0 + $0x368] sm:$0xff]  ;;  %v125_v43 = vld [vmem:[%s8267_s0 + $0x358] sm:$0xff] }
 0x12b   :  { %2916 = vmatprep.mubr.bf16.mxu0 %v4461_v56  ;;  %v4271_v56 = vcombine.high %v69_v51, %v73_v52  ;;  %v129_v44 = vld [vmem:[%s8267_s0 + $0x378] sm:$0xff] }
 0x131   :  { %2339 = vmatmul.mubr.bf16.gmra.mrb[120].mxu1 %v4456_v60  ;;  %v4266_v60 = vcombine.low %v67_v49, %v71_v50  ;;  %v131_v49 = vld [vmem:[%s8267_s0 + $0x388] sm:$0xff] }
 0x132   :  { %2917 = vmatmul.mubr.bf16.gmra.mrb[120].mxu0 %v4460_v61  ;;  %2346 = vmatprep.mubr.bf16.mxu1 %v4465_v62  ;;  %v4270_v61 = vcombine.low %v69_v51, %v73_v52  ;;  %v4275_v62 = vcombine.high %v75_v57, %v79_v0  ;;  %v135_v50 = vld [vmem:[%s8267_s0 + $0x3a8] sm:$0xff]  ;;  %v133_v51 = vld [vmem:[%s8267_s0 + $0x398] sm:$0xff] }
 0x133   :  { %2924 = vmatprep.mubr.bf16.mxu0 %v4469_v63  ;;  %v4279_v63 = vcombine.high %v77_v58, %v81_v59  ;;  %v137_v52 = vld [vmem:[%s8267_s0 + $0x3b8] sm:$0xff] }
 0x139   :  { %2347 = vmatmul.mubr.bf16.gmra.mrb[124].mxu1 %v4464_v5  ;;  %v4274_v5 = vcombine.low %v75_v57, %v79_v0  ;;  %v139_v57 = vld [vmem:[%s8267_s0 + $0x3c8] sm:$0xff] }
 0x13a   :  { %2925 = vmatmul.mubr.bf16.gmra.mrb[124].mxu0 %v4468_v6  ;;  %2387 = vmatprep.mubr.bf16.mxu1 %v4219_v7  ;;  %v4278_v6 = vcombine.low %v77_v58, %v81_v59  ;;  %v4283_v7 = vcombine.high %v83_v1, %v87_v2  ;;  %v143_v0 = vld [vmem:[%s8267_s0 + $0x3e8] sm:$0xff]  ;;  %v141_v58 = vld [vmem:[%s8267_s0 + $0x3d8] sm:$0xff] }
 0x13b   :  { %2965 = vmatprep.mubr.bf16.mxu0 %v4223_v8  ;;  %v4287_v8 = vcombine.high %v85_v3, %v89_v4  ;;  %v145_v59 = vld [vmem:[%s8267_s0 + $0x3f8] sm:$0xff] }
 0x141   :  { %2388 = vmatmul.mubr.bf16.vlgmr.msra.gmra.mrb[0].mxu1 %v4218_v13  ;;  %v4282_v13 = vcombine.low %v83_v1, %v87_v2  ;;  %v147_v1 = vld [vmem:[%s8267_s0 + $0x408] sm:$0xff] }
 0x142   :  { %2966 = vmatmul.mubr.bf16.vlgmr.msra.gmra.mrb[0].mxu0 %v4222_v14  ;;  %2395 = vmatprep.mubr.bf16.mxu1 %v4227_v15  ;;  %v4286_v14 = vcombine.low %v85_v3, %v89_v4  ;;  %v4291_v15 = vcombine.high %v91_v9, %v95_v10  ;;  %v151_v2 = vld [vmem:[%s8267_s0 + $0x428] sm:$0xff]  ;;  %v149_v3 = vld [vmem:[%s8267_s0 + $0x418] sm:$0xff] }
 0x143   :  { %2973 = vmatprep.mubr.bf16.mxu0 %v4231_v16  ;;  %v4295_v16 = vcombine.high %v93_v11, %v97_v12  ;;  %v153_v4 = vld [vmem:[%s8267_s0 + $0x438] sm:$0xff] }
 0x149   :  { %2396 = vmatmul.mubr.bf16.gmra.mrb[4].mxu1 %v4226_v21  ;;  %v4290_v21 = vcombine.low %v91_v9, %v95_v10  ;;  %v155_v9 = vld [vmem:[%s8267_s0 + $0x448] sm:$0xff] }
 0x14a   :  { %2974 = vmatmul.mubr.bf16.gmra.mrb[4].mxu0 %v4230_v22  ;;  %2403 = vmatprep.mubr.bf16.mxu1 %v4235_v23  ;;  %v4294_v22 = vcombine.low %v93_v11, %v97_v12  ;;  %v4299_v23 = vcombine.high %v99_v17, %v103_v18  ;;  %v159_v10 = vld [vmem:[%s8267_s0 + $0x468] sm:$0xff]  ;;  %v157_v11 = vld [vmem:[%s8267_s0 + $0x458] sm:$0xff] }
 0x14b   :  { %2981 = vmatprep.mubr.bf16.mxu0 %v4239_v24  ;;  %v4303_v24 = vcombine.high %v101_v19, %v105_v20  ;;  %v161_v12 = vld [vmem:[%s8267_s0 + $0x478] sm:$0xff] }
 0x151   :  { %2404 = vmatmul.mubr.bf16.gmra.mrb[8].mxu1 %v4234_v29  ;;  %v4298_v29 = vcombine.low %v99_v17, %v103_v18  ;;  %v163_v17 = vld [vmem:[%s8267_s0 + $0x488] sm:$0xff] }
 0x152   :  { %2982 = vmatmul.mubr.bf16.gmra.mrb[8].mxu0 %v4238_v30  ;;  %2411 = vmatprep.mubr.bf16.mxu1 %v4243_v31  ;;  %v4302_v30 = vcombine.low %v101_v19, %v105_v20  ;;  %v4307_v31 = vcombine.high %v107_v25, %v111_v26  ;;  %v167_v18 = vld [vmem:[%s8267_s0 + $0x4a8] sm:$0xff]  ;;  %v165_v19 = vld [vmem:[%s8267_s0 + $0x498] sm:$0xff] }
 0x153   :  { %2989 = vmatprep.mubr.bf16.mxu0 %v4247_v32  ;;  %v4311_v32 = vcombine.high %v109_v27, %v113_v28  ;;  %v169_v20 = vld [vmem:[%s8267_s0 + $0x4b8] sm:$0xff] }
 0x159   :  { %2412 = vmatmul.mubr.bf16.gmra.mrb[12].mxu1 %v4242_v37  ;;  %v4306_v37 = vcombine.low %v107_v25, %v111_v26  ;;  %v171_v25 = vld [vmem:[%s8267_s0 + $0x4c8] sm:$0xff] }
 0x15a   :  { %2990 = vmatmul.mubr.bf16.gmra.mrb[12].mxu0 %v4246_v38  ;;  %2419 = vmatprep.mubr.bf16.mxu1 %v4251_v39  ;;  %v4310_v38 = vcombine.low %v109_v27, %v113_v28  ;;  %v4315_v39 = vcombine.high %v115_v33, %v119_v34  ;;  %v175_v26 = vld [vmem:[%s8267_s0 + $0x4e8] sm:$0xff]  ;;  %v173_v27 = vld [vmem:[%s8267_s0 + $0x4d8] sm:$0xff] }
 0x15b   :  { %2997 = vmatprep.mubr.bf16.mxu0 %v4255_v40  ;;  %v4319_v40 = vcombine.high %v117_v35, %v121_v36  ;;  %v177_v28 = vld [vmem:[%s8267_s0 + $0x4f8] sm:$0xff] }
 0x161   :  { %2420 = vmatmul.mubr.bf16.gmra.mrb[16].mxu1 %v4250_v45  ;;  %v4314_v45 = vcombine.low %v115_v33, %v119_v34  ;;  %v179_v33 = vld [vmem:[%s8267_s0 + $0x508] sm:$0xff] }
 0x162   :  { %2998 = vmatmul.mubr.bf16.gmra.mrb[16].mxu0 %v4254_v46  ;;  %2427 = vmatprep.mubr.bf16.mxu1 %v4259_v47  ;;  %v4318_v46 = vcombine.low %v117_v35, %v121_v36  ;;  %v4323_v47 = vcombine.high %v123_v41, %v127_v42  ;;  %v183_v34 = vld [vmem:[%s8267_s0 + $0x528] sm:$0xff]  ;;  %v181_v35 = vld [vmem:[%s8267_s0 + $0x518] sm:$0xff] }
 0x163   :  { %3005 = vmatprep.mubr.bf16.mxu0 %v4263_v48  ;;  %v4327_v48 = vcombine.high %v125_v43, %v129_v44  ;;  %v185_v36 = vld [vmem:[%s8267_s0 + $0x538] sm:$0xff] }
 0x169   :  { %2428 = vmatmul.mubr.bf16.gmra.mrb[20].mxu1 %v4258_v53  ;;  %v4322_v53 = vcombine.low %v123_v41, %v127_v42  ;;  %v187_v41 = vld [vmem:[%s8267_s0 + $0x548] sm:$0xff] }
 0x16a   :  { %3006 = vmatmul.mubr.bf16.gmra.mrb[20].mxu0 %v4262_v54  ;;  %2435 = vmatprep.mubr.bf16.mxu1 %v4267_v55  ;;  %v4326_v54 = vcombine.low %v125_v43, %v129_v44  ;;  %v4331_v55 = vcombine.high %v131_v49, %v135_v50  ;;  %v191_v42 = vld [vmem:[%s8267_s0 + $0x568] sm:$0xff]  ;;  %v189_v43 = vld [vmem:[%s8267_s0 + $0x558] sm:$0xff] }
 0x16b   :  { %3013 = vmatprep.mubr.bf16.mxu0 %v4271_v56  ;;  %v4335_v56 = vcombine.high %v133_v51, %v137_v52  ;;  %v193_v44 = vld [vmem:[%s8267_s0 + $0x578] sm:$0xff] }
 0x171   :  { %2436 = vmatmul.mubr.bf16.gmra.mrb[24].mxu1 %v4266_v60  ;;  %v4330_v60 = vcombine.low %v131_v49, %v135_v50  ;;  %v195_v49 = vld [vmem:[%s8267_s0 + $0x588] sm:$0xff] }
 0x172   :  { %3014 = vmatmul.mubr.bf16.gmra.mrb[24].mxu0 %v4270_v61  ;;  %2443 = vmatprep.mubr.bf16.mxu1 %v4275_v62  ;;  %v4334_v61 = vcombine.low %v133_v51, %v137_v52  ;;  %v4339_v62 = vcombine.high %v139_v57, %v143_v0  ;;  %v199_v50 = vld [vmem:[%s8267_s0 + $0x5a8] sm:$0xff]  ;;  %v197_v51 = vld [vmem:[%s8267_s0 + $0x598] sm:$0xff] }
 0x173   :  { %3021 = vmatprep.mubr.bf16.mxu0 %v4279_v63  ;;  %v4343_v63 = vcombine.high %v141_v58, %v145_v59  ;;  %v201_v52 = vld [vmem:[%s8267_s0 + $0x5b8] sm:$0xff] }
 0x179   :  { %2444 = vmatmul.mubr.bf16.gmra.mrb[28].mxu1 %v4274_v5  ;;  %v4338_v5 = vcombine.low %v139_v57, %v143_v0  ;;  %v203_v57 = vld [vmem:[%s8267_s0 + $0x5c8] sm:$0xff] }
 0x17a   :  { %3022 = vmatmul.mubr.bf16.gmra.mrb[28].mxu0 %v4278_v6  ;;  %2451 = vmatprep.mubr.bf16.mxu1 %v4283_v7  ;;  %v4342_v6 = vcombine.low %v141_v58, %v145_v59  ;;  %v4347_v7 = vcombine.high %v147_v1, %v151_v2  ;;  %v207_v0 = vld [vmem:[%s8267_s0 + $0x5e8] sm:$0xff]  ;;  %v205_v58 = vld [vmem:[%s8267_s0 + $0x5d8] sm:$0xff] }
 0x17b   :  { %3029 = vmatprep.mubr.bf16.mxu0 %v4287_v8  ;;  %v4351_v8 = vcombine.high %v149_v3, %v153_v4  ;;  %v209_v59 = vld [vmem:[%s8267_s0 + $0x5f8] sm:$0xff] }
 0x181   :  { %2452 = vmatmul.mubr.bf16.gmra.mrb[32].mxu1 %v4282_v13  ;;  %v4346_v13 = vcombine.low %v147_v1, %v151_v2  ;;  %v211_v1 = vld [vmem:[%s8267_s0 + $0x608] sm:$0xff] }
 0x182   :  { %3030 = vmatmul.mubr.bf16.gmra.mrb[32].mxu0 %v4286_v14  ;;  %2459 = vmatprep.mubr.bf16.mxu1 %v4291_v15  ;;  %v4350_v14 = vcombine.low %v149_v3, %v153_v4  ;;  %v4355_v15 = vcombine.high %v155_v9, %v159_v10  ;;  %v215_v2 = vld [vmem:[%s8267_s0 + $0x628] sm:$0xff]  ;;  %v213_v3 = vld [vmem:[%s8267_s0 + $0x618] sm:$0xff] }
 0x183   :  { %3037 = vmatprep.mubr.bf16.mxu0 %v4295_v16  ;;  %v4359_v16 = vcombine.high %v157_v11, %v161_v12  ;;  %v217_v4 = vld [vmem:[%s8267_s0 + $0x638] sm:$0xff] }
 0x189   :  { %2460 = vmatmul.mubr.bf16.gmra.mrb[36].mxu1 %v4290_v21  ;;  %v4354_v21 = vcombine.low %v155_v9, %v159_v10  ;;  %v219_v9 = vld [vmem:[%s8267_s0 + $0x648] sm:$0xff] }
 0x18a   :  { %3038 = vmatmul.mubr.bf16.gmra.mrb[36].mxu0 %v4294_v22  ;;  %2467 = vmatprep.mubr.bf16.mxu1 %v4299_v23  ;;  %v4358_v22 = vcombine.low %v157_v11, %v161_v12  ;;  %v4363_v23 = vcombine.high %v163_v17, %v167_v18  ;;  %v223_v10 = vld [vmem:[%s8267_s0 + $0x668] sm:$0xff]  ;;  %v221_v11 = vld [vmem:[%s8267_s0 + $0x658] sm:$0xff] }
 0x18b   :  { %3045 = vmatprep.mubr.bf16.mxu0 %v4303_v24  ;;  %v4367_v24 = vcombine.high %v165_v19, %v169_v20  ;;  %v225_v12 = vld [vmem:[%s8267_s0 + $0x678] sm:$0xff] }
 0x191   :  { %2468 = vmatmul.mubr.bf16.gmra.mrb[40].mxu1 %v4298_v29  ;;  %v4362_v29 = vcombine.low %v163_v17, %v167_v18  ;;  %v227_v17 = vld [vmem:[%s8267_s0 + $0x688] sm:$0xff] }
 0x192   :  { %3046 = vmatmul.mubr.bf16.gmra.mrb[40].mxu0 %v4302_v30  ;;  %2475 = vmatprep.mubr.bf16.mxu1 %v4307_v31  ;;  %v4366_v30 = vcombine.low %v165_v19, %v169_v20  ;;  %v4371_v31 = vcombine.high %v171_v25, %v175_v26  ;;  %v231_v18 = vld [vmem:[%s8267_s0 + $0x6a8] sm:$0xff]  ;;  %v229_v19 = vld [vmem:[%s8267_s0 + $0x698] sm:$0xff] }
 0x193   :  { %3053 = vmatprep.mubr.bf16.mxu0 %v4311_v32  ;;  %v4375_v32 = vcombine.high %v173_v27, %v177_v28  ;;  %v233_v20 = vld [vmem:[%s8267_s0 + $0x6b8] sm:$0xff] }
 0x199   :  { %2476 = vmatmul.mubr.bf16.gmra.mrb[44].mxu1 %v4306_v37  ;;  %v4370_v37 = vcombine.low %v171_v25, %v175_v26  ;;  %v235_v25 = vld [vmem:[%s8267_s0 + $0x6c8] sm:$0xff] }
 0x19a   :  { %3054 = vmatmul.mubr.bf16.gmra.mrb[44].mxu0 %v4310_v38  ;;  %2483 = vmatprep.mubr.bf16.mxu1 %v4315_v39  ;;  %v4374_v38 = vcombine.low %v173_v27, %v177_v28  ;;  %v4379_v39 = vcombine.high %v179_v33, %v183_v34  ;;  %v239_v26 = vld [vmem:[%s8267_s0 + $0x6e8] sm:$0xff]  ;;  %v237_v27 = vld [vmem:[%s8267_s0 + $0x6d8] sm:$0xff] }
 0x19b   :  { %3061 = vmatprep.mubr.bf16.mxu0 %v4319_v40  ;;  %v4383_v40 = vcombine.high %v181_v35, %v185_v36  ;;  %v241_v28 = vld [vmem:[%s8267_s0 + $0x6f8] sm:$0xff] }
 0x1a1   :  { %2484 = vmatmul.mubr.bf16.gmra.mrb[48].mxu1 %v4314_v45  ;;  %v4378_v45 = vcombine.low %v179_v33, %v183_v34  ;;  %v243_v33 = vld [vmem:[%s8267_s0 + $0x708] sm:$0xff] }
 0x1a2   :  { %3062 = vmatmul.mubr.bf16.gmra.mrb[48].mxu0 %v4318_v46  ;;  %2491 = vmatprep.mubr.bf16.mxu1 %v4323_v47  ;;  %v4382_v46 = vcombine.low %v181_v35, %v185_v36  ;;  %v4387_v47 = vcombine.high %v187_v41, %v191_v42  ;;  %v247_v34 = vld [vmem:[%s8267_s0 + $0x728] sm:$0xff]  ;;  %v245_v36 = vld [vmem:[%s8267_s0 + $0x718] sm:$0xff] }
 0x1a3   :  { %3069 = vmatprep.mubr.bf16.mxu0 %v4327_v48  ;;  %v4391_v48 = vcombine.high %v189_v43, %v193_v44 }
 0x1a9   :  { %2492 = vmatmul.mubr.bf16.gmra.mrb[52].mxu1 %v4322_v53  ;;  %v4386_v53 = vcombine.low %v187_v41, %v191_v42 }
 0x1aa   :  { %3070 = vmatmul.mubr.bf16.gmra.mrb[52].mxu0 %v4326_v54  ;;  %2499 = vmatprep.mubr.bf16.mxu1 %v4331_v55  ;;  %v4390_v54 = vcombine.low %v189_v43, %v193_v44  ;;  %v4395_v55 = vcombine.high %v195_v49, %v199_v50  ;;  %v4438_v44 = vcombine.low %v237_v27, %v241_v28 }
 0x1ab   :  { %3077 = vmatprep.mubr.bf16.mxu0 %v4335_v56  ;;  %v4399_v56 = vcombine.high %v197_v51, %v201_v52 }
 0x1b1   :  { %2500 = vmatmul.mubr.bf16.gmra.mrb[56].mxu1 %v4330_v60  ;;  %v4394_v60 = vcombine.low %v195_v49, %v199_v50 }
 0x1b2   :  { %3078 = vmatmul.mubr.bf16.gmra.mrb[56].mxu0 %v4334_v61  ;;  %2507 = vmatprep.mubr.bf16.mxu1 %v4339_v62  ;;  %v4398_v61 = vcombine.low %v197_v51, %v201_v52  ;;  %v4403_v62 = vcombine.high %v203_v57, %v207_v0  ;;  %v251_v51 = vld [vmem:[%s8267_s0 + $0x748] sm:$0xff] }
 0x1b3   :  { %3085 = vmatprep.mubr.bf16.mxu0 %v4343_v63  ;;  %v4407_v63 = vcombine.high %v205_v58, %v209_v59  ;;  %v255_v52 = vld [vmem:[%s8267_s0 + $0x768] sm:$0xff] }
 0x1b9   :  { %2508 = vmatmul.mubr.bf16.gmra.mrb[60].mxu1 %v4338_v5  ;;  %v4402_v5 = vcombine.low %v203_v57, %v207_v0  ;;  %v4442_v0 = vcombine.low %v243_v33, %v247_v34 }
 0x1ba   :  { %3086 = vmatmul.mubr.bf16.gmra.mrb[60].mxu0 %v4342_v6  ;;  %2515 = vmatprep.mubr.bf16.mxu1 %v4347_v7  ;;  %v4406_v6 = vcombine.low %v205_v58, %v209_v59  ;;  %v4411_v7 = vcombine.high %v211_v1, %v215_v2 }
 0x1bb   :  { %3093 = vmatprep.mubr.bf16.mxu0 %v4351_v8  ;;  %v4415_v8 = vcombine.high %v213_v3, %v217_v4 }
 0x1c1   :  { %2516 = vmatmul.mubr.bf16.gmra.mrb[64].mxu1 %v4346_v13  ;;  %v4410_v13 = vcombine.low %v211_v1, %v215_v2 }
 0x1c2   :  { %3094 = vmatmul.mubr.bf16.gmra.mrb[64].mxu0 %v4350_v14  ;;  %2523 = vmatprep.mubr.bf16.mxu1 %v4355_v15  ;;  %v4414_v14 = vcombine.low %v213_v3, %v217_v4  ;;  %v4419_v15 = vcombine.high %v219_v9, %v223_v10 }
 0x1c3   :  { %3101 = vmatprep.mubr.bf16.mxu0 %v4359_v16  ;;  %v4423_v16 = vcombine.high %v221_v11, %v225_v12 }
 0x1c9   :  { %2524 = vmatmul.mubr.bf16.gmra.mrb[68].mxu1 %v4354_v21  ;;  %v4418_v21 = vcombine.low %v219_v9, %v223_v10  ;;  %v265_v9 = vld [vmem:[%s8267_s0 + $0x7b8] sm:$0xff] }
 0x1ca   :  { %3102 = vmatmul.mubr.bf16.gmra.mrb[68].mxu0 %v4358_v22  ;;  %2531 = vmatprep.mubr.bf16.mxu1 %v4363_v23  ;;  %v4422_v22 = vcombine.low %v221_v11, %v225_v12  ;;  %v4427_v23 = vcombine.high %v227_v17, %v231_v18  ;;  %v4450_v12 = vcombine.low %v251_v51, %v255_v52 }
 0x1cb   :  { %3109 = vmatprep.mubr.bf16.mxu0 %v4367_v24  ;;  %v4431_v24 = vcombine.high %v229_v19, %v233_v20 }
 0x1d1   :  { %2532 = vmatmul.mubr.bf16.gmra.mrb[72].mxu1 %v4362_v29  ;;  %v4426_v29 = vcombine.low %v227_v17, %v231_v18 }
 0x1d2   :  { %3110 = vmatmul.mubr.bf16.gmra.mrb[72].mxu0 %v4366_v30  ;;  %2539 = vmatprep.mubr.bf16.mxu1 %v4371_v31  ;;  %v4430_v30 = vcombine.low %v229_v19, %v233_v20  ;;  %v4435_v31 = vcombine.high %v235_v25, %v239_v26 }
 0x1d3   :  { %3117 = vmatprep.mubr.bf16.mxu0 %v4375_v32  ;;  %v4439_v32 = vcombine.high %v237_v27, %v241_v28  ;;  %v273_v27 = vld [vmem:[%s8267_s0 + $0x7f8] sm:$0xff] }
 0x1d9   :  { %2540 = vmatmul.mubr.bf16.gmra.mrb[76].mxu1 %v4370_v37  ;;  %v249_v37 = vld [vmem:[%s8267_s0 + $0x738] sm:$0xff] }
 0x1da   :  { %3118 = vmatmul.mubr.bf16.gmra.mrb[76].mxu0 %v4374_v38  ;;  %2547 = vmatprep.mubr.bf16.mxu1 %v4379_v39 }
 0x1db   :  { %3125 = vmatprep.mubr.bf16.mxu0 %v4383_v40  ;;  %v4434_v40 = vcombine.low %v235_v25, %v239_v26  ;;  %v269_v26 = vld [vmem:[%s8267_s0 + $0x7d8] sm:$0xff] }
 0x1e1   :  { %2548 = vmatmul.mubr.bf16.gmra.mrb[80].mxu1 %v4378_v45  ;;  %v4443_v45 = vcombine.high %v243_v33, %v247_v34 }
 0x1e2   :  { %3126 = vmatmul.mubr.bf16.gmra.mrb[80].mxu0 %v4382_v46  ;;  %2555 = vmatprep.mubr.bf16.mxu1 %v4387_v47 }
 0x1e3   :  { %3133 = vmatprep.mubr.bf16.mxu0 %v4391_v48  ;;  %v4447_v48 = vcombine.high %v245_v36, %v249_v37 }
 0x1e9   :  { %2556 = vmatmul.mubr.bf16.gmra.mrb[84].mxu1 %v4386_v53 }
 0x1ea   :  { %3134 = vmatmul.mubr.bf16.gmra.mrb[84].mxu0 %v4390_v54  ;;  %2563 = vmatprep.mubr.bf16.mxu1 %v4395_v55  ;;  %v253_v54 = vld [vmem:[%s8267_s0 + $0x758] sm:$0xff] }
 0x1eb   :  { %3141 = vmatprep.mubr.bf16.mxu0 %v4399_v56  ;;  %v257_v55 = vld [vmem:[%s8267_s0 + $0x778] sm:$0xff] }
 0x1ec   :  { %v4455_v2 = vcombine.high %v253_v54, %v257_v55 }
 0x1f1   :  { %2564 = vmatmul.mubr.bf16.gmra.mrb[88].mxu1 %v4394_v60 }
 0x1f2   :  { %3142 = vmatmul.mubr.bf16.gmra.mrb[88].mxu0 %v4398_v61  ;;  %2571 = vmatprep.mubr.bf16.mxu1 %v4403_v62  ;;  %v4446_v61 = vcombine.low %v245_v36, %v249_v37  ;;  %v4451_v62 = vcombine.high %v251_v51, %v255_v52 }
 0x1f3   :  { %3149 = vmatprep.mubr.bf16.mxu0 %v4407_v63 }
 0x1f9   :  { %2572 = vmatmul.mubr.bf16.gmra.mrb[92].mxu1 %v4402_v5  ;;  %v259_v5 = vld [vmem:[%s8267_s0 + $0x788] sm:$0xff] }
 0x1fa   :  { %3150 = vmatmul.mubr.bf16.gmra.mrb[92].mxu0 %v4406_v6  ;;  %2579 = vmatprep.mubr.bf16.mxu1 %v4411_v7  ;;  %v263_v6 = vld [vmem:[%s8267_s0 + $0x7a8] sm:$0xff] }
 0x1fb   :  { %3157 = vmatprep.mubr.bf16.mxu0 %v4415_v8  ;;  %v261_v8 = vld [vmem:[%s8267_s0 + $0x798] sm:$0xff]  ;;  %v4459_v17 = vcombine.high %v259_v5, %v263_v6 }
 0x1fc   :  { %v4463_v20 = vcombine.high %v261_v8, %v265_v9  ;;  %v4462_v34 = vcombine.low %v261_v8, %v265_v9 }
 0x201   :  { %2580 = vmatmul.mubr.bf16.gmra.mrb[96].mxu1 %v4410_v13 }
 0x202   :  { %3158 = vmatmul.mubr.bf16.gmra.mrb[96].mxu0 %v4414_v14  ;;  %2587 = vmatprep.mubr.bf16.mxu1 %v4419_v15 }
 0x203   :  { %3165 = vmatprep.mubr.bf16.mxu0 %v4423_v16  ;;  %v4454_v16 = vcombine.low %v253_v54, %v257_v55 }
 0x209   :  { %2588 = vmatmul.mubr.bf16.gmra.mrb[100].mxu1 %v4418_v21 }
 0x20a   :  { %3166 = vmatmul.mubr.bf16.gmra.mrb[100].mxu0 %v4422_v22  ;;  %2595 = vmatprep.mubr.bf16.mxu1 %v4427_v23  ;;  %v267_v23 = vld [vmem:[%s8267_s0 + $0x7c8] sm:$0xff] }
 0x20b   :  { %3173 = vmatprep.mubr.bf16.mxu0 %v4431_v24  ;;  %v271_v24 = vld [vmem:[%s8267_s0 + $0x7e8] sm:$0xff] }
 0x211   :  { %2596 = vmatmul.mubr.bf16.gmra.mrb[104].mxu1 %v4426_v29 }
 0x212   :  { %3174 = vmatmul.mubr.bf16.gmra.mrb[104].mxu0 %v4430_v30  ;;  %2603 = vmatprep.mubr.bf16.mxu1 %v4435_v31  ;;  %v4458_v30 = vcombine.low %v259_v5, %v263_v6 }
 0x213   :  { %3181 = vmatprep.mubr.bf16.mxu0 %v4439_v32 }
 0x214   :  { %v2389_v35 = vpop.f32.mrb[0].mxu1 }
 0x215   :  { %v2967_v38 = vpop.f32.mrb[0].mxu0  ;;  %v2391_v39 = vpop.f32.mrb[1].mxu1 }
 0x216   :  { %v6274_v41 = vadd.f32 %v2967_v38, %v2389_v35  ;;  %v2969_v42 = vpop.f32.mrb[1].mxu0  ;;  %v2392_v43 = vpop.f32.mrb[2].mxu1  ;;  %v4467_v35 = vcombine.high %v267_v23, %v271_v24  ;;  %v4471_v38 = vcombine.high %v269_v26, %v273_v27 }
 0x217   :  { %v2970_v46 = vpop.f32.mrb[2].mxu0  ;;  %v2394_v47 = vpop.f32.mrb[3].mxu1 }
 0x218   :  { %v6276_v49 = vadd.f32 %v2970_v46, %v2392_v43  ;;  %v2972_v50 = vpop.f32.mrb[3].mxu0 }
 0x219   :  { %2604 = vmatmul.mubr.bf16.gmra.mrb[108].mxu1 %v4434_v40  ;;  %v4470_v50 = vcombine.low %v269_v26, %v273_v27 }
 0x21a   :  { %3182 = vmatmul.mubr.bf16.gmra.mrb[108].mxu0 %v4438_v44  ;;  %2611 = vmatprep.mubr.bf16.mxu1 %v4443_v45  ;;  %v4466_v45 = vcombine.low %v267_v23, %v271_v24 }
 0x21b   :  { %3189 = vmatprep.mubr.bf16.mxu0 %v4447_v48 }
 0x21c   :  { %v2397_v53 = vpop.f32.mrb[4].mxu1 }
 0x21d   :  { %v2975_v56 = vpop.f32.mrb[4].mxu0  ;;  %v2399_v57 = vpop.f32.mrb[5].mxu1 }
 0x21e   :  { %v6290_v58 = vadd.f32 %v2975_v56, %v2397_v53  ;;  %v2977_v59 = vpop.f32.mrb[5].mxu0  ;;  %v2400_v60 = vpop.f32.mrb[6].mxu1 }
 0x21f   :  { %v2978_v63 = vpop.f32.mrb[6].mxu0  ;;  %v2402_v1 = vpop.f32.mrb[7].mxu1 }
 0x220   :  { %v6292_v3 = vadd.f32 %v2978_v63, %v2400_v60  ;;  %v2980_v4 = vpop.f32.mrb[7].mxu0 }
 0x221   :  { %2612 = vmatmul.mubr.bf16.gmra.mrb[112].mxu1 %v4442_v0 }
 0x222   :  { %3190 = vmatmul.mubr.bf16.gmra.mrb[112].mxu0 %v4446_v61  ;;  %2619 = vmatprep.mubr.bf16.mxu1 %v4451_v62 }
 0x223   :  { %3197 = vmatprep.mubr.bf16.mxu0 %v4455_v2 }
 0x224   :  { %v2405_v7 = vpop.f32.mrb[8].mxu1 }
 0x225   :  { %v2983_v10 = vpop.f32.mrb[8].mxu0  ;;  %v2407_v11 = vpop.f32.mrb[9].mxu1 }
 0x226   :  { %v6306_v13 = vadd.f32 %v2983_v10, %v2405_v7  ;;  %v2985_v14 = vpop.f32.mrb[9].mxu0  ;;  %v2408_v15 = vpop.f32.mrb[10].mxu1 }
 0x227   :  { %v2986_v18 = vpop.f32.mrb[10].mxu0  ;;  %v2410_v19 = vpop.f32.mrb[11].mxu1  ;;  %v3293_v14 = vmul.f32 %v6276_v49, %v6276_v49 }
 0x228   :  { %v6308_v21 = vadd.f32 %v2986_v18, %v2408_v15  ;;  %v2988_v22 = vpop.f32.mrb[11].mxu0  ;;  %v3292_v18 = vmul.f32 %v6274_v41, %v6274_v41  ;;  %v3222_v19 = vadd.f32 %v6276_v49, %v6274_v41 }
 0x229   :  { %2620 = vmatmul.mubr.bf16.gmra.mrb[116].mxu1 %v4450_v12 }
 0x22a   :  { %3198 = vmatmul.mubr.bf16.gmra.mrb[116].mxu0 %v4454_v16  ;;  %2627 = vmatprep.mubr.bf16.mxu1 %v4459_v17  ;;  %v3356_v27 = vadd.f32 %v3293_v14, %v3292_v18 }
 0x22b   :  { %3205 = vmatprep.mubr.bf16.mxu0 %v4463_v20  ;;  %v3294_v20 = vmul.f32 %v6290_v58, %v6290_v58 }
 0x22c   :  { %v2413_v25 = vpop.f32.mrb[12].mxu1 }
 0x22d   :  { %v2991_v28 = vpop.f32.mrb[12].mxu0  ;;  %v2415_v29 = vpop.f32.mrb[13].mxu1 }
 0x22e   :  { %v6322_v31 = vadd.f32 %v2991_v28, %v2413_v25  ;;  %v2993_v32 = vpop.f32.mrb[13].mxu0  ;;  %v2416_v33 = vpop.f32.mrb[14].mxu1  ;;  %v3223_v28 = vadd.f32 %v6290_v58, %v3222_v19 }
 0x22f   :  { %v2994_v36 = vpop.f32.mrb[14].mxu0  ;;  %v2418_v37 = vpop.f32.mrb[15].mxu1  ;;  %v3357_v32 = vadd.f32 %v3356_v27, %v3294_v20 }
 0x230   :  { %v6324_v39 = vadd.f32 %v2994_v36, %v2416_v33  ;;  %v2996_v40 = vpop.f32.mrb[15].mxu0  ;;  %v3295_v33 = vmul.f32 %v6292_v3, %v6292_v3 }
 0x231   :  { %2628 = vmatmul.mubr.bf16.gmra.mrb[120].mxu1 %v4458_v30 }
 0x232   :  { %3206 = vmatmul.mubr.bf16.gmra.mrb[120].mxu0 %v4462_v34  ;;  %2635 = vmatprep.mubr.bf16.mxu1 %v4467_v35  ;;  %v3224_v34 = vadd.f32 %v6292_v3, %v3223_v28  ;;  %v3296_v35 = vmul.f32 %v6306_v13, %v6306_v13  ;;  %v3358_v40 = vadd.f32 %v3357_v32, %v3295_v33 }
 0x233   :  { %3213 = vmatprep.mubr.bf16.mxu0 %v4471_v38 }
 0x234   :  { %v2421_v42 = vpop.f32.mrb[16].mxu1 }
 0x235   :  { %v2999_v43 = vpop.f32.mrb[16].mxu0  ;;  %v2423_v44 = vpop.f32.mrb[17].mxu1 }
 0x236   :  { %v6326_v46 = vadd.f32 %v2999_v43, %v2421_v42  ;;  %v3001_v47 = vpop.f32.mrb[17].mxu0  ;;  %v2424_v48 = vpop.f32.mrb[18].mxu1  ;;  %v3225_v42 = vadd.f32 %v6306_v13, %v3224_v34 }
 0x237   :  { %v3002_v51 = vpop.f32.mrb[18].mxu0  ;;  %v2426_v52 = vpop.f32.mrb[19].mxu1 }
 0x238   :  { %v6328_v53 = vadd.f32 %v3002_v51, %v2424_v48  ;;  %v3004_v54 = vpop.f32.mrb[19].mxu0  ;;  %v3297_v51 = vmul.f32 %v6308_v21, %v6308_v21 }
 0x239   :  { %2636 = vmatmul.mubr.bf16.gmra.mrb[124].mxu1 %v4466_v45 }
 0x23a   :  { %3214 = vmatmul.mubr.bf16.gmra.mrb[124].mxu0 %v4470_v50  ;;  %v3359_v50 = vadd.f32 %v3358_v40, %v3296_v35  ;;  %v3301_v19 = vmul.f32 %v6328_v53, %v6328_v53 }
 0x23c   :  { %v2429_v55 = vpop.f32.mrb[20].mxu1 }
 0x23d   :  { %v3007_v56 = vpop.f32.mrb[20].mxu0  ;;  %v2431_v57 = vpop.f32.mrb[21].mxu1 }
 0x23e   :  { %v6330_v0 = vadd.f32 %v3007_v56, %v2429_v55  ;;  %v3009_v59 = vpop.f32.mrb[21].mxu0  ;;  %v2432_v60 = vpop.f32.mrb[22].mxu1  ;;  %v3226_v55 = vadd.f32 %v6308_v21, %v3225_v42  ;;  %v3298_v56 = vmul.f32 %v6322_v31, %v6322_v31  ;;  %v3360_v57 = vadd.f32 %v3359_v50, %v3297_v51 }
 0x23f   :  { %v3010_v61 = vpop.f32.mrb[22].mxu0  ;;  %v2434_v62 = vpop.f32.mrb[23].mxu1 }
 0x240   :  { %v6332_v63 = vadd.f32 %v3010_v61, %v2432_v60  ;;  %v3012_v1 = vpop.f32.mrb[23].mxu0  ;;  %v3227_v59 = vadd.f32 %v6322_v31, %v3226_v55 }
 0x241   :  { %v3361_v1 = vadd.f32 %v3360_v57, %v3298_v56 }
 0x242   :  { %v3303_v40 = vmul.f32 %v6332_v63, %v6332_v63 }
 0x244   :  { %v2437_v2 = vpop.f32.mrb[24].mxu1 }
 0x245   :  { %v3015_v4 = vpop.f32.mrb[24].mxu0  ;;  %v2439_v5 = vpop.f32.mrb[25].mxu1 }
 0x246   :  { %v6334_v6 = vadd.f32 %v3015_v4, %v2437_v2  ;;  %v3017_v7 = vpop.f32.mrb[25].mxu0  ;;  %v2440_v8 = vpop.f32.mrb[26].mxu1  ;;  %v3299_v2 = vmul.f32 %v6324_v39, %v6324_v39 }
 0x247   :  { %v3018_v9 = vpop.f32.mrb[26].mxu0  ;;  %v2442_v10 = vpop.f32.mrb[27].mxu1 }
 0x248   :  { %v6336_v11 = vadd.f32 %v3018_v9, %v2440_v8  ;;  %v3020_v12 = vpop.f32.mrb[27].mxu0  ;;  %v3228_v10 = vadd.f32 %v6324_v39, %v3227_v59 }
 0x249   :  { %v3300_v12 = vmul.f32 %v6326_v46, %v6326_v46 }
 0x24c   :  { %v2445_v15 = vpop.f32.mrb[28].mxu1 }
 0x24d   :  { %v3023_v16 = vpop.f32.mrb[28].mxu0  ;;  %v2447_v17 = vpop.f32.mrb[29].mxu1 }
 0x24e   :  { %v6346_v22 = vadd.f32 %v3023_v16, %v2445_v15  ;;  %v3025_v23 = vpop.f32.mrb[29].mxu0  ;;  %v2448_v24 = vpop.f32.mrb[30].mxu1  ;;  %v3362_v16 = vadd.f32 %v3361_v1, %v3299_v2  ;;  %v3229_v17 = vadd.f32 %v6326_v46, %v3228_v10 }
 0x24f   :  { %v3026_v25 = vpop.f32.mrb[30].mxu0  ;;  %v2450_v26 = vpop.f32.mrb[31].mxu1 }
 0x250   :  { %v6349_v29 = vadd.f32 %v3026_v25, %v2448_v24  ;;  %v3028_v30 = vpop.f32.mrb[31].mxu0  ;;  %v3363_v18 = vadd.f32 %v3362_v16, %v3300_v12  ;;  %v3230_v25 = vadd.f32 %v6328_v53, %v3229_v17  ;;  %v3302_v26 = vmul.f32 %v6330_v0, %v6330_v0 }
 0x252   :  { %v3364_v34 = vadd.f32 %v3363_v18, %v3301_v19  ;;  %v3231_v35 = vadd.f32 %v6330_v0, %v3230_v25  ;;  %v3307_v16 = vmul.f32 %v6349_v29, %v6349_v29 }
 0x254   :  { %v2453_v36 = vpop.f32.mrb[32].mxu1  ;;  %v3232_v42 = vadd.f32 %v6332_v63, %v3231_v35 }
 0x255   :  { %v3031_v37 = vpop.f32.mrb[32].mxu0  ;;  %v2455_v38 = vpop.f32.mrb[33].mxu1 }
 0x256   :  { %v6357_v43 = vadd.f32 %v3031_v37, %v2453_v36  ;;  %v3033_v44 = vpop.f32.mrb[33].mxu0  ;;  %v2456_v45 = vpop.f32.mrb[34].mxu1  ;;  %v3365_v38 = vadd.f32 %v3364_v34, %v3302_v26  ;;  %v3233_v51 = vadd.f32 %v6334_v6, %v3232_v42 }
 0x257   :  { %v3034_v47 = vpop.f32.mrb[34].mxu0  ;;  %v2458_v48 = vpop.f32.mrb[35].mxu1  ;;  %v3304_v44 = vmul.f32 %v6334_v6, %v6334_v6 }
 0x258   :  { %v6361_v52 = vadd.f32 %v3034_v47, %v2456_v45  ;;  %v3036_v54 = vpop.f32.mrb[35].mxu0  ;;  %v3366_v50 = vadd.f32 %v3365_v38, %v3303_v40  ;;  %v3234_v2 = vadd.f32 %v6336_v11, %v3233_v51  ;;  %v3308_v25 = vmul.f32 %v6357_v43, %v6357_v43 }
 0x25a   :  { %v3309_v34 = vmul.f32 %v6361_v52, %v6361_v52 }
 0x25c   :  { %v2461_v60 = vpop.f32.mrb[36].mxu1 }
 0x25d   :  { %v3039_v61 = vpop.f32.mrb[36].mxu0  ;;  %v2463_v62 = vpop.f32.mrb[37].mxu1 }
 0x25e   :  { %v6369_v4 = vadd.f32 %v3039_v61, %v2461_v60  ;;  %v3041_v5 = vpop.f32.mrb[37].mxu0  ;;  %v2464_v7 = vpop.f32.mrb[38].mxu1  ;;  %v3367_v60 = vadd.f32 %v3366_v50, %v3304_v44  ;;  %v3305_v61 = vmul.f32 %v6336_v11, %v6336_v11 }
 0x25f   :  { %v3042_v8 = vpop.f32.mrb[38].mxu0  ;;  %v2466_v9 = vpop.f32.mrb[39].mxu1  ;;  %v3306_v5 = vmul.f32 %v6346_v22, %v6346_v22 }
 0x260   :  { %v6374_v14 = vadd.f32 %v3042_v8, %v2464_v7  ;;  %v3044_v15 = vpop.f32.mrb[39].mxu0  ;;  %v3368_v7 = vadd.f32 %v3367_v60, %v3305_v61  ;;  %v3235_v8 = vadd.f32 %v6346_v22, %v3234_v2  ;;  %v3310_v42 = vmul.f32 %v6369_v4, %v6369_v4 }
 0x262   :  { %v3369_v15 = vadd.f32 %v3368_v7, %v3306_v5  ;;  %v3311_v60 = vmul.f32 %v6374_v14, %v6374_v14 }
 0x264   :  { %v2469_v20 = vpop.f32.mrb[40].mxu1 }
 0x265   :  { %v3047_v23 = vpop.f32.mrb[40].mxu0  ;;  %v2471_v24 = vpop.f32.mrb[41].mxu1 }
 0x266   :  { %v6382_v27 = vadd.f32 %v3047_v23, %v2469_v20  ;;  %v3049_v28 = vpop.f32.mrb[41].mxu0  ;;  %v2472_v30 = vpop.f32.mrb[42].mxu1  ;;  %v3236_v24 = vadd.f32 %v6349_v29, %v3235_v8 }
 0x267   :  { %v3050_v32 = vpop.f32.mrb[42].mxu0  ;;  %v2474_v33 = vpop.f32.mrb[43].mxu1 }
 0x268   :  { %v6385_v36 = vadd.f32 %v3050_v32, %v2472_v30  ;;  %v3052_v37 = vpop.f32.mrb[43].mxu0  ;;  %v3370_v30 = vadd.f32 %v3369_v15, %v3307_v16  ;;  %v3237_v32 = vadd.f32 %v6357_v43, %v3236_v24 }
 0x26a   :  { %v3371_v33 = vadd.f32 %v3370_v30, %v3308_v25  ;;  %v3238_v40 = vadd.f32 %v6361_v52, %v3237_v32 }
 0x26c   :  { %v2477_v45 = vpop.f32.mrb[44].mxu1  ;;  %v3372_v51 = vadd.f32 %v3371_v33, %v3309_v34 }
 0x26d   :  { %v3055_v47 = vpop.f32.mrb[44].mxu0  ;;  %v2479_v48 = vpop.f32.mrb[45].mxu1 }
 0x26e   :  { %v6393_v54 = vadd.f32 %v3055_v47, %v2477_v45  ;;  %v3057_v55 = vpop.f32.mrb[45].mxu0  ;;  %v2480_v56 = vpop.f32.mrb[46].mxu1 }
 0x26f   :  { %v3058_v57 = vpop.f32.mrb[46].mxu0  ;;  %v2482_v59 = vpop.f32.mrb[47].mxu1  ;;  %v3239_v55 = vadd.f32 %v6369_v4, %v3238_v40 }
 0x270   :  { %v6397_v62 = vadd.f32 %v3058_v57, %v2480_v56  ;;  %v3060_v1 = vpop.f32.mrb[47].mxu0  ;;  %v3373_v59 = vadd.f32 %v3372_v51, %v3310_v42 }
 0x271   :  { %v3240_v61 = vadd.f32 %v6374_v14, %v3239_v55  ;;  %v3312_v1 = vmul.f32 %v6382_v27, %v6382_v27 }
 0x272   :  { %v3374_v8 = vadd.f32 %v3373_v59, %v3311_v60 }
 0x274   :  { %v2485_v9 = vpop.f32.mrb[48].mxu1 }
 0x275   :  { %v3063_v10 = vpop.f32.mrb[48].mxu0  ;;  %v2487_v12 = vpop.f32.mrb[49].mxu1 }
 0x276   :  { %v6405_v17 = vadd.f32 %v3063_v10, %v2485_v9  ;;  %v3065_v18 = vpop.f32.mrb[49].mxu0  ;;  %v2488_v19 = vpop.f32.mrb[50].mxu1  ;;  %v3241_v9 = vadd.f32 %v6382_v27, %v3240_v61 }
 0x277   :  { %v3066_v20 = vpop.f32.mrb[50].mxu0  ;;  %v2490_v23 = vpop.f32.mrb[51].mxu1 }
 0x278   :  { %v6410_v26 = vadd.f32 %v3066_v20, %v2488_v19  ;;  %v3068_v28 = vpop.f32.mrb[51].mxu0  ;;  %v3375_v19 = vadd.f32 %v3374_v8, %v3312_v1  ;;  %v3313_v20 = vmul.f32 %v6385_v36, %v6385_v36  ;;  %v3242_v25 = vadd.f32 %v6385_v36, %v3241_v9 }
 0x279   :  { %v3314_v28 = vmul.f32 %v6393_v54, %v6393_v54  ;;  %v3316_v51 = vmul.f32 %v6405_v17, %v6405_v17 }
 0x27a   :  { %v3376_v30 = vadd.f32 %v3375_v19, %v3313_v20  ;;  %v3243_v32 = vadd.f32 %v6393_v54, %v3242_v25  ;;  %v3317_v1 = vmul.f32 %v6410_v26, %v6410_v26 }
 0x27c   :  { %v2493_v35 = vpop.f32.mrb[52].mxu1 }
 0x27d   :  { %v3071_v37 = vpop.f32.mrb[52].mxu0  ;;  %v2495_v38 = vpop.f32.mrb[53].mxu1 }
 0x27e   :  { %v6418_v44 = vadd.f32 %v3071_v37, %v2493_v35  ;;  %v3073_v45 = vpop.f32.mrb[53].mxu0  ;;  %v2496_v47 = vpop.f32.mrb[54].mxu1  ;;  %v3377_v37 = vadd.f32 %v3376_v30, %v3314_v28  ;;  %v3315_v38 = vmul.f32 %v6397_v62, %v6397_v62 }
 0x27f   :  { %v3074_v48 = vpop.f32.mrb[54].mxu0  ;;  %v2498_v50 = vpop.f32.mrb[55].mxu1 }
 0x280   :  { %v6421_v56 = vadd.f32 %v3074_v48, %v2496_v47  ;;  %v3076_v57 = vpop.f32.mrb[55].mxu0  ;;  %v3244_v50 = vadd.f32 %v6397_v62, %v3243_v32  ;;  %v3378_v59 = vadd.f32 %v3377_v37, %v3315_v38  ;;  %v3318_v9 = vmul.f32 %v6418_v44, %v6418_v44 }
 0x282   :  { %v3245_v60 = vadd.f32 %v6405_v17, %v3244_v50  ;;  %v3379_v61 = vadd.f32 %v3378_v59, %v3316_v51  ;;  %v3319_v32 = vmul.f32 %v6421_v56, %v6421_v56 }
 0x284   :  { %v2501_v2 = vpop.f32.mrb[56].mxu1  ;;  %v3246_v8 = vadd.f32 %v6410_v26, %v3245_v60  ;;  %v3380_v20 = vadd.f32 %v3379_v61, %v3317_v1 }
 0x285   :  { %v3079_v5 = vpop.f32.mrb[56].mxu0  ;;  %v2503_v7 = vpop.f32.mrb[57].mxu1 }
 0x286   :  { %v6429_v10 = vadd.f32 %v3079_v5, %v2501_v2  ;;  %v3081_v12 = vpop.f32.mrb[57].mxu0  ;;  %v2504_v15 = vpop.f32.mrb[58].mxu1  ;;  %v3381_v30 = vadd.f32 %v3380_v20, %v3318_v9 }
 0x287   :  { %v3082_v16 = vpop.f32.mrb[58].mxu0  ;;  %v2506_v18 = vpop.f32.mrb[59].mxu1 }
 0x288   :  { %v6433_v23 = vadd.f32 %v3082_v16, %v2504_v15  ;;  %v3084_v24 = vpop.f32.mrb[59].mxu0 }
 0x289   :  { %v3247_v24 = vadd.f32 %v6418_v44, %v3246_v8 }
 0x28a   :  { %v3321_v60 = vmul.f32 %v6433_v23, %v6433_v23 }
 0x28c   :  { %v2509_v33 = vpop.f32.mrb[60].mxu1 }
 0x28d   :  { %v3087_v34 = vpop.f32.mrb[60].mxu0  ;;  %v2511_v35 = vpop.f32.mrb[61].mxu1 }
 0x28e   :  { %v6441_v40 = vadd.f32 %v3087_v34, %v2509_v33  ;;  %v3089_v42 = vpop.f32.mrb[61].mxu0  ;;  %v2512_v45 = vpop.f32.mrb[62].mxu1  ;;  %v3248_v33 = vadd.f32 %v6421_v56, %v3247_v24  ;;  %v3320_v34 = vmul.f32 %v6429_v10, %v6429_v10 }
 0x28f   :  { %v3090_v47 = vpop.f32.mrb[62].mxu0  ;;  %v2514_v48 = vpop.f32.mrb[63].mxu1  ;;  %v3382_v42 = vadd.f32 %v3381_v30, %v3319_v32 }
 0x290   :  { %8335 = vst [vmem:[#allocation2_spill] sm:$0xff] %v6441_v40  ;;  %v6446_v55 = vadd.f32 %v3090_v47, %v2512_v45  ;;  %v3092_v57 = vpop.f32.mrb[63].mxu0  ;;  %v3249_v45 = vadd.f32 %v6429_v10, %v3248_v33 }
 0x291   :  { %v3383_v59 = vadd.f32 %v3382_v42, %v3320_v34 }
 0x292   :  { %8336 = vst [vmem:[#allocation3_spill] sm:$0xff] %v6446_v55 }
 0x294   :  { %v2517_v2 = vpop.f32.mrb[64].mxu1 }
 0x295   :  { %v3095_v5 = vpop.f32.mrb[64].mxu0  ;;  %v2519_v7 = vpop.f32.mrb[65].mxu1 }
 0x296   :  { %v6454_v12 = vadd.f32 %v3095_v5, %v2517_v2  ;;  %v3097_v15 = vpop.f32.mrb[65].mxu0  ;;  %v2520_v16 = vpop.f32.mrb[66].mxu1  ;;  %v3250_v2 = vadd.f32 %v6433_v23, %v3249_v45  ;;  %v3322_v5 = vmul.f32 %v6441_v40, %v6441_v40  ;;  %v3384_v7 = vadd.f32 %v3383_v59, %v3321_v60 }
 0x297   :  { %v3098_v18 = vpop.f32.mrb[66].mxu0  ;;  %v2522_v19 = vpop.f32.mrb[67].mxu1 }
 0x298   :  { %8337 = vst [vmem:[#allocation4_spill] sm:$0xff] %v6454_v12  ;;  %v6457_v25 = vadd.f32 %v3098_v18, %v2520_v16  ;;  %v3100_v28 = vpop.f32.mrb[67].mxu0  ;;  %v3251_v8 = vadd.f32 %v6441_v40, %v3250_v2  ;;  %v3385_v18 = vadd.f32 %v3384_v7, %v3322_v5  ;;  %v3323_v19 = vmul.f32 %v6446_v55, %v6446_v55 }
 0x299   :  { %v3324_v34 = vmul.f32 %v6454_v12, %v6454_v12 }
 0x29a   :  { %8338 = vst [vmem:[#allocation5_spill] sm:$0xff] %v6457_v25  ;;  %v3252_v33 = vadd.f32 %v6446_v55, %v3251_v8 }
 0x29c   :  { %v2525_v35 = vpop.f32.mrb[68].mxu1  ;;  %v3253_v42 = vadd.f32 %v6454_v12, %v3252_v33 }
 0x29d   :  { %v3103_v37 = vpop.f32.mrb[68].mxu0  ;;  %v2527_v38 = vpop.f32.mrb[69].mxu1 }
 0x29e   :  { %v6465_v47 = vadd.f32 %v3103_v37, %v2525_v35  ;;  %v3105_v48 = vpop.f32.mrb[69].mxu0  ;;  %v2528_v50 = vpop.f32.mrb[70].mxu1  ;;  %v3386_v38 = vadd.f32 %v3385_v18, %v3323_v19  ;;  %v3254_v59 = vadd.f32 %v6457_v25, %v3253_v42 }
 0x29f   :  { %v3106_v51 = vpop.f32.mrb[70].mxu0  ;;  %v2530_v57 = vpop.f32.mrb[71].mxu1  ;;  %v3325_v48 = vmul.f32 %v6457_v25, %v6457_v25 }
 0x2a0   :  { %8339 = vst [vmem:[#allocation6_spill] sm:$0xff] %v6465_v47  ;;  %v6469_v61 = vadd.f32 %v3106_v51, %v2528_v50  ;;  %v3108_v1 = vpop.f32.mrb[71].mxu0  ;;  %v3387_v45 = vadd.f32 %v3386_v38, %v3324_v34  ;;  %v3326_v60 = vmul.f32 %v6465_v47, %v6465_v47 }
 0x2a2   :  { %8340 = vst [vmem:[#allocation7_spill] sm:$0xff] %v6469_v61 }
 0x2a4   :  { %v2533_v9 = vpop.f32.mrb[72].mxu1 }
 0x2a5   :  { %v3111_v15 = vpop.f32.mrb[72].mxu0  ;;  %v2535_v16 = vpop.f32.mrb[73].mxu1 }
 0x2a6   :  { %v6477_v20 = vadd.f32 %v3111_v15, %v2533_v9  ;;  %v3113_v24 = vpop.f32.mrb[73].mxu0  ;;  %v2536_v28 = vpop.f32.mrb[74].mxu1  ;;  %v3388_v9 = vadd.f32 %v3387_v45, %v3325_v48  ;;  %v3255_v15 = vadd.f32 %v6465_v47, %v3254_v59 }
 0x2a7   :  { %v3114_v30 = vpop.f32.mrb[74].mxu0  ;;  %v2538_v32 = vpop.f32.mrb[75].mxu1  ;;  %v3327_v24 = vmul.f32 %v6469_v61, %v6469_v61 }
 0x2a8   :  { %8341 = vst [vmem:[#allocation8_spill] sm:$0xff] %v6477_v20  ;;  %v6482_v35 = vadd.f32 %v3114_v30, %v2536_v28  ;;  %v3116_v37 = vpop.f32.mrb[75].mxu0  ;;  %v3389_v19 = vadd.f32 %v3388_v9, %v3326_v60  ;;  %v3256_v28 = vadd.f32 %v6469_v61, %v3255_v15  ;;  %v3328_v30 = vmul.f32 %v6477_v20, %v6477_v20 }
 0x2aa   :  { %8342 = vst [vmem:[#allocation9_spill] sm:$0xff] %v6482_v35  ;;  %v3390_v37 = vadd.f32 %v3389_v19, %v3327_v24  ;;  %v3257_v38 = vadd.f32 %v6477_v20, %v3256_v28  ;;  %v3329_v59 = vmul.f32 %v6482_v35, %v6482_v35 }
 0x2ac   :  { %v2541_v50 = vpop.f32.mrb[76].mxu1 }
 0x2ad   :  { %v3119_v51 = vpop.f32.mrb[76].mxu0  ;;  %v2543_v57 = vpop.f32.mrb[77].mxu1 }
 0x2ae   :  { %v6490_v1 = vadd.f32 %v3119_v51, %v2541_v50  ;;  %v3121_v2 = vpop.f32.mrb[77].mxu0  ;;  %v2544_v5 = vpop.f32.mrb[78].mxu1  ;;  %v3391_v57 = vadd.f32 %v3390_v37, %v3328_v30 }
 0x2af   :  { %v3122_v7 = vpop.f32.mrb[78].mxu0  ;;  %v2546_v8 = vpop.f32.mrb[79].mxu1 }
 0x2b0   :  { %8343 = vst [vmem:[#allocation10_spill] sm:$0xff] %v6490_v1  ;;  %v6493_v16 = vadd.f32 %v3122_v7, %v2544_v5  ;;  %v3124_v18 = vpop.f32.mrb[79].mxu0  ;;  %v3258_v5 = vadd.f32 %v6482_v35, %v3257_v38  ;;  %v3330_v7 = vmul.f32 %v6490_v1, %v6490_v1  ;;  %v3392_v8 = vadd.f32 %v3391_v57, %v3329_v59 }
 0x2b2   :  { %8344 = vst [vmem:[#allocation11_spill] sm:$0xff] %v6493_v16  ;;  %v3259_v9 = vadd.f32 %v6490_v1, %v3258_v5  ;;  %v3393_v24 = vadd.f32 %v3392_v8, %v3330_v7  ;;  %v3331_v28 = vmul.f32 %v6493_v16, %v6493_v16 }
 0x2b4   :  { %v2549_v32 = vpop.f32.mrb[80].mxu1  ;;  %v3260_v38 = vadd.f32 %v6493_v16, %v3259_v9 }
 0x2b5   :  { %v3127_v33 = vpop.f32.mrb[80].mxu0  ;;  %v2551_v34 = vpop.f32.mrb[81].mxu1 }
 0x2b6   :  { %v6501_v42 = vadd.f32 %v3127_v33, %v2549_v32  ;;  %v3129_v45 = vpop.f32.mrb[81].mxu0  ;;  %v2552_v48 = vpop.f32.mrb[82].mxu1 }
 0x2b7   :  { %v3130_v50 = vpop.f32.mrb[82].mxu0  ;;  %v2554_v51 = vpop.f32.mrb[83].mxu1 }
 0x2b8   :  { %8345 = vst [vmem:[#allocation12_spill] sm:$0xff] %v6501_v42  ;;  %v6505_v60 = vadd.f32 %v3130_v50, %v2552_v48  ;;  %v3132_v2 = vpop.f32.mrb[83].mxu0  ;;  %v3332_v45 = vmul.f32 %v6501_v42, %v6501_v42  ;;  %v3394_v51 = vadd.f32 %v3393_v24, %v3331_v28  ;;  %v3261_v57 = vadd.f32 %v6501_v42, %v3260_v38 }
 0x2ba   :  { %8346 = vst [vmem:[#allocation13_spill] sm:$0xff] %v6505_v60  ;;  %v3395_v59 = vadd.f32 %v3394_v51, %v3332_v45  ;;  %v3333_v2 = vmul.f32 %v6505_v60, %v6505_v60 }
 0x2bc   :  { %v2557_v15 = vpop.f32.mrb[84].mxu1  ;;  %v3396_v28 = vadd.f32 %v3395_v59, %v3333_v2 }
 0x2bd   :  { %v3135_v18 = vpop.f32.mrb[84].mxu0  ;;  %v2559_v19 = vpop.f32.mrb[85].mxu1 }
 0x2be   :  { %v6513_v30 = vadd.f32 %v3135_v18, %v2557_v15  ;;  %v3137_v32 = vpop.f32.mrb[85].mxu0  ;;  %v2560_v33 = vpop.f32.mrb[86].mxu1  ;;  %v3262_v15 = vadd.f32 %v6505_v60, %v3261_v57 }
 0x2bf   :  { %v3138_v34 = vpop.f32.mrb[86].mxu0  ;;  %v2562_v37 = vpop.f32.mrb[87].mxu1 }
 0x2c0   :  { %8347 = vst [vmem:[#allocation14_spill] sm:$0xff] %v6513_v30  ;;  %v6518_v48 = vadd.f32 %v3138_v34, %v2560_v33  ;;  %v3140_v50 = vpop.f32.mrb[87].mxu0  ;;  %v3334_v9 = vmul.f32 %v6513_v30, %v6513_v30  ;;  %v3263_v34 = vadd.f32 %v6513_v30, %v3262_v15 }
 0x2c2   :  { %8348 = vst [vmem:[#allocation15_spill] sm:$0xff] %v6518_v48  ;;  %v3397_v45 = vadd.f32 %v3396_v28, %v3334_v9  ;;  %v3335_v50 = vmul.f32 %v6518_v48, %v6518_v48  ;;  %v3264_v51 = vadd.f32 %v6518_v48, %v3263_v34 }
 0x2c4   :  { %v2565_v5 = vpop.f32.mrb[88].mxu1 }
 0x2c5   :  { %v3143_v7 = vpop.f32.mrb[88].mxu0  ;;  %v2567_v8 = vpop.f32.mrb[89].mxu1 }
 0x2c6   :  { %v6526_v18 = vadd.f32 %v3143_v7, %v2565_v5  ;;  %v3145_v19 = vpop.f32.mrb[89].mxu0  ;;  %v2568_v32 = vpop.f32.mrb[90].mxu1 }
 0x2c7   :  { %v3146_v33 = vpop.f32.mrb[90].mxu0  ;;  %v2570_v24 = vpop.f32.mrb[91].mxu1  ;;  %v3398_v19 = vadd.f32 %v3397_v45, %v3335_v50 }
 0x2c8   :  { %8349 = vst [vmem:[#allocation16_spill] sm:$0xff] %v6526_v18  ;;  %v6529_v37 = vadd.f32 %v3146_v33, %v2568_v32  ;;  %v3148_v38 = vpop.f32.mrb[91].mxu0  ;;  %v3336_v57 = vmul.f32 %v6526_v18, %v6526_v18  ;;  %v3265_v59 = vadd.f32 %v6526_v18, %v3264_v51 }
 0x2ca   :  { %8350 = vst [vmem:[#allocation17_spill] sm:$0xff] %v6529_v37  ;;  %v3399_v24 = vadd.f32 %v3398_v19, %v3336_v57  ;;  %v3337_v28 = vmul.f32 %v6529_v37, %v6529_v37  ;;  %v3266_v48 = vadd.f32 %v6529_v37, %v3265_v59 }
 0x2cc   :  { %v2573_v5 = vpop.f32.mrb[92].mxu1  ;;  %v3400_v50 = vadd.f32 %v3399_v24, %v3337_v28 }
 0x2cd   :  { %v3151_v7 = vpop.f32.mrb[92].mxu0  ;;  %v2575_v8 = vpop.f32.mrb[93].mxu1 }
 0x2ce   :  { %v6537_v2 = vadd.f32 %v3151_v7, %v2573_v5  ;;  %v3153_v15 = vpop.f32.mrb[93].mxu0  ;;  %v2576_v32 = vpop.f32.mrb[94].mxu1 }
 0x2cf   :  { %v3154_v33 = vpop.f32.mrb[94].mxu0  ;;  %v2578_v9 = vpop.f32.mrb[95].mxu1 }
 0x2d0   :  { %8351 = vst [vmem:[#allocation18_spill] sm:$0xff] %v6537_v2  ;;  %v6541_v34 = vadd.f32 %v3154_v33, %v2576_v32  ;;  %v3156_v38 = vpop.f32.mrb[95].mxu0  ;;  %v3338_v45 = vmul.f32 %v6537_v2, %v6537_v2  ;;  %v3267_v51 = vadd.f32 %v6537_v2, %v3266_v48 }
 0x2d2   :  { %8352 = vst [vmem:[#allocation19_spill] sm:$0xff] %v6541_v34  ;;  %v3401_v15 = vadd.f32 %v3400_v50, %v3338_v45  ;;  %v3339_v57 = vmul.f32 %v6541_v34, %v6541_v34  ;;  %v3268_v59 = vadd.f32 %v6541_v34, %v3267_v51 }
 0x2d4   :  { %v2581_v5 = vpop.f32.mrb[96].mxu1  ;;  %v3402_v2 = vadd.f32 %v3401_v15, %v3339_v57 }
 0x2d5   :  { %v3159_v7 = vpop.f32.mrb[96].mxu0  ;;  %v2583_v8 = vpop.f32.mrb[97].mxu1 }
 0x2d6   :  { %v6549_v19 = vadd.f32 %v3159_v7, %v2581_v5  ;;  %v3161_v32 = vpop.f32.mrb[97].mxu0  ;;  %v2584_v33 = vpop.f32.mrb[98].mxu1 }
 0x2d7   :  { %v3162_v9 = vpop.f32.mrb[98].mxu0  ;;  %v2586_v38 = vpop.f32.mrb[99].mxu1 }
 0x2d8   :  { %8353 = vst [vmem:[#allocation20_spill] sm:$0xff] %v6549_v19  ;;  %v3340_v24 = vmul.f32 %v6549_v19, %v6549_v19  ;;  %v6554_v28 = vadd.f32 %v3162_v9, %v2584_v33  ;;  %v3164_v48 = vpop.f32.mrb[99].mxu0  ;;  %v3269_v45 = vadd.f32 %v6549_v19, %v3268_v59 }
 0x2da   :  { %8354 = vst [vmem:[#allocation21_spill] sm:$0xff] %v6554_v28  ;;  %v3403_v50 = vadd.f32 %v3402_v2, %v3340_v24  ;;  %v3341_v5 = vmul.f32 %v6554_v28, %v6554_v28  ;;  %v3270_v38 = vadd.f32 %v6554_v28, %v3269_v45 }
 0x2dc   :  { %v2589_v7 = vpop.f32.mrb[100].mxu1  ;;  %v3404_v9 = vadd.f32 %v3403_v50, %v3341_v5 }
 0x2dd   :  { %v3167_v8 = vpop.f32.mrb[100].mxu0  ;;  %v2591_v32 = vpop.f32.mrb[101].mxu1 }
 0x2de   :  { %v6560_v37 = vadd.f32 %v3167_v8, %v2589_v7  ;;  %v3169_v51 = vpop.f32.mrb[101].mxu0  ;;  %v2592_v34 = vpop.f32.mrb[102].mxu1 }
 0x2df   :  { %v3170_v18 = vpop.f32.mrb[102].mxu0  ;;  %v2594_v33 = vpop.f32.mrb[103].mxu1 }
 0x2e0   :  { %v3271_v15 = vadd.f32 %v6560_v37, %v3270_v38  ;;  %v3342_v2 = vmul.f32 %v6560_v37, %v6560_v37  ;;  %v6565_v57 = vadd.f32 %v3170_v18, %v2592_v34  ;;  %v3172_v59 = vpop.f32.mrb[103].mxu0 }
 0x2e2   :  { %v3405_v24 = vadd.f32 %v3404_v9, %v3342_v2  ;;  %v3272_v48 = vadd.f32 %v6565_v57, %v3271_v15  ;;  %v3343_v45 = vmul.f32 %v6565_v57, %v6565_v57 }
 0x2e4   :  { %v3406_v7 = vadd.f32 %v3405_v24, %v3343_v45  ;;  %v2597_v8 = vpop.f32.mrb[104].mxu1 }
 0x2e5   :  { %v3175_v32 = vpop.f32.mrb[104].mxu0  ;;  %v2599_v51 = vpop.f32.mrb[105].mxu1 }
 0x2e6   :  { %v6570_v33 = vadd.f32 %v3175_v32, %v2597_v8  ;;  %v3177_v50 = vpop.f32.mrb[105].mxu0  ;;  %v2600_v5 = vpop.f32.mrb[106].mxu1 }
 0x2e7   :  { %v3178_v38 = vpop.f32.mrb[106].mxu0  ;;  %v2602_v28 = vpop.f32.mrb[107].mxu1 }
 0x2e8   :  { %v3273_v18 = vadd.f32 %v6570_v33, %v3272_v48  ;;  %v3344_v34 = vmul.f32 %v6570_v33, %v6570_v33  ;;  %v6575_v9 = vadd.f32 %v3178_v38, %v2600_v5  ;;  %v3180_v15 = vpop.f32.mrb[107].mxu0 }
 0x2ea   :  { %v3407_v2 = vadd.f32 %v3406_v7, %v3344_v34  ;;  %v3274_v59 = vadd.f32 %v6575_v9, %v3273_v18  ;;  %v3345_v24 = vmul.f32 %v6575_v9, %v6575_v9 }
 0x2ec   :  { %v3408_v45 = vadd.f32 %v3407_v2, %v3345_v24  ;;  %v2605_v8 = vpop.f32.mrb[108].mxu1 }
 0x2ed   :  { %v3183_v32 = vpop.f32.mrb[108].mxu0  ;;  %v2607_v51 = vpop.f32.mrb[109].mxu1 }
 0x2ee   :  { %v6580_v50 = vadd.f32 %v3183_v32, %v2605_v8  ;;  %v3185_v28 = vpop.f32.mrb[109].mxu0  ;;  %v2608_v48 = vpop.f32.mrb[110].mxu1 }
 0x2ef   :  { %v3186_v19 = vpop.f32.mrb[110].mxu0  ;;  %v2610_v30 = vpop.f32.mrb[111].mxu1 }
 0x2f0   :  { %v3275_v5 = vadd.f32 %v6580_v50, %v3274_v59  ;;  %v3346_v7 = vmul.f32 %v6580_v50, %v6580_v50  ;;  %v6585_v38 = vadd.f32 %v3186_v19, %v2608_v48  ;;  %v3188_v18 = vpop.f32.mrb[111].mxu0 }
 0x2f2   :  { %8355 = vst [vmem:[#allocation22_spill] sm:$0xff] %v6585_v38  ;;  %v3409_v34 = vadd.f32 %v3408_v45, %v3346_v7  ;;  %v3276_v15 = vadd.f32 %v6585_v38, %v3275_v5  ;;  %v3347_v2 = vmul.f32 %v6585_v38, %v6585_v38 }
 0x2f4   :  { %v3410_v24 = vadd.f32 %v3409_v34, %v3347_v2  ;;  %v2613_v8 = vpop.f32.mrb[112].mxu1 }
 0x2f5   :  { %v3191_v32 = vpop.f32.mrb[112].mxu0  ;;  %v2615_v51 = vpop.f32.mrb[113].mxu1 }
 0x2f6   :  { %v6590_v28 = vadd.f32 %v3191_v32, %v2613_v8  ;;  %v3193_v30 = vpop.f32.mrb[113].mxu0  ;;  %v2616_v59 = vpop.f32.mrb[114].mxu1 }
 0x2f7   :  { %v3194_v60 = vpop.f32.mrb[114].mxu0  ;;  %v2618_v42 = vpop.f32.mrb[115].mxu1 }
 0x2f8   :  { %8356 = vst [vmem:[#allocation23_spill] sm:$0xff] %v6590_v28  ;;  %v3277_v19 = vadd.f32 %v6590_v28, %v3276_v15  ;;  %v3348_v45 = vmul.f32 %v6590_v28, %v6590_v28  ;;  %v6595_v48 = vadd.f32 %v3194_v60, %v2616_v59  ;;  %v3196_v5 = vpop.f32.mrb[115].mxu0  ;;  %v8383_v28 = vld [vmem:[#allocation21_spill] sm:$0xff] }
 0x2fa   :  { %8357 = vst [vmem:[#allocation24_spill] sm:$0xff] %v6595_v48  ;;  %v3411_v7 = vadd.f32 %v3410_v24, %v3348_v45  ;;  %v3278_v18 = vadd.f32 %v6595_v48, %v3277_v19  ;;  %v3349_v34 = vmul.f32 %v6595_v48, %v6595_v48  ;;  %v8382_v48 = vld [vmem:[#allocation20_spill] sm:$0xff] }
 0x2fc   :  { %v3412_v2 = vadd.f32 %v3411_v7, %v3349_v34  ;;  %v2621_v8 = vpop.f32.mrb[116].mxu1 }
 0x2fd   :  { %v3199_v32 = vpop.f32.mrb[116].mxu0  ;;  %v2623_v51 = vpop.f32.mrb[117].mxu1 }
 0x2fe   :  { %v6600_v30 = vadd.f32 %v3199_v32, %v2621_v8  ;;  %v3201_v42 = vpop.f32.mrb[117].mxu0  ;;  %v2624_v15 = vpop.f32.mrb[118].mxu1 }
 0x2ff   :  { %v3202_v16 = vpop.f32.mrb[118].mxu0  ;;  %v2626_v1 = vpop.f32.mrb[119].mxu1 }
 0x300   :  { %8358 = vst [vmem:[#allocation25_spill] sm:$0xff] %v6600_v30  ;;  %v3279_v60 = vadd.f32 %v6600_v30, %v3278_v18  ;;  %v3350_v24 = vmul.f32 %v6600_v30, %v6600_v30  ;;  %v6605_v59 = vadd.f32 %v3202_v16, %v2624_v15  ;;  %v3204_v19 = vpop.f32.mrb[119].mxu0  ;;  %v8381_v30 = vld [vmem:[#allocation19_spill] sm:$0xff] }
 0x302   :  { %8359 = vst [vmem:[#allocation26_spill] sm:$0xff] %v6605_v59  ;;  %v3413_v45 = vadd.f32 %v3412_v2, %v3350_v24  ;;  %v3280_v5 = vadd.f32 %v6605_v59, %v3279_v60  ;;  %v3351_v7 = vmul.f32 %v6605_v59, %v6605_v59 }
 0x304   :  { %v3414_v34 = vadd.f32 %v3413_v45, %v3351_v7  ;;  %v2629_v8 = vpop.f32.mrb[120].mxu1 }
 0x305   :  { %v3207_v32 = vpop.f32.mrb[120].mxu0  ;;  %v2631_v51 = vpop.f32.mrb[121].mxu1 }
 0x306   :  { %v6610_v42 = vadd.f32 %v3207_v32, %v2629_v8  ;;  %v3209_v1 = vpop.f32.mrb[121].mxu0  ;;  %v2632_v18 = vpop.f32.mrb[122].mxu1 }
 0x307   :  { %v3210_v35 = vpop.f32.mrb[122].mxu0  ;;  %v2634_v20 = vpop.f32.mrb[123].mxu1 }
 0x308   :  { %8360 = vst [vmem:[#allocation27_spill] sm:$0xff] %v6610_v42  ;;  %v3281_v16 = vadd.f32 %v6610_v42, %v3280_v5  ;;  %v3352_v2 = vmul.f32 %v6610_v42, %v6610_v42  ;;  %v6615_v15 = vadd.f32 %v3210_v35, %v2632_v18  ;;  %v3212_v60 = vpop.f32.mrb[123].mxu0 }
 0x30a   :  { %8361 = vst [vmem:[#allocation28_spill] sm:$0xff] %v6615_v15  ;;  %v3415_v24 = vadd.f32 %v3414_v34, %v3352_v2  ;;  %v3282_v19 = vadd.f32 %v6615_v15, %v3281_v16  ;;  %v3353_v45 = vmul.f32 %v6615_v15, %v6615_v15 }
 0x30c   :  { %v3416_v7 = vadd.f32 %v3415_v24, %v3353_v45  ;;  %v2637_v8 = vpop.f32.mrb[124].mxu1 }
 0x30d   :  { %v3215_v32 = vpop.f32.mrb[124].mxu0  ;;  %v2639_v51 = vpop.f32.mrb[125].mxu1 }
 0x30e   :  { %v6620_v1 = vadd.f32 %v3215_v32, %v2637_v8  ;;  %v3217_v20 = vpop.f32.mrb[125].mxu0  ;;  %v2640_v5 = vpop.f32.mrb[126].mxu1 }
 0x30f   :  { %v3218_v61 = vpop.f32.mrb[126].mxu0  ;;  %v2642_v47 = vpop.f32.mrb[127].mxu1 }
 0x310   :  { %8362 = vst [vmem:[#allocation29_spill] sm:$0xff] %v6620_v1  ;;  %v3283_v35 = vadd.f32 %v6620_v1, %v3282_v19  ;;  %v3354_v34 = vmul.f32 %v6620_v1, %v6620_v1  ;;  %v6625_v18 = vadd.f32 %v3218_v61, %v2640_v5  ;;  %v3220_v16 = vpop.f32.mrb[127].mxu0 }
 0x312   :  { %8363 = vst [vmem:[#allocation30_spill] sm:$0xff] %v6625_v18  ;;  %v3417_v2 = vadd.f32 %v3416_v7, %v3354_v34  ;;  %v3284_v60 = vadd.f32 %v6625_v18, %v3283_v35  ;;  %v3355_v24 = vmul.f32 %v6625_v18, %v6625_v18 }
 0x314   :  { %v3285_v45 = vrot.slane %v3284_v60, 4  ;;  %v3418_v8 = vadd.f32 %v3417_v2, %v3355_v24 }
 0x316   :  { %v3286_v32 = vadd.f32 %v3285_v45, %v3284_v60  ;;  %v3419_v51 = vrot.slane %v3418_v8, 4 }
 0x318   :  { %v3287_v20 = vrot.slane %v3286_v32, 2  ;;  %v3420_v47 = vadd.f32 %v3419_v51, %v3418_v8 }
 0x31a   :  { %v3288_v25 = vadd.f32 %v3287_v20, %v3286_v32  ;;  %v3421_v19 = vrot.slane %v3420_v47, 2 }
 0x31c   :  { %v3289_v12 = vrot.slane %v3288_v25, 1  ;;  %v3422_v55 = vadd.f32 %v3421_v19, %v3420_v47 }
 0x31e   :  { %v3290_v40 = vadd.f32 %v3289_v12, %v3288_v25  ;;  %v3423_v61 = vrot.slane %v3422_v55, 1 }
 0x320   :  { %v6630_v5 = vmul.f32 0.001953125, %v3290_v40  ;;  %v3424_v7 = vadd.f32 %v3423_v61, %v3422_v55 }
 0x322   :  { %v3425_v34 = vmul.f32 0.001953125, %v3424_v7  ;;  %v3426_v35 = vmul.f32 %v6630_v5, %v6630_v5  ;;  %v3431_v51 = vsub.f32 %v6292_v3, %v6630_v5  ;;  %v3432_v20 = vsub.f32 %v6306_v13, %v6630_v5 }
 0x323   :  { %v3433_v47 = vsub.f32 %v6308_v21, %v6630_v5  ;;  %v3434_v19 = vsub.f32 %v6322_v31, %v6630_v5  ;;  %v3435_v61 = vsub.f32 %v6324_v39, %v6630_v5  ;;  %v3436_v7 = vsub.f32 %v6326_v46, %v6630_v5 }
 0x324   :  { %v3427_v16 = vsub.f32 %v3425_v34, %v3426_v35  ;;  %v3438_v3 = vsub.f32 %v6330_v0, %v6630_v5  ;;  %v3439_v13 = vsub.f32 %v6332_v63, %v6630_v5  ;;  %v3440_v21 = vsub.f32 %v6334_v6, %v6630_v5 }
 0x325   :  { %v3441_v31 = vsub.f32 %v6336_v11, %v6630_v5  ;;  %v3442_v39 = vsub.f32 %v6346_v22, %v6630_v5  ;;  %v3443_v46 = vsub.f32 %v6349_v29, %v6630_v5  ;;  %v3445_v0 = vsub.f32 %v6361_v52, %v6630_v5 }
 0x326   :  { %v3492_v35 = vadd.f32 1e-05, %v3427_v16  ;;  %v3437_v16 = vsub.f32 %v6328_v53, %v6630_v5  ;;  %v3444_v53 = vsub.f32 %v6357_v43, %v6630_v5  ;;  %v3446_v63 = vsub.f32 %v6369_v4, %v6630_v5 }
 0x327   :  { %v3447_v6 = vsub.f32 %v6374_v14, %v6630_v5  ;;  %v3448_v11 = vsub.f32 %v6382_v27, %v6630_v5  ;;  %v3449_v22 = vsub.f32 %v6385_v36, %v6630_v5  ;;  %v3450_v29 = vsub.f32 %v6393_v54, %v6630_v5 }
 0x328   :  { %5242 = vrsqrt.f32 %v3492_v35  ;;  %v3451_v43 = vsub.f32 %v6397_v62, %v6630_v5  ;;  %v3452_v52 = vsub.f32 %v6405_v17, %v6630_v5  ;;  %v3453_v4 = vsub.f32 %v6410_v26, %v6630_v5  ;;  %v8364_v62 = vld [vmem:[#allocation2_spill] sm:$0xff]  ;;  %v8365_v17 = vld [vmem:[#allocation3_spill] sm:$0xff]  ;;  %v8366_v26 = vld [vmem:[#allocation4_spill] sm:$0xff] }
 0x329   :  { %v3454_v14 = vsub.f32 %v6418_v44, %v6630_v5  ;;  %v3455_v27 = vsub.f32 %v6421_v56, %v6630_v5  ;;  %v3456_v36 = vsub.f32 %v6429_v10, %v6630_v5  ;;  %v3457_v54 = vsub.f32 %v6433_v23, %v6630_v5  ;;  %v8367_v44 = vld [vmem:[#allocation5_spill] sm:$0xff]  ;;  %v8368_v56 = vld [vmem:[#allocation6_spill] sm:$0xff]  ;;  %v8369_v10 = vld [vmem:[#allocation7_spill] sm:$0xff] }
 0x32a   :  { %v3458_v35 = vsub.f32 %v8364_v62, %v6630_v5  ;;  %v3459_v34 = vsub.f32 %v8365_v17, %v6630_v5  ;;  %v3460_v32 = vsub.f32 %v8366_v26, %v6630_v5  ;;  %v3461_v8 = vsub.f32 %v8367_v44, %v6630_v5  ;;  %v8370_v23 = vld [vmem:[#allocation8_spill] sm:$0xff]  ;;  %v8371_v62 = vld [vmem:[#allocation9_spill] sm:$0xff]  ;;  %v8372_v17 = vld [vmem:[#allocation10_spill] sm:$0xff] }
 0x32b   :  { %v3462_v45 = vsub.f32 %v8368_v56, %v6630_v5  ;;  %v3463_v25 = vsub.f32 %v8369_v10, %v6630_v5  ;;  %v3464_v55 = vsub.f32 %v8370_v23, %v6630_v5  ;;  %v3465_v40 = vsub.f32 %v8371_v62, %v6630_v5  ;;  %v8373_v26 = vld [vmem:[#allocation11_spill] sm:$0xff]  ;;  %v8374_v44 = vld [vmem:[#allocation12_spill] sm:$0xff]  ;;  %v8375_v56 = vld [vmem:[#allocation13_spill] sm:$0xff] }
 0x32c   :  { %v3466_v12 = vsub.f32 %v8372_v17, %v6630_v5  ;;  %v3467_v24 = vsub.f32 %v8373_v26, %v6630_v5  ;;  %v3468_v60 = vsub.f32 %v8374_v44, %v6630_v5  ;;  %v3469_v2 = vsub.f32 %v8375_v56, %v6630_v5  ;;  %v8376_v10 = vld [vmem:[#allocation14_spill] sm:$0xff]  ;;  %v8377_v23 = vld [vmem:[#allocation15_spill] sm:$0xff]  ;;  %v8378_v62 = vld [vmem:[#allocation16_spill] sm:$0xff] }
 0x32d   :  { %v3470_v18 = vsub.f32 %v8376_v10, %v6630_v5  ;;  %v3471_v1 = vsub.f32 %v8377_v23, %v6630_v5  ;;  %v3472_v15 = vsub.f32 %v8378_v62, %v6630_v5  ;;  %v8379_v17 = vld [vmem:[#allocation17_spill] sm:$0xff]  ;;  %v8380_v26 = vld [vmem:[#allocation18_spill] sm:$0xff]  ;;  %v3475_v56 = vsub.f32 %v8381_v30, %v6630_v5 }
 0x32e   :  { %v3473_v42 = vsub.f32 %v8379_v17, %v6630_v5  ;;  %v3474_v44 = vsub.f32 %v8380_v26, %v6630_v5  ;;  %v3476_v10 = vsub.f32 %v8382_v48, %v6630_v5  ;;  %v3477_v23 = vsub.f32 %v8383_v28, %v6630_v5 }
 0x32f   :  { %v8384_v62 = vsub.f32 %v6274_v41, %v6630_v5  ;;  %v8385_v17 = vsub.f32 %v6276_v49, %v6630_v5  ;;  %v8386_v30 = vsub.f32 %v6290_v58, %v6630_v5 }
 0x332   :  { %v6754_v59 = vpop.eup %5242 }
 0x333   :  { %v6768_v38 = vmul.f32 %v6754_v59, %v8384_v62  ;;  %v6774_v26 = vmul.f32 %v6754_v59, %v8385_v17  ;;  %v6780_v48 = vmul.f32 %v6754_v59, %v8386_v30  ;;  %v6783_v28 = vmul.f32 %v6754_v59, %v3431_v51 }
 0x334   :  { %v6786_v41 = vmul.f32 %v6754_v59, %v3432_v20  ;;  %v6789_v62 = vmul.f32 %v6754_v59, %v3433_v47  ;;  %v6792_v49 = vmul.f32 %v6754_v59, %v3434_v19  ;;  %v6795_v17 = vmul.f32 %v6754_v59, %v3435_v61 }
 0x335   :  { %v6798_v58 = vmul.f32 %v6754_v59, %v3436_v7  ;;  %v6801_v30 = vmul.f32 %v6754_v59, %v3437_v16  ;;  %v6804_v51 = vmul.f32 %v6754_v59, %v3438_v3  ;;  %v6807_v20 = vmul.f32 %v6754_v59, %v3439_v13 }
 0x336   :  { %v6810_v47 = vmul.f32 %v6754_v59, %v3440_v21  ;;  %v6813_v19 = vmul.f32 %v6754_v59, %v3441_v31  ;;  %v6816_v61 = vmul.f32 %v6754_v59, %v3442_v39  ;;  %v6819_v7 = vmul.f32 %v6754_v59, %v3443_v46 }
 0x337   :  { %v6822_v16 = vmul.f32 %v6754_v59, %v3444_v53  ;;  %v6825_v3 = vmul.f32 %v6754_v59, %v3445_v0  ;;  %v6828_v13 = vmul.f32 %v6754_v59, %v3446_v63  ;;  %v6831_v21 = vmul.f32 %v6754_v59, %v3447_v6 }
 0x338   :  { %v6834_v31 = vmul.f32 %v6754_v59, %v3448_v11  ;;  %v6837_v39 = vmul.f32 %v6754_v59, %v3449_v22  ;;  %v6840_v46 = vmul.f32 %v6754_v59, %v3450_v29  ;;  %v6843_v53 = vmul.f32 %v6754_v59, %v3451_v43 }
 0x339   :  { %v6846_v0 = vmul.f32 %v6754_v59, %v3452_v52  ;;  %v6849_v63 = vmul.f32 %v6754_v59, %v3453_v4  ;;  %v6852_v6 = vmul.f32 %v6754_v59, %v3454_v14  ;;  %v6855_v11 = vmul.f32 %v6754_v59, %v3455_v27 }
 0x33a   :  { %v6858_v22 = vmul.f32 %v6754_v59, %v3456_v36  ;;  %v6861_v29 = vmul.f32 %v6754_v59, %v3457_v54  ;;  %v6864_v43 = vmul.f32 %v6754_v59, %v3458_v35  ;;  %v6867_v52 = vmul.f32 %v6754_v59, %v3459_v34 }
 0x33b   :  { %v6870_v4 = vmul.f32 %v6754_v59, %v3460_v32  ;;  %v6873_v14 = vmul.f32 %v6754_v59, %v3461_v8  ;;  %v6876_v27 = vmul.f32 %v6754_v59, %v3462_v45  ;;  %v6879_v36 = vmul.f32 %v6754_v59, %v3463_v25 }
 0x33c   :  { %v6882_v54 = vmul.f32 %v6754_v59, %v3464_v55  ;;  %v6885_v35 = vmul.f32 %v6754_v59, %v3465_v40  ;;  %v6888_v34 = vmul.f32 %v6754_v59, %v3466_v12  ;;  %v6891_v32 = vmul.f32 %v6754_v59, %v3467_v24 }
 0x33d   :  { %v6894_v8 = vmul.f32 %v6754_v59, %v3468_v60  ;;  %v6897_v45 = vmul.f32 %v6754_v59, %v3469_v2  ;;  %v6900_v25 = vmul.f32 %v6754_v59, %v3470_v18  ;;  %v6903_v55 = vmul.f32 %v6754_v59, %v3471_v1 }
 0x33e   :  { %v6906_v40 = vmul.f32 %v6754_v59, %v3472_v15  ;;  %v6909_v12 = vmul.f32 %v6754_v59, %v3473_v42  ;;  %v6912_v24 = vmul.f32 %v6754_v59, %v3474_v44  ;;  %v6915_v60 = vmul.f32 %v6754_v59, %v3475_v56 }
 0x33f   :  { %v6918_v2 = vmul.f32 %v6754_v59, %v3476_v10  ;;  %v6921_v18 = vmul.f32 %v6754_v59, %v3477_v23  ;;  %v8387_v1 = vsub.f32 %v6560_v37, %v6630_v5  ;;  %v8388_v42 = vsub.f32 %v6565_v57, %v6630_v5 }
 0x340   :  { %v8390_v56 = vsub.f32 %v6570_v33, %v6630_v5  ;;  %v8392_v23 = vsub.f32 %v6575_v9, %v6630_v5 }
 0x341   :  { %v6927_v15 = vmul.f32 %v6754_v59, %v8387_v1  ;;  %v6933_v44 = vmul.f32 %v6754_v59, %v8388_v42  ;;  %v8394_v1 = vsub.f32 %v6580_v50, %v6630_v5  ;;  %v8396_v42 = vld [vmem:[#allocation22_spill] sm:$0xff] }
 0x342   :  { %v6939_v10 = vmul.f32 %v6754_v59, %v8390_v56  ;;  %v6945_v37 = vmul.f32 %v6754_v59, %v8392_v23  ;;  %v8399_v56 = vld [vmem:[#allocation23_spill] sm:$0xff]  ;;  %v8402_v23 = vld [vmem:[#allocation24_spill] sm:$0xff] }
 0x343   :  { %8389 = vst [vmem:[#allocation2_spill] sm:$0xff] %v6933_v44  ;;  %v6951_v57 = vmul.f32 %v6754_v59, %v8394_v1  ;;  %v8397_v44 = vsub.f32 %v8396_v42, %v6630_v5  ;;  %v8405_v1 = vld [vmem:[#allocation25_spill] sm:$0xff] }
 0x344   :  { %8391 = vst [vmem:[#allocation3_spill] sm:$0xff] %v6939_v10  ;;  %8393 = vst [vmem:[#allocation4_spill] sm:$0xff] %v6945_v37  ;;  %v8400_v10 = vsub.f32 %v8399_v56, %v6630_v5  ;;  %v8403_v37 = vsub.f32 %v8402_v23, %v6630_v5 }
 0x345   :  { %8395 = vst [vmem:[#allocation5_spill] sm:$0xff] %v6951_v57  ;;  %v6957_v33 = vmul.f32 %v6754_v59, %v8397_v44  ;;  %v8406_v57 = vsub.f32 %v8405_v1, %v6630_v5  ;;  %v8408_v44 = vld [vmem:[#allocation26_spill] sm:$0xff] }
 0x346   :  { %v6963_v9 = vmul.f32 %v6754_v59, %v8400_v10  ;;  %v6969_v50 = vmul.f32 %v6754_v59, %v8403_v37  ;;  %v8411_v10 = vld [vmem:[#allocation27_spill] sm:$0xff]  ;;  %v8413_v37 = vld [vmem:[#allocation28_spill] sm:$0xff] }
 0x347   :  { %8398 = vst [vmem:[#allocation6_spill] sm:$0xff] %v6957_v33  ;;  %v6975_v42 = vmul.f32 %v6754_v59, %v8406_v57  ;;  %v8409_v33 = vsub.f32 %v8408_v44, %v6630_v5  ;;  %v8415_v57 = vld [vmem:[#allocation29_spill] sm:$0xff] }
 0x348   :  { %8401 = vst [vmem:[#allocation7_spill] sm:$0xff] %v6963_v9  ;;  %8404 = vst [vmem:[#allocation8_spill] sm:$0xff] %v6969_v50  ;;  %v8412_v9 = vsub.f32 %v8411_v10, %v6630_v5  ;;  %v8414_v50 = vsub.f32 %v8413_v37, %v6630_v5 }
 0x349   :  { %8407 = vst [vmem:[#allocation9_spill] sm:$0xff] %v6975_v42  ;;  %v6981_v56 = vmul.f32 %v6754_v59, %v8409_v33  ;;  %v8416_v42 = vsub.f32 %v8415_v57, %v6630_v5  ;;  %v8417_v33 = vld [vmem:[#allocation30_spill] sm:$0xff] }
 0x34a   :  { %v6987_v23 = vmul.f32 %v6754_v59, %v8412_v9  ;;  %v6993_v1 = vmul.f32 %v6754_v59, %v8414_v50  ;;  %v7010_v9 = vld [vmem:[%s8268_s2] ss:$0 sm:$0xff] }
 0x34b   :  { %8410 = vst [vmem:[#allocation10_spill] sm:$0xff] %v6981_v56  ;;  %v6999_v44 = vmul.f32 %v6754_v59, %v8416_v42  ;;  %v8418_v56 = vsub.f32 %v8417_v33, %v6630_v5  ;;  %v7014_v50 = vmul.f32 %v7010_v9, %v6768_v38  ;;  %v7018_v37 = vmul.f32 %v7010_v9, %v6774_v26  ;;  %v8424_v57 = vld [vmem:[#allocation3_spill] sm:$0xff]  ;;  %v8426_v33 = vld [vmem:[#allocation4_spill] sm:$0xff] }
 0x34c   :  { %v7022_v42 = vmul.f32 %v7010_v9, %v6780_v48  ;;  %v7030_v5 = vmul.f32 %v7010_v9, %v6786_v41  ;;  %v7034_v38 = vmul.f32 %v7010_v9, %v6789_v62  ;;  %v7038_v26 = vmul.f32 %v7010_v9, %v6792_v49 }
 0x34d   :  { %v7005_v10 = vmul.f32 %v6754_v59, %v8418_v56  ;;  %v7026_v59 = vmul.f32 %v7010_v9, %v6783_v28  ;;  %v7042_v48 = vmul.f32 %v7010_v9, %v6795_v17  ;;  %v7046_v28 = vmul.f32 %v7010_v9, %v6798_v58  ;;  %v8422_v56 = vld [vmem:[#allocation2_spill] sm:$0xff] }
 0x34e   :  { %v7050_v41 = vmul.f32 %v7010_v9, %v6801_v30  ;;  %v7054_v62 = vmul.f32 %v7010_v9, %v6804_v51  ;;  %v7058_v49 = vmul.f32 %v7010_v9, %v6807_v20  ;;  %v7062_v17 = vmul.f32 %v7010_v9, %v6810_v47 }
 0x34f   :  { %v7066_v58 = vmul.f32 %v7010_v9, %v6813_v19  ;;  %v7070_v30 = vmul.f32 %v7010_v9, %v6816_v61  ;;  %v7074_v51 = vmul.f32 %v7010_v9, %v6819_v7  ;;  %v7078_v20 = vmul.f32 %v7010_v9, %v6822_v16 }
 0x350   :  { %v7082_v47 = vmul.f32 %v7010_v9, %v6825_v3  ;;  %v7086_v19 = vmul.f32 %v7010_v9, %v6828_v13  ;;  %v7090_v61 = vmul.f32 %v7010_v9, %v6831_v21  ;;  %v7094_v7 = vmul.f32 %v7010_v9, %v6834_v31 }
 0x351   :  { %v7098_v16 = vmul.f32 %v7010_v9, %v6837_v39  ;;  %v7102_v3 = vmul.f32 %v7010_v9, %v6840_v46  ;;  %v7106_v13 = vmul.f32 %v7010_v9, %v6843_v53  ;;  %v7110_v21 = vmul.f32 %v7010_v9, %v6846_v0 }
 0x352   :  { %v7114_v31 = vmul.f32 %v7010_v9, %v6849_v63  ;;  %v7118_v39 = vmul.f32 %v7010_v9, %v6852_v6  ;;  %v7122_v46 = vmul.f32 %v7010_v9, %v6855_v11  ;;  %v7126_v53 = vmul.f32 %v7010_v9, %v6858_v22 }
 0x353   :  { %v7130_v0 = vmul.f32 %v7010_v9, %v6861_v29  ;;  %v7134_v63 = vmul.f32 %v7010_v9, %v6864_v43  ;;  %v7138_v6 = vmul.f32 %v7010_v9, %v6867_v52  ;;  %v7142_v11 = vmul.f32 %v7010_v9, %v6870_v4 }
 0x354   :  { %v7146_v22 = vmul.f32 %v7010_v9, %v6873_v14  ;;  %v7150_v29 = vmul.f32 %v7010_v9, %v6876_v27  ;;  %v7154_v43 = vmul.f32 %v7010_v9, %v6879_v36  ;;  %v7158_v52 = vmul.f32 %v7010_v9, %v6882_v54 }
 0x355   :  { %v7162_v4 = vmul.f32 %v7010_v9, %v6885_v35  ;;  %v7166_v14 = vmul.f32 %v7010_v9, %v6888_v34  ;;  %v7170_v27 = vmul.f32 %v7010_v9, %v6891_v32  ;;  %v7174_v36 = vmul.f32 %v7010_v9, %v6894_v8 }
 0x356   :  { %v7178_v54 = vmul.f32 %v7010_v9, %v6897_v45  ;;  %v7182_v35 = vmul.f32 %v7010_v9, %v6900_v25  ;;  %v7186_v34 = vmul.f32 %v7010_v9, %v6903_v55  ;;  %v7190_v32 = vmul.f32 %v7010_v9, %v6906_v40 }
 0x357   :  { %v7194_v8 = vmul.f32 %v7010_v9, %v6909_v12  ;;  %v7198_v45 = vmul.f32 %v7010_v9, %v6912_v24  ;;  %v7202_v25 = vmul.f32 %v7010_v9, %v6915_v60  ;;  %v7206_v55 = vmul.f32 %v7010_v9, %v6918_v2 }
 0x358   :  { %v7210_v40 = vmul.f32 %v7010_v9, %v6921_v18  ;;  %v7214_v12 = vmul.f32 %v7010_v9, %v6927_v15  ;;  %v7218_v24 = vmul.f32 %v7010_v9, %v8422_v56  ;;  %v7222_v60 = vmul.f32 %v7010_v9, %v8424_v57  ;;  %v7235_v15 = vld [vmem:[%s8269_s3] ss:$0 sm:$0xff] }
 0x359   :  { %8419 = vst [vmem:[#allocation11_spill] sm:$0xff] %v7206_v55  ;;  %v7226_v2 = vmul.f32 %v7010_v9, %v8426_v33  ;;  %v8428_v55 = vld [vmem:[#allocation5_spill] sm:$0xff] }
 0x35a   :  { %8420 = vst [vmem:[#allocation12_spill] sm:$0xff] %v7210_v40  ;;  %8421 = vst [vmem:[#allocation13_spill] sm:$0xff] %v7214_v12  ;;  %v7230_v18 = vmul.f32 %v7010_v9, %v8428_v55  ;;  %v8430_v12 = vld [vmem:[#allocation6_spill] sm:$0xff] }
 0x35b   :  { %8423 = vst [vmem:[#allocation14_spill] sm:$0xff] %v7218_v24  ;;  %8425 = vst [vmem:[#allocation15_spill] sm:$0xff] %v7222_v60  ;;  %v7239_v56 = vmul.f32 %v7010_v9, %v8430_v12  ;;  %v8431_v24 = vld [vmem:[#allocation7_spill] sm:$0xff]  ;;  %v8432_v60 = vld [vmem:[#allocation8_spill] sm:$0xff]  ;;  %v7259_v12 = vmul.f32 %v7010_v9, %v6987_v23  ;;  %v7279_v23 = vadd.f32 %v7235_v15, %v7018_v37 }
 0x35c   :  { %8427 = vst [vmem:[#allocation16_spill] sm:$0xff] %v7226_v2  ;;  %8429 = vst [vmem:[#allocation17_spill] sm:$0xff] %v7230_v18  ;;  %v7243_v57 = vmul.f32 %v7010_v9, %v8431_v24  ;;  %v7247_v33 = vmul.f32 %v7010_v9, %v8432_v60  ;;  %v8433_v2 = vld [vmem:[#allocation9_spill] sm:$0xff]  ;;  %v8434_v18 = vld [vmem:[#allocation10_spill] sm:$0xff]  ;;  %v7263_v24 = vmul.f32 %v7010_v9, %v6993_v1 }
 0x35d   :  { %v7251_v55 = vmul.f32 %v7010_v9, %v8433_v2  ;;  %v7255_v40 = vmul.f32 %v7010_v9, %v8434_v18  ;;  %v7267_v60 = vmul.f32 %v7010_v9, %v6999_v44  ;;  %v7271_v2 = vmul.f32 %v7010_v9, %v7005_v10 }
 0x35e   :  { %v7275_v18 = vadd.f32 %v7235_v15, %v7014_v50  ;;  %v7283_v1 = vadd.f32 %v7235_v15, %v7022_v42  ;;  %v7287_v44 = vadd.f32 %v7235_v15, %v7026_v59  ;;  %v7291_v10 = vadd.f32 %v7235_v15, %v7030_v5 }
 0x35f   :  { %v7295_v9 = vadd.f32 %v7235_v15, %v7034_v38  ;;  %v7299_v50 = vadd.f32 %v7235_v15, %v7038_v26  ;;  %v7303_v37 = vadd.f32 %v7235_v15, %v7042_v48  ;;  %v7307_v42 = vadd.f32 %v7235_v15, %v7046_v28 }
 0x360   :  { %v7311_v59 = vadd.f32 %v7235_v15, %v7050_v41  ;;  %v7315_v5 = vadd.f32 %v7235_v15, %v7054_v62  ;;  %v7319_v38 = vadd.f32 %v7235_v15, %v7058_v49  ;;  %v7323_v26 = vadd.f32 %v7235_v15, %v7062_v17 }
 0x361   :  { %v7327_v48 = vadd.f32 %v7235_v15, %v7066_v58  ;;  %v7331_v28 = vadd.f32 %v7235_v15, %v7070_v30  ;;  %v7335_v41 = vadd.f32 %v7235_v15, %v7074_v51  ;;  %v7339_v62 = vadd.f32 %v7235_v15, %v7078_v20 }
 0x362   :  { %v7343_v49 = vadd.f32 %v7235_v15, %v7082_v47  ;;  %v7347_v17 = vadd.f32 %v7235_v15, %v7086_v19  ;;  %v7351_v58 = vadd.f32 %v7235_v15, %v7090_v61  ;;  %v7355_v30 = vadd.f32 %v7235_v15, %v7094_v7 }
 0x363   :  { %v7359_v51 = vadd.f32 %v7235_v15, %v7098_v16  ;;  %v7363_v20 = vadd.f32 %v7235_v15, %v7102_v3  ;;  %v7367_v47 = vadd.f32 %v7235_v15, %v7106_v13  ;;  %v7371_v19 = vadd.f32 %v7235_v15, %v7110_v21 }
 0x364   :  { %v7375_v61 = vadd.f32 %v7235_v15, %v7114_v31  ;;  %v7379_v7 = vadd.f32 %v7235_v15, %v7118_v39  ;;  %v7383_v16 = vadd.f32 %v7235_v15, %v7122_v46  ;;  %v7387_v3 = vadd.f32 %v7235_v15, %v7126_v53 }
 0x365   :  { %v7391_v13 = vadd.f32 %v7235_v15, %v7130_v0  ;;  %v7395_v21 = vadd.f32 %v7235_v15, %v7134_v63  ;;  %v7399_v31 = vadd.f32 %v7235_v15, %v7138_v6  ;;  %v7403_v39 = vadd.f32 %v7235_v15, %v7142_v11 }
 0x366   :  { %v7407_v46 = vadd.f32 %v7235_v15, %v7146_v22  ;;  %v7411_v53 = vadd.f32 %v7235_v15, %v7150_v29  ;;  %v7415_v0 = vadd.f32 %v7235_v15, %v7154_v43  ;;  %v7419_v63 = vadd.f32 %v7235_v15, %v7158_v52 }
 0x367   :  { %v7423_v6 = vadd.f32 %v7235_v15, %v7162_v4  ;;  %v7427_v11 = vadd.f32 %v7235_v15, %v7166_v14  ;;  %v7431_v22 = vadd.f32 %v7235_v15, %v7170_v27  ;;  %v7435_v29 = vadd.f32 %v7235_v15, %v7174_v36 }
 0x368   :  { %v7439_v43 = vadd.f32 %v7235_v15, %v7178_v54  ;;  %v7443_v52 = vadd.f32 %v7235_v15, %v7182_v35  ;;  %v7447_v4 = vadd.f32 %v7235_v15, %v7186_v34  ;;  %v7451_v14 = vadd.f32 %v7235_v15, %v7190_v32  ;;  %v8441_v35 = vld [vmem:[#allocation11_spill] sm:$0xff] }
 0x369   :  { %8435 = vst [vmem:[#allocation18_spill] sm:$0xff] %v7423_v6  ;;  %v7455_v27 = vadd.f32 %v7235_v15, %v7194_v8  ;;  %v7459_v36 = vadd.f32 %v7235_v15, %v7198_v45  ;;  %v7463_v54 = vadd.f32 %v7235_v15, %v7202_v25  ;;  %v7467_v34 = vadd.f32 %v7235_v15, %v8441_v35 }
 0x36a   :  { %8436 = vst [vmem:[#allocation19_spill] sm:$0xff] %v7447_v4  ;;  %8437 = vst [vmem:[#allocation20_spill] sm:$0xff] %v7451_v14  ;;  %v8443_v4 = vld [vmem:[#allocation12_spill] sm:$0xff]  ;;  %v8445_v14 = vld [vmem:[#allocation13_spill] sm:$0xff]  ;;  %vm3700_vm0 = vcmp.gt.f32.partialorder %v7275_v18, 0.0  ;;  %vm3701_vm1 = vcmp.gt.f32.partialorder %v7279_v23, 0.0 }
 0x36b   :  { %8438 = vst [vmem:[#allocation21_spill] sm:$0xff] %v7455_v27  ;;  %8439 = vst [vmem:[#allocation22_spill] sm:$0xff] %v7459_v36  ;;  %v7471_v32 = vadd.f32 %v7235_v15, %v8443_v4  ;;  %v7475_v8 = vadd.f32 %v7235_v15, %v8445_v14  ;;  %v8447_v27 = vld [vmem:[#allocation14_spill] sm:$0xff]  ;;  %v8449_v36 = vld [vmem:[#allocation15_spill] sm:$0xff]  ;;  %v7495_v14 = vadd.f32 %v7235_v15, %v7239_v56  ;;  %vm3702_vm2 = vcmp.gt.f32.partialorder %v7283_v1, 0.0 }
 0x36c   :  { %8440 = vst [vmem:[#allocation23_spill] sm:$0xff] %v7463_v54  ;;  %8442 = vst [vmem:[#allocation24_spill] sm:$0xff] %v7467_v34  ;;  %v7479_v45 = vadd.f32 %v7235_v15, %v8447_v27  ;;  %v7483_v25 = vadd.f32 %v7235_v15, %v8449_v36  ;;  %v8451_v54 = vld [vmem:[#allocation16_spill] sm:$0xff]  ;;  %v8453_v34 = vld [vmem:[#allocation17_spill] sm:$0xff]  ;;  %v7499_v27 = vadd.f32 %v7235_v15, %v7243_v57  ;;  %vm3703_vm3 = vcmp.gt.f32.partialorder %v7287_v44, 0.0 }
 0x36d   :  { %8444 = vst [vmem:[#allocation25_spill] sm:$0xff] %v7471_v32  ;;  %8446 = vst [vmem:[#allocation26_spill] sm:$0xff] %v7475_v8  ;;  %v7487_v35 = vadd.f32 %v7235_v15, %v8451_v54  ;;  %v7491_v4 = vadd.f32 %v7235_v15, %v8453_v34  ;;  %v7503_v36 = vadd.f32 %v7235_v15, %v7247_v33  ;;  %vm3704_vm4 = vcmp.gt.f32.partialorder %v7291_v10, 0.0 }
 0x36e   :  { %8448 = vst [vmem:[#allocation27_spill] sm:$0xff] %v7479_v45  ;;  %8450 = vst [vmem:[#allocation28_spill] sm:$0xff] %v7483_v25  ;;  %v7507_v54 = vadd.f32 %v7235_v15, %v7251_v55  ;;  %v7511_v34 = vadd.f32 %v7235_v15, %v7255_v40  ;;  %v7515_v56 = vadd.f32 %v7235_v15, %v7259_v12  ;;  %vm3705_vm5 = vcmp.gt.f32.partialorder %v7295_v9, 0.0 }
 0x36f   :  { %8452 = vst [vmem:[#allocation29_spill] sm:$0xff] %v7487_v35  ;;  %8454 = vst [vmem:[#allocation30_spill] sm:$0xff] %v7491_v4  ;;  %v7519_v57 = vadd.f32 %v7235_v15, %v7263_v24  ;;  %vm3706_vm6 = vcmp.gt.f32.partialorder %v7299_v50, 0.0  ;;  %vm3707_vm7 = vcmp.gt.f32.partialorder %v7303_v37, 0.0  ;;  %vm3708_vm8 = vcmp.gt.f32.partialorder %v7307_v42, 0.0 }
 0x370   :  { %8455 = vst [vmem:[#allocation2_spill] sm:$0xff] %v7495_v14  ;;  %8456 = vst [vmem:[#allocation3_spill] sm:$0xff] %v7499_v27  ;;  %v7532_v40 = vadd.f32 %v7235_v15, %v7267_v60  ;;  %vm3709_vm9 = vcmp.gt.f32.partialorder %v7311_v59, 0.0  ;;  %v3764_v33 = vmul.f32 0.2, %v7275_v18  ;;  %v7540_v24 = vadd.f32 %v7235_v15, %v7271_v2 }
 0x371   :  { %8457 = vst [vmem:[#allocation4_spill] sm:$0xff] %v7503_v36  ;;  %8458 = vst [vmem:[#allocation5_spill] sm:$0xff] %v7507_v54  ;;  %v3765_v55 = vmul.f32 0.2, %v7279_v23  ;;  %v3766_v12 = vmul.f32 0.2, %v7283_v1 }
 0x372   :  { %8459 = vst [vmem:[#allocation6_spill] sm:$0xff] %v7511_v34  ;;  %8460 = vst [vmem:[#allocation7_spill] sm:$0xff] %v7515_v56  ;;  %vm3710_vm10 = vcmp.gt.f32.partialorder %v7315_v5, 0.0  ;;  %v3768_v56 = vmul.f32 0.2, %v7291_v10  ;;  %vm3711_vm11 = vcmp.gt.f32.partialorder %v7319_v38, 0.0  ;;  %v7553_v15 = vsel %vm3700_vm0, %v7275_v18, %v3764_v33 }
 0x373   :  { %8461 = vst [vmem:[#allocation8_spill] sm:$0xff] %v7519_v57  ;;  %8462 = vst [vmem:[#allocation9_spill] sm:$0xff] %v7532_v40  ;;  %v3767_v57 = vmul.f32 0.2, %v7287_v44  ;;  %v3769_v60 = vmul.f32 0.2, %v7295_v9  ;;  %v7564_v27 = vsel %vm3701_vm1, %v7279_v23, %v3765_v55 }
 0x374   :  { %8463 = vst [vmem:[#allocation10_spill] sm:$0xff] %v7540_v24  ;;  %v3770_v40 = vmul.f32 0.2, %v7299_v50  ;;  %v3771_v34 = vmul.f32 0.2, %v7303_v37  ;;  %8464 = vst [vmem:[#allocation11_spill] sm:$0xff] %v7553_v15  ;;  %v7579_v15 = vsel %vm3702_vm2, %v7283_v1, %v3766_v12 }
 0x375   :  { %v3772_v54 = vmul.f32 0.2, %v7307_v42  ;;  %vm3712_vm12 = vcmp.gt.f32.partialorder %v7323_v26, 0.0  ;;  %v3773_v2 = vmul.f32 0.2, %v7311_v59  ;;  %8465 = vst [vmem:[#allocation12_spill] sm:$0xff] %v7564_v27  ;;  %v7594_v4 = vsel %vm3703_vm3, %v7287_v44, %v3767_v57 }
 0x376   :  { %v3774_v24 = vmul.f32 0.2, %v7315_v5  ;;  %v7559_v36 = vmul.f32 0.2, %v7319_v38  ;;  %vm3713_vm13 = vcmp.gt.f32.partialorder %v7327_v48, 0.0  ;;  %8466 = vst [vmem:[#allocation13_spill] sm:$0xff] %v7579_v15 }
 0x377   :  { %v7568_v14 = vmul.f32 0.2, %v7323_v26  ;;  %v7571_v18 = vmul.f32 0.2, %v7327_v48  ;;  %v7574_v33 = vmul.f32 0.2, %v7331_v28 }
 0x378   :  { %vm3714_vm14 = vcmp.gt.f32.partialorder %v7331_v28, 0.0  ;;  %v7583_v23 = vmul.f32 0.2, %v7335_v41  ;;  %v7586_v55 = vmul.f32 0.2, %v7339_v62  ;;  %8468 = vst [vmem:[#allocation15_spill] sm:$0xff] %v7594_v4 }
 0x379   :  { %v7589_v27 = vmul.f32 0.2, %v7343_v49  ;;  %vm3715_vm15 = vcmp.gt.f32.partialorder %v7335_v41, 0.0  ;;  %v7598_v1 = vmul.f32 0.2, %v7347_v17  ;;  %vm3716_vm0 = vcmp.gt.f32.partialorder %v7339_v62, 0.0 }
 0x37a   :  { %v7601_v12 = vmul.f32 0.2, %v7351_v58  ;;  %v7604_v15 = vmul.f32 0.2, %v7355_v30  ;;  %v7613_v44 = vmul.f32 0.2, %v7359_v51 }
 0x37b   :  { %8467 = vst [vmem:[#allocation14_spill] sm:$0xff] %v7589_v27  ;;  %v7609_v27 = vsel %vm3704_vm4, %v7291_v10, %v3768_v56  ;;  %v7616_v57 = vmul.f32 0.2, %v7363_v20  ;;  %v7619_v4 = vmul.f32 0.2, %v7367_v47  ;;  %vm3717_vm1 = vcmp.gt.f32.partialorder %v7343_v49, 0.0 }
 0x37c   :  { %8469 = vst [vmem:[#allocation16_spill] sm:$0xff] %v7604_v15  ;;  %8470 = vst [vmem:[#allocation17_spill] sm:$0xff] %v7609_v27  ;;  %v7624_v15 = vsel %vm3705_vm5, %v7295_v9, %v3769_v60  ;;  %v7628_v10 = vmul.f32 0.2, %v7371_v19  ;;  %v7631_v56 = vmul.f32 0.2, %v7375_v61 }
 0x37d   :  { %8471 = vst [vmem:[#allocation31_spill] sm:$0xff] %v7619_v4  ;;  %8472 = vst [vmem:[#allocation32_spill] sm:$0xff] %v7624_v15  ;;  %v7634_v27 = vmul.f32 0.2, %v7379_v7  ;;  %v7639_v4 = vsel %vm3706_vm6, %v7299_v50, %v3770_v40  ;;  %vm3718_vm2 = vcmp.gt.f32.partialorder %v7347_v17, 0.0  ;;  %vm3719_vm3 = vcmp.gt.f32.partialorder %v7351_v58, 0.0 }
 0x37e   :  { %8474 = vst [vmem:[#allocation34_spill] sm:$0xff] %v7639_v4  ;;  %v7643_v9 = vmul.f32 0.2, %v7383_v16  ;;  %v7646_v60 = vmul.f32 0.2, %v7387_v3  ;;  %vm3722_vm6 = vcmp.gt.f32.partialorder %v7363_v20, 0.0 }
 0x37f   :  { %8473 = vst [vmem:[#allocation33_spill] sm:$0xff] %v7634_v27  ;;  %v7649_v15 = vmul.f32 0.2, %v7391_v13  ;;  %v7654_v27 = vsel %vm3707_vm7, %v7303_v37, %v3771_v34  ;;  %v7660_v50 = vmul.f32 0.2, %v7395_v21  ;;  %v7671_v37 = vsel %vm3708_vm8, %v7307_v42, %v3772_v54 }
 0x380   :  { %8475 = vst [vmem:[#allocation35_spill] sm:$0xff] %v7654_v27  ;;  %v7663_v40 = vmul.f32 0.2, %v7399_v31  ;;  %v7666_v4 = vmul.f32 0.2, %v7403_v39  ;;  %8477 = vst [vmem:[#allocation37_spill] sm:$0xff] %v7671_v37  ;;  %v7689_v42 = vsel %vm3709_vm9, %v7311_v59, %v3773_v2  ;;  %v7707_v59 = vsel %vm3710_vm10, %v7315_v5, %v3774_v24 }
 0x381   :  { %v7678_v34 = vmul.f32 0.2, %v7407_v46  ;;  %v7681_v27 = vmul.f32 0.2, %v7411_v53  ;;  %8479 = vst [vmem:[#allocation39_spill] sm:$0xff] %v7689_v42  ;;  %vm3726_vm8 = vcmp.gt.f32.partialorder %v7379_v7, 0.0  ;;  %v7726_v5 = vsel %vm3711_vm11, %v7319_v38, %v7559_v36 }
 0x382   :  { %8476 = vst [vmem:[#allocation36_spill] sm:$0xff] %v7666_v4  ;;  %v7684_v4 = vmul.f32 0.2, %v7415_v0  ;;  %v7696_v54 = vmul.f32 0.2, %v7419_v63  ;;  %8481 = vst [vmem:[#allocation41_spill] sm:$0xff] %v7707_v59  ;;  %v7745_v38 = vsel %vm3712_vm12, %v7323_v26, %v7568_v14  ;;  %v7764_v26 = vsel %vm3713_vm13, %v7327_v48, %v7571_v18 }
 0x383   :  { %v7699_v37 = vmul.f32 0.2, %v7423_v6  ;;  %vm3730_vm9 = vcmp.gt.f32.partialorder %v7395_v21, 0.0  ;;  %v7714_v2 = vmul.f32 0.2, %v7431_v22  ;;  %8485 = vst [vmem:[#allocation45_spill] sm:$0xff] %v7726_v5  ;;  %v7783_v48 = vsel %vm3714_vm14, %v7331_v28, %v7574_v33 }
 0x384   :  { %8478 = vst [vmem:[#allocation38_spill] sm:$0xff] %v7684_v4  ;;  %v7702_v4 = vmul.f32 0.2, %v7427_v11  ;;  %v7717_v42 = vmul.f32 0.2, %v7435_v29  ;;  %vm3734_vm10 = vcmp.gt.f32.partialorder %v7411_v53, 0.0  ;;  %v7802_v28 = vsel %vm3715_vm15, %v7335_v41, %v7583_v23 }
 0x385   :  { %8482 = vst [vmem:[#allocation42_spill] sm:$0xff] %v7714_v2  ;;  %v7733_v24 = vmul.f32 0.2, %v7443_v52  ;;  %v8487_v59 = vld [vmem:[#allocation19_spill] sm:$0xff]  ;;  %8491 = vst [vmem:[#allocation47_spill] sm:$0xff] %v7745_v38  ;;  %vm3738_vm11 = vcmp.gt.f32.partialorder %v7427_v11, 0.0  ;;  %v7815_v41 = vsel %vm3716_vm0, %v7339_v62, %v7586_v55 }
 0x386   :  { %8480 = vst [vmem:[#allocation40_spill] sm:$0xff] %v7702_v4  ;;  %8483 = vst [vmem:[#allocation43_spill] sm:$0xff] %v7717_v42  ;;  %v7720_v4 = vmul.f32 0.2, %v7439_v43  ;;  %v7736_v42 = vmul.f32 0.2, %v8487_v59 }
 0x387   :  { %8486 = vst [vmem:[#allocation46_spill] sm:$0xff] %v7733_v24  ;;  %v8492_v36 = vld [vmem:[#allocation21_spill] sm:$0xff]  ;;  %vm3742_vm12 = vcmp.gt.f32.partialorder %v7443_v52, 0.0  ;;  %v8498_v14 = vld [vmem:[#allocation24_spill] sm:$0xff]  ;;  %8501 = vst [vmem:[#allocation49_spill] sm:$0xff] %v7783_v48  ;;  %vm3750_vm14 = vcmp.gt.f32.partialorder %v7475_v8, 0.0 }
 0x388   :  { %8484 = vst [vmem:[#allocation44_spill] sm:$0xff] %v7720_v4  ;;  %8488 = vst [vmem:[#allocation19_spill] sm:$0xff] %v7736_v42  ;;  %v8489_v4 = vld [vmem:[#allocation20_spill] sm:$0xff]  ;;  %v7752_v5 = vmul.f32 0.2, %v8492_v36  ;;  %v8493_v42 = vld [vmem:[#allocation22_spill] sm:$0xff] }
 0x389   :  { %v7739_v2 = vmul.f32 0.2, %v8489_v4  ;;  %v7755_v24 = vmul.f32 0.2, %v8493_v42  ;;  %v7771_v38 = vmul.f32 0.2, %v8498_v14 }
 0x38a   :  { %vm3746_vm13 = vcmp.gt.f32.partialorder %v8493_v42, 0.0  ;;  %v7790_v18 = vmul.f32 0.2, %v7479_v45  ;;  %8505 = vst [vmem:[#allocation53_spill] sm:$0xff] %v7802_v28  ;;  %v8506_v33 = vld [vmem:[#allocation30_spill] sm:$0xff]  ;;  %8509 = vst [vmem:[#allocation54_spill] sm:$0xff] %v7815_v41 }
 0x38b   :  { %8490 = vst [vmem:[#allocation20_spill] sm:$0xff] %v7739_v2  ;;  %8494 = vst [vmem:[#allocation21_spill] sm:$0xff] %v7755_v24  ;;  %v8495_v2 = vld [vmem:[#allocation23_spill] sm:$0xff]  ;;  %v7774_v24 = vmul.f32 0.2, %v7471_v32  ;;  %vm3754_vm15 = vcmp.gt.f32.partialorder %v8506_v33, 0.0 }
 0x38c   :  { %v7758_v6 = vmul.f32 0.2, %v8495_v2  ;;  %8497 = vst [vmem:[#allocation23_spill] sm:$0xff] %v7764_v26  ;;  %8502 = vst [vmem:[#allocation50_spill] sm:$0xff] %v7790_v18  ;;  %v7793_v26 = vmul.f32 0.2, %v7483_v25 }
 0x38d   :  { %8499 = vst [vmem:[#allocation24_spill] sm:$0xff] %v7774_v24  ;;  %v3818_v48 = vmul.f32 0.2, %v8506_v33  ;;  %v8508_v32 = vld [vmem:[#allocation3_spill] sm:$0xff]  ;;  %v8510_v23 = vld [vmem:[#allocation4_spill] sm:$0xff]  ;;  %v8512_v45 = vld [vmem:[#allocation6_spill] sm:$0xff] }
 0x38e   :  { %8496 = vst [vmem:[#allocation22_spill] sm:$0xff] %v7758_v6  ;;  %v7777_v6 = vmul.f32 0.2, %v7475_v8  ;;  %8503 = vst [vmem:[#allocation51_spill] sm:$0xff] %v7793_v26  ;;  %v8507_v26 = vld [vmem:[#allocation2_spill] sm:$0xff]  ;;  %v8515_v55 = vld [vmem:[#allocation7_spill] sm:$0xff] }
 0x38f   :  { %v3819_v18 = vmul.f32 0.2, %v8507_v26  ;;  %v3821_v28 = vmul.f32 0.2, %v8510_v23  ;;  %v3823_v8 = vmul.f32 0.2, %v8512_v45 }
 0x390   :  { %8500 = vst [vmem:[#allocation48_spill] sm:$0xff] %v7777_v6  ;;  %v7796_v6 = vmul.f32 0.2, %v7487_v35  ;;  %v8511_v35 = vld [vmem:[#allocation5_spill] sm:$0xff]  ;;  %v8513_v24 = vld [vmem:[#allocation14_spill] sm:$0xff]  ;;  %vm3760_vm4 = vcmp.gt.f32.partialorder %v8515_v55, 0.0 }
 0x391   :  { %v3822_v25 = vmul.f32 0.2, %v8511_v35  ;;  %v7828_v62 = vsel %vm3717_vm1, %v7343_v49, %v8513_v24  ;;  %vm3758_vm0 = vcmp.gt.f32.partialorder %v8511_v35, 0.0  ;;  %v8516_v41 = vld [vmem:[#allocation8_spill] sm:$0xff]  ;;  %v3824_v23 = vmul.f32 0.2, %v8515_v55 }
 0x392   :  { %8504 = vst [vmem:[#allocation52_spill] sm:$0xff] %v7796_v6  ;;  %v3820_v6 = vmul.f32 0.2, %v8508_v32  ;;  %8514 = vst [vmem:[#allocation5_spill] sm:$0xff] %v7828_v62  ;;  %v3825_v32 = vmul.f32 0.2, %v8516_v41  ;;  %v7841_v49 = vsel %vm3718_vm2, %v7347_v17, %v7598_v1  ;;  %v7850_v55 = vsel %vm3719_vm3, %v7351_v58, %v7601_v12 }
 0x393   :  { %v8517_v26 = vld [vmem:[#allocation9_spill] sm:$0xff]  ;;  %v8518_v24 = vld [vmem:[#allocation10_spill] sm:$0xff]  ;;  %v8519_v41 = vld [vmem:[#allocation16_spill] sm:$0xff]  ;;  %vm8520_vm7 = vcmp.gt.f32.partialorder %v7355_v30, 0.0  ;;  %vm8521_vm2 = vcmp.gt.f32.partialorder %v7359_v51, 0.0  ;;  %v7868_v1 = vsel %vm3722_vm6, %v7363_v20, %v7616_v57  ;;  %vm8523_vm3 = vcmp.gt.f32.partialorder %v7367_v47, 0.0 }
 0x394   :  { %v3826_v33 = vmul.f32 0.2, %v8517_v26  ;;  %vm3762_vm1 = vcmp.gt.f32.partialorder %v8517_v26, 0.0  ;;  %vm3763_vm5 = vcmp.gt.f32.partialorder %v8518_v24, 0.0  ;;  %v3827_v62 = vmul.f32 0.2, %v8518_v24 }
 0x395   :  { %v7856_v45 = vsel %vm8520_vm7, %v7355_v30, %v8519_v41  ;;  %v7862_v17 = vsel %vm8521_vm2, %v7359_v51, %v7613_v44  ;;  %v8522_v58 = vld [vmem:[#allocation31_spill] sm:$0xff]  ;;  %vm8524_vm7 = vcmp.gt.f32.partialorder %v7371_v19, 0.0  ;;  %vm8525_vm2 = vcmp.gt.f32.partialorder %v7375_v61, 0.0  ;;  %v8526_v20 = vld [vmem:[#allocation33_spill] sm:$0xff] }
 0x396   :  { %v7874_v12 = vsel %vm8523_vm3, %v7367_v47, %v8522_v58  ;;  %v7880_v30 = vsel %vm8524_vm7, %v7371_v19, %v7628_v10  ;;  %v7886_v51 = vsel %vm8525_vm2, %v7375_v61, %v7631_v56  ;;  %v7892_v44 = vsel %vm3726_vm8, %v7379_v7, %v8526_v20  ;;  %v8560_v20 = vld [vmem:[#allocation26_spill] sm:$0xff] }
 0x397   :  { %vm8527_vm6 = vcmp.gt.f32.partialorder %v7383_v16, 0.0  ;;  %vm8528_vm3 = vcmp.gt.f32.partialorder %v7387_v3, 0.0  ;;  %vm8529_vm7 = vcmp.gt.f32.partialorder %v7391_v13, 0.0  ;;  %v7916_v7 = vsel %vm3730_vm9, %v7395_v21, %v7660_v50 }
 0x398   :  { %v7898_v47 = vsel %vm8527_vm6, %v7383_v16, %v7643_v9  ;;  %v7904_v19 = vsel %vm8528_vm3, %v7387_v3, %v7646_v60  ;;  %v7910_v61 = vsel %vm8529_vm7, %v7391_v13, %v7649_v15  ;;  %vm8530_vm8 = vcmp.gt.f32.partialorder %v7399_v31, 0.0  ;;  %v8531_v3 = vld [vmem:[#allocation36_spill] sm:$0xff] }
 0x399   :  { %v7922_v16 = vsel %vm8530_vm8, %v7399_v31, %v7663_v40  ;;  %vm8532_vm2 = vcmp.gt.f32.partialorder %v7403_v39, 0.0  ;;  %vm8533_vm6 = vcmp.gt.f32.partialorder %v7407_v46, 0.0  ;;  %v7940_v21 = vsel %vm3734_vm10, %v7411_v53, %v7681_v27  ;;  %v8534_v31 = vld [vmem:[#allocation38_spill] sm:$0xff]  ;;  %v8539_v53 = vld [vmem:[#allocation40_spill] sm:$0xff] }
 0x39a   :  { %v7928_v57 = vsel %vm8532_vm2, %v7403_v39, %v8531_v3  ;;  %v7934_v13 = vsel %vm8533_vm6, %v7407_v46, %v7678_v34  ;;  %vm8535_vm9 = vcmp.gt.f32.partialorder %v7415_v0, 0.0  ;;  %vm8536_vm3 = vcmp.gt.f32.partialorder %v7419_v63, 0.0  ;;  %v8537_v46 = vld [vmem:[#allocation18_spill] sm:$0xff]  ;;  %v8544_v60 = vld [vmem:[#allocation44_spill] sm:$0xff] }
 0x39b   :  { %v7946_v15 = vsel %vm8535_vm9, %v7415_v0, %v8534_v31  ;;  %v7952_v39 = vsel %vm8536_vm3, %v7419_v63, %v7696_v54  ;;  %vm8538_vm7 = vcmp.gt.f32.partialorder %v8537_v46, 0.0  ;;  %v7964_v27 = vsel %vm3738_vm11, %v7427_v11, %v8539_v53  ;;  %v8540_v0 = vld [vmem:[#allocation42_spill] sm:$0xff]  ;;  %v8542_v63 = vld [vmem:[#allocation43_spill] sm:$0xff] }
 0x39c   :  { %v7958_v10 = vsel %vm8538_vm7, %v8537_v46, %v7699_v37  ;;  %vm8541_vm10 = vcmp.gt.f32.partialorder %v7431_v22, 0.0  ;;  %vm8543_vm8 = vcmp.gt.f32.partialorder %v7435_v29, 0.0  ;;  %vm8545_vm2 = vcmp.gt.f32.partialorder %v7439_v43, 0.0  ;;  %v8546_v11 = vld [vmem:[#allocation46_spill] sm:$0xff]  ;;  %v8562_v31 = vld [vmem:[#allocation27_spill] sm:$0xff] }
 0x39d   :  { %v7970_v56 = vsel %vm8541_vm10, %v7431_v22, %v8540_v0  ;;  %v7976_v9 = vsel %vm8543_vm8, %v7435_v29, %v8542_v63  ;;  %v7982_v50 = vsel %vm8545_vm2, %v7439_v43, %v8544_v60  ;;  %v7988_v40 = vsel %vm3742_vm12, %v7443_v52, %v8546_v11  ;;  %v8547_v22 = vld [vmem:[#allocation19_spill] sm:$0xff]  ;;  %v8549_v29 = vld [vmem:[#allocation20_spill] sm:$0xff]  ;;  %v8552_v52 = vld [vmem:[#allocation21_spill] sm:$0xff] }
 0x39e   :  { %vm8548_vm11 = vcmp.gt.f32.partialorder %v8487_v59, 0.0  ;;  %vm8550_vm6 = vcmp.gt.f32.partialorder %v8489_v4, 0.0  ;;  %vm8551_vm9 = vcmp.gt.f32.partialorder %v8492_v36, 0.0  ;;  %v8012_v54 = vsel %vm3746_vm13, %v8493_v42, %v8552_v52  ;;  %v8559_v42 = vld [vmem:[#allocation48_spill] sm:$0xff]  ;;  %v8568_v63 = vld [vmem:[#allocation29_spill] sm:$0xff]  ;;  %v8570_v11 = vld [vmem:[#allocation30_spill] sm:$0xff] }
 0x39f   :  { %v7994_v37 = vsel %vm8548_vm11, %v8487_v59, %v8547_v22  ;;  %v8000_v34 = vsel %vm8550_vm6, %v8489_v4, %v8549_v29  ;;  %v8006_v43 = vsel %vm8551_vm9, %v8492_v36, %v7752_v5  ;;  %v8553_v59 = vld [vmem:[#allocation22_spill] sm:$0xff]  ;;  %vm8554_vm12 = vcmp.gt.f32.partialorder %v8495_v2, 0.0  ;;  %v8556_v5 = vld [vmem:[#allocation24_spill] sm:$0xff]  ;;  %v8557_v36 = vld [vmem:[#allocation25_spill] sm:$0xff] }
 0x3a0   :  { %v8018_v41 = vsel %vm8554_vm12, %v8495_v2, %v8553_v59  ;;  %vm8555_vm3 = vcmp.gt.f32.partialorder %v8498_v14, 0.0  ;;  %vm8558_vm7 = vcmp.gt.f32.partialorder %v8557_v36, 0.0  ;;  %v8036_v3 = vsel %vm3750_vm14, %v8560_v20, %v8559_v42  ;;  %v8561_v2 = vld [vmem:[#allocation50_spill] sm:$0xff]  ;;  %v8567_v0 = vld [vmem:[#allocation52_spill] sm:$0xff]  ;;  %v8573_v59 = vld [vmem:[#allocation3_spill] sm:$0xff] }
 0x3a1   :  { %v8024_v4 = vsel %vm8555_vm3, %v8498_v14, %v7771_v38  ;;  %v8030_v58 = vsel %vm8558_vm7, %v8557_v36, %v8556_v5  ;;  %vm8563_vm13 = vcmp.gt.f32.partialorder %v8562_v31, 0.0  ;;  %v8564_v38 = vld [vmem:[#allocation51_spill] sm:$0xff]  ;;  %v8565_v14 = vld [vmem:[#allocation28_spill] sm:$0xff]  ;;  %vm8569_vm8 = vcmp.gt.f32.partialorder %v8568_v63, 0.0  ;;  %v8571_v29 = vld [vmem:[#allocation2_spill] sm:$0xff] }
 0x3a2   :  { %v8042_v46 = vsel %vm8563_vm13, %v8562_v31, %v8561_v2  ;;  %vm8566_vm10 = vcmp.gt.f32.partialorder %v8565_v14, 0.0  ;;  %v8054_v60 = vsel %vm8569_vm8, %v8568_v63, %v8567_v0  ;;  %v8059_v22 = vsel %vm3754_vm15, %v8570_v11, %v3818_v48  ;;  %v8575_v36 = vld [vmem:[#allocation4_spill] sm:$0xff]  ;;  %v8577_v20 = vld [vmem:[#allocation6_spill] sm:$0xff]  ;;  %v8579_v2 = vld [vmem:[#allocation7_spill] sm:$0xff] }
 0x3a3   :  { %v8048_v53 = vsel %vm8566_vm10, %v8565_v14, %v8564_v38  ;;  %vm8572_vm14 = vcmp.gt.f32.partialorder %v8571_v29, 0.0  ;;  %vm8574_vm2 = vcmp.gt.f32.partialorder %v8573_v59, 0.0  ;;  %vm8576_vm11 = vcmp.gt.f32.partialorder %v8575_v36, 0.0  ;;  %v8580_v31 = vld [vmem:[#allocation8_spill] sm:$0xff]  ;;  %v8587_v0 = vld [vmem:[#allocation15_spill] sm:$0xff]  ;;  %v8588_v11 = vld [vmem:[#allocation17_spill] sm:$0xff] }
 0x3a4   :  { %v8064_v52 = vsel %vm8572_vm14, %v8571_v29, %v3819_v18  ;;  %v8069_v5 = vsel %vm8574_vm2, %v8573_v59, %v3820_v6  ;;  %v8074_v42 = vsel %vm8576_vm11, %v8575_v36, %v3821_v28  ;;  %v8079_v48 = vsel %vm3758_vm0, %v8511_v35, %v3822_v25  ;;  %v8584_v35 = vld [vmem:[#allocation11_spill] sm:$0xff]  ;;  %v8585_v38 = vld [vmem:[#allocation12_spill] sm:$0xff]  ;;  %v8590_v59 = vld [vmem:[#allocation34_spill] sm:$0xff] }
 0x3a5   :  { %vm8578_vm15 = vcmp.gt.f32.partialorder %v8577_v20, 0.0  ;;  %v8089_v6 = vsel %vm3760_vm4, %v8579_v2, %v3824_v23  ;;  %vm8581_vm6 = vcmp.gt.f32.partialorder %v8580_v31, 0.0  ;;  %v8099_v25 = vsel %vm3762_vm1, %v8517_v26, %v3826_v33  ;;  %v8586_v23 = vld [vmem:[#allocation13_spill] sm:$0xff]  ;;  %v8589_v29 = vld [vmem:[#allocation32_spill] sm:$0xff]  ;;  %v8591_v36 = vld [vmem:[#allocation35_spill] sm:$0xff] }
 0x3a6   :  { %v8084_v18 = vsel %vm8578_vm15, %v8577_v20, %v3823_v8  ;;  %v8094_v28 = vsel %vm8581_vm6, %v8580_v31, %v3825_v32  ;;  %8583 = vst [vmem:[#allocation9_spill] sm:$0xff] %v8099_v25  ;;  %v8104_v8 = vsel %vm3763_vm5, %v8518_v24, %v3827_v62  ;;  %v4669_v14 = vpack.c.bf16 %v8585_v38, %v8584_v35  ;;  %v8592_v2 = vld [vmem:[#allocation37_spill] sm:$0xff]  ;;  %v8593_v26 = vld [vmem:[#allocation39_spill] sm:$0xff] }
 0x3a7   :  { %8582 = vst [vmem:[#allocation14_spill] sm:$0xff] %v8094_v28  ;;  %v4674_v63 = vpack.c.bf16 %v8587_v0, %v8586_v23  ;;  %v4679_v32 = vpack.c.bf16 %v8589_v29, %v8588_v11  ;;  %v4684_v20 = vpack.c.bf16 %v8591_v36, %v8590_v59  ;;  %v4689_v33 = vpack.c.bf16 %v8593_v26, %v8592_v2  ;;  %v8594_v31 = vld [vmem:[#allocation41_spill] sm:$0xff]  ;;  %v8596_v62 = vld [vmem:[#allocation47_spill] sm:$0xff]  ;;  %v8600_v11 = vld [vmem:[#allocation54_spill] sm:$0xff] }
 0x3a8   :  { %v8595_v25 = vld [vmem:[#allocation45_spill] sm:$0xff]  ;;  %4670 = vst [vmem:[%s8270_s4] sm:$0xff] %v4669_v14   ;;  %v8597_v24 = vld [vmem:[#allocation23_spill] sm:$0xff]  ;;  %v4719_v14 = vpack.c.bf16 %v7862_v17, %v7856_v45  ;;  %v4739_v45 = vpack.c.bf16 %v7910_v61, %v7904_v19  ;;  %v4744_v17 = vpack.c.bf16 %v7922_v16, %v7916_v7  ;;  %v4779_v19 = vpack.c.bf16 %v8006_v43, %v8000_v34 }
 0x3a9   :  { %v4694_v28 = vpack.c.bf16 %v8595_v25, %v8594_v31  ;;  %4826 = vst [vmem:[%s8270_s4 + $0x8] sm:$0xff] %v4674_v63   ;;  %v4699_v35 = vpack.c.bf16 %v8597_v24, %v8596_v62  ;;  %v8598_v38 = vld [vmem:[#allocation49_spill] sm:$0xff]  ;;  %v4714_v25 = vpack.c.bf16 %v7850_v55, %v7841_v49  ;;  %4827 = vst [vmem:[%s8270_s4 + $0x10] sm:$0xff] %v4679_v32  }
 0x3aa   :  { %v8599_v23 = vld [vmem:[#allocation53_spill] sm:$0xff]  ;;  %4828 = vst [vmem:[%s8270_s4 + $0x18] sm:$0xff] %v4684_v20   ;;  %4829 = vst [vmem:[%s8270_s4 + $0x20] sm:$0xff] %v4689_v33   ;;  %v4724_v55 = vpack.c.bf16 %v7874_v12, %v7868_v1  ;;  %v4729_v49 = vpack.c.bf16 %v7886_v51, %v7880_v30  ;;  %v4734_v63 = vpack.c.bf16 %v7898_v47, %v7892_v44 }
 0x3ab   :  { %v4704_v0 = vpack.c.bf16 %v8599_v23, %v8598_v38  ;;  %v8601_v29 = vld [vmem:[#allocation5_spill] sm:$0xff]  ;;  %4830 = vst [vmem:[%s8270_s4 + $0x28] sm:$0xff] %v4694_v28   ;;  %4831 = vst [vmem:[%s8270_s4 + $0x30] sm:$0xff] %v4699_v35   ;;  %v4749_v1 = vpack.c.bf16 %v7934_v13, %v7928_v57  ;;  %v4754_v12 = vpack.c.bf16 %v7946_v15, %v7940_v21 }
 0x3ac   :  { %v4709_v59 = vpack.c.bf16 %v8601_v29, %v8600_v11  ;;  %4834 = vst [vmem:[%s8270_s4 + $0x48] sm:$0xff] %v4714_v25   ;;  %4835 = vst [vmem:[%s8270_s4 + $0x50] sm:$0xff] %v4719_v14   ;;  %v4759_v30 = vpack.c.bf16 %v7958_v10, %v7952_v39  ;;  %v4764_v51 = vpack.c.bf16 %v7970_v56, %v7964_v27 }
 0x3ad   :  { %4832 = vst [vmem:[%s8270_s4 + $0x38] sm:$0xff] %v4704_v0   ;;  %4836 = vst [vmem:[%s8270_s4 + $0x58] sm:$0xff] %v4724_v55   ;;  %v4769_v44 = vpack.c.bf16 %v7982_v50, %v7976_v9  ;;  %v4774_v47 = vpack.c.bf16 %v7994_v37, %v7988_v40  ;;  %v4784_v61 = vpack.c.bf16 %v8018_v41, %v8012_v54  ;;  %v8603_v27 = vld [vmem:[#allocation9_spill] sm:$0xff] }
 0x3ae   :  { %4833 = vst [vmem:[%s8270_s4 + $0x40] sm:$0xff] %v4709_v59   ;;  %4837 = vst [vmem:[%s8270_s4 + $0x60] sm:$0xff] %v4729_v49   ;;  %v4789_v7 = vpack.c.bf16 %v8030_v58, %v8024_v4  ;;  %v4794_v16 = vpack.c.bf16 %v8042_v46, %v8036_v3  ;;  %v4799_v57 = vpack.c.bf16 %v8054_v60, %v8048_v53  ;;  %v8602_v39 = vld [vmem:[#allocation14_spill] sm:$0xff] }
 0x3af   :  { %4838 = vst [vmem:[%s8270_s4 + $0x68] sm:$0xff] %v4734_v63   ;;  %4839 = vst [vmem:[%s8270_s4 + $0x70] sm:$0xff] %v4739_v45   ;;  %v4804_v13 = vpack.c.bf16 %v8064_v52, %v8059_v22  ;;  %v4809_v21 = vpack.c.bf16 %v8074_v42, %v8069_v5  ;;  %v4814_v15 = vpack.c.bf16 %v8084_v18, %v8079_v48 }
 0x3b0   :  { %4840 = vst [vmem:[%s8270_s4 + $0x78] sm:$0xff] %v4744_v17   ;;  %4841 = vst [vmem:[%s8270_s4 + $0x80] sm:$0xff] %v4749_v1   ;;  %v4819_v10 = vpack.c.bf16 %v8602_v39, %v8089_v6  ;;  %v4824_v56 = vpack.c.bf16 %v8104_v8, %v8603_v27 }
 0x3b1   :  { %4842 = vst [vmem:[%s8270_s4 + $0x88] sm:$0xff] %v4754_v12   ;;  %4843 = vst [vmem:[%s8270_s4 + $0x90] sm:$0xff] %v4759_v30  }
 0x3b2   :  { %4844 = vst [vmem:[%s8270_s4 + $0x98] sm:$0xff] %v4764_v51   ;;  %4845 = vst [vmem:[%s8270_s4 + $0xa0] sm:$0xff] %v4769_v44  }
 0x3b3   :  { %4846 = vst [vmem:[%s8270_s4 + $0xa8] sm:$0xff] %v4774_v47   ;;  %4847 = vst [vmem:[%s8270_s4 + $0xb0] sm:$0xff] %v4779_v19  }
 0x3b4   :  { %4848 = vst [vmem:[%s8270_s4 + $0xb8] sm:$0xff] %v4784_v61   ;;  %4849 = vst [vmem:[%s8270_s4 + $0xc0] sm:$0xff] %v4789_v7  }
 0x3b5   :  { %4850 = vst [vmem:[%s8270_s4 + $0xc8] sm:$0xff] %v4794_v16   ;;  %4851 = vst [vmem:[%s8270_s4 + $0xd0] sm:$0xff] %v4799_v57  }
 0x3b6   :  { %4852 = vst [vmem:[%s8270_s4 + $0xd8] sm:$0xff] %v4804_v13   ;;  %4853 = vst [vmem:[%s8270_s4 + $0xe0] sm:$0xff] %v4809_v21  }
 0x3b7   :  { %4854 = vst [vmem:[%s8270_s4 + $0xe8] sm:$0xff] %v4814_v15   ;;  %4855 = vst [vmem:[%s8270_s4 + $0xf0] sm:$0xff] %v4819_v10  }
 0x3b8   :  { %4856 = vst [vmem:[%s8270_s4 + $0xf8] sm:$0xff] %v4824_v56  }

// kernel: discriminator_forward.6
= control target key start
LH: loop header
LB: loop body
LE: loop exit
PB: predicated region body
PF: predicated region fallthrough
CT: control target
= control target key end

     0   :  { %s6486_s1 = inlined_call_operand.vmem [shape: bf16[2048,256], index: 1, kind: input, shape index: {}]   ;;  %s6487_s0 = inlined_call_operand.vmem [shape: bf16[128,2048], index: 0, kind: input, shape index: {}]   ;;  %s6488_s2 = inlined_call_operand.vmem [shape: f32[1,256], index: 2, kind: input, shape index: {}]   ;;  %s6489_s3 = inlined_call_operand.vmem [shape: f32[1,256], index: 3, kind: input, shape index: {}]   ;;  %s6490_s4 = inlined_call_operand.vmem [shape: bf16[128,256], index: 4, kind: output, shape index: {}]  }
   0x1   :  { %v4357_v0 = vld [vmem:[%s6486_s1 + $0x4] ss:$8 sps:$4 sm:$0xff]   ;;  %v4361_v2 = vld [vmem:[%s6486_s1] ss:$8 sps:$4 sm:$0xff]   ;;  %v4363_v4 = vld [vmem:[%s6486_s1 + $0x14] ss:$8 sps:$4 sm:$0xff]  }
   0x2   :  { %v4359_v1 = vld [vmem:[%s6486_s1 + $0x404] ss:$8 sps:$4 sm:$0xff]   ;;  %2321 = vmatprep.subr.bf16.mxu1 %v4357_v0  ;;  %v4362_v3 = vld [vmem:[%s6486_s1 + $0x400] ss:$8 sps:$4 sm:$0xff]   ;;  %v4365_v5 = vld [vmem:[%s6486_s1 + $0x414] ss:$8 sps:$4 sm:$0xff]  }
   0x3   :  { %2773 = vmatprep.subr.bf16.mxu0 %v4359_v1  ;;  %2322 = vmatpush1.bf16.msra.mxu1 %v4361_v2  ;;  %v4367_v6 = vld [vmem:[%s6486_s1 + $0x10] ss:$8 sps:$4 sm:$0xff]   ;;  %v4369_v8 = vld [vmem:[%s6486_s1 + $0x24] ss:$8 sps:$4 sm:$0xff]   ;;  %v4373_v10 = vld [vmem:[%s6486_s1 + $0x20] ss:$8 sps:$4 sm:$0xff]  }
   0x4   :  { %2774 = vmatpush1.bf16.msra.mxu0 %v4362_v3  ;;  %2323 = vmatprep.subr.bf16.mxu1 %v4363_v4  ;;  %v4368_v7 = vld [vmem:[%s6486_s1 + $0x410] ss:$8 sps:$4 sm:$0xff]   ;;  %v4371_v9 = vld [vmem:[%s6486_s1 + $0x424] ss:$8 sps:$4 sm:$0xff]   ;;  %v4374_v11 = vld [vmem:[%s6486_s1 + $0x420] ss:$8 sps:$4 sm:$0xff]  }
   0x5   :  { %2775 = vmatprep.subr.bf16.mxu0 %v4365_v5  ;;  %v4375_v12 = vld [vmem:[%s6486_s1 + $0x34] ss:$8 sps:$4 sm:$0xff]   ;;  %v4379_v14 = vld [vmem:[%s6486_s1 + $0x30] ss:$8 sps:$4 sm:$0xff]   ;;  %v4381_v16 = vld [vmem:[%s6486_s1 + $0x44] ss:$8 sps:$4 sm:$0xff]  }
   0x6   :  { %v4377_v13 = vld [vmem:[%s6486_s1 + $0x434] ss:$8 sps:$4 sm:$0xff]   ;;  %v4380_v15 = vld [vmem:[%s6486_s1 + $0x430] ss:$8 sps:$4 sm:$0xff]   ;;  %v4383_v17 = vld [vmem:[%s6486_s1 + $0x444] ss:$8 sps:$4 sm:$0xff]  }
   0x7   :  { %2324 = vmatpush1.bf16.msra.mxu1 %v4367_v6  ;;  %v4385_v18 = vld [vmem:[%s6486_s1 + $0x40] ss:$8 sps:$4 sm:$0xff]   ;;  %v4387_v20 = vld [vmem:[%s6486_s1 + $0x54] ss:$8 sps:$4 sm:$0xff]   ;;  %v4391_v22 = vld [vmem:[%s6486_s1 + $0x50] ss:$8 sps:$4 sm:$0xff]  }
   0x8   :  { %2776 = vmatpush1.bf16.msra.mxu0 %v4368_v7  ;;  %2325 = vmatprep.subr.bf16.mxu1 %v4369_v8  ;;  %v4386_v19 = vld [vmem:[%s6486_s1 + $0x440] ss:$8 sps:$4 sm:$0xff]   ;;  %v4389_v21 = vld [vmem:[%s6486_s1 + $0x454] ss:$8 sps:$4 sm:$0xff]   ;;  %v4392_v23 = vld [vmem:[%s6486_s1 + $0x450] ss:$8 sps:$4 sm:$0xff]  }
   0x9   :  { %2777 = vmatprep.subr.bf16.mxu0 %v4371_v9  ;;  %v4393_v24 = vld [vmem:[%s6486_s1 + $0x64] ss:$8 sps:$4 sm:$0xff]   ;;  %v4397_v26 = vld [vmem:[%s6486_s1 + $0x60] ss:$8 sps:$4 sm:$0xff]   ;;  %v4399_v28 = vld [vmem:[%s6486_s1 + $0x74] ss:$8 sps:$4 sm:$0xff]  }
   0xa   :  { %v4395_v25 = vld [vmem:[%s6486_s1 + $0x464] ss:$8 sps:$4 sm:$0xff]   ;;  %v4398_v27 = vld [vmem:[%s6486_s1 + $0x460] ss:$8 sps:$4 sm:$0xff]   ;;  %v4401_v29 = vld [vmem:[%s6486_s1 + $0x474] ss:$8 sps:$4 sm:$0xff]  }
   0xb   :  { %2326 = vmatpush1.bf16.msra.mxu1 %v4373_v10  ;;  %v4403_v30 = vld [vmem:[%s6486_s1 + $0x70] ss:$8 sps:$4 sm:$0xff]   ;;  %v4405_v32 = vld [vmem:[%s6486_s1 + $0x84] ss:$8 sps:$4 sm:$0xff]   ;;  %v4409_v34 = vld [vmem:[%s6486_s1 + $0x80] ss:$8 sps:$4 sm:$0xff]  }
   0xc   :  { %2778 = vmatpush1.bf16.msra.mxu0 %v4374_v11  ;;  %2327 = vmatprep.subr.bf16.mxu1 %v4375_v12  ;;  %v4404_v31 = vld [vmem:[%s6486_s1 + $0x470] ss:$8 sps:$4 sm:$0xff]   ;;  %v4407_v33 = vld [vmem:[%s6486_s1 + $0x484] ss:$8 sps:$4 sm:$0xff]   ;;  %v4410_v35 = vld [vmem:[%s6486_s1 + $0x480] ss:$8 sps:$4 sm:$0xff]  }
   0xd   :  { %2779 = vmatprep.subr.bf16.mxu0 %v4377_v13  ;;  %v4411_v36 = vld [vmem:[%s6486_s1 + $0x94] ss:$8 sps:$4 sm:$0xff]   ;;  %v4415_v38 = vld [vmem:[%s6486_s1 + $0x90] ss:$8 sps:$4 sm:$0xff]   ;;  %v4417_v40 = vld [vmem:[%s6486_s1 + $0xa4] ss:$8 sps:$4 sm:$0xff]  }
   0xe   :  { %v4413_v37 = vld [vmem:[%s6486_s1 + $0x494] ss:$8 sps:$4 sm:$0xff]   ;;  %v4416_v39 = vld [vmem:[%s6486_s1 + $0x490] ss:$8 sps:$4 sm:$0xff]   ;;  %v4419_v41 = vld [vmem:[%s6486_s1 + $0x4a4] ss:$8 sps:$4 sm:$0xff]  }
   0xf   :  { %2328 = vmatpush1.bf16.msra.mxu1 %v4379_v14  ;;  %v4421_v42 = vld [vmem:[%s6486_s1 + $0xa0] ss:$8 sps:$4 sm:$0xff]   ;;  %v4423_v44 = vld [vmem:[%s6486_s1 + $0xb4] ss:$8 sps:$4 sm:$0xff]   ;;  %v4427_v46 = vld [vmem:[%s6486_s1 + $0xb0] ss:$8 sps:$4 sm:$0xff]  }
  0x10   :  { %2780 = vmatpush1.bf16.msra.mxu0 %v4380_v15  ;;  %2329 = vmatprep.subr.bf16.mxu1 %v4381_v16  ;;  %v4422_v43 = vld [vmem:[%s6486_s1 + $0x4a0] ss:$8 sps:$4 sm:$0xff]   ;;  %v4425_v45 = vld [vmem:[%s6486_s1 + $0x4b4] ss:$8 sps:$4 sm:$0xff]   ;;  %v4428_v47 = vld [vmem:[%s6486_s1 + $0x4b0] ss:$8 sps:$4 sm:$0xff]  }
  0x11   :  { %2781 = vmatprep.subr.bf16.mxu0 %v4383_v17  ;;  %v17_v48 = vld [vmem:[%s6487_s0] sm:$0xff]  ;;  %v4435_v58 = vld [vmem:[%s6486_s1 + $0xd4] ss:$8 sps:$4 sm:$0xff]   ;;  %v4439_v60 = vld [vmem:[%s6486_s1 + $0xd0] ss:$8 sps:$4 sm:$0xff]  }
  0x12   :  { %v25_v49 = vld [vmem:[%s6487_s0 + $0x40] sm:$0xff]  ;;  %v4437_v59 = vld [vmem:[%s6486_s1 + $0x4d4] ss:$8 sps:$4 sm:$0xff]   ;;  %v4440_v61 = vld [vmem:[%s6486_s1 + $0x4d0] ss:$8 sps:$4 sm:$0xff]  }
  0x13   :  { %2330 = vmatpush1.bf16.msra.mxu1 %v4385_v18  ;;  %v21_v50 = vld [vmem:[%s6487_s0 + $0x20] sm:$0xff]  ;;  %v3718_v53 = vcombine.high %v17_v48, %v25_v49  ;;  %v4447_v2 = vld [vmem:[%s6486_s1 + $0xf4] ss:$8 sps:$4 sm:$0xff]   ;;  %v4451_v4 = vld [vmem:[%s6486_s1 + $0xf0] ss:$8 sps:$4 sm:$0xff]   ;;  %v3717_v11 = vcombine.low %v17_v48, %v25_v49 }
  0x14   :  { %2782 = vmatpush1.bf16.msra.mxu0 %v4386_v19  ;;  %2331 = vmatprep.subr.bf16.mxu1 %v4387_v20  ;;  %v29_v51 = vld [vmem:[%s6487_s0 + $0x60] sm:$0xff]  ;;  %v4449_v3 = vld [vmem:[%s6486_s1 + $0x4f4] ss:$8 sps:$4 sm:$0xff]   ;;  %v4452_v5 = vld [vmem:[%s6486_s1 + $0x4f0] ss:$8 sps:$4 sm:$0xff]  }
  0x15   :  { %2783 = vmatprep.subr.bf16.mxu0 %v4389_v21  ;;  %v4429_v52 = vld [vmem:[%s6486_s1 + $0xc4] ss:$8 sps:$4 sm:$0xff]   ;;  %v3726_v55 = vcombine.high %v21_v50, %v29_v51  ;;  %2353 = vmatprep.mubr.bf16.mxu1 %v3718_v53  ;;  %v4433_v56 = vld [vmem:[%s6486_s1 + $0xc0] ss:$8 sps:$4 sm:$0xff]   ;;  %v3725_v12 = vcombine.low %v21_v50, %v29_v51  ;;  %v4461_v16 = vld [vmem:[%s6486_s1 + $0x114] ss:$8 sps:$4 sm:$0xff]  }
  0x16   :  { %v4431_v54 = vld [vmem:[%s6486_s1 + $0x4c4] ss:$8 sps:$4 sm:$0xff]   ;;  %v4434_v57 = vld [vmem:[%s6486_s1 + $0x4c0] ss:$8 sps:$4 sm:$0xff]   ;;  %v4464_v17 = vld [vmem:[%s6486_s1 + $0x514] ss:$8 sps:$4 sm:$0xff]  }
  0x17   :  { %2332 = vmatpush1.bf16.msra.mxu1 %v4391_v22  ;;  %2805 = vmatprep.mubr.bf16.mxu0 %v3726_v55  ;;  %v4441_v62 = vld [vmem:[%s6486_s1 + $0xe4] ss:$8 sps:$4 sm:$0xff]   ;;  %v4445_v0 = vld [vmem:[%s6486_s1 + $0xe0] ss:$8 sps:$4 sm:$0xff]   ;;  %v4459_v20 = vld [vmem:[%s6486_s1 + $0x110] ss:$8 sps:$4 sm:$0xff]  }
  0x18   :  { %2784 = vmatpush1.bf16.msra.mxu0 %v4392_v23  ;;  %2333 = vmatprep.subr.bf16.mxu1 %v4393_v24  ;;  %v4443_v63 = vld [vmem:[%s6486_s1 + $0x4e4] ss:$8 sps:$4 sm:$0xff]   ;;  %v4446_v1 = vld [vmem:[%s6486_s1 + $0x4e0] ss:$8 sps:$4 sm:$0xff]   ;;  %v4462_v21 = vld [vmem:[%s6486_s1 + $0x510] ss:$8 sps:$4 sm:$0xff]  }
  0x19   :  { %2785 = vmatprep.subr.bf16.mxu0 %v4395_v25  ;;  %v4455_v6 = vld [vmem:[%s6486_s1 + $0x104] ss:$8 sps:$4 sm:$0xff]   ;;  %v4453_v8 = vld [vmem:[%s6486_s1 + $0x100] ss:$8 sps:$4 sm:$0xff]   ;;  %v4485_v48 = vld [vmem:[%s6486_s1 + $0x154] ss:$8 sps:$4 sm:$0xff]  }
  0x1a   :  { %v4458_v7 = vld [vmem:[%s6486_s1 + $0x504] ss:$8 sps:$4 sm:$0xff]   ;;  %v4456_v9 = vld [vmem:[%s6486_s1 + $0x500] ss:$8 sps:$4 sm:$0xff]   ;;  %v4488_v49 = vld [vmem:[%s6486_s1 + $0x554] ss:$8 sps:$4 sm:$0xff]  }
  0x1b   :  { %2334 = vmatpush1.bf16.msra.mxu1 %v4397_v26  ;;  %v33_v10 = vld [vmem:[%s6487_s0 + $0x80] sm:$0xff]  ;;  %v4486_v53 = vld [vmem:[%s6486_s1 + $0x550] ss:$8 sps:$4 sm:$0xff]  }
  0x1c   :  { %2786 = vmatpush1.bf16.msra.mxu0 %v4398_v27  ;;  %2335 = vmatprep.subr.bf16.mxu1 %v4399_v28  ;;  %v41_v13 = vld [vmem:[%s6487_s0 + $0xc0] sm:$0xff] }
  0x1d   :  { %2787 = vmatprep.subr.bf16.mxu0 %v4401_v29  ;;  %v37_v14 = vld [vmem:[%s6487_s0 + $0xa0] sm:$0xff]  ;;  %v3734_v18 = vcombine.high %v33_v10, %v41_v13  ;;  %v3733_v28 = vcombine.low %v33_v10, %v41_v13 }
  0x1e   :  { %v45_v15 = vld [vmem:[%s6487_s0 + $0xe0] sm:$0xff] }
  0x1f   :  { %2336 = vmatpush1.bf16.msra.mxu1 %v4403_v30  ;;  %v3742_v19 = vcombine.high %v37_v14, %v45_v15  ;;  %v4467_v22 = vld [vmem:[%s6486_s1 + $0x124] ss:$8 sps:$4 sm:$0xff]   ;;  %v4465_v24 = vld [vmem:[%s6486_s1 + $0x120] ss:$8 sps:$4 sm:$0xff]   ;;  %v3741_v29 = vcombine.low %v37_v14, %v45_v15 }
  0x20   :  { %2788 = vmatpush1.bf16.msra.mxu0 %v4404_v31  ;;  %2337 = vmatprep.subr.bf16.mxu1 %v4405_v32  ;;  %v4470_v23 = vld [vmem:[%s6486_s1 + $0x524] ss:$8 sps:$4 sm:$0xff]   ;;  %v4468_v25 = vld [vmem:[%s6486_s1 + $0x520] ss:$8 sps:$4 sm:$0xff]   ;;  %v4473_v32 = vld [vmem:[%s6486_s1 + $0x134] ss:$8 sps:$4 sm:$0xff]  }
  0x21   :  { %2789 = vmatprep.subr.bf16.mxu0 %v4407_v33  ;;  %v49_v26 = vld [vmem:[%s6487_s0 + $0x100] sm:$0xff]  ;;  %v4476_v33 = vld [vmem:[%s6486_s1 + $0x534] ss:$8 sps:$4 sm:$0xff]  }
  0x22   :  { %v57_v27 = vld [vmem:[%s6487_s0 + $0x140] sm:$0xff] }
  0x23   :  { %2338 = vmatpush1.bf16.msra.mxu1 %v4409_v34  ;;  %v53_v30 = vld [vmem:[%s6487_s0 + $0x120] sm:$0xff]  ;;  %v3750_v34 = vcombine.high %v49_v26, %v57_v27 }
  0x24   :  { %2790 = vmatpush1.bf16.msra.mxu0 %v4410_v35  ;;  %2339 = vmatprep.subr.bf16.mxu1 %v4411_v36  ;;  %v61_v31 = vld [vmem:[%s6487_s0 + $0x160] sm:$0xff]  ;;  %v4471_v36 = vld [vmem:[%s6486_s1 + $0x130] ss:$8 sps:$4 sm:$0xff]  }
  0x25   :  { %2791 = vmatprep.subr.bf16.mxu0 %v4413_v37  ;;  %v3758_v35 = vcombine.high %v53_v30, %v61_v31  ;;  %v4474_v37 = vld [vmem:[%s6486_s1 + $0x530] ss:$8 sps:$4 sm:$0xff]   ;;  %v4494_v55 = vld [vmem:[%s6486_s1 + $0x564] ss:$8 sps:$4 sm:$0xff]   ;;  %v4501_v14 = vld [vmem:[%s6486_s1 + $0x180] ss:$8 sps:$4 sm:$0xff]  }
  0x26   :  { %v109_v13 = vld [vmem:[%s6487_s0 + $0x2e0] sm:$0xff] }
  0x27   :  { %2340 = vmatpush1.bf16.msra.mxu1 %v4415_v38  ;;  %v4479_v38 = vld [vmem:[%s6486_s1 + $0x144] ss:$8 sps:$4 sm:$0xff]   ;;  %v4504_v15 = vld [vmem:[%s6486_s1 + $0x580] ss:$8 sps:$4 sm:$0xff]  }
  0x28   :  { %2792 = vmatpush1.bf16.msra.mxu0 %v4416_v39  ;;  %2341 = vmatprep.subr.bf16.mxu1 %v4417_v40  ;;  %v4482_v39 = vld [vmem:[%s6486_s1 + $0x544] ss:$8 sps:$4 sm:$0xff]   ;;  %v4477_v40 = vld [vmem:[%s6486_s1 + $0x140] ss:$8 sps:$4 sm:$0xff]  }
  0x29   :  { %2793 = vmatprep.subr.bf16.mxu0 %v4419_v41  ;;  %v4480_v41 = vld [vmem:[%s6486_s1 + $0x540] ss:$8 sps:$4 sm:$0xff]  }
  0x2b   :  { %2342 = vmatpush1.bf16.msra.mxu1 %v4421_v42  ;;  %v65_v42 = vld [vmem:[%s6487_s0 + $0x180] sm:$0xff] }
  0x2c   :  { %2794 = vmatpush1.bf16.msra.mxu0 %v4422_v43  ;;  %2343 = vmatprep.subr.bf16.mxu1 %v4423_v44  ;;  %v73_v43 = vld [vmem:[%s6487_s0 + $0x1c0] sm:$0xff]  ;;  %v3749_v44 = vcombine.low %v49_v26, %v57_v27 }
  0x2d   :  { %2795 = vmatprep.subr.bf16.mxu0 %v4425_v45  ;;  %v3757_v45 = vcombine.low %v53_v30, %v61_v31  ;;  %v3766_v50 = vcombine.high %v65_v42, %v73_v43  ;;  %v113_v26 = vld [vmem:[%s6487_s0 + $0x300] sm:$0xff] }
  0x2e   :  { %v117_v30 = vld [vmem:[%s6487_s0 + $0x320] sm:$0xff] }
  0x2f   :  { %2344 = vmatpush1.bf16.msra.mxu1 %v4427_v46  ;;  %v69_v46 = vld [vmem:[%s6487_s0 + $0x1a0] sm:$0xff] }
  0x30   :  { %2796 = vmatpush1.bf16.msra.mxu0 %v4428_v47  ;;  %2345 = vmatprep.subr.bf16.mxu1 %v4429_v52  ;;  %v77_v47 = vld [vmem:[%s6487_s0 + $0x1e0] sm:$0xff]  ;;  %v4483_v52 = vld [vmem:[%s6486_s1 + $0x150] ss:$8 sps:$4 sm:$0xff]  }
  0x31   :  { %2797 = vmatprep.subr.bf16.mxu0 %v4431_v54  ;;  %v3774_v51 = vcombine.high %v69_v46, %v77_v47  ;;  %v4491_v54 = vld [vmem:[%s6486_s1 + $0x164] ss:$8 sps:$4 sm:$0xff]  }
  0x32   :  { %v125_v31 = vld [vmem:[%s6487_s0 + $0x360] sm:$0xff] }
  0x33   :  { %2346 = vmatpush1.bf16.msra.mxu1 %v4433_v56  ;;  %v4489_v56 = vld [vmem:[%s6486_s1 + $0x160] ss:$8 sps:$4 sm:$0xff]  }
  0x34   :  { %2798 = vmatpush1.bf16.msra.mxu0 %v4434_v57  ;;  %2347 = vmatprep.subr.bf16.mxu1 %v4435_v58  ;;  %v81_v57 = vld [vmem:[%s6487_s0 + $0x200] sm:$0xff] }
  0x35   :  { %2799 = vmatprep.subr.bf16.mxu0 %v4437_v59  ;;  %v89_v58 = vld [vmem:[%s6487_s0 + $0x240] sm:$0xff]  ;;  %v3765_v59 = vcombine.low %v65_v42, %v73_v43 }
  0x36   :  { %v3781_v10 = vcombine.low %v81_v57, %v89_v58  ;;  %v129_v42 = vld [vmem:[%s6487_s0 + $0x380] sm:$0xff] }
  0x37   :  { %2348 = vmatpush1.bf16.msra.mxu1 %v4439_v60  ;;  %v3773_v60 = vcombine.low %v69_v46, %v77_v47  ;;  %v137_v43 = vld [vmem:[%s6487_s0 + $0x3c0] sm:$0xff] }
  0x38   :  { %2800 = vmatpush1.bf16.msra.mxu0 %v4440_v61  ;;  %2349 = vmatprep.subr.bf16.mxu1 %v4441_v62  ;;  %v85_v61 = vld [vmem:[%s6487_s0 + $0x220] sm:$0xff] }
  0x39   :  { %2801 = vmatprep.subr.bf16.mxu0 %v4443_v63  ;;  %v93_v62 = vld [vmem:[%s6487_s0 + $0x260] sm:$0xff] }
  0x3a   :  { %v4492_v63 = vld [vmem:[%s6486_s1 + $0x560] ss:$8 sps:$4 sm:$0xff]  }
  0x3b   :  { %2350 = vmatpush1.bf16.msra.mxu1 %v4445_v0  ;;  %v4497_v0 = vld [vmem:[%s6486_s1 + $0x174] ss:$8 sps:$4 sm:$0xff]   ;;  %v133_v46 = vld [vmem:[%s6487_s0 + $0x3a0] sm:$0xff] }
  0x3c   :  { %2802 = vmatpush1.bf16.msra.mxu0 %v4446_v1  ;;  %2351 = vmatprep.subr.bf16.mxu1 %v4447_v2  ;;  %v4500_v1 = vld [vmem:[%s6486_s1 + $0x574] ss:$8 sps:$4 sm:$0xff]   ;;  %v3782_v2 = vcombine.high %v81_v57, %v89_v58  ;;  %v141_v47 = vld [vmem:[%s6487_s0 + $0x3e0] sm:$0xff]  ;;  %v18_v58 = vld [vmem:[%s6487_s0 + $0x8] sm:$0xff] }
  0x3d   :  { %2803 = vmatprep.subr.bf16.mxu0 %v4449_v3  ;;  %v3790_v3 = vcombine.high %v85_v61, %v93_v62  ;;  %v4540_v57 = vld [vmem:[%s6486_s1 + $0x5e0] ss:$8 sps:$4 sm:$0xff]  }
  0x3f   :  { %2352 = vmatpush1.bf16.msra.mxu1 %v4451_v4  ;;  %v4495_v4 = vld [vmem:[%s6486_s1 + $0x170] ss:$8 sps:$4 sm:$0xff]  }
  0x40   :  { %2804 = vmatpush1.bf16.msra.mxu0 %v4452_v5  ;;  %2434 = vmatprep.subr.bf16.mxu1 %v4455_v6  ;;  %v4498_v5 = vld [vmem:[%s6486_s1 + $0x570] ss:$8 sps:$4 sm:$0xff]   ;;  %v4503_v6 = vld [vmem:[%s6486_s1 + $0x184] ss:$8 sps:$4 sm:$0xff]  }
  0x41   :  { %2886 = vmatprep.subr.bf16.mxu0 %v4458_v7  ;;  %v4506_v7 = vld [vmem:[%s6486_s1 + $0x584] ss:$8 sps:$4 sm:$0xff]  }
  0x42   :  { %2354 = vmatmul.mubr.bf16.vlgmr.msra.gmra.mrb[0].mxu1 %v3717_v11  ;;  %v3789_v11 = vcombine.low %v85_v61, %v93_v62  ;;  %v3837_v61 = vcombine.low %v133_v46, %v141_v47  ;;  %v22_v62 = vld [vmem:[%s6487_s0 + $0x28] sm:$0xff] }
  0x43   :  { %2806 = vmatmul.mubr.bf16.vlgmr.msra.gmra.mrb[0].mxu0 %v3725_v12  ;;  %2435 = vmatpush1.bf16.msra.mxu1 %v4453_v8  ;;  %v97_v8 = vld [vmem:[%s6487_s0 + $0x280] sm:$0xff] }
  0x44   :  { %2887 = vmatpush1.bf16.msra.mxu0 %v4456_v9  ;;  %2436 = vmatprep.subr.bf16.mxu1 %v4461_v16  ;;  %v105_v9 = vld [vmem:[%s6487_s0 + $0x2c0] sm:$0xff]  ;;  %v4509_v16 = vld [vmem:[%s6486_s1 + $0x194] ss:$8 sps:$4 sm:$0xff]  }
  0x45   :  { %2888 = vmatprep.subr.bf16.mxu0 %v4464_v17  ;;  %2363 = vmatprep.mubr.bf16.mxu1 %v3734_v18  ;;  %v101_v12 = vld [vmem:[%s6487_s0 + $0x2a0] sm:$0xff]  ;;  %v4512_v17 = vld [vmem:[%s6486_s1 + $0x594] ss:$8 sps:$4 sm:$0xff]   ;;  %v3798_v18 = vcombine.high %v97_v8, %v105_v9  ;;  %v3797_v27 = vcombine.low %v97_v8, %v105_v9  ;;  %v34_v9 = vld [vmem:[%s6487_s0 + $0x88] sm:$0xff] }
  0x46   :  { %2815 = vmatprep.mubr.bf16.mxu0 %v3742_v19  ;;  %v3806_v19 = vcombine.high %v101_v12, %v109_v13  ;;  %v4549_v8 = vld [vmem:[%s6486_s1 + $0x200] ss:$8 sps:$4 sm:$0xff]  }
  0x47   :  { %2437 = vmatpush1.bf16.msra.mxu1 %v4459_v20  ;;  %v4507_v20 = vld [vmem:[%s6486_s1 + $0x190] ss:$8 sps:$4 sm:$0xff]  }
  0x48   :  { %2889 = vmatpush1.bf16.msra.mxu0 %v4462_v21  ;;  %2438 = vmatprep.subr.bf16.mxu1 %v4467_v22  ;;  %v4510_v21 = vld [vmem:[%s6486_s1 + $0x590] ss:$8 sps:$4 sm:$0xff]   ;;  %v4515_v22 = vld [vmem:[%s6486_s1 + $0x1a4] ss:$8 sps:$4 sm:$0xff]  }
  0x49   :  { %2890 = vmatprep.subr.bf16.mxu0 %v4470_v23  ;;  %v4518_v23 = vld [vmem:[%s6486_s1 + $0x5a4] ss:$8 sps:$4 sm:$0xff]  }
  0x4a   :  { %2364 = vmatmul.mubr.bf16.gmra.mrb[4].mxu1 %v3733_v28  ;;  %v3805_v28 = vcombine.low %v101_v12, %v109_v13  ;;  %v38_v13 = vld [vmem:[%s6487_s0 + $0xa8] sm:$0xff] }
  0x4b   :  { %2816 = vmatmul.mubr.bf16.gmra.mrb[4].mxu0 %v3741_v29  ;;  %2439 = vmatpush1.bf16.msra.mxu1 %v4465_v24  ;;  %v4513_v24 = vld [vmem:[%s6486_s1 + $0x1a0] ss:$8 sps:$4 sm:$0xff]  }
  0x4c   :  { %2891 = vmatpush1.bf16.msra.mxu0 %v4468_v25  ;;  %2440 = vmatprep.subr.bf16.mxu1 %v4473_v32  ;;  %v4516_v25 = vld [vmem:[%s6486_s1 + $0x5a0] ss:$8 sps:$4 sm:$0xff]   ;;  %v4521_v32 = vld [vmem:[%s6486_s1 + $0x1b4] ss:$8 sps:$4 sm:$0xff]  }
  0x4d   :  { %2892 = vmatprep.subr.bf16.mxu0 %v4476_v33  ;;  %2373 = vmatprep.mubr.bf16.mxu1 %v3750_v34  ;;  %v121_v29 = vld [vmem:[%s6487_s0 + $0x340] sm:$0xff]  ;;  %v4524_v33 = vld [vmem:[%s6486_s1 + $0x5b4] ss:$8 sps:$4 sm:$0xff]  }
  0x4e   :  { %2825 = vmatprep.mubr.bf16.mxu0 %v3758_v35  ;;  %v3814_v34 = vcombine.high %v113_v26, %v121_v29  ;;  %v3822_v35 = vcombine.high %v117_v30, %v125_v31 }
  0x4f   :  { %2441 = vmatpush1.bf16.msra.mxu1 %v4471_v36  ;;  %v4519_v36 = vld [vmem:[%s6486_s1 + $0x1b0] ss:$8 sps:$4 sm:$0xff]  }
  0x50   :  { %2893 = vmatpush1.bf16.msra.mxu0 %v4474_v37  ;;  %2442 = vmatprep.subr.bf16.mxu1 %v4479_v38  ;;  %v4522_v37 = vld [vmem:[%s6486_s1 + $0x5b0] ss:$8 sps:$4 sm:$0xff]   ;;  %v4527_v38 = vld [vmem:[%s6486_s1 + $0x1c4] ss:$8 sps:$4 sm:$0xff]  }
  0x51   :  { %2894 = vmatprep.subr.bf16.mxu0 %v4482_v39  ;;  %v4530_v39 = vld [vmem:[%s6486_s1 + $0x5c4] ss:$8 sps:$4 sm:$0xff]  }
  0x52   :  { %2374 = vmatmul.mubr.bf16.gmra.mrb[8].mxu1 %v3749_v44  ;;  %v3813_v44 = vcombine.low %v113_v26, %v121_v29  ;;  %v62_v29 = vld [vmem:[%s6487_s0 + $0x168] sm:$0xff] }
  0x53   :  { %2826 = vmatmul.mubr.bf16.gmra.mrb[8].mxu0 %v3757_v45  ;;  %2443 = vmatpush1.bf16.msra.mxu1 %v4477_v40  ;;  %v4525_v40 = vld [vmem:[%s6486_s1 + $0x1c0] ss:$8 sps:$4 sm:$0xff]   ;;  %v3821_v45 = vcombine.low %v117_v30, %v125_v31 }
  0x54   :  { %2895 = vmatpush1.bf16.msra.mxu0 %v4480_v41  ;;  %2444 = vmatprep.subr.bf16.mxu1 %v4485_v48  ;;  %v4528_v41 = vld [vmem:[%s6486_s1 + $0x5c0] ss:$8 sps:$4 sm:$0xff]   ;;  %v4533_v48 = vld [vmem:[%s6486_s1 + $0x1d4] ss:$8 sps:$4 sm:$0xff]  }
  0x55   :  { %2896 = vmatprep.subr.bf16.mxu0 %v4488_v49  ;;  %2383 = vmatprep.mubr.bf16.mxu1 %v3766_v50  ;;  %v4536_v49 = vld [vmem:[%s6486_s1 + $0x5d4] ss:$8 sps:$4 sm:$0xff]   ;;  %v3830_v50 = vcombine.high %v129_v42, %v137_v43  ;;  %v4561_v30 = vld [vmem:[%s6486_s1 + $0x220] ss:$8 sps:$4 sm:$0xff]  }
  0x56   :  { %2835 = vmatprep.mubr.bf16.mxu0 %v3774_v51  ;;  %v3838_v51 = vcombine.high %v133_v46, %v141_v47  ;;  %v4564_v31 = vld [vmem:[%s6486_s1 + $0x620] ss:$8 sps:$4 sm:$0xff]  }
  0x57   :  { %2445 = vmatpush1.bf16.msra.mxu1 %v4483_v52  ;;  %v4531_v52 = vld [vmem:[%s6486_s1 + $0x1d0] ss:$8 sps:$4 sm:$0xff]   ;;  %v70_v46 = vld [vmem:[%s6487_s0 + $0x1a8] sm:$0xff] }
  0x58   :  { %2897 = vmatpush1.bf16.msra.mxu0 %v4486_v53  ;;  %2446 = vmatprep.subr.bf16.mxu1 %v4491_v54  ;;  %v4534_v53 = vld [vmem:[%s6486_s1 + $0x5d0] ss:$8 sps:$4 sm:$0xff]   ;;  %v4539_v54 = vld [vmem:[%s6486_s1 + $0x1e4] ss:$8 sps:$4 sm:$0xff]  }
  0x59   :  { %2898 = vmatprep.subr.bf16.mxu0 %v4494_v55  ;;  %v4542_v55 = vld [vmem:[%s6486_s1 + $0x5e4] ss:$8 sps:$4 sm:$0xff]  }
  0x5a   :  { %2384 = vmatmul.mubr.bf16.gmra.mrb[12].mxu1 %v3765_v59  ;;  %v26_v59 = vld [vmem:[%s6487_s0 + $0x48] sm:$0xff] }
  0x5b   :  { %2836 = vmatmul.mubr.bf16.gmra.mrb[12].mxu0 %v3773_v60  ;;  %2447 = vmatpush1.bf16.msra.mxu1 %v4489_v56  ;;  %v4537_v56 = vld [vmem:[%s6486_s1 + $0x1e0] ss:$8 sps:$4 sm:$0xff]   ;;  %v3829_v60 = vcombine.low %v129_v42, %v137_v43 }
  0x5c   :  { %2899 = vmatpush1.bf16.msra.mxu0 %v4492_v63  ;;  %2448 = vmatprep.subr.bf16.mxu1 %v4497_v0  ;;  %v30_v63 = vld [vmem:[%s6487_s0 + $0x68] sm:$0xff]  ;;  %v4545_v0 = vld [vmem:[%s6486_s1 + $0x1f4] ss:$8 sps:$4 sm:$0xff]  }
  0x5d   :  { %2900 = vmatprep.subr.bf16.mxu0 %v4500_v1  ;;  %2393 = vmatprep.mubr.bf16.mxu1 %v3782_v2  ;;  %v4548_v1 = vld [vmem:[%s6486_s1 + $0x5f4] ss:$8 sps:$4 sm:$0xff]   ;;  %v3720_v2 = vcombine.high %v18_v58, %v26_v59  ;;  %v3727_v12 = vcombine.low %v22_v62, %v30_v63  ;;  %v66_v42 = vld [vmem:[%s6487_s0 + $0x188] sm:$0xff] }
  0x5e   :  { %2845 = vmatprep.mubr.bf16.mxu0 %v3790_v3  ;;  %v3728_v3 = vcombine.high %v22_v62, %v30_v63  ;;  %v78_v47 = vld [vmem:[%s6487_s0 + $0x1e8] sm:$0xff] }
  0x5f   :  { %2449 = vmatpush1.bf16.msra.mxu1 %v4495_v4  ;;  %v4543_v4 = vld [vmem:[%s6486_s1 + $0x1f0] ss:$8 sps:$4 sm:$0xff]   ;;  %v86_v62 = vld [vmem:[%s6487_s0 + $0x228] sm:$0xff] }
  0x60   :  { %2901 = vmatpush1.bf16.msra.mxu0 %v4498_v5  ;;  %2450 = vmatprep.subr.bf16.mxu1 %v4503_v6  ;;  %v4546_v5 = vld [vmem:[%s6486_s1 + $0x5f0] ss:$8 sps:$4 sm:$0xff]   ;;  %v4551_v6 = vld [vmem:[%s6486_s1 + $0x204] ss:$8 sps:$4 sm:$0xff]  }
  0x61   :  { %2902 = vmatprep.subr.bf16.mxu0 %v4506_v7  ;;  %v4554_v7 = vld [vmem:[%s6486_s1 + $0x604] ss:$8 sps:$4 sm:$0xff]  }
  0x62   :  { %2394 = vmatmul.mubr.bf16.gmra.mrb[16].mxu1 %v3781_v10  ;;  %v42_v10 = vld [vmem:[%s6487_s0 + $0xc8] sm:$0xff] }
  0x63   :  { %2846 = vmatmul.mubr.bf16.gmra.mrb[16].mxu0 %v3789_v11  ;;  %2451 = vmatpush1.bf16.msra.mxu1 %v4501_v14  ;;  %v3719_v11 = vcombine.low %v18_v58, %v26_v59  ;;  %v46_v14 = vld [vmem:[%s6487_s0 + $0xe8] sm:$0xff]  ;;  %v3735_v26 = vcombine.low %v34_v9, %v42_v10 }
  0x64   :  { %2903 = vmatpush1.bf16.msra.mxu0 %v4504_v15  ;;  %2452 = vmatprep.subr.bf16.mxu1 %v4509_v16  ;;  %v4552_v15 = vld [vmem:[%s6486_s1 + $0x600] ss:$8 sps:$4 sm:$0xff]   ;;  %v4557_v16 = vld [vmem:[%s6486_s1 + $0x214] ss:$8 sps:$4 sm:$0xff]  }
  0x65   :  { %2904 = vmatprep.subr.bf16.mxu0 %v4512_v17  ;;  %2403 = vmatprep.mubr.bf16.mxu1 %v3798_v18  ;;  %v4560_v17 = vld [vmem:[%s6486_s1 + $0x614] ss:$8 sps:$4 sm:$0xff]   ;;  %v3736_v18 = vcombine.high %v34_v9, %v42_v10  ;;  %v82_v58 = vld [vmem:[%s6487_s0 + $0x208] sm:$0xff] }
  0x66   :  { %2855 = vmatprep.mubr.bf16.mxu0 %v3806_v19  ;;  %v3744_v19 = vcombine.high %v38_v13, %v46_v14  ;;  %v90_v59 = vld [vmem:[%s6487_s0 + $0x248] sm:$0xff] }
  0x67   :  { %2453 = vmatpush1.bf16.msra.mxu1 %v4507_v20  ;;  %v4555_v20 = vld [vmem:[%s6486_s1 + $0x210] ss:$8 sps:$4 sm:$0xff]   ;;  %v94_v63 = vld [vmem:[%s6487_s0 + $0x268] sm:$0xff] }
  0x68   :  { %2905 = vmatpush1.bf16.msra.mxu0 %v4510_v21  ;;  %2454 = vmatprep.subr.bf16.mxu1 %v4515_v22  ;;  %v4558_v21 = vld [vmem:[%s6486_s1 + $0x610] ss:$8 sps:$4 sm:$0xff]   ;;  %v4563_v22 = vld [vmem:[%s6486_s1 + $0x224] ss:$8 sps:$4 sm:$0xff]   ;;  %v4600_v9 = vld [vmem:[%s6486_s1 + $0x680] ss:$8 sps:$4 sm:$0xff]  }
  0x69   :  { %2906 = vmatprep.subr.bf16.mxu0 %v4518_v23  ;;  %v4566_v23 = vld [vmem:[%s6486_s1 + $0x624] ss:$8 sps:$4 sm:$0xff]  }
  0x6a   :  { %2404 = vmatmul.mubr.bf16.gmra.mrb[20].mxu1 %v3797_v27  ;;  %v3743_v27 = vcombine.low %v38_v13, %v46_v14  ;;  %v98_v10 = vld [vmem:[%s6487_s0 + $0x288] sm:$0xff]  ;;  %v3791_v13 = vcombine.low %v86_v62, %v94_v63 }
  0x6b   :  { %2856 = vmatmul.mubr.bf16.gmra.mrb[20].mxu0 %v3805_v28  ;;  %2455 = vmatpush1.bf16.msra.mxu1 %v4513_v24  ;;  %v50_v24 = vld [vmem:[%s6487_s0 + $0x108] sm:$0xff] }
  0x6c   :  { %2907 = vmatpush1.bf16.msra.mxu0 %v4516_v25  ;;  %2456 = vmatprep.subr.bf16.mxu1 %v4521_v32  ;;  %v58_v25 = vld [vmem:[%s6487_s0 + $0x148] sm:$0xff]  ;;  %v4569_v32 = vld [vmem:[%s6486_s1 + $0x234] ss:$8 sps:$4 sm:$0xff]  }
  0x6d   :  { %2908 = vmatprep.subr.bf16.mxu0 %v4524_v33  ;;  %2413 = vmatprep.mubr.bf16.mxu1 %v3814_v34  ;;  %v54_v28 = vld [vmem:[%s6487_s0 + $0x128] sm:$0xff]  ;;  %v4572_v33 = vld [vmem:[%s6486_s1 + $0x634] ss:$8 sps:$4 sm:$0xff]   ;;  %v3752_v34 = vcombine.high %v50_v24, %v58_v25  ;;  %v3751_v43 = vcombine.low %v50_v24, %v58_v25 }
  0x6e   :  { %2865 = vmatprep.mubr.bf16.mxu0 %v3822_v35  ;;  %v3760_v35 = vcombine.high %v54_v28, %v62_v29  ;;  %v102_v14 = vld [vmem:[%s6487_s0 + $0x2a8] sm:$0xff] }
  0x6f   :  { %2457 = vmatpush1.bf16.msra.mxu1 %v4519_v36  ;;  %v4567_v36 = vld [vmem:[%s6486_s1 + $0x230] ss:$8 sps:$4 sm:$0xff]   ;;  %v4609_v24 = vld [vmem:[%s6486_s1 + $0x2a0] ss:$8 sps:$4 sm:$0xff]  }
  0x70   :  { %2909 = vmatpush1.bf16.msra.mxu0 %v4522_v37  ;;  %2458 = vmatprep.subr.bf16.mxu1 %v4527_v38  ;;  %v4570_v37 = vld [vmem:[%s6486_s1 + $0x630] ss:$8 sps:$4 sm:$0xff]   ;;  %v4575_v38 = vld [vmem:[%s6486_s1 + $0x244] ss:$8 sps:$4 sm:$0xff]  }
  0x71   :  { %2910 = vmatprep.subr.bf16.mxu0 %v4530_v39  ;;  %v4578_v39 = vld [vmem:[%s6486_s1 + $0x644] ss:$8 sps:$4 sm:$0xff]  }
  0x72   :  { %2414 = vmatmul.mubr.bf16.gmra.mrb[24].mxu1 %v3813_v44  ;;  %v3759_v44 = vcombine.low %v54_v28, %v62_v29  ;;  %v114_v25 = vld [vmem:[%s6487_s0 + $0x308] sm:$0xff] }
  0x73   :  { %2866 = vmatmul.mubr.bf16.gmra.mrb[24].mxu0 %v3821_v45  ;;  %2459 = vmatpush1.bf16.msra.mxu1 %v4525_v40  ;;  %v4573_v40 = vld [vmem:[%s6486_s1 + $0x240] ss:$8 sps:$4 sm:$0xff]  }
  0x74   :  { %2911 = vmatpush1.bf16.msra.mxu0 %v4528_v41  ;;  %2460 = vmatprep.subr.bf16.mxu1 %v4533_v48  ;;  %v4576_v41 = vld [vmem:[%s6486_s1 + $0x640] ss:$8 sps:$4 sm:$0xff]   ;;  %v4581_v48 = vld [vmem:[%s6486_s1 + $0x254] ss:$8 sps:$4 sm:$0xff]  }
  0x75   :  { %2912 = vmatprep.subr.bf16.mxu0 %v4536_v49  ;;  %2423 = vmatprep.mubr.bf16.mxu1 %v3830_v50  ;;  %v74_v45 = vld [vmem:[%s6487_s0 + $0x1c8] sm:$0xff]  ;;  %v4584_v49 = vld [vmem:[%s6486_s1 + $0x654] ss:$8 sps:$4 sm:$0xff]  }
  0x76   :  { %2875 = vmatprep.mubr.bf16.mxu0 %v3838_v51  ;;  %v3768_v50 = vcombine.high %v66_v42, %v74_v45  ;;  %v3776_v51 = vcombine.high %v70_v46, %v78_v47  ;;  %v118_v29 = vld [vmem:[%s6487_s0 + $0x328] sm:$0xff] }
  0x77   :  { %2461 = vmatpush1.bf16.msra.mxu1 %v4531_v52  ;;  %v4579_v52 = vld [vmem:[%s6486_s1 + $0x250] ss:$8 sps:$4 sm:$0xff]  }
  0x78   :  { %2913 = vmatpush1.bf16.msra.mxu0 %v4534_v53  ;;  %2462 = vmatprep.subr.bf16.mxu1 %v4539_v54  ;;  %v4582_v53 = vld [vmem:[%s6486_s1 + $0x650] ss:$8 sps:$4 sm:$0xff]   ;;  %v4587_v54 = vld [vmem:[%s6486_s1 + $0x264] ss:$8 sps:$4 sm:$0xff]  }
  0x79   :  { %2914 = vmatprep.subr.bf16.mxu0 %v4542_v55  ;;  %v4590_v55 = vld [vmem:[%s6486_s1 + $0x664] ss:$8 sps:$4 sm:$0xff]  }
  0x7a   :  { %2424 = vmatmul.mubr.bf16.gmra.mrb[28].mxu1 %v3829_v60  ;;  %v3767_v60 = vcombine.low %v66_v42, %v74_v45  ;;  %v142_v45 = vld [vmem:[%s6487_s0 + $0x3e8] sm:$0xff] }
  0x7b   :  { %2876 = vmatmul.mubr.bf16.gmra.mrb[28].mxu0 %v3837_v61  ;;  %2463 = vmatpush1.bf16.msra.mxu1 %v4537_v56  ;;  %v4585_v56 = vld [vmem:[%s6486_s1 + $0x260] ss:$8 sps:$4 sm:$0xff]   ;;  %v3775_v61 = vcombine.low %v70_v46, %v78_v47 }
  0x7c   :  { %2915 = vmatpush1.bf16.msra.mxu0 %v4540_v57  ;;  %2464 = vmatprep.subr.bf16.mxu1 %v4545_v0  ;;  %v4588_v57 = vld [vmem:[%s6486_s1 + $0x660] ss:$8 sps:$4 sm:$0xff]   ;;  %v4593_v0 = vld [vmem:[%s6486_s1 + $0x274] ss:$8 sps:$4 sm:$0xff]  }
  0x7d   :  { %2916 = vmatprep.subr.bf16.mxu0 %v4548_v1  ;;  %2466 = vmatprep.mubr.bf16.mxu1 %v3720_v2  ;;  %v4596_v1 = vld [vmem:[%s6486_s1 + $0x674] ss:$8 sps:$4 sm:$0xff]   ;;  %v3784_v2 = vcombine.high %v82_v58, %v90_v59  ;;  %v4621_v46 = vld [vmem:[%s6486_s1 + $0x2c0] ss:$8 sps:$4 sm:$0xff]  }
  0x7e   :  { %2918 = vmatprep.mubr.bf16.mxu0 %v3728_v3  ;;  %v3792_v3 = vcombine.high %v86_v62, %v94_v63  ;;  %v4624_v47 = vld [vmem:[%s6486_s1 + $0x6c0] ss:$8 sps:$4 sm:$0xff]   ;;  %v23_v62 = vld [vmem:[%s6487_s0 + $0x30] sm:$0xff] }
  0x7f   :  { %2465 = vmatpush1.bf16.msra.mxu1 %v4543_v4  ;;  %v4591_v4 = vld [vmem:[%s6486_s1 + $0x270] ss:$8 sps:$4 sm:$0xff]  }
  0x80   :  { %2917 = vmatpush1.bf16.msra.mxu0 %v4546_v5  ;;  %2547 = vmatprep.subr.bf16.mxu1 %v4551_v6  ;;  %v4594_v5 = vld [vmem:[%s6486_s1 + $0x670] ss:$8 sps:$4 sm:$0xff]   ;;  %v4599_v6 = vld [vmem:[%s6486_s1 + $0x284] ss:$8 sps:$4 sm:$0xff]  }
  0x81   :  { %2999 = vmatprep.subr.bf16.mxu0 %v4554_v7  ;;  %v4602_v7 = vld [vmem:[%s6486_s1 + $0x684] ss:$8 sps:$4 sm:$0xff]   ;;  %v31_v63 = vld [vmem:[%s6487_s0 + $0x70] sm:$0xff] }
  0x82   :  { %2467 = vmatmul.mubr.bf16.vlgmr.msra.gmra.mrb[0].mxu1 %v3719_v11  ;;  %v106_v11 = vld [vmem:[%s6487_s0 + $0x2c8] sm:$0xff] }
  0x83   :  { %2919 = vmatmul.mubr.bf16.vlgmr.msra.gmra.mrb[0].mxu0 %v3727_v12  ;;  %2548 = vmatpush1.bf16.msra.mxu1 %v4549_v8  ;;  %v4597_v8 = vld [vmem:[%s6486_s1 + $0x280] ss:$8 sps:$4 sm:$0xff]   ;;  %v3783_v12 = vcombine.low %v82_v58, %v90_v59  ;;  %v19_v58 = vld [vmem:[%s6487_s0 + $0x10] sm:$0xff] }
  0x84   :  { %3000 = vmatpush1.bf16.msra.mxu0 %v4552_v15  ;;  %2549 = vmatprep.subr.bf16.mxu1 %v4557_v16  ;;  %v110_v15 = vld [vmem:[%s6487_s0 + $0x2e8] sm:$0xff]  ;;  %v4605_v16 = vld [vmem:[%s6486_s1 + $0x294] ss:$8 sps:$4 sm:$0xff]  }
  0x85   :  { %3001 = vmatprep.subr.bf16.mxu0 %v4560_v17  ;;  %2476 = vmatprep.mubr.bf16.mxu1 %v3736_v18  ;;  %v4608_v17 = vld [vmem:[%s6486_s1 + $0x694] ss:$8 sps:$4 sm:$0xff]   ;;  %v3800_v18 = vcombine.high %v98_v10, %v106_v11  ;;  %v3807_v28 = vcombine.low %v102_v14, %v110_v15 }
  0x86   :  { %2928 = vmatprep.mubr.bf16.mxu0 %v3744_v19  ;;  %v3808_v19 = vcombine.high %v102_v14, %v110_v15  ;;  %v39_v14 = vld [vmem:[%s6487_s0 + $0xb0] sm:$0xff] }
  0x87   :  { %2550 = vmatpush1.bf16.msra.mxu1 %v4555_v20  ;;  %v4603_v20 = vld [vmem:[%s6486_s1 + $0x290] ss:$8 sps:$4 sm:$0xff]  }
  0x88   :  { %3002 = vmatpush1.bf16.msra.mxu0 %v4558_v21  ;;  %2551 = vmatprep.subr.bf16.mxu1 %v4563_v22  ;;  %v4606_v21 = vld [vmem:[%s6486_s1 + $0x690] ss:$8 sps:$4 sm:$0xff]   ;;  %v4611_v22 = vld [vmem:[%s6486_s1 + $0x2a4] ss:$8 sps:$4 sm:$0xff]  }
  0x89   :  { %3003 = vmatprep.subr.bf16.mxu0 %v4566_v23  ;;  %v4614_v23 = vld [vmem:[%s6486_s1 + $0x6a4] ss:$8 sps:$4 sm:$0xff]   ;;  %v47_v15 = vld [vmem:[%s6487_s0 + $0xf0] sm:$0xff] }
  0x8a   :  { %2477 = vmatmul.mubr.bf16.gmra.mrb[4].mxu1 %v3735_v26  ;;  %v122_v26 = vld [vmem:[%s6487_s0 + $0x348] sm:$0xff] }
  0x8b   :  { %2929 = vmatmul.mubr.bf16.gmra.mrb[4].mxu0 %v3743_v27  ;;  %2552 = vmatpush1.bf16.msra.mxu1 %v4561_v30  ;;  %v3799_v27 = vcombine.low %v98_v10, %v106_v11  ;;  %v126_v30 = vld [vmem:[%s6487_s0 + $0x368] sm:$0xff]  ;;  %v3815_v42 = vcombine.low %v114_v25, %v122_v26  ;;  %v35_v10 = vld [vmem:[%s6487_s0 + $0x90] sm:$0xff] }
  0x8c   :  { %3004 = vmatpush1.bf16.msra.mxu0 %v4564_v31  ;;  %2553 = vmatprep.subr.bf16.mxu1 %v4569_v32  ;;  %v4612_v31 = vld [vmem:[%s6486_s1 + $0x6a0] ss:$8 sps:$4 sm:$0xff]   ;;  %v4617_v32 = vld [vmem:[%s6486_s1 + $0x2b4] ss:$8 sps:$4 sm:$0xff]  }
  0x8d   :  { %3005 = vmatprep.subr.bf16.mxu0 %v4572_v33  ;;  %2486 = vmatprep.mubr.bf16.mxu1 %v3752_v34  ;;  %v4620_v33 = vld [vmem:[%s6486_s1 + $0x6b4] ss:$8 sps:$4 sm:$0xff]   ;;  %v3816_v34 = vcombine.high %v114_v25, %v122_v26  ;;  %v4660_v25 = vld [vmem:[%s6486_s1 + $0x720] ss:$8 sps:$4 sm:$0xff]  }
  0x8e   :  { %2938 = vmatprep.mubr.bf16.mxu0 %v3760_v35  ;;  %v3824_v35 = vcombine.high %v118_v29, %v126_v30  ;;  %v43_v11 = vld [vmem:[%s6487_s0 + $0xd0] sm:$0xff] }
  0x8f   :  { %2554 = vmatpush1.bf16.msra.mxu1 %v4567_v36  ;;  %v4615_v36 = vld [vmem:[%s6486_s1 + $0x2b0] ss:$8 sps:$4 sm:$0xff]  }
  0x90   :  { %3006 = vmatpush1.bf16.msra.mxu0 %v4570_v37  ;;  %2555 = vmatprep.subr.bf16.mxu1 %v4575_v38  ;;  %v4618_v37 = vld [vmem:[%s6486_s1 + $0x6b0] ss:$8 sps:$4 sm:$0xff]   ;;  %v4623_v38 = vld [vmem:[%s6486_s1 + $0x2c4] ss:$8 sps:$4 sm:$0xff]  }
  0x91   :  { %3007 = vmatprep.subr.bf16.mxu0 %v4578_v39  ;;  %v4626_v39 = vld [vmem:[%s6486_s1 + $0x6c4] ss:$8 sps:$4 sm:$0xff]   ;;  %v51_v26 = vld [vmem:[%s6487_s0 + $0x110] sm:$0xff] }
  0x92   :  { %2487 = vmatmul.mubr.bf16.gmra.mrb[8].mxu1 %v3751_v43  ;;  %v3823_v43 = vcombine.low %v118_v29, %v126_v30  ;;  %v3745_v29 = vcombine.low %v39_v14, %v47_v15  ;;  %v55_v30 = vld [vmem:[%s6487_s0 + $0x130] sm:$0xff] }
  0x93   :  { %2939 = vmatmul.mubr.bf16.gmra.mrb[8].mxu0 %v3759_v44  ;;  %2556 = vmatpush1.bf16.msra.mxu1 %v4573_v40  ;;  %v130_v40 = vld [vmem:[%s6487_s0 + $0x388] sm:$0xff] }
  0x94   :  { %3008 = vmatpush1.bf16.msra.mxu0 %v4576_v41  ;;  %2557 = vmatprep.subr.bf16.mxu1 %v4581_v48  ;;  %v138_v41 = vld [vmem:[%s6487_s0 + $0x3c8] sm:$0xff]  ;;  %v4629_v48 = vld [vmem:[%s6486_s1 + $0x2d4] ss:$8 sps:$4 sm:$0xff]  }
  0x95   :  { %3009 = vmatprep.subr.bf16.mxu0 %v4584_v49  ;;  %2496 = vmatprep.mubr.bf16.mxu1 %v3768_v50  ;;  %v134_v44 = vld [vmem:[%s6487_s0 + $0x3a8] sm:$0xff]  ;;  %v4632_v49 = vld [vmem:[%s6486_s1 + $0x6d4] ss:$8 sps:$4 sm:$0xff]   ;;  %v3832_v50 = vcombine.high %v130_v40, %v138_v41  ;;  %v3831_v59 = vcombine.low %v130_v40, %v138_v41 }
  0x96   :  { %2948 = vmatprep.mubr.bf16.mxu0 %v3776_v51  ;;  %v3840_v51 = vcombine.high %v134_v44, %v142_v45  ;;  %v67_v40 = vld [vmem:[%s6487_s0 + $0x190] sm:$0xff] }
  0x97   :  { %2558 = vmatpush1.bf16.msra.mxu1 %v4579_v52  ;;  %v4627_v52 = vld [vmem:[%s6486_s1 + $0x2d0] ss:$8 sps:$4 sm:$0xff]  }
  0x98   :  { %3010 = vmatpush1.bf16.msra.mxu0 %v4582_v53  ;;  %2559 = vmatprep.subr.bf16.mxu1 %v4587_v54  ;;  %v4630_v53 = vld [vmem:[%s6486_s1 + $0x6d0] ss:$8 sps:$4 sm:$0xff]   ;;  %v4635_v54 = vld [vmem:[%s6486_s1 + $0x2e4] ss:$8 sps:$4 sm:$0xff]  }
  0x99   :  { %3011 = vmatprep.subr.bf16.mxu0 %v4590_v55  ;;  %v4638_v55 = vld [vmem:[%s6486_s1 + $0x6e4] ss:$8 sps:$4 sm:$0xff]  }
  0x9a   :  { %2497 = vmatmul.mubr.bf16.gmra.mrb[12].mxu1 %v3767_v60  ;;  %v3839_v60 = vcombine.low %v134_v44, %v142_v45  ;;  %v71_v44 = vld [vmem:[%s6487_s0 + $0x1b0] sm:$0xff] }
  0x9b   :  { %2949 = vmatmul.mubr.bf16.gmra.mrb[12].mxu0 %v3775_v61  ;;  %2560 = vmatpush1.bf16.msra.mxu1 %v4585_v56  ;;  %v4633_v56 = vld [vmem:[%s6486_s1 + $0x2e0] ss:$8 sps:$4 sm:$0xff]   ;;  %v27_v61 = vld [vmem:[%s6487_s0 + $0x50] sm:$0xff] }
  0x9c   :  { %3012 = vmatpush1.bf16.msra.mxu0 %v4588_v57  ;;  %2561 = vmatprep.subr.bf16.mxu1 %v4593_v0  ;;  %v4636_v57 = vld [vmem:[%s6486_s1 + $0x6e0] ss:$8 sps:$4 sm:$0xff]   ;;  %v4641_v0 = vld [vmem:[%s6486_s1 + $0x2f4] ss:$8 sps:$4 sm:$0xff]  }
  0x9d   :  { %3013 = vmatprep.subr.bf16.mxu0 %v4596_v1  ;;  %2506 = vmatprep.mubr.bf16.mxu1 %v3784_v2  ;;  %v4644_v1 = vld [vmem:[%s6486_s1 + $0x6f4] ss:$8 sps:$4 sm:$0xff]   ;;  %v3722_v2 = vcombine.high %v19_v58, %v27_v61 }
  0x9e   :  { %2958 = vmatprep.mubr.bf16.mxu0 %v3792_v3  ;;  %v3730_v3 = vcombine.high %v23_v62, %v31_v63  ;;  %v79_v45 = vld [vmem:[%s6487_s0 + $0x1f0] sm:$0xff] }
  0x9f   :  { %2562 = vmatpush1.bf16.msra.mxu1 %v4591_v4  ;;  %v4639_v4 = vld [vmem:[%s6486_s1 + $0x2f0] ss:$8 sps:$4 sm:$0xff]  }
  0xa0   :  { %3014 = vmatpush1.bf16.msra.mxu0 %v4594_v5  ;;  %2563 = vmatprep.subr.bf16.mxu1 %v4599_v6  ;;  %v4642_v5 = vld [vmem:[%s6486_s1 + $0x6f0] ss:$8 sps:$4 sm:$0xff]   ;;  %v4647_v6 = vld [vmem:[%s6486_s1 + $0x304] ss:$8 sps:$4 sm:$0xff]  }
  0xa1   :  { %3015 = vmatprep.subr.bf16.mxu0 %v4602_v7  ;;  %v4650_v7 = vld [vmem:[%s6486_s1 + $0x704] ss:$8 sps:$4 sm:$0xff]  }
  0xa2   :  { %2507 = vmatmul.mubr.bf16.gmra.mrb[16].mxu1 %v3783_v12  ;;  %v3721_v12 = vcombine.low %v19_v58, %v27_v61  ;;  %v3777_v58 = vcombine.low %v71_v44, %v79_v45  ;;  %v95_v61 = vld [vmem:[%s6487_s0 + $0x270] sm:$0xff] }
  0xa3   :  { %2959 = vmatmul.mubr.bf16.gmra.mrb[16].mxu0 %v3791_v13  ;;  %2564 = vmatpush1.bf16.msra.mxu1 %v4597_v8  ;;  %v4645_v8 = vld [vmem:[%s6486_s1 + $0x300] ss:$8 sps:$4 sm:$0xff]   ;;  %v3729_v13 = vcombine.low %v23_v62, %v31_v63 }
  0xa4   :  { %3016 = vmatpush1.bf16.msra.mxu0 %v4600_v9  ;;  %2565 = vmatprep.subr.bf16.mxu1 %v4605_v16  ;;  %v4648_v9 = vld [vmem:[%s6486_s1 + $0x700] ss:$8 sps:$4 sm:$0xff]   ;;  %v4653_v16 = vld [vmem:[%s6486_s1 + $0x314] ss:$8 sps:$4 sm:$0xff]  }
  0xa5   :  { %3017 = vmatprep.subr.bf16.mxu0 %v4608_v17  ;;  %2516 = vmatprep.mubr.bf16.mxu1 %v3800_v18  ;;  %v4656_v17 = vld [vmem:[%s6486_s1 + $0x714] ss:$8 sps:$4 sm:$0xff]   ;;  %v3738_v18 = vcombine.high %v35_v10, %v43_v11  ;;  %v4681_v62 = vld [vmem:[%s6486_s1 + $0x360] ss:$8 sps:$4 sm:$0xff]  }
  0xa6   :  { %2968 = vmatprep.mubr.bf16.mxu0 %v3808_v19  ;;  %v3746_v19 = vcombine.high %v39_v14, %v47_v15  ;;  %v4684_v63 = vld [vmem:[%s6486_s1 + $0x760] ss:$8 sps:$4 sm:$0xff]  }
  0xa7   :  { %2566 = vmatpush1.bf16.msra.mxu1 %v4603_v20  ;;  %v4651_v20 = vld [vmem:[%s6486_s1 + $0x310] ss:$8 sps:$4 sm:$0xff]   ;;  %v4693_v14 = vld [vmem:[%s6486_s1 + $0x380] ss:$8 sps:$4 sm:$0xff]  }
  0xa8   :  { %3018 = vmatpush1.bf16.msra.mxu0 %v4606_v21  ;;  %2567 = vmatprep.subr.bf16.mxu1 %v4611_v22  ;;  %v4654_v21 = vld [vmem:[%s6486_s1 + $0x710] ss:$8 sps:$4 sm:$0xff]   ;;  %v4659_v22 = vld [vmem:[%s6486_s1 + $0x324] ss:$8 sps:$4 sm:$0xff]   ;;  %v4696_v15 = vld [vmem:[%s6486_s1 + $0x780] ss:$8 sps:$4 sm:$0xff]  }
  0xa9   :  { %3019 = vmatprep.subr.bf16.mxu0 %v4614_v23  ;;  %v4662_v23 = vld [vmem:[%s6486_s1 + $0x724] ss:$8 sps:$4 sm:$0xff]  }
  0xaa   :  { %2517 = vmatmul.mubr.bf16.gmra.mrb[20].mxu1 %v3799_v27  ;;  %v59_v27 = vld [vmem:[%s6487_s0 + $0x150] sm:$0xff] }
  0xab   :  { %2969 = vmatmul.mubr.bf16.gmra.mrb[20].mxu0 %v3807_v28  ;;  %2568 = vmatpush1.bf16.msra.mxu1 %v4609_v24  ;;  %v4657_v24 = vld [vmem:[%s6486_s1 + $0x320] ss:$8 sps:$4 sm:$0xff]   ;;  %v3737_v28 = vcombine.low %v35_v10, %v43_v11  ;;  %v3753_v41 = vcombine.low %v51_v26, %v59_v27  ;;  %v107_v11 = vld [vmem:[%s6487_s0 + $0x2d0] sm:$0xff] }
  0xac   :  { %3020 = vmatpush1.bf16.msra.mxu0 %v4612_v31  ;;  %2569 = vmatprep.subr.bf16.mxu1 %v4617_v32  ;;  %v63_v31 = vld [vmem:[%s6487_s0 + $0x170] sm:$0xff] }
  0xad   :  { %3021 = vmatprep.subr.bf16.mxu0 %v4620_v33  ;;  %2526 = vmatprep.mubr.bf16.mxu1 %v3816_v34  ;;  %v4665_v32 = vld [vmem:[%s6486_s1 + $0x334] ss:$8 sps:$4 sm:$0xff]   ;;  %v3754_v34 = vcombine.high %v51_v26, %v59_v27 }
  0xae   :  { %2978 = vmatprep.mubr.bf16.mxu0 %v3824_v35  ;;  %v4668_v33 = vld [vmem:[%s6486_s1 + $0x734] ss:$8 sps:$4 sm:$0xff]   ;;  %v3762_v35 = vcombine.high %v55_v30, %v63_v31 }
  0xaf   :  { %2570 = vmatpush1.bf16.msra.mxu1 %v4615_v36  ;;  %v4663_v36 = vld [vmem:[%s6486_s1 + $0x330] ss:$8 sps:$4 sm:$0xff]  }
  0xb0   :  { %3022 = vmatpush1.bf16.msra.mxu0 %v4618_v37  ;;  %2571 = vmatprep.subr.bf16.mxu1 %v4623_v38  ;;  %v4666_v37 = vld [vmem:[%s6486_s1 + $0x730] ss:$8 sps:$4 sm:$0xff]   ;;  %v4671_v38 = vld [vmem:[%s6486_s1 + $0x344] ss:$8 sps:$4 sm:$0xff]  }
  0xb1   :  { %3023 = vmatprep.subr.bf16.mxu0 %v4626_v39  ;;  %v4674_v39 = vld [vmem:[%s6486_s1 + $0x744] ss:$8 sps:$4 sm:$0xff]   ;;  %v123_v27 = vld [vmem:[%s6487_s0 + $0x350] sm:$0xff] }
  0xb2   :  { %2527 = vmatmul.mubr.bf16.gmra.mrb[24].mxu1 %v3815_v42  ;;  %v3761_v42 = vcombine.low %v55_v30, %v63_v31  ;;  %v4705_v30 = vld [vmem:[%s6486_s1 + $0x3a0] ss:$8 sps:$4 sm:$0xff]  }
  0xb3   :  { %2979 = vmatmul.mubr.bf16.gmra.mrb[24].mxu0 %v3823_v43  ;;  %2572 = vmatpush1.bf16.msra.mxu1 %v4621_v46  ;;  %v75_v43 = vld [vmem:[%s6487_s0 + $0x1d0] sm:$0xff]  ;;  %v4669_v46 = vld [vmem:[%s6486_s1 + $0x340] ss:$8 sps:$4 sm:$0xff]  }
  0xb4   :  { %3024 = vmatpush1.bf16.msra.mxu0 %v4624_v47  ;;  %2573 = vmatprep.subr.bf16.mxu1 %v4629_v48  ;;  %v4672_v47 = vld [vmem:[%s6486_s1 + $0x740] ss:$8 sps:$4 sm:$0xff]   ;;  %v4677_v48 = vld [vmem:[%s6486_s1 + $0x354] ss:$8 sps:$4 sm:$0xff]  }
  0xb5   :  { %3025 = vmatprep.subr.bf16.mxu0 %v4632_v49  ;;  %2536 = vmatprep.mubr.bf16.mxu1 %v3832_v50  ;;  %v4680_v49 = vld [vmem:[%s6486_s1 + $0x754] ss:$8 sps:$4 sm:$0xff]   ;;  %v3770_v50 = vcombine.high %v67_v40, %v75_v43  ;;  %v4708_v31 = vld [vmem:[%s6486_s1 + $0x7a0] ss:$8 sps:$4 sm:$0xff]  }
  0xb6   :  { %2988 = vmatprep.mubr.bf16.mxu0 %v3840_v51  ;;  %v3778_v51 = vcombine.high %v71_v44, %v79_v45  ;;  %v135_v44 = vld [vmem:[%s6487_s0 + $0x3b0] sm:$0xff] }
  0xb7   :  { %2574 = vmatpush1.bf16.msra.mxu1 %v4627_v52  ;;  %v4675_v52 = vld [vmem:[%s6486_s1 + $0x350] ss:$8 sps:$4 sm:$0xff]  }
  0xb8   :  { %3026 = vmatpush1.bf16.msra.mxu0 %v4630_v53  ;;  %2575 = vmatprep.subr.bf16.mxu1 %v4635_v54  ;;  %v4678_v53 = vld [vmem:[%s6486_s1 + $0x750] ss:$8 sps:$4 sm:$0xff]   ;;  %v4683_v54 = vld [vmem:[%s6486_s1 + $0x364] ss:$8 sps:$4 sm:$0xff]  }
  0xb9   :  { %3027 = vmatprep.subr.bf16.mxu0 %v4638_v55  ;;  %v4686_v55 = vld [vmem:[%s6486_s1 + $0x764] ss:$8 sps:$4 sm:$0xff]   ;;  %v143_v45 = vld [vmem:[%s6487_s0 + $0x3f0] sm:$0xff] }
  0xba   :  { %2537 = vmatmul.mubr.bf16.gmra.mrb[28].mxu1 %v3831_v59  ;;  %v91_v59 = vld [vmem:[%s6487_s0 + $0x250] sm:$0xff] }
  0xbb   :  { %2989 = vmatmul.mubr.bf16.gmra.mrb[28].mxu0 %v3839_v60  ;;  %2576 = vmatpush1.bf16.msra.mxu1 %v4633_v56  ;;  %v83_v56 = vld [vmem:[%s6487_s0 + $0x210] sm:$0xff] }
  0xbc   :  { %3028 = vmatpush1.bf16.msra.mxu0 %v4636_v57  ;;  %2577 = vmatprep.subr.bf16.mxu1 %v4641_v0  ;;  %v3769_v57 = vcombine.low %v67_v40, %v75_v43  ;;  %v87_v60 = vld [vmem:[%s6487_s0 + $0x230] sm:$0xff] }
  0xbd   :  { %3029 = vmatprep.subr.bf16.mxu0 %v4644_v1  ;;  %2579 = vmatprep.mubr.bf16.mxu1 %v3722_v2  ;;  %v4689_v0 = vld [vmem:[%s6486_s1 + $0x374] ss:$8 sps:$4 sm:$0xff]   ;;  %v3786_v2 = vcombine.high %v83_v56, %v91_v59  ;;  %v3793_v10 = vcombine.low %v87_v60, %v95_v61 }
  0xbe   :  { %3031 = vmatprep.mubr.bf16.mxu0 %v3730_v3  ;;  %v4692_v1 = vld [vmem:[%s6486_s1 + $0x774] ss:$8 sps:$4 sm:$0xff]   ;;  %v3794_v3 = vcombine.high %v87_v60, %v95_v61 }
  0xbf   :  { %2578 = vmatpush1.bf16.msra.mxu1 %v4639_v4  ;;  %v4687_v4 = vld [vmem:[%s6486_s1 + $0x370] ss:$8 sps:$4 sm:$0xff]  }
  0xc0   :  { %3030 = vmatpush1.bf16.msra.mxu0 %v4642_v5  ;;  %2660 = vmatprep.subr.bf16.mxu1 %v4647_v6  ;;  %v4690_v5 = vld [vmem:[%s6486_s1 + $0x770] ss:$8 sps:$4 sm:$0xff]   ;;  %v4695_v6 = vld [vmem:[%s6486_s1 + $0x384] ss:$8 sps:$4 sm:$0xff]  }
  0xc1   :  { %3112 = vmatprep.subr.bf16.mxu0 %v4650_v7  ;;  %v4698_v7 = vld [vmem:[%s6486_s1 + $0x784] ss:$8 sps:$4 sm:$0xff]   ;;  %v131_v40 = vld [vmem:[%s6487_s0 + $0x390] sm:$0xff]  ;;  %v24_v60 = vld [vmem:[%s6487_s0 + $0x38] sm:$0xff] }
  0xc2   :  { %2580 = vmatmul.mubr.bf16.vlgmr.msra.gmra.mrb[0].mxu1 %v3721_v12  ;;  %v103_v12 = vld [vmem:[%s6487_s0 + $0x2b0] sm:$0xff]  ;;  %v32_v61 = vld [vmem:[%s6487_s0 + $0x78] sm:$0xff] }
  0xc3   :  { %3032 = vmatmul.mubr.bf16.vlgmr.msra.gmra.mrb[0].mxu0 %v3729_v13  ;;  %2661 = vmatpush1.bf16.msra.mxu1 %v4645_v8  ;;  %v99_v8 = vld [vmem:[%s6487_s0 + $0x290] sm:$0xff] }
  0xc4   :  { %3113 = vmatpush1.bf16.msra.mxu0 %v4648_v9  ;;  %2662 = vmatprep.subr.bf16.mxu1 %v4653_v16  ;;  %v3785_v9 = vcombine.low %v83_v56, %v91_v59  ;;  %v111_v13 = vld [vmem:[%s6487_s0 + $0x2f0] sm:$0xff]  ;;  %v20_v56 = vld [vmem:[%s6487_s0 + $0x18] sm:$0xff] }
  0xc5   :  { %3114 = vmatprep.subr.bf16.mxu0 %v4656_v17  ;;  %2589 = vmatprep.mubr.bf16.mxu1 %v3738_v18  ;;  %v4701_v16 = vld [vmem:[%s6486_s1 + $0x394] ss:$8 sps:$4 sm:$0xff]   ;;  %v3802_v18 = vcombine.high %v99_v8, %v107_v11  ;;  %v3809_v26 = vcombine.low %v103_v12, %v111_v13 }
  0xc6   :  { %3041 = vmatprep.mubr.bf16.mxu0 %v3746_v19  ;;  %v4704_v17 = vld [vmem:[%s6486_s1 + $0x794] ss:$8 sps:$4 sm:$0xff]   ;;  %v3810_v19 = vcombine.high %v103_v12, %v111_v13 }
  0xc7   :  { %2663 = vmatpush1.bf16.msra.mxu1 %v4651_v20  ;;  %v4699_v20 = vld [vmem:[%s6486_s1 + $0x390] ss:$8 sps:$4 sm:$0xff]  }
  0xc8   :  { %3115 = vmatpush1.bf16.msra.mxu0 %v4654_v21  ;;  %2664 = vmatprep.subr.bf16.mxu1 %v4659_v22  ;;  %v4702_v21 = vld [vmem:[%s6486_s1 + $0x790] ss:$8 sps:$4 sm:$0xff]   ;;  %v4707_v22 = vld [vmem:[%s6486_s1 + $0x3a4] ss:$8 sps:$4 sm:$0xff]  }
  0xc9   :  { %3116 = vmatprep.subr.bf16.mxu0 %v4662_v23  ;;  %v4710_v23 = vld [vmem:[%s6486_s1 + $0x7a4] ss:$8 sps:$4 sm:$0xff]   ;;  %v139_v43 = vld [vmem:[%s6487_s0 + $0x3d0] sm:$0xff]  ;;  %v28_v59 = vld [vmem:[%s6487_s0 + $0x58] sm:$0xff] }
  0xca   :  { %2590 = vmatmul.mubr.bf16.gmra.mrb[4].mxu1 %v3737_v28  ;;  %v119_v28 = vld [vmem:[%s6487_s0 + $0x330] sm:$0xff] }
  0xcb   :  { %3042 = vmatmul.mubr.bf16.gmra.mrb[4].mxu0 %v3745_v29  ;;  %2665 = vmatpush1.bf16.msra.mxu1 %v4657_v24  ;;  %v115_v24 = vld [vmem:[%s6487_s0 + $0x310] sm:$0xff] }
  0xcc   :  { %3117 = vmatpush1.bf16.msra.mxu0 %v4660_v25  ;;  %2666 = vmatprep.subr.bf16.mxu1 %v4665_v32  ;;  %v3801_v25 = vcombine.low %v99_v8, %v107_v11  ;;  %v127_v29 = vld [vmem:[%s6487_s0 + $0x370] sm:$0xff]  ;;  %v40_v8 = vld [vmem:[%s6487_s0 + $0xb8] sm:$0xff]  ;;  %v3731_v11 = vcombine.low %v24_v60, %v32_v61 }
  0xcd   :  { %3118 = vmatprep.subr.bf16.mxu0 %v4668_v33  ;;  %2599 = vmatprep.mubr.bf16.mxu1 %v3754_v34  ;;  %v4713_v32 = vld [vmem:[%s6486_s1 + $0x3b4] ss:$8 sps:$4 sm:$0xff]   ;;  %v3818_v34 = vcombine.high %v115_v24, %v123_v27 }
  0xce   :  { %3051 = vmatprep.mubr.bf16.mxu0 %v3762_v35  ;;  %v4716_v33 = vld [vmem:[%s6486_s1 + $0x7b4] ss:$8 sps:$4 sm:$0xff]   ;;  %v3826_v35 = vcombine.high %v119_v28, %v127_v29 }
  0xcf   :  { %2667 = vmatpush1.bf16.msra.mxu1 %v4663_v36  ;;  %v4711_v36 = vld [vmem:[%s6486_s1 + $0x3b0] ss:$8 sps:$4 sm:$0xff]  }
  0xd0   :  { %3119 = vmatpush1.bf16.msra.mxu0 %v4666_v37  ;;  %2668 = vmatprep.subr.bf16.mxu1 %v4671_v38  ;;  %v4714_v37 = vld [vmem:[%s6486_s1 + $0x7b0] ss:$8 sps:$4 sm:$0xff]   ;;  %v4719_v38 = vld [vmem:[%s6486_s1 + $0x3c4] ss:$8 sps:$4 sm:$0xff]  }
  0xd1   :  { %3120 = vmatprep.subr.bf16.mxu0 %v4674_v39  ;;  %v4722_v39 = vld [vmem:[%s6486_s1 + $0x7c4] ss:$8 sps:$4 sm:$0xff]  }
  0xd2   :  { %2600 = vmatmul.mubr.bf16.gmra.mrb[8].mxu1 %v3753_v41  ;;  %v3817_v41 = vcombine.low %v115_v24, %v123_v27  ;;  %v72_v24 = vld [vmem:[%s6487_s0 + $0x1b8] sm:$0xff] }
  0xd3   :  { %3052 = vmatmul.mubr.bf16.gmra.mrb[8].mxu0 %v3761_v42  ;;  %2669 = vmatpush1.bf16.msra.mxu1 %v4669_v46  ;;  %v3825_v42 = vcombine.low %v119_v28, %v127_v29  ;;  %v4717_v46 = vld [vmem:[%s6486_s1 + $0x3c0] ss:$8 sps:$4 sm:$0xff]  }
  0xd4   :  { %3121 = vmatpush1.bf16.msra.mxu0 %v4672_v47  ;;  %2670 = vmatprep.subr.bf16.mxu1 %v4677_v48  ;;  %v4720_v47 = vld [vmem:[%s6486_s1 + $0x7c0] ss:$8 sps:$4 sm:$0xff]   ;;  %v4725_v48 = vld [vmem:[%s6486_s1 + $0x3d4] ss:$8 sps:$4 sm:$0xff]  }
  0xd5   :  { %3122 = vmatprep.subr.bf16.mxu0 %v4680_v49  ;;  %2609 = vmatprep.mubr.bf16.mxu1 %v3770_v50  ;;  %v4728_v49 = vld [vmem:[%s6486_s1 + $0x7d4] ss:$8 sps:$4 sm:$0xff]   ;;  %v3834_v50 = vcombine.high %v131_v40, %v139_v43 }
  0xd6   :  { %3061 = vmatprep.mubr.bf16.mxu0 %v3778_v51  ;;  %v3842_v51 = vcombine.high %v135_v44, %v143_v45 }
  0xd7   :  { %2671 = vmatpush1.bf16.msra.mxu1 %v4675_v52  ;;  %v4723_v52 = vld [vmem:[%s6486_s1 + $0x3d0] ss:$8 sps:$4 sm:$0xff]  }
  0xd8   :  { %3123 = vmatpush1.bf16.msra.mxu0 %v4678_v53  ;;  %2672 = vmatprep.subr.bf16.mxu1 %v4683_v54  ;;  %v4726_v53 = vld [vmem:[%s6486_s1 + $0x7d0] ss:$8 sps:$4 sm:$0xff]   ;;  %v4731_v54 = vld [vmem:[%s6486_s1 + $0x3e4] ss:$8 sps:$4 sm:$0xff]  }
  0xd9   :  { %3124 = vmatprep.subr.bf16.mxu0 %v4686_v55  ;;  %v4734_v55 = vld [vmem:[%s6486_s1 + $0x7e4] ss:$8 sps:$4 sm:$0xff]  }
  0xda   :  { %2610 = vmatmul.mubr.bf16.gmra.mrb[12].mxu1 %v3769_v57  ;;  %v3833_v57 = vcombine.low %v131_v40, %v139_v43  ;;  %v104_v40 = vld [vmem:[%s6487_s0 + $0x2b8] sm:$0xff] }
  0xdb   :  { %3062 = vmatmul.mubr.bf16.gmra.mrb[12].mxu0 %v3777_v58  ;;  %2673 = vmatpush1.bf16.msra.mxu1 %v4681_v62  ;;  %v3841_v58 = vcombine.low %v135_v44, %v143_v45  ;;  %v4729_v62 = vld [vmem:[%s6486_s1 + $0x3e0] ss:$8 sps:$4 sm:$0xff]  }
  0xdc   :  { %3125 = vmatpush1.bf16.msra.mxu0 %v4684_v63  ;;  %2674 = vmatprep.subr.bf16.mxu1 %v4689_v0  ;;  %v4732_v63 = vld [vmem:[%s6486_s1 + $0x7e0] ss:$8 sps:$4 sm:$0xff]   ;;  %v4737_v0 = vld [vmem:[%s6486_s1 + $0x3f4] ss:$8 sps:$4 sm:$0xff]  }
  0xdd   :  { %3126 = vmatprep.subr.bf16.mxu0 %v4692_v1  ;;  %2619 = vmatprep.mubr.bf16.mxu1 %v3786_v2  ;;  %v4740_v1 = vld [vmem:[%s6486_s1 + $0x7f4] ss:$8 sps:$4 sm:$0xff]   ;;  %v3724_v2 = vcombine.high %v20_v56, %v28_v59 }
  0xde   :  { %3071 = vmatprep.mubr.bf16.mxu0 %v3794_v3  ;;  %v3732_v3 = vcombine.high %v24_v60, %v32_v61 }
  0xdf   :  { %2675 = vmatpush1.bf16.msra.mxu1 %v4687_v4  ;;  %v4735_v4 = vld [vmem:[%s6486_s1 + $0x3f0] ss:$8 sps:$4 sm:$0xff]  }
  0xe0   :  { %3127 = vmatpush1.bf16.msra.mxu0 %v4690_v5  ;;  %2676 = vmatprep.subr.bf16.mxu1 %v4695_v6  ;;  %v4738_v5 = vld [vmem:[%s6486_s1 + $0x7f0] ss:$8 sps:$4 sm:$0xff]  }
  0xe1   :  { %3128 = vmatprep.subr.bf16.mxu0 %v4698_v7  ;;  %v36_v6 = vld [vmem:[%s6487_s0 + $0x98] sm:$0xff] }
  0xe2   :  { %2620 = vmatmul.mubr.bf16.gmra.mrb[16].mxu1 %v3785_v9  ;;  %v44_v7 = vld [vmem:[%s6487_s0 + $0xd8] sm:$0xff] }
  0xe3   :  { %3072 = vmatmul.mubr.bf16.gmra.mrb[16].mxu0 %v3793_v10  ;;  %2677 = vmatpush1.bf16.msra.mxu1 %v4693_v14  ;;  %v48_v9 = vld [vmem:[%s6487_s0 + $0xf8] sm:$0xff]  ;;  %v3723_v10 = vcombine.low %v20_v56, %v28_v59  ;;  %v3740_v12 = vcombine.high %v36_v6, %v44_v7 }
  0xe4   :  { %3129 = vmatpush1.bf16.msra.mxu0 %v4696_v15  ;;  %2678 = vmatprep.subr.bf16.mxu1 %v4701_v16  ;;  %v3748_v13 = vcombine.high %v40_v8, %v48_v9  ;;  %v52_v14 = vld [vmem:[%s6487_s0 + $0x118] sm:$0xff] }
  0xe5   :  { %3130 = vmatprep.subr.bf16.mxu0 %v4704_v17  ;;  %2629 = vmatprep.mubr.bf16.mxu1 %v3802_v18  ;;  %v60_v15 = vld [vmem:[%s6487_s0 + $0x158] sm:$0xff]  ;;  %v3739_v18 = vcombine.low %v36_v6, %v44_v7 }
  0xe6   :  { %3081 = vmatprep.mubr.bf16.mxu0 %v3810_v19  ;;  %v56_v16 = vld [vmem:[%s6487_s0 + $0x138] sm:$0xff]  ;;  %v3747_v19 = vcombine.low %v40_v8, %v48_v9 }
  0xe7   :  { %2679 = vmatpush1.bf16.msra.mxu1 %v4699_v20  ;;  %v64_v17 = vld [vmem:[%s6487_s0 + $0x178] sm:$0xff]  ;;  %v3756_v20 = vcombine.high %v52_v14, %v60_v15 }
  0xe8   :  { %3131 = vmatpush1.bf16.msra.mxu0 %v4702_v21  ;;  %2680 = vmatprep.subr.bf16.mxu1 %v4707_v22  ;;  %v3764_v21 = vcombine.high %v56_v16, %v64_v17  ;;  %v68_v22 = vld [vmem:[%s6487_s0 + $0x198] sm:$0xff]  ;;  %v3763_v27 = vcombine.low %v56_v16, %v64_v17 }
  0xe9   :  { %3132 = vmatprep.subr.bf16.mxu0 %v4710_v23  ;;  %v76_v23 = vld [vmem:[%s6487_s0 + $0x1d8] sm:$0xff] }
  0xea   :  { %2630 = vmatmul.mubr.bf16.gmra.mrb[20].mxu1 %v3801_v25  ;;  %v80_v25 = vld [vmem:[%s6487_s0 + $0x1f8] sm:$0xff]  ;;  %v3772_v28 = vcombine.high %v68_v22, %v76_v23 }
  0xeb   :  { %3082 = vmatmul.mubr.bf16.gmra.mrb[20].mxu0 %v3809_v26  ;;  %2681 = vmatpush1.bf16.msra.mxu1 %v4705_v30  ;;  %v3755_v26 = vcombine.low %v52_v14, %v60_v15  ;;  %v3780_v29 = vcombine.high %v72_v24, %v80_v25  ;;  %v84_v30 = vld [vmem:[%s6487_s0 + $0x218] sm:$0xff] }
  0xec   :  { %3133 = vmatpush1.bf16.msra.mxu0 %v4708_v31  ;;  %2682 = vmatprep.subr.bf16.mxu1 %v4713_v32  ;;  %v92_v31 = vld [vmem:[%s6487_s0 + $0x258] sm:$0xff] }
  0xed   :  { %3134 = vmatprep.subr.bf16.mxu0 %v4716_v33  ;;  %2639 = vmatprep.mubr.bf16.mxu1 %v3818_v34  ;;  %v88_v32 = vld [vmem:[%s6487_s0 + $0x238] sm:$0xff]  ;;  %v3771_v34 = vcombine.low %v68_v22, %v76_v23 }
  0xee   :  { %3091 = vmatprep.mubr.bf16.mxu0 %v3826_v35  ;;  %v96_v33 = vld [vmem:[%s6487_s0 + $0x278] sm:$0xff]  ;;  %v3779_v35 = vcombine.low %v72_v24, %v80_v25 }
  0xef   :  { %2683 = vmatpush1.bf16.msra.mxu1 %v4711_v36  ;;  %v3788_v36 = vcombine.high %v84_v30, %v92_v31  ;;  %v3795_v43 = vcombine.low %v88_v32, %v96_v33  ;;  %v136_v56 = vld [vmem:[%s6487_s0 + $0x3b8] sm:$0xff] }
  0xf0   :  { %3135 = vmatpush1.bf16.msra.mxu0 %v4714_v37  ;;  %2684 = vmatprep.subr.bf16.mxu1 %v4719_v38  ;;  %v3796_v37 = vcombine.high %v88_v32, %v96_v33  ;;  %v100_v38 = vld [vmem:[%s6487_s0 + $0x298] sm:$0xff] }
  0xf1   :  { %3136 = vmatprep.subr.bf16.mxu0 %v4722_v39  ;;  %v108_v39 = vld [vmem:[%s6487_s0 + $0x2d8] sm:$0xff] }
  0xf2   :  { %2640 = vmatmul.mubr.bf16.gmra.mrb[24].mxu1 %v3817_v41  ;;  %v112_v41 = vld [vmem:[%s6487_s0 + $0x2f8] sm:$0xff]  ;;  %v3804_v44 = vcombine.high %v100_v38, %v108_v39 }
  0xf3   :  { %3092 = vmatmul.mubr.bf16.gmra.mrb[24].mxu0 %v3825_v42  ;;  %2685 = vmatpush1.bf16.msra.mxu1 %v4717_v46  ;;  %v3787_v42 = vcombine.low %v84_v30, %v92_v31  ;;  %v3812_v45 = vcombine.high %v104_v40, %v112_v41  ;;  %v116_v46 = vld [vmem:[%s6487_s0 + $0x318] sm:$0xff] }
  0xf4   :  { %3137 = vmatpush1.bf16.msra.mxu0 %v4720_v47  ;;  %2686 = vmatprep.subr.bf16.mxu1 %v4725_v48  ;;  %v124_v47 = vld [vmem:[%s6487_s0 + $0x358] sm:$0xff] }
  0xf5   :  { %3138 = vmatprep.subr.bf16.mxu0 %v4728_v49  ;;  %2649 = vmatprep.mubr.bf16.mxu1 %v3834_v50  ;;  %v120_v48 = vld [vmem:[%s6487_s0 + $0x338] sm:$0xff]  ;;  %v3803_v50 = vcombine.low %v100_v38, %v108_v39 }
  0xf6   :  { %3101 = vmatprep.mubr.bf16.mxu0 %v3842_v51  ;;  %v128_v49 = vld [vmem:[%s6487_s0 + $0x378] sm:$0xff]  ;;  %v3811_v51 = vcombine.low %v104_v40, %v112_v41 }
  0xf7   :  { %2687 = vmatpush1.bf16.msra.mxu1 %v4723_v52  ;;  %v3820_v52 = vcombine.high %v116_v46, %v124_v47  ;;  %v3827_v59 = vcombine.low %v120_v48, %v128_v49 }
  0xf8   :  { %3139 = vmatpush1.bf16.msra.mxu0 %v4726_v53  ;;  %2688 = vmatprep.subr.bf16.mxu1 %v4731_v54  ;;  %v3828_v53 = vcombine.high %v120_v48, %v128_v49  ;;  %v132_v54 = vld [vmem:[%s6487_s0 + $0x398] sm:$0xff] }
  0xf9   :  { %3140 = vmatprep.subr.bf16.mxu0 %v4734_v55  ;;  %v140_v55 = vld [vmem:[%s6487_s0 + $0x3d8] sm:$0xff] }
  0xfa   :  { %2650 = vmatmul.mubr.bf16.gmra.mrb[28].mxu1 %v3833_v57  ;;  %v144_v57 = vld [vmem:[%s6487_s0 + $0x3f8] sm:$0xff]  ;;  %v3836_v60 = vcombine.high %v132_v54, %v140_v55 }
  0xfb   :  { %3102 = vmatmul.mubr.bf16.gmra.mrb[28].mxu0 %v3841_v58  ;;  %2689 = vmatpush1.bf16.msra.mxu1 %v4729_v62  ;;  %v3819_v58 = vcombine.low %v116_v46, %v124_v47  ;;  %v3844_v61 = vcombine.high %v136_v56, %v144_v57  ;;  %v3835_v62 = vcombine.low %v132_v54, %v140_v55 }
  0xfc   :  { %3141 = vmatpush1.bf16.msra.mxu0 %v4732_v63  ;;  %2690 = vmatprep.subr.bf16.mxu1 %v4737_v0  ;;  %v3843_v63 = vcombine.low %v136_v56, %v144_v57 }
  0xfd   :  { %3142 = vmatprep.subr.bf16.mxu0 %v4740_v1  ;;  %2692 = vmatprep.mubr.bf16.mxu1 %v3724_v2 }
  0xfe   :  { %3144 = vmatprep.mubr.bf16.mxu0 %v3732_v3 }
  0xff   :  { %2691 = vmatpush1.bf16.msra.mxu1 %v4735_v4 }
 0x100   :  { %3143 = vmatpush1.bf16.msra.mxu0 %v4738_v5 }
 0x102   :  { %2693 = vmatmul.mubr.bf16.vlgmr.msra.gmra.mrb[0].mxu1 %v3723_v10 }
 0x103   :  { %3145 = vmatmul.mubr.bf16.vlgmr.msra.gmra.mrb[0].mxu0 %v3731_v11  ;;  %2702 = vmatprep.mubr.bf16.mxu1 %v3740_v12 }
 0x104   :  { %3154 = vmatprep.mubr.bf16.mxu0 %v3748_v13 }
 0x10a   :  { %2703 = vmatmul.mubr.bf16.gmra.mrb[4].mxu1 %v3739_v18 }
 0x10b   :  { %3155 = vmatmul.mubr.bf16.gmra.mrb[4].mxu0 %v3747_v19  ;;  %2712 = vmatprep.mubr.bf16.mxu1 %v3756_v20 }
 0x10c   :  { %3164 = vmatprep.mubr.bf16.mxu0 %v3764_v21 }
 0x112   :  { %2713 = vmatmul.mubr.bf16.gmra.mrb[8].mxu1 %v3755_v26 }
 0x113   :  { %3165 = vmatmul.mubr.bf16.gmra.mrb[8].mxu0 %v3763_v27  ;;  %2722 = vmatprep.mubr.bf16.mxu1 %v3772_v28 }
 0x114   :  { %3174 = vmatprep.mubr.bf16.mxu0 %v3780_v29 }
 0x11a   :  { %2723 = vmatmul.mubr.bf16.gmra.mrb[12].mxu1 %v3771_v34 }
 0x11b   :  { %3175 = vmatmul.mubr.bf16.gmra.mrb[12].mxu0 %v3779_v35  ;;  %2732 = vmatprep.mubr.bf16.mxu1 %v3788_v36 }
 0x11c   :  { %3184 = vmatprep.mubr.bf16.mxu0 %v3796_v37 }
 0x122   :  { %2733 = vmatmul.mubr.bf16.gmra.mrb[16].mxu1 %v3787_v42 }
 0x123   :  { %3185 = vmatmul.mubr.bf16.gmra.mrb[16].mxu0 %v3795_v43  ;;  %2742 = vmatprep.mubr.bf16.mxu1 %v3804_v44 }
 0x124   :  { %3194 = vmatprep.mubr.bf16.mxu0 %v3812_v45 }
 0x12a   :  { %2743 = vmatmul.mubr.bf16.gmra.mrb[20].mxu1 %v3803_v50 }
 0x12b   :  { %3195 = vmatmul.mubr.bf16.gmra.mrb[20].mxu0 %v3811_v51  ;;  %2752 = vmatprep.mubr.bf16.mxu1 %v3820_v52 }
 0x12c   :  { %3204 = vmatprep.mubr.bf16.mxu0 %v3828_v53 }
 0x132   :  { %2753 = vmatmul.mubr.bf16.gmra.mrb[24].mxu1 %v3819_v58 }
 0x133   :  { %3205 = vmatmul.mubr.bf16.gmra.mrb[24].mxu0 %v3827_v59  ;;  %2762 = vmatprep.mubr.bf16.mxu1 %v3836_v60 }
 0x134   :  { %3214 = vmatprep.mubr.bf16.mxu0 %v3844_v61 }
 0x13a   :  { %2763 = vmatmul.mubr.bf16.gmra.mrb[28].mxu1 %v3835_v62 }
 0x13b   :  { %3215 = vmatmul.mubr.bf16.gmra.mrb[28].mxu0 %v3843_v63 }
 0x1d5   :  { %v2694_v0 = vpop.f32.mrb[0].mxu1 }
 0x1d6   :  { %v3146_v1 = vpop.f32.mrb[0].mxu0  ;;  %v2696_v3 = vpop.f32.mrb[1].mxu1 }
 0x1d7   :  { %v5922_v2 = vadd.f32 %v3146_v1, %v2694_v0  ;;  %v3148_v4 = vpop.f32.mrb[1].mxu0  ;;  %v2698_v6 = vpop.f32.mrb[2].mxu1 }
 0x1d8   :  { %v5924_v5 = vadd.f32 %v3148_v4, %v2696_v3  ;;  %v3150_v7 = vpop.f32.mrb[2].mxu0  ;;  %v2700_v9 = vpop.f32.mrb[3].mxu1 }
 0x1d9   :  { %v5926_v8 = vadd.f32 %v3150_v7, %v2698_v6  ;;  %v3152_v10 = vpop.f32.mrb[3].mxu0  ;;  %v3269_v12 = vmul.f32 %v5922_v2, %v5922_v2 }
 0x1da   :  { %v5928_v11 = vadd.f32 %v3152_v10, %v2700_v9  ;;  %v3270_v15 = vmul.f32 %v5924_v5, %v5924_v5 }
 0x1db   :  { %v3225_v13 = vadd.f32 %v5926_v8, %v5922_v2  ;;  %v3271_v14 = vmul.f32 %v5926_v8, %v5926_v8 }
 0x1dc   :  { %v3246_v16 = vadd.f32 %v5928_v11, %v5924_v5  ;;  %v3272_v17 = vmul.f32 %v5928_v11, %v5928_v11 }
 0x1dd   :  { %v3301_v18 = vadd.f32 %v3271_v14, %v3269_v12  ;;  %v2704_v20 = vpop.f32.mrb[4].mxu1 }
 0x1de   :  { %v3322_v19 = vadd.f32 %v3272_v17, %v3270_v15  ;;  %v3156_v21 = vpop.f32.mrb[4].mxu0  ;;  %v2706_v23 = vpop.f32.mrb[5].mxu1 }
 0x1df   :  { %v5942_v22 = vadd.f32 %v3156_v21, %v2704_v20  ;;  %v3158_v24 = vpop.f32.mrb[5].mxu0  ;;  %v2708_v26 = vpop.f32.mrb[6].mxu1 }
 0x1e0   :  { %v5944_v25 = vadd.f32 %v3158_v24, %v2706_v23  ;;  %v3160_v27 = vpop.f32.mrb[6].mxu0  ;;  %v2710_v31 = vpop.f32.mrb[7].mxu1 }
 0x1e1   :  { %v3226_v28 = vadd.f32 %v5942_v22, %v3225_v13  ;;  %v3273_v29 = vmul.f32 %v5942_v22, %v5942_v22  ;;  %v5949_v30 = vadd.f32 %v3160_v27, %v2708_v26  ;;  %v3162_v32 = vpop.f32.mrb[7].mxu0 }
 0x1e2   :  { %v3247_v33 = vadd.f32 %v5944_v25, %v3246_v16  ;;  %v3274_v34 = vmul.f32 %v5944_v25, %v5944_v25  ;;  %v5954_v35 = vadd.f32 %v3162_v32, %v2710_v31 }
 0x1e3   :  { %v3302_v36 = vadd.f32 %v3301_v18, %v3273_v29  ;;  %v3227_v37 = vadd.f32 %v5949_v30, %v3226_v28  ;;  %v3275_v38 = vmul.f32 %v5949_v30, %v5949_v30 }
 0x1e4   :  { %v3323_v39 = vadd.f32 %v3322_v19, %v3274_v34  ;;  %v3248_v40 = vadd.f32 %v5954_v35, %v3247_v33  ;;  %v3276_v41 = vmul.f32 %v5954_v35, %v5954_v35 }
 0x1e5   :  { %v3303_v42 = vadd.f32 %v3302_v36, %v3275_v38  ;;  %v2714_v44 = vpop.f32.mrb[8].mxu1 }
 0x1e6   :  { %v3324_v43 = vadd.f32 %v3323_v39, %v3276_v41  ;;  %v3166_v45 = vpop.f32.mrb[8].mxu0  ;;  %v2716_v47 = vpop.f32.mrb[9].mxu1 }
 0x1e7   :  { %v5962_v46 = vadd.f32 %v3166_v45, %v2714_v44  ;;  %v3168_v48 = vpop.f32.mrb[9].mxu0  ;;  %v2718_v50 = vpop.f32.mrb[10].mxu1 }
 0x1e8   :  { %v5964_v49 = vadd.f32 %v3168_v48, %v2716_v47  ;;  %v3170_v51 = vpop.f32.mrb[10].mxu0  ;;  %v2720_v55 = vpop.f32.mrb[11].mxu1 }
 0x1e9   :  { %v3228_v52 = vadd.f32 %v5962_v46, %v3227_v37  ;;  %v3277_v53 = vmul.f32 %v5962_v46, %v5962_v46  ;;  %v5969_v54 = vadd.f32 %v3170_v51, %v2718_v50  ;;  %v3172_v56 = vpop.f32.mrb[11].mxu0 }
 0x1ea   :  { %v3249_v57 = vadd.f32 %v5964_v49, %v3248_v40  ;;  %v3278_v58 = vmul.f32 %v5964_v49, %v5964_v49  ;;  %v5974_v59 = vadd.f32 %v3172_v56, %v2720_v55 }
 0x1eb   :  { %v3304_v60 = vadd.f32 %v3303_v42, %v3277_v53  ;;  %v3229_v61 = vadd.f32 %v5969_v54, %v3228_v52  ;;  %v3279_v62 = vmul.f32 %v5969_v54, %v5969_v54 }
 0x1ec   :  { %v3325_v63 = vadd.f32 %v3324_v43, %v3278_v58  ;;  %v3250_v0 = vadd.f32 %v5974_v59, %v3249_v57  ;;  %v3280_v1 = vmul.f32 %v5974_v59, %v5974_v59 }
 0x1ed   :  { %v3305_v3 = vadd.f32 %v3304_v60, %v3279_v62  ;;  %v2724_v6 = vpop.f32.mrb[12].mxu1 }
 0x1ee   :  { %v3326_v4 = vadd.f32 %v3325_v63, %v3280_v1  ;;  %v3176_v7 = vpop.f32.mrb[12].mxu0  ;;  %v2726_v10 = vpop.f32.mrb[13].mxu1 }
 0x1ef   :  { %v5982_v9 = vadd.f32 %v3176_v7, %v2724_v6  ;;  %v3178_v12 = vpop.f32.mrb[13].mxu0  ;;  %v2728_v14 = vpop.f32.mrb[14].mxu1 }
 0x1f0   :  { %v5984_v13 = vadd.f32 %v3178_v12, %v2726_v10  ;;  %v3180_v15 = vpop.f32.mrb[14].mxu0  ;;  %v2730_v19 = vpop.f32.mrb[15].mxu1 }
 0x1f1   :  { %v3230_v16 = vadd.f32 %v5982_v9, %v3229_v61  ;;  %v3281_v17 = vmul.f32 %v5982_v9, %v5982_v9  ;;  %v5989_v18 = vadd.f32 %v3180_v15, %v2728_v14  ;;  %v3182_v20 = vpop.f32.mrb[15].mxu0 }
 0x1f2   :  { %v3251_v21 = vadd.f32 %v5984_v13, %v3250_v0  ;;  %v3282_v23 = vmul.f32 %v5984_v13, %v5984_v13  ;;  %v5994_v24 = vadd.f32 %v3182_v20, %v2730_v19 }
 0x1f3   :  { %v3306_v26 = vadd.f32 %v3305_v3, %v3281_v17  ;;  %v3231_v27 = vadd.f32 %v5989_v18, %v3230_v16  ;;  %v3283_v28 = vmul.f32 %v5989_v18, %v5989_v18 }
 0x1f4   :  { %v3327_v29 = vadd.f32 %v3326_v4, %v3282_v23  ;;  %v3252_v31 = vadd.f32 %v5994_v24, %v3251_v21  ;;  %v3284_v32 = vmul.f32 %v5994_v24, %v5994_v24 }
 0x1f5   :  { %v3307_v33 = vadd.f32 %v3306_v26, %v3283_v28  ;;  %v2734_v36 = vpop.f32.mrb[16].mxu1 }
 0x1f6   :  { %v3328_v34 = vadd.f32 %v3327_v29, %v3284_v32  ;;  %v3186_v37 = vpop.f32.mrb[16].mxu0  ;;  %v2736_v39 = vpop.f32.mrb[17].mxu1 }
 0x1f7   :  { %v6002_v38 = vadd.f32 %v3186_v37, %v2734_v36  ;;  %v3188_v40 = vpop.f32.mrb[17].mxu0  ;;  %v2738_v42 = vpop.f32.mrb[18].mxu1 }
 0x1f8   :  { %v6004_v41 = vadd.f32 %v3188_v40, %v2736_v39  ;;  %v3190_v43 = vpop.f32.mrb[18].mxu0  ;;  %v2740_v48 = vpop.f32.mrb[19].mxu1 }
 0x1f9   :  { %v3232_v44 = vadd.f32 %v6002_v38, %v3231_v27  ;;  %v3285_v45 = vmul.f32 %v6002_v38, %v6002_v38  ;;  %v6009_v47 = vadd.f32 %v3190_v43, %v2738_v42  ;;  %v3192_v50 = vpop.f32.mrb[19].mxu0 }
 0x1fa   :  { %v3253_v51 = vadd.f32 %v6004_v41, %v3252_v31  ;;  %v3286_v52 = vmul.f32 %v6004_v41, %v6004_v41  ;;  %v6014_v53 = vadd.f32 %v3192_v50, %v2740_v48 }
 0x1fb   :  { %v3308_v55 = vadd.f32 %v3307_v33, %v3285_v45  ;;  %v3233_v56 = vadd.f32 %v6009_v47, %v3232_v44  ;;  %v3287_v57 = vmul.f32 %v6009_v47, %v6009_v47 }
 0x1fc   :  { %v3329_v58 = vadd.f32 %v3328_v34, %v3286_v52  ;;  %v3254_v60 = vadd.f32 %v6014_v53, %v3253_v51  ;;  %v3288_v61 = vmul.f32 %v6014_v53, %v6014_v53 }
 0x1fd   :  { %v3309_v62 = vadd.f32 %v3308_v55, %v3287_v57  ;;  %v2744_v0 = vpop.f32.mrb[20].mxu1 }
 0x1fe   :  { %v3330_v63 = vadd.f32 %v3329_v58, %v3288_v61  ;;  %v3196_v1 = vpop.f32.mrb[20].mxu0  ;;  %v2746_v4 = vpop.f32.mrb[21].mxu1 }
 0x1ff   :  { %v6022_v3 = vadd.f32 %v3196_v1, %v2744_v0  ;;  %v3198_v6 = vpop.f32.mrb[21].mxu0  ;;  %v2748_v10 = vpop.f32.mrb[22].mxu1 }
 0x200   :  { %v6024_v7 = vadd.f32 %v3198_v6, %v2746_v4  ;;  %v3200_v12 = vpop.f32.mrb[22].mxu0  ;;  %v2750_v17 = vpop.f32.mrb[23].mxu1 }
 0x201   :  { %v3234_v14 = vadd.f32 %v6022_v3, %v3233_v56  ;;  %v3289_v15 = vmul.f32 %v6022_v3, %v6022_v3  ;;  %v6029_v16 = vadd.f32 %v3200_v12, %v2748_v10  ;;  %v3202_v19 = vpop.f32.mrb[23].mxu0 }
 0x202   :  { %v3255_v20 = vadd.f32 %v6024_v7, %v3254_v60  ;;  %v3290_v21 = vmul.f32 %v6024_v7, %v6024_v7  ;;  %v6034_v23 = vadd.f32 %v3202_v19, %v2750_v17 }
 0x203   :  { %v3310_v26 = vadd.f32 %v3309_v62, %v3289_v15  ;;  %v3235_v27 = vadd.f32 %v6029_v16, %v3234_v14  ;;  %v3291_v28 = vmul.f32 %v6029_v16, %v6029_v16 }
 0x204   :  { %v3331_v29 = vadd.f32 %v3330_v63, %v3290_v21  ;;  %v3256_v31 = vadd.f32 %v6034_v23, %v3255_v20  ;;  %v3292_v32 = vmul.f32 %v6034_v23, %v6034_v23 }
 0x205   :  { %v3311_v33 = vadd.f32 %v3310_v26, %v3291_v28  ;;  %v2754_v36 = vpop.f32.mrb[24].mxu1 }
 0x206   :  { %v3332_v34 = vadd.f32 %v3331_v29, %v3292_v32  ;;  %v3206_v37 = vpop.f32.mrb[24].mxu0  ;;  %v2756_v40 = vpop.f32.mrb[25].mxu1 }
 0x207   :  { %v6042_v39 = vadd.f32 %v3206_v37, %v2754_v36  ;;  %v3208_v42 = vpop.f32.mrb[25].mxu0  ;;  %v2758_v44 = vpop.f32.mrb[26].mxu1 }
 0x208   :  { %v6044_v43 = vadd.f32 %v3208_v42, %v2756_v40  ;;  %v3210_v45 = vpop.f32.mrb[26].mxu0  ;;  %v2760_v52 = vpop.f32.mrb[27].mxu1 }
 0x209   :  { %v3236_v48 = vadd.f32 %v6042_v39, %v3235_v27  ;;  %v3293_v50 = vmul.f32 %v6042_v39, %v6042_v39  ;;  %v6049_v51 = vadd.f32 %v3210_v45, %v2758_v44  ;;  %v3212_v55 = vpop.f32.mrb[27].mxu0 }
 0x20a   :  { %v3257_v56 = vadd.f32 %v6044_v43, %v3256_v31  ;;  %v3294_v57 = vmul.f32 %v6044_v43, %v6044_v43  ;;  %v6054_v58 = vadd.f32 %v3212_v55, %v2760_v52 }
 0x20b   :  { %v3312_v60 = vadd.f32 %v3311_v33, %v3293_v50  ;;  %v3237_v61 = vadd.f32 %v6049_v51, %v3236_v48  ;;  %v3295_v62 = vmul.f32 %v6049_v51, %v6049_v51 }
 0x20c   :  { %v3333_v63 = vadd.f32 %v3332_v34, %v3294_v57  ;;  %v3258_v0 = vadd.f32 %v6054_v58, %v3257_v56  ;;  %v3296_v1 = vmul.f32 %v6054_v58, %v6054_v58 }
 0x20d   :  { %v3313_v4 = vadd.f32 %v3312_v60, %v3295_v62  ;;  %v2764_v10 = vpop.f32.mrb[28].mxu1 }
 0x20e   :  { %v3334_v6 = vadd.f32 %v3333_v63, %v3296_v1  ;;  %v3216_v12 = vpop.f32.mrb[28].mxu0  ;;  %v2766_v15 = vpop.f32.mrb[29].mxu1 }
 0x20f   :  { %v6062_v14 = vadd.f32 %v3216_v12, %v2764_v10  ;;  %v3218_v17 = vpop.f32.mrb[29].mxu0  ;;  %v2768_v20 = vpop.f32.mrb[30].mxu1 }
 0x210   :  { %v6064_v19 = vadd.f32 %v3218_v17, %v2766_v15  ;;  %v3220_v21 = vpop.f32.mrb[30].mxu0  ;;  %v2770_v29 = vpop.f32.mrb[31].mxu1 }
 0x211   :  { %v3238_v26 = vadd.f32 %v6062_v14, %v3237_v61  ;;  %v3297_v27 = vmul.f32 %v6062_v14, %v6062_v14  ;;  %v6069_v28 = vadd.f32 %v3220_v21, %v2768_v20  ;;  %v3222_v31 = vpop.f32.mrb[31].mxu0  ;;  %v3419_v20 = vlaneseq }
 0x212   :  { %v3259_v32 = vadd.f32 %v6064_v19, %v3258_v0  ;;  %v3298_v33 = vmul.f32 %v6064_v19, %v6064_v19  ;;  %v6074_v34 = vadd.f32 %v3222_v31, %v2770_v29 }
 0x213   :  { %v3314_v36 = vadd.f32 %v3313_v4, %v3297_v27  ;;  %v3239_v37 = vadd.f32 %v6069_v28, %v3238_v26  ;;  %v3299_v40 = vmul.f32 %v6069_v28, %v6069_v28 }
 0x214   :  { %v3335_v42 = vadd.f32 %v3334_v6, %v3298_v33  ;;  %v3260_v44 = vadd.f32 %v6074_v34, %v3259_v32  ;;  %v3300_v45 = vmul.f32 %v6074_v34, %v6074_v34 }
 0x215   :  { %v3240_v48 = vrot.slane %v3239_v37, 4  ;;  %v3315_v50 = vadd.f32 %v3314_v36, %v3299_v40 }
 0x216   :  { %v3261_v52 = vrot.slane %v3260_v44, 4  ;;  %v3336_v55 = vadd.f32 %v3335_v42, %v3300_v45 }
 0x217   :  { %v3241_v56 = vadd.f32 %v3240_v48, %v3239_v37  ;;  %v3316_v57 = vrot.slane %v3315_v50, 4  ;;  %v6084_v37 = vshrl.u32 %v3419_v20, 7 }
 0x218   :  { %v3262_v60 = vadd.f32 %v3261_v52, %v3260_v44  ;;  %v3337_v61 = vrot.slane %v3336_v55, 4 }
 0x219   :  { %v3242_v62 = vrot.slane %v3241_v56, 2  ;;  %v3317_v63 = vadd.f32 %v3316_v57, %v3315_v50 }
 0x21a   :  { %v3263_v0 = vrot.slane %v3262_v60, 2  ;;  %v3338_v1 = vadd.f32 %v3337_v61, %v3336_v55 }
 0x21b   :  { %v3243_v4 = vadd.f32 %v3242_v62, %v3241_v56  ;;  %v3318_v10 = vrot.slane %v3317_v63, 2 }
 0x21c   :  { %v3264_v6 = vadd.f32 %v3263_v0, %v3262_v60  ;;  %v3339_v12 = vrot.slane %v3338_v1, 2 }
 0x21d   :  { %v3244_v15 = vrot.slane %v3243_v4, 1  ;;  %v3319_v17 = vadd.f32 %v3318_v10, %v3317_v63 }
 0x21e   :  { %v3265_v21 = vrot.slane %v3264_v6, 1  ;;  %v3340_v26 = vadd.f32 %v3339_v12, %v3338_v1 }
 0x21f   :  { %v3245_v27 = vadd.f32 %v3244_v15, %v3243_v4  ;;  %v3320_v29 = vrot.slane %v3319_v17, 1 }
 0x220   :  { %v3266_v31 = vadd.f32 %v3265_v21, %v3264_v6  ;;  %v3341_v32 = vrot.slane %v3340_v26, 1 }
 0x221   :  { %v6082_v33 = vmul.f32 0.0078125, %v3245_v27  ;;  %v3321_v36 = vadd.f32 %v3320_v29, %v3319_v17 }
 0x222   :  { %v6086_v40 = vmul.f32 0.0078125, %v3266_v31  ;;  %v3342_v42 = vadd.f32 %v3341_v32, %v3340_v26 }
 0x223   :  { %v3343_v44 = vmul.f32 0.0078125, %v3321_v36  ;;  %v3345_v45 = vmul.f32 %v6082_v33, %v6082_v33  ;;  %v3349_v48 = vsub.f32 %v5922_v2, %v6082_v33  ;;  %v3351_v50 = vsub.f32 %v5926_v8, %v6082_v33 }
 0x224   :  { %v3353_v52 = vsub.f32 %v5942_v22, %v6082_v33  ;;  %v3355_v55 = vsub.f32 %v5949_v30, %v6082_v33  ;;  %v3357_v56 = vsub.f32 %v5962_v46, %v6082_v33  ;;  %v3359_v57 = vsub.f32 %v5969_v54, %v6082_v33 }
 0x225   :  { %v3347_v60 = vsub.f32 %v3343_v44, %v3345_v45  ;;  %v3361_v61 = vsub.f32 %v5982_v9, %v6082_v33  ;;  %v3363_v2 = vsub.f32 %v5989_v18, %v6082_v33  ;;  %v3365_v8 = vsub.f32 %v6002_v38, %v6082_v33 }
 0x226   :  { %v3367_v22 = vsub.f32 %v6009_v47, %v6082_v33  ;;  %v3369_v30 = vsub.f32 %v6022_v3, %v6082_v33  ;;  %v3371_v46 = vsub.f32 %v6029_v16, %v6082_v33  ;;  %v3373_v54 = vsub.f32 %v6042_v39, %v6082_v33 }
 0x227   :  { %v3375_v9 = vsub.f32 %v6049_v51, %v6082_v33  ;;  %v3377_v18 = vsub.f32 %v6062_v14, %v6082_v33  ;;  %v3379_v38 = vsub.f32 %v6069_v28, %v6082_v33  ;;  %v3381_v62 = vadd.f32 1e-05, %v3347_v60 }
 0x228   :  { %v3344_v47 = vmul.f32 0.0078125, %v3342_v42  ;;  %v3346_v3 = vmul.f32 %v6086_v40, %v6086_v40  ;;  %v3350_v16 = vsub.f32 %v5924_v5, %v6086_v40  ;;  %v3352_v39 = vsub.f32 %v5928_v11, %v6086_v40 }
 0x229   :  { %4741 = vrsqrt.f32 %v3381_v62  ;;  %v3354_v51 = vsub.f32 %v5944_v25, %v6086_v40  ;;  %v3356_v14 = vsub.f32 %v5954_v35, %v6086_v40  ;;  %v3358_v28 = vsub.f32 %v5964_v49, %v6086_v40 }
 0x22a   :  { %v3348_v63 = vsub.f32 %v3344_v47, %v3346_v3  ;;  %v3360_v0 = vsub.f32 %v5974_v59, %v6086_v40  ;;  %v3362_v5 = vsub.f32 %v5984_v13, %v6086_v40  ;;  %v3364_v11 = vsub.f32 %v5994_v24, %v6086_v40 }
 0x22b   :  { %v3366_v1 = vsub.f32 %v6004_v41, %v6086_v40  ;;  %v3368_v25 = vsub.f32 %v6014_v53, %v6086_v40  ;;  %v3370_v35 = vsub.f32 %v6024_v7, %v6086_v40  ;;  %v3372_v49 = vsub.f32 %v6034_v23, %v6086_v40  ;;  %v3417_v7 = vld [vmem:[%s6488_s2] sm:$0x3] }
 0x22c   :  { %v3374_v59 = vsub.f32 %v6044_v43, %v6086_v40  ;;  %v3376_v13 = vsub.f32 %v6054_v58, %v6086_v40  ;;  %v3378_v24 = vsub.f32 %v6064_v19, %v6086_v40  ;;  %v3380_v41 = vsub.f32 %v6074_v34, %v6086_v40  ;;  %v3461_v23 = vld [vmem:[%s6489_s3] sm:$0x3] }
 0x22d   :  { %v3382_v4 = vadd.f32 1e-05, %v3348_v63  ;;  %v3421_v53 = vsub.s32 0, %v6084_v37 }
 0x22f   :  { %4743 = vrsqrt.f32 %v3382_v4  ;;  %v6163_v43 = vrot.slane %v3417_v7, %v3421_v53  ;;  %v6165_v10 = vrot.slane %v3461_v23, %v3421_v53 }
 0x233   :  { %v4742_v58 = vpop.eup %4741 }
 0x234   :  { %v3415_v19 = vmul.f32 %v4742_v58, %v3379_v38  ;;  %v3385_v6 = vmul.f32 %v4742_v58, %v3349_v48  ;;  %v3387_v34 = vmul.f32 %v4742_v58, %v3351_v50  ;;  %v3389_v12 = vmul.f32 %v4742_v58, %v3353_v52 }
 0x235   :  { %v3391_v15 = vmul.f32 %v4742_v58, %v3355_v55  ;;  %v3393_v17 = vmul.f32 %v4742_v58, %v3357_v56  ;;  %v3395_v20 = vmul.f32 %v4742_v58, %v3359_v57  ;;  %v3397_v21 = vmul.f32 %v4742_v58, %v3361_v61 }
 0x236   :  { %v3459_v26 = vmul.f32 %v6163_v43, %v3415_v19  ;;  %v3399_v27 = vmul.f32 %v4742_v58, %v3363_v2  ;;  %v3401_v29 = vmul.f32 %v4742_v58, %v3365_v8  ;;  %v3403_v31 = vmul.f32 %v4742_v58, %v3367_v22 }
 0x237   :  { %v3405_v32 = vmul.f32 %v4742_v58, %v3369_v30  ;;  %v3407_v33 = vmul.f32 %v4742_v58, %v3371_v46  ;;  %v3409_v36 = vmul.f32 %v4742_v58, %v3373_v54  ;;  %v3411_v40 = vmul.f32 %v4742_v58, %v3375_v9 }
 0x238   :  { %v3413_v42 = vmul.f32 %v4742_v58, %v3377_v18  ;;  %v3503_v45 = vadd.f32 %v6165_v10, %v3459_v26  ;;  %v3425_v52 = vsub.s32 1, %v6084_v37  ;;  %v3429_v37 = vmul.f32 %v6163_v43, %v3385_v6 }
 0x239   :  { %v4744_v44 = vpop.eup %4743  ;;  %v3437_v63 = vmul.f32 %v6163_v43, %v3393_v17  ;;  %v3447_v53 = vmul.f32 %v6163_v43, %v3403_v31  ;;  %v3451_v19 = vmul.f32 %v6163_v43, %v3407_v33 }
 0x23a   :  { %v3386_v48 = vmul.f32 %v4744_v44, %v3350_v16  ;;  %v3388_v50 = vmul.f32 %v4744_v44, %v3352_v39  ;;  %v3390_v55 = vmul.f32 %v4744_v44, %v3354_v51  ;;  %v3392_v56 = vmul.f32 %v4744_v44, %v3356_v14 }
 0x23b   :  { %v3394_v57 = vmul.f32 %v4744_v44, %v3358_v28  ;;  %v3396_v60 = vmul.f32 %v4744_v44, %v3360_v0  ;;  %v3398_v61 = vmul.f32 %v4744_v44, %v3362_v5  ;;  %v3400_v2 = vmul.f32 %v4744_v44, %v3364_v11 }
 0x23c   :  { %v3402_v8 = vmul.f32 %v4744_v44, %v3366_v1  ;;  %v3404_v22 = vmul.f32 %v4744_v44, %v3368_v25  ;;  %v3406_v30 = vmul.f32 %v4744_v44, %v3370_v35  ;;  %v3408_v46 = vmul.f32 %v4744_v44, %v3372_v49 }
 0x23d   :  { %v3410_v54 = vmul.f32 %v4744_v44, %v3374_v59  ;;  %v3412_v9 = vmul.f32 %v4744_v44, %v3376_v13  ;;  %v3414_v18 = vmul.f32 %v4744_v44, %v3378_v24  ;;  %v3416_v38 = vmul.f32 %v4744_v44, %v3380_v41 }
 0x23e   :  { %v3567_v62 = vmul.f32 0.2, %v3503_v45  ;;  %v3426_v47 = vrot.slane %v3417_v7, %v3425_v52  ;;  %vm3535_vm0 = vcmp.gt.f32.partialorder %v3503_v45, 0.0  ;;  %v6170_v3 = vrot.slane %v3461_v23, %v3425_v52 }
 0x23f   :  { %v3431_v16 = vmul.f32 %v6163_v43, %v3387_v34  ;;  %v3433_v39 = vmul.f32 %v6163_v43, %v3389_v12  ;;  %v3435_v51 = vmul.f32 %v6163_v43, %v3391_v15  ;;  %v3439_v0 = vmul.f32 %v6163_v43, %v3395_v20 }
 0x240   :  { %v6176_v14 = vsel %vm3535_vm0, %v3503_v45, %v3567_v62  ;;  %v3430_v28 = vmul.f32 %v3426_v47, %v3386_v48  ;;  %v3432_v5 = vmul.f32 %v3426_v47, %v3388_v50  ;;  %v3434_v11 = vmul.f32 %v3426_v47, %v3390_v55 }
 0x241   :  { %v3436_v1 = vmul.f32 %v3426_v47, %v3392_v56  ;;  %v3438_v25 = vmul.f32 %v3426_v47, %v3394_v57  ;;  %v3440_v35 = vmul.f32 %v3426_v47, %v3396_v60  ;;  %v3441_v49 = vmul.f32 %v6163_v43, %v3397_v21 }
 0x242   :  { %v3442_v59 = vmul.f32 %v3426_v47, %v3398_v61  ;;  %v3443_v13 = vmul.f32 %v6163_v43, %v3399_v27  ;;  %v3444_v24 = vmul.f32 %v3426_v47, %v3400_v2  ;;  %v3445_v41 = vmul.f32 %v6163_v43, %v3401_v29 }
 0x243   :  { %v3446_v4 = vmul.f32 %v3426_v47, %v3402_v8  ;;  %v3448_v7 = vmul.f32 %v3426_v47, %v3404_v22  ;;  %v3449_v23 = vmul.f32 %v6163_v43, %v3405_v32  ;;  %v3450_v58 = vmul.f32 %v3426_v47, %v3406_v30 }
 0x244   :  { %v3452_v6 = vmul.f32 %v3426_v47, %v3408_v46  ;;  %v3453_v34 = vmul.f32 %v6163_v43, %v3409_v36  ;;  %v3454_v12 = vmul.f32 %v3426_v47, %v3410_v54  ;;  %v3455_v15 = vmul.f32 %v6163_v43, %v3411_v40 }
 0x245   :  { %v3456_v17 = vmul.f32 %v3426_v47, %v3412_v9  ;;  %v3457_v20 = vmul.f32 %v6163_v43, %v3413_v42  ;;  %v3458_v21 = vmul.f32 %v3426_v47, %v3414_v18  ;;  %v3460_v26 = vmul.f32 %v3426_v47, %v3416_v38 }
 0x246   :  { %v3473_v27 = vadd.f32 %v6165_v10, %v3429_v37  ;;  %v6191_v29 = vadd.f32 %v6170_v3, %v3430_v28  ;;  %v6194_v31 = vadd.f32 %v6165_v10, %v3431_v16  ;;  %v6197_v32 = vadd.f32 %v6170_v3, %v3432_v5 }
 0x247   :  { %v6200_v33 = vadd.f32 %v6165_v10, %v3433_v39  ;;  %v6203_v36 = vadd.f32 %v6170_v3, %v3434_v11  ;;  %v6206_v43 = vadd.f32 %v6165_v10, %v3435_v51  ;;  %v6209_v40 = vadd.f32 %v6170_v3, %v3436_v1 }
 0x248   :  { %v6212_v42 = vadd.f32 %v6165_v10, %v3437_v63  ;;  %v6215_v44 = vadd.f32 %v6170_v3, %v3438_v25  ;;  %v6218_v45 = vadd.f32 %v6165_v10, %v3439_v0  ;;  %v6221_v48 = vadd.f32 %v6170_v3, %v3440_v35 }
 0x249   :  { %v6224_v50 = vadd.f32 %v6165_v10, %v3441_v49  ;;  %v6227_v52 = vadd.f32 %v6170_v3, %v3442_v59  ;;  %v6230_v55 = vadd.f32 %v6165_v10, %v3443_v13  ;;  %v6233_v56 = vadd.f32 %v6170_v3, %v3444_v24 }
 0x24a   :  { %v6236_v57 = vadd.f32 %v6165_v10, %v3445_v41  ;;  %v6239_v60 = vadd.f32 %v6170_v3, %v3446_v4  ;;  %v6242_v61 = vadd.f32 %v6165_v10, %v3447_v53  ;;  %v6245_v2 = vadd.f32 %v6170_v3, %v3448_v7 }
 0x24b   :  { %v6248_v8 = vadd.f32 %v6165_v10, %v3449_v23  ;;  %v6251_v22 = vadd.f32 %v6170_v3, %v3450_v58  ;;  %v6254_v30 = vadd.f32 %v6165_v10, %v3451_v19  ;;  %v6257_v46 = vadd.f32 %v6170_v3, %v3452_v6 }
 0x24c   :  { %v6260_v54 = vadd.f32 %v6165_v10, %v3453_v34  ;;  %v6263_v9 = vadd.f32 %v6170_v3, %v3454_v12  ;;  %v6266_v18 = vadd.f32 %v6165_v10, %v3455_v15  ;;  %v6269_v38 = vadd.f32 %v6170_v3, %v3456_v17 }
 0x24d   :  { %v6272_v62 = vadd.f32 %v6165_v10, %v3457_v20  ;;  %v6275_v47 = vadd.f32 %v6170_v3, %v3458_v21  ;;  %vm3505_vm1 = vcmp.gt.f32.partialorder %v3473_v27, 0.0  ;;  %vm3506_vm2 = vcmp.gt.f32.partialorder %v6191_v29, 0.0 }
 0x24e   :  { %vm3507_vm3 = vcmp.gt.f32.partialorder %v6194_v31, 0.0  ;;  %vm3508_vm4 = vcmp.gt.f32.partialorder %v6197_v32, 0.0  ;;  %vm3509_vm5 = vcmp.gt.f32.partialorder %v6200_v33, 0.0  ;;  %vm3510_vm6 = vcmp.gt.f32.partialorder %v6203_v36, 0.0 }
 0x24f   :  { %vm3511_vm7 = vcmp.gt.f32.partialorder %v6206_v43, 0.0  ;;  %vm3512_vm8 = vcmp.gt.f32.partialorder %v6209_v40, 0.0  ;;  %vm3513_vm9 = vcmp.gt.f32.partialorder %v6212_v42, 0.0  ;;  %v3537_v10 = vmul.f32 0.2, %v3473_v27 }
 0x250   :  { %v3538_v37 = vmul.f32 0.2, %v6191_v29  ;;  %v6292_v16 = vadd.f32 %v6170_v3, %v3460_v26  ;;  %vm3520_vm0 = vcmp.gt.f32.partialorder %v6233_v56, 0.0  ;;  %v3539_v39 = vmul.f32 0.2, %v6194_v31 }
 0x251   :  { %v3540_v51 = vmul.f32 0.2, %v6197_v32  ;;  %v3541_v28 = vmul.f32 0.2, %v6200_v33  ;;  %vm3525_vm12 = vcmp.gt.f32.partialorder %v6248_v8, 0.0  ;;  %vm3526_vm15 = vcmp.gt.f32.partialorder %v6251_v22, 0.0 }
 0x252   :  { %v3542_v3 = vmul.f32 0.2, %v6203_v36  ;;  %v3543_v63 = vmul.f32 0.2, %v6206_v43  ;;  %v3544_v0 = vmul.f32 0.2, %v6209_v40  ;;  %v6309_v5 = vsel %vm3505_vm1, %v3473_v27, %v3537_v10 }
 0x253   :  { %vm3530_vm13 = vcmp.gt.f32.partialorder %v6263_v9, 0.0  ;;  %v3545_v11 = vmul.f32 0.2, %v6212_v42  ;;  %v3546_v1 = vmul.f32 0.2, %v6215_v44  ;;  %v6321_v35 = vsel %vm3506_vm2, %v6191_v29, %v3538_v37 }
 0x254   :  { %v3547_v25 = vmul.f32 0.2, %v6218_v45  ;;  %vm3531_vm1 = vcmp.gt.f32.partialorder %v6266_v18, 0.0  ;;  %vm3532_vm11 = vcmp.gt.f32.partialorder %v6269_v38, 0.0  ;;  %vm3533_vm10 = vcmp.gt.f32.partialorder %v6272_v62, 0.0 }
 0x255   :  { %vm3534_vm14 = vcmp.gt.f32.partialorder %v6275_v47, 0.0  ;;  %v3548_v49 = vmul.f32 0.2, %v6221_v48  ;;  %v3549_v59 = vmul.f32 0.2, %v6224_v50  ;;  %v3571_v24 = vsel %vm3507_vm3, %v6194_v31, %v3539_v39 }
 0x256   :  { %v3550_v13 = vmul.f32 0.2, %v6227_v52  ;;  %vm3536_vm2 = vcmp.gt.f32.partialorder %v6292_v16, 0.0  ;;  %v3551_v41 = vmul.f32 0.2, %v6230_v55  ;;  %v3572_v7 = vsel %vm3508_vm4, %v6197_v32, %v3540_v51 }
 0x257   :  { %v3552_v4 = vmul.f32 0.2, %v6233_v56  ;;  %v3553_v53 = vmul.f32 0.2, %v6236_v57  ;;  %v3554_v23 = vmul.f32 0.2, %v6239_v60  ;;  %v3573_v6 = vsel %vm3509_vm5, %v6200_v33, %v3541_v28 }
 0x258   :  { %v3555_v58 = vmul.f32 0.2, %v6242_v61  ;;  %v3556_v19 = vmul.f32 0.2, %v6245_v2  ;;  %v3557_v34 = vmul.f32 0.2, %v6248_v8  ;;  %v3574_v17 = vsel %vm3510_vm6, %v6203_v36, %v3542_v3 }
 0x259   :  { %v3558_v12 = vmul.f32 0.2, %v6251_v22  ;;  %v3559_v15 = vmul.f32 0.2, %v6254_v30  ;;  %v3560_v20 = vmul.f32 0.2, %v6257_v46  ;;  %v3575_v27 = vsel %vm3511_vm7, %v6206_v43, %v3543_v63 }
 0x25a   :  { %v3561_v21 = vmul.f32 0.2, %v6260_v54  ;;  %v3562_v26 = vmul.f32 0.2, %v6263_v9  ;;  %v3563_v29 = vmul.f32 0.2, %v6266_v18  ;;  %v3576_v33 = vsel %vm3512_vm8, %v6209_v40, %v3544_v0 }
 0x25b   :  { %v3564_v31 = vmul.f32 0.2, %v6269_v38  ;;  %v3565_v32 = vmul.f32 0.2, %v6272_v62  ;;  %v3566_v36 = vmul.f32 0.2, %v6275_v47  ;;  %v3577_v37 = vsel %vm3513_vm9, %v6212_v42, %v3545_v11 }
 0x25c   :  { %v3568_v10 = vmul.f32 0.2, %v6292_v16  ;;  %vm6491_vm3 = vcmp.gt.f32.partialorder %v6215_v44, 0.0  ;;  %vm6492_vm4 = vcmp.gt.f32.partialorder %v6218_v45, 0.0  ;;  %vm6493_vm5 = vcmp.gt.f32.partialorder %v6221_v48, 0.0 }
 0x25d   :  { %v3578_v43 = vsel %vm6491_vm3, %v6215_v44, %v3546_v1  ;;  %v3579_v39 = vsel %vm6492_vm4, %v6218_v45, %v3547_v25  ;;  %v3580_v40 = vsel %vm6493_vm5, %v6221_v48, %v3548_v49  ;;  %vm6494_vm6 = vcmp.gt.f32.partialorder %v6224_v50, 0.0 }
 0x25e   :  { %v3581_v51 = vsel %vm6494_vm6, %v6224_v50, %v3549_v59  ;;  %vm6495_vm7 = vcmp.gt.f32.partialorder %v6227_v52, 0.0  ;;  %vm6496_vm8 = vcmp.gt.f32.partialorder %v6230_v55, 0.0  ;;  %v3584_v45 = vsel %vm3520_vm0, %v6233_v56, %v3552_v4 }
 0x25f   :  { %v3582_v42 = vsel %vm6495_vm7, %v6227_v52, %v3550_v13  ;;  %v3583_v44 = vsel %vm6496_vm8, %v6230_v55, %v3551_v41  ;;  %vm6497_vm9 = vcmp.gt.f32.partialorder %v6236_v57, 0.0  ;;  %vm6498_vm3 = vcmp.gt.f32.partialorder %v6239_v60, 0.0 }
 0x260   :  { %v3585_v48 = vsel %vm6497_vm9, %v6236_v57, %v3553_v53  ;;  %v3586_v50 = vsel %vm6498_vm3, %v6239_v60, %v3554_v23  ;;  %vm6499_vm4 = vcmp.gt.f32.partialorder %v6242_v61, 0.0  ;;  %vm6500_vm5 = vcmp.gt.f32.partialorder %v6245_v2, 0.0 }
 0x261   :  { %v3587_v52 = vsel %vm6499_vm4, %v6242_v61, %v3555_v58  ;;  %v3588_v55 = vsel %vm6500_vm5, %v6245_v2, %v3556_v19  ;;  %v3589_v56 = vsel %vm3525_vm12, %v6248_v8, %v3557_v34  ;;  %v3590_v57 = vsel %vm3526_vm15, %v6251_v22, %v3558_v12 }
 0x262   :  { %vm6501_vm0 = vcmp.gt.f32.partialorder %v6254_v30, 0.0  ;;  %vm6502_vm6 = vcmp.gt.f32.partialorder %v6257_v46, 0.0  ;;  %vm6503_vm7 = vcmp.gt.f32.partialorder %v6260_v54, 0.0  ;;  %v3594_v8 = vsel %vm3530_vm13, %v6263_v9, %v3562_v26 }
 0x263   :  { %v3591_v60 = vsel %vm6501_vm0, %v6254_v30, %v3559_v15  ;;  %v3592_v61 = vsel %vm6502_vm6, %v6257_v46, %v3560_v20  ;;  %v3593_v2 = vsel %vm6503_vm7, %v6260_v54, %v3561_v21  ;;  %v3595_v22 = vsel %vm3531_vm1, %v6266_v18, %v3563_v29 }
 0x264   :  { %v3596_v30 = vsel %vm3532_vm11, %v6269_v38, %v3564_v31  ;;  %v3597_v46 = vsel %vm3533_vm10, %v6272_v62, %v3565_v32  ;;  %v3598_v54 = vsel %vm3534_vm14, %v6275_v47, %v3566_v36  ;;  %v3600_v9 = vsel %vm3536_vm2, %v6292_v16, %v3568_v10 }
 0x265   :  { %v4117_v28 = vpack.c.bf16 %v6321_v35, %v6309_v5  ;;  %v4118_v18 = vpack.c.bf16 %v3572_v7, %v3571_v24  ;;  %v4119_v3 = vpack.c.bf16 %v3574_v17, %v3573_v6  ;;  %v4120_v63 = vpack.c.bf16 %v3576_v33, %v3575_v27 }
 0x266   :  { %v4121_v0 = vpack.c.bf16 %v3578_v43, %v3577_v37  ;;  %v4122_v38 = vpack.c.bf16 %v3580_v40, %v3579_v39  ;;  %v4123_v11 = vpack.c.bf16 %v3582_v42, %v3581_v51  ;;  %v4124_v1 = vpack.c.bf16 %v3584_v45, %v3583_v44 }
 0x267   :  { %v4125_v25 = vpack.c.bf16 %v3586_v50, %v3585_v48  ;;  %v4126_v62 = vpack.c.bf16 %v3588_v55, %v3587_v52  ;;  %v4127_v49 = vpack.c.bf16 %v3590_v57, %v3589_v56  ;;  %3697 = vst [vmem:[%s6490_s4] sm:$0xff] %v4117_v28  ;;  %3698 = vst [vmem:[%s6490_s4 + $0x8] sm:$0xff] %v4118_v18 }
 0x268   :  { %3699 = vst [vmem:[%s6490_s4 + $0x10] sm:$0xff] %v4119_v3  ;;  %v4128_v47 = vpack.c.bf16 %v3592_v61, %v3591_v60  ;;  %v4129_v16 = vpack.c.bf16 %v3594_v8, %v3593_v2  ;;  %v4130_v5 = vpack.c.bf16 %v3596_v30, %v3595_v22  ;;  %v4131_v35 = vpack.c.bf16 %v3598_v54, %v3597_v46 }
 0x269   :  { %3700 = vst [vmem:[%s6490_s4 + $0x18] sm:$0xff] %v4120_v63  ;;  %3701 = vst [vmem:[%s6490_s4 + $0x20] sm:$0xff] %v4121_v0  ;;  %v4132_v59 = vpack.c.bf16 %v3600_v9, %v6176_v14 }
 0x26a   :  { %3702 = vst [vmem:[%s6490_s4 + $0x28] sm:$0xff] %v4122_v38  ;;  %3703 = vst [vmem:[%s6490_s4 + $0x30] sm:$0xff] %v4123_v11 }
 0x26b   :  { %3704 = vst [vmem:[%s6490_s4 + $0x38] sm:$0xff] %v4124_v1  ;;  %3705 = vst [vmem:[%s6490_s4 + $0x40] sm:$0xff] %v4125_v25 }
 0x26c   :  { %3706 = vst [vmem:[%s6490_s4 + $0x48] sm:$0xff] %v4126_v62  ;;  %3707 = vst [vmem:[%s6490_s4 + $0x50] sm:$0xff] %v4127_v49 }
 0x26d   :  { %3708 = vst [vmem:[%s6490_s4 + $0x58] sm:$0xff] %v4128_v47  ;;  %3709 = vst [vmem:[%s6490_s4 + $0x60] sm:$0xff] %v4129_v16 }
 0x26e   :  { %3710 = vst [vmem:[%s6490_s4 + $0x68] sm:$0xff] %v4130_v5  ;;  %3711 = vst [vmem:[%s6490_s4 + $0x70] sm:$0xff] %v4131_v35 }
 0x26f   :  { %3712 = vst [vmem:[%s6490_s4 + $0x78] sm:$0xff] %v4132_v59 }

// kernel: discriminator_forward.7
= control target key start
LH: loop header
LB: loop body
LE: loop exit
PB: predicated region body
PF: predicated region fallthrough
CT: control target
= control target key end

     0   :  { %s15331_s1 = inlined_call_operand.vmem [shape: bf16[4096,512], index: 1, kind: input, shape index: {}]   ;;  %s15332_s0 = inlined_call_operand.vmem [shape: bf16[32,4096], index: 0, kind: input, shape index: {}]   ;;  %s15333_s2 = inlined_call_operand.vmem [shape: f32[1,512], index: 2, kind: input, shape index: {}]   ;;  %s15334_s3 = inlined_call_operand.vmem [shape: f32[1,512], index: 3, kind: input, shape index: {}]   ;;  %s15335_s4 = inlined_call_operand.vmem [shape: f32[32,512], index: 4, kind: input, shape index: {}]   ;;  %s15336_s5 = inlined_call_operand.vmem [shape: f32[2,32], index: 5, kind: input, shape index: {}]   ;;  %s15337_s6 = inlined_call_operand.vmem [shape: f32[2,1], index: 6, kind: output, shape index: {}]  }
   0x1   :  { %v10064_v0 = vld [vmem:[%s15331_s1 + $0x4] ss:$16 sps:$4 sm:$0xff]   ;;  %v10066_v1 = vld [vmem:[%s15331_s1 + $0xc] ss:$16 sps:$4 sm:$0xff]   ;;  %v10068_v2 = vld [vmem:[%s15331_s1] ss:$16 sps:$4 sm:$0xff]  }
   0x2   :  { %6551 = vmatprep.subr.bf16.mxu0 %v10064_v0  ;;  %v10069_v3 = vld [vmem:[%s15331_s1 + $0x8] ss:$16 sps:$4 sm:$0xff]   ;;  %7399 = vmatprep.subr.bf16.mxu1 %v10066_v1  ;;  %v10070_v4 = vld [vmem:[%s15331_s1 + $0x24] ss:$16 sps:$4 sm:$0xff]   ;;  %v10072_v5 = vld [vmem:[%s15331_s1 + $0x2c] ss:$16 sps:$4 sm:$0xff]  }
   0x3   :  { %6552 = vmatpush1.bf16.msra.mxu0 %v10068_v2  ;;  %7400 = vmatpush1.bf16.msra.mxu1 %v10069_v3  ;;  %v10074_v6 = vld [vmem:[%s15331_s1 + $0x20] ss:$16 sps:$4 sm:$0xff]   ;;  %v10075_v7 = vld [vmem:[%s15331_s1 + $0x28] ss:$16 sps:$4 sm:$0xff]   ;;  %v10076_v8 = vld [vmem:[%s15331_s1 + $0x44] ss:$16 sps:$4 sm:$0xff]  }
   0x4   :  { %6553 = vmatprep.subr.bf16.mxu0 %v10070_v4  ;;  %7401 = vmatprep.subr.bf16.mxu1 %v10072_v5  ;;  %v10078_v9 = vld [vmem:[%s15331_s1 + $0x4c] ss:$16 sps:$4 sm:$0xff]   ;;  %v10080_v10 = vld [vmem:[%s15331_s1 + $0x40] ss:$16 sps:$4 sm:$0xff]   ;;  %v10081_v11 = vld [vmem:[%s15331_s1 + $0x48] ss:$16 sps:$4 sm:$0xff]  }
   0x5   :  { %v10082_v12 = vld [vmem:[%s15331_s1 + $0x64] ss:$16 sps:$4 sm:$0xff]   ;;  %v10084_v13 = vld [vmem:[%s15331_s1 + $0x6c] ss:$16 sps:$4 sm:$0xff]   ;;  %v10086_v14 = vld [vmem:[%s15331_s1 + $0x60] ss:$16 sps:$4 sm:$0xff]  }
   0x6   :  { %v10087_v15 = vld [vmem:[%s15331_s1 + $0x68] ss:$16 sps:$4 sm:$0xff]   ;;  %v10088_v16 = vld [vmem:[%s15331_s1 + $0x84] ss:$16 sps:$4 sm:$0xff]   ;;  %v10090_v17 = vld [vmem:[%s15331_s1 + $0x8c] ss:$16 sps:$4 sm:$0xff]  }
   0x7   :  { %6554 = vmatpush1.bf16.msra.mxu0 %v10074_v6  ;;  %7402 = vmatpush1.bf16.msra.mxu1 %v10075_v7  ;;  %v10092_v18 = vld [vmem:[%s15331_s1 + $0x80] ss:$16 sps:$4 sm:$0xff]   ;;  %v10093_v19 = vld [vmem:[%s15331_s1 + $0x88] ss:$16 sps:$4 sm:$0xff]   ;;  %v10094_v20 = vld [vmem:[%s15331_s1 + $0xa4] ss:$16 sps:$4 sm:$0xff]  }
   0x8   :  { %6555 = vmatprep.subr.bf16.mxu0 %v10076_v8  ;;  %7403 = vmatprep.subr.bf16.mxu1 %v10078_v9  ;;  %v10096_v21 = vld [vmem:[%s15331_s1 + $0xac] ss:$16 sps:$4 sm:$0xff]   ;;  %v10098_v22 = vld [vmem:[%s15331_s1 + $0xa0] ss:$16 sps:$4 sm:$0xff]   ;;  %v10099_v23 = vld [vmem:[%s15331_s1 + $0xa8] ss:$16 sps:$4 sm:$0xff]  }
   0x9   :  { %v10100_v24 = vld [vmem:[%s15331_s1 + $0xc4] ss:$16 sps:$4 sm:$0xff]   ;;  %v10102_v25 = vld [vmem:[%s15331_s1 + $0xcc] ss:$16 sps:$4 sm:$0xff]   ;;  %v10104_v26 = vld [vmem:[%s15331_s1 + $0xc0] ss:$16 sps:$4 sm:$0xff]  }
   0xa   :  { %v10105_v27 = vld [vmem:[%s15331_s1 + $0xc8] ss:$16 sps:$4 sm:$0xff]   ;;  %v10106_v28 = vld [vmem:[%s15331_s1 + $0xe4] ss:$16 sps:$4 sm:$0xff]   ;;  %v10108_v29 = vld [vmem:[%s15331_s1 + $0xec] ss:$16 sps:$4 sm:$0xff]  }
   0xb   :  { %6556 = vmatpush1.bf16.msra.mxu0 %v10080_v10  ;;  %7404 = vmatpush1.bf16.msra.mxu1 %v10081_v11  ;;  %v10110_v30 = vld [vmem:[%s15331_s1 + $0xe0] ss:$16 sps:$4 sm:$0xff]   ;;  %v10111_v31 = vld [vmem:[%s15331_s1 + $0xe8] ss:$16 sps:$4 sm:$0xff]   ;;  %v10112_v32 = vld [vmem:[%s15331_s1 + $0x104] ss:$16 sps:$4 sm:$0xff]  }
   0xc   :  { %6557 = vmatprep.subr.bf16.mxu0 %v10082_v12  ;;  %7405 = vmatprep.subr.bf16.mxu1 %v10084_v13  ;;  %v10114_v33 = vld [vmem:[%s15331_s1 + $0x10c] ss:$16 sps:$4 sm:$0xff]   ;;  %v10116_v34 = vld [vmem:[%s15331_s1 + $0x100] ss:$16 sps:$4 sm:$0xff]   ;;  %v10117_v35 = vld [vmem:[%s15331_s1 + $0x108] ss:$16 sps:$4 sm:$0xff]  }
   0xd   :  { %v10118_v36 = vld [vmem:[%s15331_s1 + $0x124] ss:$16 sps:$4 sm:$0xff]   ;;  %v10120_v37 = vld [vmem:[%s15331_s1 + $0x12c] ss:$16 sps:$4 sm:$0xff]   ;;  %v10122_v38 = vld [vmem:[%s15331_s1 + $0x120] ss:$16 sps:$4 sm:$0xff]  }
   0xe   :  { %v10123_v39 = vld [vmem:[%s15331_s1 + $0x128] ss:$16 sps:$4 sm:$0xff]   ;;  %v10124_v40 = vld [vmem:[%s15331_s1 + $0x144] ss:$16 sps:$4 sm:$0xff]   ;;  %v10126_v41 = vld [vmem:[%s15331_s1 + $0x14c] ss:$16 sps:$4 sm:$0xff]  }
   0xf   :  { %6558 = vmatpush1.bf16.msra.mxu0 %v10086_v14  ;;  %7406 = vmatpush1.bf16.msra.mxu1 %v10087_v15  ;;  %v10128_v42 = vld [vmem:[%s15331_s1 + $0x140] ss:$16 sps:$4 sm:$0xff]   ;;  %v10129_v43 = vld [vmem:[%s15331_s1 + $0x148] ss:$16 sps:$4 sm:$0xff]   ;;  %v10130_v44 = vld [vmem:[%s15331_s1 + $0x164] ss:$16 sps:$4 sm:$0xff]  }
  0x10   :  { %6559 = vmatprep.subr.bf16.mxu0 %v10088_v16  ;;  %7407 = vmatprep.subr.bf16.mxu1 %v10090_v17  ;;  %v10132_v45 = vld [vmem:[%s15331_s1 + $0x16c] ss:$16 sps:$4 sm:$0xff]   ;;  %v23_v46 = vld [vmem:[%s15332_s0] sm:$0xff]  ;;  %v10135_v49 = vld [vmem:[%s15331_s1 + $0x168] ss:$16 sps:$4 sm:$0xff]  }
  0x11   :  { %v39_v47 = vld [vmem:[%s15332_s0 + $0x80] sm:$0xff]  ;;  %v10138_v52 = vld [vmem:[%s15331_s1 + $0x18c] ss:$16 sps:$4 sm:$0xff]   ;;  %v10141_v54 = vld [vmem:[%s15331_s1 + $0x188] ss:$16 sps:$4 sm:$0xff]  }
  0x12   :  { %v10134_v48 = vld [vmem:[%s15331_s1 + $0x160] ss:$16 sps:$4 sm:$0xff]   ;;  %v8718_v50 = vcombine.high %v23_v46, %v39_v47  ;;  %v10136_v51 = vld [vmem:[%s15331_s1 + $0x184] ss:$16 sps:$4 sm:$0xff]   ;;  %v10144_v56 = vld [vmem:[%s15331_s1 + $0x1ac] ss:$16 sps:$4 sm:$0xff]   ;;  %v8717_v5 = vcombine.low %v23_v46, %v39_v47 }
  0x13   :  { %6560 = vmatpush1.bf16.msra.mxu0 %v10092_v18  ;;  %7408 = vmatpush1.bf16.msra.mxu1 %v10093_v19  ;;  %v10140_v53 = vld [vmem:[%s15331_s1 + $0x180] ss:$16 sps:$4 sm:$0xff]   ;;  %v10142_v55 = vld [vmem:[%s15331_s1 + $0x1a4] ss:$16 sps:$4 sm:$0xff]   ;;  %v10147_v58 = vld [vmem:[%s15331_s1 + $0x1a8] ss:$16 sps:$4 sm:$0xff]  }
  0x14   :  { %6561 = vmatprep.subr.bf16.mxu0 %v10094_v20  ;;  %7409 = vmatprep.subr.bf16.mxu1 %v10096_v21  ;;  %v10146_v57 = vld [vmem:[%s15331_s1 + $0x1a0] ss:$16 sps:$4 sm:$0xff]   ;;  %v10148_v59 = vld [vmem:[%s15331_s1 + $0x1c4] ss:$16 sps:$4 sm:$0xff]   ;;  %v10150_v60 = vld [vmem:[%s15331_s1 + $0x1cc] ss:$16 sps:$4 sm:$0xff]  }
  0x15   :  { %6583 = vmatprep.mubr.bf16.mxu0 %v8718_v50  ;;  %7431 = vmatprep.mubr.bf16.mxu1 %v8718_v50  ;;  %v10152_v61 = vld [vmem:[%s15331_s1 + $0x1c0] ss:$16 sps:$4 sm:$0xff]   ;;  %v10153_v62 = vld [vmem:[%s15331_s1 + $0x1c8] ss:$16 sps:$4 sm:$0xff]   ;;  %v10154_v63 = vld [vmem:[%s15331_s1 + $0x1e4] ss:$16 sps:$4 sm:$0xff]  }
  0x16   :  { %v10156_v0 = vld [vmem:[%s15331_s1 + $0x1ec] ss:$16 sps:$4 sm:$0xff]   ;;  %v10158_v1 = vld [vmem:[%s15331_s1 + $0x1e0] ss:$16 sps:$4 sm:$0xff]   ;;  %v10159_v2 = vld [vmem:[%s15331_s1 + $0x1e8] ss:$16 sps:$4 sm:$0xff]  }
  0x17   :  { %6562 = vmatpush1.bf16.msra.mxu0 %v10098_v22  ;;  %7410 = vmatpush1.bf16.msra.mxu1 %v10099_v23  ;;  %v10162_v3 = vld [vmem:[%s15331_s1 + $0x204] ss:$16 sps:$4 sm:$0xff]   ;;  %v10165_v4 = vld [vmem:[%s15331_s1 + $0x20c] ss:$16 sps:$4 sm:$0xff]   ;;  %v10160_v6 = vld [vmem:[%s15331_s1 + $0x200] ss:$16 sps:$4 sm:$0xff]  }
  0x18   :  { %6563 = vmatprep.subr.bf16.mxu0 %v10100_v24  ;;  %7411 = vmatprep.subr.bf16.mxu1 %v10102_v25  ;;  %v10163_v7 = vld [vmem:[%s15331_s1 + $0x208] ss:$16 sps:$4 sm:$0xff]   ;;  %v10168_v8 = vld [vmem:[%s15331_s1 + $0x224] ss:$16 sps:$4 sm:$0xff]   ;;  %v10171_v9 = vld [vmem:[%s15331_s1 + $0x22c] ss:$16 sps:$4 sm:$0xff]  }
  0x19   :  { %v10166_v10 = vld [vmem:[%s15331_s1 + $0x220] ss:$16 sps:$4 sm:$0xff]   ;;  %v10169_v11 = vld [vmem:[%s15331_s1 + $0x228] ss:$16 sps:$4 sm:$0xff]   ;;  %v10174_v12 = vld [vmem:[%s15331_s1 + $0x244] ss:$16 sps:$4 sm:$0xff]  }
  0x1a   :  { %v10177_v13 = vld [vmem:[%s15331_s1 + $0x24c] ss:$16 sps:$4 sm:$0xff]   ;;  %v10172_v14 = vld [vmem:[%s15331_s1 + $0x240] ss:$16 sps:$4 sm:$0xff]   ;;  %v10175_v15 = vld [vmem:[%s15331_s1 + $0x248] ss:$16 sps:$4 sm:$0xff]  }
  0x1b   :  { %6564 = vmatpush1.bf16.msra.mxu0 %v10104_v26  ;;  %7412 = vmatpush1.bf16.msra.mxu1 %v10105_v27  ;;  %v10180_v16 = vld [vmem:[%s15331_s1 + $0x264] ss:$16 sps:$4 sm:$0xff]   ;;  %v10183_v17 = vld [vmem:[%s15331_s1 + $0x26c] ss:$16 sps:$4 sm:$0xff]   ;;  %v10178_v18 = vld [vmem:[%s15331_s1 + $0x260] ss:$16 sps:$4 sm:$0xff]  }
  0x1c   :  { %6565 = vmatprep.subr.bf16.mxu0 %v10106_v28  ;;  %7413 = vmatprep.subr.bf16.mxu1 %v10108_v29  ;;  %v10181_v19 = vld [vmem:[%s15331_s1 + $0x268] ss:$16 sps:$4 sm:$0xff]   ;;  %v10186_v20 = vld [vmem:[%s15331_s1 + $0x284] ss:$16 sps:$4 sm:$0xff]   ;;  %v10189_v21 = vld [vmem:[%s15331_s1 + $0x28c] ss:$16 sps:$4 sm:$0xff]  }
  0x1d   :  { %v10184_v22 = vld [vmem:[%s15331_s1 + $0x280] ss:$16 sps:$4 sm:$0xff]   ;;  %v10187_v23 = vld [vmem:[%s15331_s1 + $0x288] ss:$16 sps:$4 sm:$0xff]   ;;  %v10192_v24 = vld [vmem:[%s15331_s1 + $0x2a4] ss:$16 sps:$4 sm:$0xff]  }
  0x1e   :  { %v10195_v25 = vld [vmem:[%s15331_s1 + $0x2ac] ss:$16 sps:$4 sm:$0xff]   ;;  %v55_v26 = vld [vmem:[%s15332_s0 + $0x100] sm:$0xff]  ;;  %v10211_v46 = vld [vmem:[%s15331_s1 + $0x308] ss:$16 sps:$4 sm:$0xff]  }
  0x1f   :  { %6566 = vmatpush1.bf16.msra.mxu0 %v10110_v30  ;;  %7414 = vmatpush1.bf16.msra.mxu1 %v10111_v31  ;;  %v71_v27 = vld [vmem:[%s15332_s0 + $0x180] sm:$0xff]  ;;  %v10193_v30 = vld [vmem:[%s15331_s1 + $0x2a8] ss:$16 sps:$4 sm:$0xff]  }
  0x20   :  { %6567 = vmatprep.subr.bf16.mxu0 %v10112_v32  ;;  %7415 = vmatprep.subr.bf16.mxu1 %v10114_v33  ;;  %v8750_v28 = vcombine.high %v55_v26, %v71_v27  ;;  %v10190_v29 = vld [vmem:[%s15331_s1 + $0x2a0] ss:$16 sps:$4 sm:$0xff]   ;;  %v8749_v31 = vcombine.low %v55_v26, %v71_v27  ;;  %v10198_v32 = vld [vmem:[%s15331_s1 + $0x2c4] ss:$16 sps:$4 sm:$0xff]   ;;  %v10201_v33 = vld [vmem:[%s15331_s1 + $0x2cc] ss:$16 sps:$4 sm:$0xff]  }
  0x21   :  { %v10216_v47 = vld [vmem:[%s15331_s1 + $0x324] ss:$16 sps:$4 sm:$0xff]   ;;  %v10217_v50 = vld [vmem:[%s15331_s1 + $0x328] ss:$16 sps:$4 sm:$0xff]  }
  0x22   :  { %v12102_v27 = vld [vmem:[%s15332_s0 + $0x90] sm:$0xff] }
  0x23   :  { %6568 = vmatpush1.bf16.msra.mxu0 %v10116_v34  ;;  %7416 = vmatpush1.bf16.msra.mxu1 %v10117_v35  ;;  %v11933_v34 = vld [vmem:[%s15332_s0 + $0x8] sm:$0xff] }
  0x24   :  { %6569 = vmatprep.subr.bf16.mxu0 %v10118_v36  ;;  %7417 = vmatprep.subr.bf16.mxu1 %v10120_v37  ;;  %v11938_v35 = vld [vmem:[%s15332_s0 + $0x88] sm:$0xff]  ;;  %v10196_v36 = vld [vmem:[%s15331_s1 + $0x2c0] ss:$16 sps:$4 sm:$0xff]  }
  0x25   :  { %v10199_v37 = vld [vmem:[%s15331_s1 + $0x2c8] ss:$16 sps:$4 sm:$0xff]  }
  0x27   :  { %6570 = vmatpush1.bf16.msra.mxu0 %v10122_v38  ;;  %7418 = vmatpush1.bf16.msra.mxu1 %v10123_v39  ;;  %v8720_v38 = vcombine.high %v11933_v34, %v11938_v35  ;;  %v10204_v39 = vld [vmem:[%s15331_s1 + $0x2e4] ss:$16 sps:$4 sm:$0xff]  }
  0x28   :  { %6571 = vmatprep.subr.bf16.mxu0 %v10124_v40  ;;  %7419 = vmatprep.subr.bf16.mxu1 %v10126_v41  ;;  %v10207_v40 = vld [vmem:[%s15331_s1 + $0x2ec] ss:$16 sps:$4 sm:$0xff]   ;;  %v10202_v41 = vld [vmem:[%s15331_s1 + $0x2e0] ss:$16 sps:$4 sm:$0xff]  }
  0x2b   :  { %6572 = vmatpush1.bf16.msra.mxu0 %v10128_v42  ;;  %7420 = vmatpush1.bf16.msra.mxu1 %v10129_v43  ;;  %v10205_v42 = vld [vmem:[%s15331_s1 + $0x2e8] ss:$16 sps:$4 sm:$0xff]   ;;  %v10210_v43 = vld [vmem:[%s15331_s1 + $0x304] ss:$16 sps:$4 sm:$0xff]  }
  0x2c   :  { %6573 = vmatprep.subr.bf16.mxu0 %v10130_v44  ;;  %7421 = vmatprep.subr.bf16.mxu1 %v10132_v45  ;;  %v10213_v44 = vld [vmem:[%s15331_s1 + $0x30c] ss:$16 sps:$4 sm:$0xff]   ;;  %v10208_v45 = vld [vmem:[%s15331_s1 + $0x300] ss:$16 sps:$4 sm:$0xff]  }
  0x2f   :  { %6574 = vmatpush1.bf16.msra.mxu0 %v10134_v48  ;;  %7422 = vmatpush1.bf16.msra.mxu1 %v10135_v49  ;;  %v10219_v48 = vld [vmem:[%s15331_s1 + $0x32c] ss:$16 sps:$4 sm:$0xff]   ;;  %v10214_v49 = vld [vmem:[%s15331_s1 + $0x320] ss:$16 sps:$4 sm:$0xff]  }
  0x30   :  { %6575 = vmatprep.subr.bf16.mxu0 %v10136_v51  ;;  %7423 = vmatprep.subr.bf16.mxu1 %v10138_v52  ;;  %v10222_v51 = vld [vmem:[%s15331_s1 + $0x344] ss:$16 sps:$4 sm:$0xff]   ;;  %v10225_v52 = vld [vmem:[%s15331_s1 + $0x34c] ss:$16 sps:$4 sm:$0xff]  }
  0x33   :  { %6576 = vmatpush1.bf16.msra.mxu0 %v10140_v53  ;;  %7424 = vmatpush1.bf16.msra.mxu1 %v10141_v54  ;;  %v10220_v53 = vld [vmem:[%s15331_s1 + $0x340] ss:$16 sps:$4 sm:$0xff]   ;;  %v10223_v54 = vld [vmem:[%s15331_s1 + $0x348] ss:$16 sps:$4 sm:$0xff]  }
  0x34   :  { %6577 = vmatprep.subr.bf16.mxu0 %v10142_v55  ;;  %7425 = vmatprep.subr.bf16.mxu1 %v10144_v56  ;;  %v10228_v55 = vld [vmem:[%s15331_s1 + $0x364] ss:$16 sps:$4 sm:$0xff]   ;;  %v10231_v56 = vld [vmem:[%s15331_s1 + $0x36c] ss:$16 sps:$4 sm:$0xff]  }
  0x37   :  { %6578 = vmatpush1.bf16.msra.mxu0 %v10146_v57  ;;  %7426 = vmatpush1.bf16.msra.mxu1 %v10147_v58  ;;  %v10226_v57 = vld [vmem:[%s15331_s1 + $0x360] ss:$16 sps:$4 sm:$0xff]   ;;  %v10229_v58 = vld [vmem:[%s15331_s1 + $0x368] ss:$16 sps:$4 sm:$0xff]  }
  0x38   :  { %6579 = vmatprep.subr.bf16.mxu0 %v10148_v59  ;;  %7427 = vmatprep.subr.bf16.mxu1 %v10150_v60  ;;  %v10234_v59 = vld [vmem:[%s15331_s1 + $0x384] ss:$16 sps:$4 sm:$0xff]   ;;  %v10237_v60 = vld [vmem:[%s15331_s1 + $0x38c] ss:$16 sps:$4 sm:$0xff]  }
  0x3b   :  { %6580 = vmatpush1.bf16.msra.mxu0 %v10152_v61  ;;  %7428 = vmatpush1.bf16.msra.mxu1 %v10153_v62  ;;  %v10232_v61 = vld [vmem:[%s15331_s1 + $0x380] ss:$16 sps:$4 sm:$0xff]   ;;  %v10235_v62 = vld [vmem:[%s15331_s1 + $0x388] ss:$16 sps:$4 sm:$0xff]  }
  0x3c   :  { %6581 = vmatprep.subr.bf16.mxu0 %v10154_v63  ;;  %7429 = vmatprep.subr.bf16.mxu1 %v10156_v0  ;;  %v10240_v63 = vld [vmem:[%s15331_s1 + $0x3a4] ss:$16 sps:$4 sm:$0xff]   ;;  %v10243_v0 = vld [vmem:[%s15331_s1 + $0x3ac] ss:$16 sps:$4 sm:$0xff]  }
  0x3f   :  { %6582 = vmatpush1.bf16.msra.mxu0 %v10158_v1  ;;  %7430 = vmatpush1.bf16.msra.mxu1 %v10159_v2  ;;  %v10238_v1 = vld [vmem:[%s15331_s1 + $0x3a0] ss:$16 sps:$4 sm:$0xff]   ;;  %v10241_v2 = vld [vmem:[%s15331_s1 + $0x3a8] ss:$16 sps:$4 sm:$0xff]  }
  0x40   :  { %6604 = vmatprep.subr.bf16.mxu0 %v10162_v3  ;;  %7452 = vmatprep.subr.bf16.mxu1 %v10165_v4  ;;  %v10246_v3 = vld [vmem:[%s15331_s1 + $0x3c4] ss:$16 sps:$4 sm:$0xff]   ;;  %v10249_v4 = vld [vmem:[%s15331_s1 + $0x3cc] ss:$16 sps:$4 sm:$0xff]  }
  0x42   :  { %6584 = vmatmul.mubr.bf16.vlgmr.msra.gmra.mrb[0].mxu0 %v8717_v5  ;;  %7432 = vmatmul.mubr.bf16.vlgmr.msra.gmra.mrb[0].mxu1 %v8717_v5  ;;  %v10244_v5 = vld [vmem:[%s15331_s1 + $0x3c0] ss:$16 sps:$4 sm:$0xff]  }
  0x43   :  { %6605 = vmatpush1.bf16.msra.mxu0 %v10160_v6  ;;  %7453 = vmatpush1.bf16.msra.mxu1 %v10163_v7  ;;  %v10247_v6 = vld [vmem:[%s15331_s1 + $0x3c8] ss:$16 sps:$4 sm:$0xff]   ;;  %v10252_v7 = vld [vmem:[%s15331_s1 + $0x3e4] ss:$16 sps:$4 sm:$0xff]  }
  0x44   :  { %6606 = vmatprep.subr.bf16.mxu0 %v10168_v8  ;;  %7454 = vmatprep.subr.bf16.mxu1 %v10171_v9  ;;  %v10255_v8 = vld [vmem:[%s15331_s1 + $0x3ec] ss:$16 sps:$4 sm:$0xff]   ;;  %v10250_v9 = vld [vmem:[%s15331_s1 + $0x3e0] ss:$16 sps:$4 sm:$0xff]  }
  0x45   :  { %6593 = vmatprep.mubr.bf16.mxu0 %v8750_v28  ;;  %7441 = vmatprep.mubr.bf16.mxu1 %v8750_v28  ;;  %v10268_v28 = vld [vmem:[%s15331_s1 + $0x440] ss:$16 sps:$4 sm:$0xff]  }
  0x47   :  { %6607 = vmatpush1.bf16.msra.mxu0 %v10166_v10  ;;  %7455 = vmatpush1.bf16.msra.mxu1 %v10169_v11  ;;  %v10253_v10 = vld [vmem:[%s15331_s1 + $0x3e8] ss:$16 sps:$4 sm:$0xff]   ;;  %v10258_v11 = vld [vmem:[%s15331_s1 + $0x404] ss:$16 sps:$4 sm:$0xff]  }
  0x48   :  { %6608 = vmatprep.subr.bf16.mxu0 %v10174_v12  ;;  %7456 = vmatprep.subr.bf16.mxu1 %v10177_v13  ;;  %v10261_v12 = vld [vmem:[%s15331_s1 + $0x40c] ss:$16 sps:$4 sm:$0xff]   ;;  %v10256_v13 = vld [vmem:[%s15331_s1 + $0x400] ss:$16 sps:$4 sm:$0xff]  }
  0x4a   :  { %6594 = vmatmul.mubr.bf16.gmra.mrb[4].mxu0 %v8749_v31  ;;  %7442 = vmatmul.mubr.bf16.gmra.mrb[4].mxu1 %v8749_v31  ;;  %v10279_v31 = vld [vmem:[%s15331_s1 + $0x46c] ss:$16 sps:$4 sm:$0xff]  }
  0x4b   :  { %6609 = vmatpush1.bf16.msra.mxu0 %v10172_v14  ;;  %7457 = vmatpush1.bf16.msra.mxu1 %v10175_v15  ;;  %v10259_v14 = vld [vmem:[%s15331_s1 + $0x408] ss:$16 sps:$4 sm:$0xff]   ;;  %v8719_v15 = vcombine.low %v11933_v34, %v11938_v35  ;;  %v10282_v35 = vld [vmem:[%s15331_s1 + $0x484] ss:$16 sps:$4 sm:$0xff]  }
  0x4c   :  { %6610 = vmatprep.subr.bf16.mxu0 %v10180_v16  ;;  %7458 = vmatprep.subr.bf16.mxu1 %v10183_v17  ;;  %v56_v16 = vld [vmem:[%s15332_s0 + $0x108] sm:$0xff] }
  0x4d   :  { %6636 = vmatprep.mubr.bf16.mxu0 %v8720_v38  ;;  %7484 = vmatprep.mubr.bf16.mxu1 %v8720_v38  ;;  %v72_v17 = vld [vmem:[%s15332_s0 + $0x188] sm:$0xff] }
  0x4e   :  { %v8751_v26 = vcombine.low %v56_v16, %v72_v17  ;;  %v10277_v34 = vld [vmem:[%s15331_s1 + $0x468] ss:$16 sps:$4 sm:$0xff]  }
  0x4f   :  { %6611 = vmatpush1.bf16.msra.mxu0 %v10178_v18  ;;  %7459 = vmatpush1.bf16.msra.mxu1 %v10181_v19  ;;  %v10264_v18 = vld [vmem:[%s15331_s1 + $0x424] ss:$16 sps:$4 sm:$0xff]   ;;  %v10267_v19 = vld [vmem:[%s15331_s1 + $0x42c] ss:$16 sps:$4 sm:$0xff]   ;;  %v10283_v38 = vld [vmem:[%s15331_s1 + $0x488] ss:$16 sps:$4 sm:$0xff]  }
  0x50   :  { %6612 = vmatprep.subr.bf16.mxu0 %v10186_v20  ;;  %7460 = vmatprep.subr.bf16.mxu1 %v10189_v21  ;;  %v8752_v20 = vcombine.high %v56_v16, %v72_v17  ;;  %v10262_v21 = vld [vmem:[%s15331_s1 + $0x420] ss:$16 sps:$4 sm:$0xff]   ;;  %v10351_v16 = vld [vmem:[%s15331_s1 + $0x5ec] ss:$16 sps:$4 sm:$0xff]  }
  0x51   :  { %v10346_v17 = vld [vmem:[%s15331_s1 + $0x5e0] ss:$16 sps:$4 sm:$0xff]  }
  0x53   :  { %6613 = vmatpush1.bf16.msra.mxu0 %v10184_v22  ;;  %7461 = vmatpush1.bf16.msra.mxu1 %v10187_v23  ;;  %v10265_v22 = vld [vmem:[%s15331_s1 + $0x428] ss:$16 sps:$4 sm:$0xff]   ;;  %v10270_v23 = vld [vmem:[%s15331_s1 + $0x444] ss:$16 sps:$4 sm:$0xff]  }
  0x54   :  { %6614 = vmatprep.subr.bf16.mxu0 %v10192_v24  ;;  %7462 = vmatprep.subr.bf16.mxu1 %v10195_v25  ;;  %v10273_v24 = vld [vmem:[%s15331_s1 + $0x44c] ss:$16 sps:$4 sm:$0xff]   ;;  %v12097_v25 = vld [vmem:[%s15332_s0 + $0x10] sm:$0xff] }
  0x57   :  { %6615 = vmatpush1.bf16.msra.mxu0 %v10190_v29  ;;  %7463 = vmatpush1.bf16.msra.mxu1 %v10193_v30  ;;  %v10271_v29 = vld [vmem:[%s15331_s1 + $0x448] ss:$16 sps:$4 sm:$0xff]   ;;  %v10276_v30 = vld [vmem:[%s15331_s1 + $0x464] ss:$16 sps:$4 sm:$0xff]  }
  0x58   :  { %6616 = vmatprep.subr.bf16.mxu0 %v10198_v32  ;;  %7464 = vmatprep.subr.bf16.mxu1 %v10201_v33  ;;  %v8722_v32 = vcombine.high %v12097_v25, %v12102_v27  ;;  %v10274_v33 = vld [vmem:[%s15331_s1 + $0x460] ss:$16 sps:$4 sm:$0xff]  }
  0x5b   :  { %6617 = vmatpush1.bf16.msra.mxu0 %v10196_v36  ;;  %7465 = vmatpush1.bf16.msra.mxu1 %v10199_v37  ;;  %v10285_v36 = vld [vmem:[%s15331_s1 + $0x48c] ss:$16 sps:$4 sm:$0xff]   ;;  %v10280_v37 = vld [vmem:[%s15331_s1 + $0x480] ss:$16 sps:$4 sm:$0xff]  }
  0x5c   :  { %6618 = vmatprep.subr.bf16.mxu0 %v10204_v39  ;;  %7466 = vmatprep.subr.bf16.mxu1 %v10207_v40  ;;  %v10288_v39 = vld [vmem:[%s15331_s1 + $0x4a4] ss:$16 sps:$4 sm:$0xff]   ;;  %v10291_v40 = vld [vmem:[%s15331_s1 + $0x4ac] ss:$16 sps:$4 sm:$0xff]  }
  0x5f   :  { %6619 = vmatpush1.bf16.msra.mxu0 %v10202_v41  ;;  %7467 = vmatpush1.bf16.msra.mxu1 %v10205_v42  ;;  %v10286_v41 = vld [vmem:[%s15331_s1 + $0x4a0] ss:$16 sps:$4 sm:$0xff]   ;;  %v10289_v42 = vld [vmem:[%s15331_s1 + $0x4a8] ss:$16 sps:$4 sm:$0xff]  }
  0x60   :  { %6620 = vmatprep.subr.bf16.mxu0 %v10210_v43  ;;  %7468 = vmatprep.subr.bf16.mxu1 %v10213_v44  ;;  %v10294_v43 = vld [vmem:[%s15331_s1 + $0x4c4] ss:$16 sps:$4 sm:$0xff]   ;;  %v10297_v44 = vld [vmem:[%s15331_s1 + $0x4cc] ss:$16 sps:$4 sm:$0xff]  }
  0x63   :  { %6621 = vmatpush1.bf16.msra.mxu0 %v10208_v45  ;;  %7469 = vmatpush1.bf16.msra.mxu1 %v10211_v46  ;;  %v10292_v45 = vld [vmem:[%s15331_s1 + $0x4c0] ss:$16 sps:$4 sm:$0xff]   ;;  %v10295_v46 = vld [vmem:[%s15331_s1 + $0x4c8] ss:$16 sps:$4 sm:$0xff]  }
  0x64   :  { %6622 = vmatprep.subr.bf16.mxu0 %v10216_v47  ;;  %7470 = vmatprep.subr.bf16.mxu1 %v10219_v48  ;;  %v10300_v47 = vld [vmem:[%s15331_s1 + $0x4e4] ss:$16 sps:$4 sm:$0xff]   ;;  %v10303_v48 = vld [vmem:[%s15331_s1 + $0x4ec] ss:$16 sps:$4 sm:$0xff]  }
  0x67   :  { %6623 = vmatpush1.bf16.msra.mxu0 %v10214_v49  ;;  %7471 = vmatpush1.bf16.msra.mxu1 %v10217_v50  ;;  %v10298_v49 = vld [vmem:[%s15331_s1 + $0x4e0] ss:$16 sps:$4 sm:$0xff]   ;;  %v10301_v50 = vld [vmem:[%s15331_s1 + $0x4e8] ss:$16 sps:$4 sm:$0xff]  }
  0x68   :  { %6624 = vmatprep.subr.bf16.mxu0 %v10222_v51  ;;  %7472 = vmatprep.subr.bf16.mxu1 %v10225_v52  ;;  %v10306_v51 = vld [vmem:[%s15331_s1 + $0x504] ss:$16 sps:$4 sm:$0xff]   ;;  %v10309_v52 = vld [vmem:[%s15331_s1 + $0x50c] ss:$16 sps:$4 sm:$0xff]  }
  0x6b   :  { %6625 = vmatpush1.bf16.msra.mxu0 %v10220_v53  ;;  %7473 = vmatpush1.bf16.msra.mxu1 %v10223_v54  ;;  %v10304_v53 = vld [vmem:[%s15331_s1 + $0x500] ss:$16 sps:$4 sm:$0xff]   ;;  %v10307_v54 = vld [vmem:[%s15331_s1 + $0x508] ss:$16 sps:$4 sm:$0xff]  }
  0x6c   :  { %6626 = vmatprep.subr.bf16.mxu0 %v10228_v55  ;;  %7474 = vmatprep.subr.bf16.mxu1 %v10231_v56  ;;  %v10312_v55 = vld [vmem:[%s15331_s1 + $0x524] ss:$16 sps:$4 sm:$0xff]   ;;  %v10315_v56 = vld [vmem:[%s15331_s1 + $0x52c] ss:$16 sps:$4 sm:$0xff]  }
  0x6f   :  { %6627 = vmatpush1.bf16.msra.mxu0 %v10226_v57  ;;  %7475 = vmatpush1.bf16.msra.mxu1 %v10229_v58  ;;  %v10310_v57 = vld [vmem:[%s15331_s1 + $0x520] ss:$16 sps:$4 sm:$0xff]   ;;  %v10313_v58 = vld [vmem:[%s15331_s1 + $0x528] ss:$16 sps:$4 sm:$0xff]  }
  0x70   :  { %6628 = vmatprep.subr.bf16.mxu0 %v10234_v59  ;;  %7476 = vmatprep.subr.bf16.mxu1 %v10237_v60  ;;  %v10318_v59 = vld [vmem:[%s15331_s1 + $0x544] ss:$16 sps:$4 sm:$0xff]   ;;  %v10321_v60 = vld [vmem:[%s15331_s1 + $0x54c] ss:$16 sps:$4 sm:$0xff]  }
  0x73   :  { %6629 = vmatpush1.bf16.msra.mxu0 %v10232_v61  ;;  %7477 = vmatpush1.bf16.msra.mxu1 %v10235_v62  ;;  %v10316_v61 = vld [vmem:[%s15331_s1 + $0x540] ss:$16 sps:$4 sm:$0xff]   ;;  %v10319_v62 = vld [vmem:[%s15331_s1 + $0x548] ss:$16 sps:$4 sm:$0xff]  }
  0x74   :  { %6630 = vmatprep.subr.bf16.mxu0 %v10240_v63  ;;  %7478 = vmatprep.subr.bf16.mxu1 %v10243_v0  ;;  %v10324_v63 = vld [vmem:[%s15331_s1 + $0x564] ss:$16 sps:$4 sm:$0xff]   ;;  %v10327_v0 = vld [vmem:[%s15331_s1 + $0x56c] ss:$16 sps:$4 sm:$0xff]  }
  0x77   :  { %6631 = vmatpush1.bf16.msra.mxu0 %v10238_v1  ;;  %7479 = vmatpush1.bf16.msra.mxu1 %v10241_v2  ;;  %v10322_v1 = vld [vmem:[%s15331_s1 + $0x560] ss:$16 sps:$4 sm:$0xff]   ;;  %v10325_v2 = vld [vmem:[%s15331_s1 + $0x568] ss:$16 sps:$4 sm:$0xff]  }
  0x78   :  { %6632 = vmatprep.subr.bf16.mxu0 %v10246_v3  ;;  %7480 = vmatprep.subr.bf16.mxu1 %v10249_v4  ;;  %v10330_v3 = vld [vmem:[%s15331_s1 + $0x584] ss:$16 sps:$4 sm:$0xff]   ;;  %v10333_v4 = vld [vmem:[%s15331_s1 + $0x58c] ss:$16 sps:$4 sm:$0xff]  }
  0x7b   :  { %6633 = vmatpush1.bf16.msra.mxu0 %v10244_v5  ;;  %7481 = vmatpush1.bf16.msra.mxu1 %v10247_v6  ;;  %v10328_v5 = vld [vmem:[%s15331_s1 + $0x580] ss:$16 sps:$4 sm:$0xff]   ;;  %v10331_v6 = vld [vmem:[%s15331_s1 + $0x588] ss:$16 sps:$4 sm:$0xff]  }
  0x7c   :  { %6634 = vmatprep.subr.bf16.mxu0 %v10252_v7  ;;  %7482 = vmatprep.subr.bf16.mxu1 %v10255_v8  ;;  %v10336_v7 = vld [vmem:[%s15331_s1 + $0x5a4] ss:$16 sps:$4 sm:$0xff]   ;;  %v10339_v8 = vld [vmem:[%s15331_s1 + $0x5ac] ss:$16 sps:$4 sm:$0xff]  }
  0x7f   :  { %6635 = vmatpush1.bf16.msra.mxu0 %v10250_v9  ;;  %7483 = vmatpush1.bf16.msra.mxu1 %v10253_v10  ;;  %v10334_v9 = vld [vmem:[%s15331_s1 + $0x5a0] ss:$16 sps:$4 sm:$0xff]   ;;  %v10337_v10 = vld [vmem:[%s15331_s1 + $0x5a8] ss:$16 sps:$4 sm:$0xff]  }
  0x80   :  { %6657 = vmatprep.subr.bf16.mxu0 %v10258_v11  ;;  %7505 = vmatprep.subr.bf16.mxu1 %v10261_v12  ;;  %v10342_v11 = vld [vmem:[%s15331_s1 + $0x5c4] ss:$16 sps:$4 sm:$0xff]   ;;  %v10345_v12 = vld [vmem:[%s15331_s1 + $0x5cc] ss:$16 sps:$4 sm:$0xff]  }
  0x82   :  { %6637 = vmatmul.mubr.bf16.vlgmr.msra.gmra.mrb[0].mxu0 %v8719_v15  ;;  %7485 = vmatmul.mubr.bf16.vlgmr.msra.gmra.mrb[0].mxu1 %v8719_v15  ;;  %v10348_v15 = vld [vmem:[%s15331_s1 + $0x5e4] ss:$16 sps:$4 sm:$0xff]  }
  0x83   :  { %6658 = vmatpush1.bf16.msra.mxu0 %v10256_v13  ;;  %7506 = vmatpush1.bf16.msra.mxu1 %v10259_v14  ;;  %v10340_v13 = vld [vmem:[%s15331_s1 + $0x5c0] ss:$16 sps:$4 sm:$0xff]   ;;  %v10343_v14 = vld [vmem:[%s15331_s1 + $0x5c8] ss:$16 sps:$4 sm:$0xff]  }
  0x84   :  { %6659 = vmatprep.subr.bf16.mxu0 %v10264_v18  ;;  %7507 = vmatprep.subr.bf16.mxu1 %v10267_v19  ;;  %v10349_v18 = vld [vmem:[%s15331_s1 + $0x5e8] ss:$16 sps:$4 sm:$0xff]   ;;  %v10354_v19 = vld [vmem:[%s15331_s1 + $0x604] ss:$16 sps:$4 sm:$0xff]  }
  0x85   :  { %6646 = vmatprep.mubr.bf16.mxu0 %v8752_v20  ;;  %7494 = vmatprep.mubr.bf16.mxu1 %v8752_v20  ;;  %v10357_v20 = vld [vmem:[%s15331_s1 + $0x60c] ss:$16 sps:$4 sm:$0xff]  }
  0x87   :  { %6660 = vmatpush1.bf16.msra.mxu0 %v10262_v21  ;;  %7508 = vmatpush1.bf16.msra.mxu1 %v10265_v22  ;;  %v57_v21 = vld [vmem:[%s15332_s0 + $0x110] sm:$0xff]  ;;  %v8721_v22 = vcombine.low %v12097_v25, %v12102_v27  ;;  %v10363_v27 = vld [vmem:[%s15331_s1 + $0x62c] ss:$16 sps:$4 sm:$0xff]  }
  0x88   :  { %6661 = vmatprep.subr.bf16.mxu0 %v10270_v23  ;;  %7509 = vmatprep.subr.bf16.mxu1 %v10273_v24  ;;  %v73_v23 = vld [vmem:[%s15332_s0 + $0x190] sm:$0xff] }
  0x89   :  { %v10352_v24 = vld [vmem:[%s15331_s1 + $0x600] ss:$16 sps:$4 sm:$0xff]   ;;  %v10360_v25 = vld [vmem:[%s15331_s1 + $0x624] ss:$16 sps:$4 sm:$0xff]  }
  0x8a   :  { %6647 = vmatmul.mubr.bf16.gmra.mrb[4].mxu0 %v8751_v26  ;;  %7495 = vmatmul.mubr.bf16.gmra.mrb[4].mxu1 %v8751_v26  ;;  %v10355_v26 = vld [vmem:[%s15331_s1 + $0x608] ss:$16 sps:$4 sm:$0xff]  }
  0x8b   :  { %6662 = vmatpush1.bf16.msra.mxu0 %v10268_v28  ;;  %7510 = vmatpush1.bf16.msra.mxu1 %v10271_v29  ;;  %v8754_v28 = vcombine.high %v57_v21, %v73_v23  ;;  %v10358_v29 = vld [vmem:[%s15331_s1 + $0x620] ss:$16 sps:$4 sm:$0xff]  }
  0x8c   :  { %6663 = vmatprep.subr.bf16.mxu0 %v10276_v30  ;;  %7511 = vmatprep.subr.bf16.mxu1 %v10279_v31  ;;  %v10361_v30 = vld [vmem:[%s15331_s1 + $0x628] ss:$16 sps:$4 sm:$0xff]   ;;  %v10366_v31 = vld [vmem:[%s15331_s1 + $0x644] ss:$16 sps:$4 sm:$0xff]  }
  0x8d   :  { %6689 = vmatprep.mubr.bf16.mxu0 %v8722_v32  ;;  %7537 = vmatprep.mubr.bf16.mxu1 %v8722_v32  ;;  %v10369_v32 = vld [vmem:[%s15331_s1 + $0x64c] ss:$16 sps:$4 sm:$0xff]  }
  0x8f   :  { %6664 = vmatpush1.bf16.msra.mxu0 %v10274_v33  ;;  %7512 = vmatpush1.bf16.msra.mxu1 %v10277_v34  ;;  %v12309_v33 = vld [vmem:[%s15332_s0 + $0x18] sm:$0xff]  ;;  %v8753_v34 = vcombine.low %v57_v21, %v73_v23  ;;  %v10436_v21 = vld [vmem:[%s15331_s1 + $0x7c0] ss:$16 sps:$4 sm:$0xff]   ;;  %v10444_v23 = vld [vmem:[%s15331_s1 + $0x7e4] ss:$16 sps:$4 sm:$0xff]  }
  0x90   :  { %6665 = vmatprep.subr.bf16.mxu0 %v10282_v35  ;;  %7513 = vmatprep.subr.bf16.mxu1 %v10285_v36  ;;  %v12314_v35 = vld [vmem:[%s15332_s0 + $0x98] sm:$0xff]  ;;  %v10364_v36 = vld [vmem:[%s15331_s1 + $0x640] ss:$16 sps:$4 sm:$0xff]  }
  0x93   :  { %6666 = vmatpush1.bf16.msra.mxu0 %v10280_v37  ;;  %7514 = vmatpush1.bf16.msra.mxu1 %v10283_v38  ;;  %v10367_v37 = vld [vmem:[%s15331_s1 + $0x648] ss:$16 sps:$4 sm:$0xff]   ;;  %v10372_v38 = vld [vmem:[%s15331_s1 + $0x664] ss:$16 sps:$4 sm:$0xff]  }
  0x94   :  { %6667 = vmatprep.subr.bf16.mxu0 %v10288_v39  ;;  %7515 = vmatprep.subr.bf16.mxu1 %v10291_v40  ;;  %v10375_v39 = vld [vmem:[%s15331_s1 + $0x66c] ss:$16 sps:$4 sm:$0xff]   ;;  %v8724_v40 = vcombine.high %v12309_v33, %v12314_v35 }
  0x97   :  { %6668 = vmatpush1.bf16.msra.mxu0 %v10286_v41  ;;  %7516 = vmatpush1.bf16.msra.mxu1 %v10289_v42  ;;  %v10370_v41 = vld [vmem:[%s15331_s1 + $0x660] ss:$16 sps:$4 sm:$0xff]   ;;  %v10373_v42 = vld [vmem:[%s15331_s1 + $0x668] ss:$16 sps:$4 sm:$0xff]  }
  0x98   :  { %6669 = vmatprep.subr.bf16.mxu0 %v10294_v43  ;;  %7517 = vmatprep.subr.bf16.mxu1 %v10297_v44  ;;  %v10378_v43 = vld [vmem:[%s15331_s1 + $0x684] ss:$16 sps:$4 sm:$0xff]   ;;  %v10381_v44 = vld [vmem:[%s15331_s1 + $0x68c] ss:$16 sps:$4 sm:$0xff]  }
  0x9b   :  { %6670 = vmatpush1.bf16.msra.mxu0 %v10292_v45  ;;  %7518 = vmatpush1.bf16.msra.mxu1 %v10295_v46  ;;  %v10376_v45 = vld [vmem:[%s15331_s1 + $0x680] ss:$16 sps:$4 sm:$0xff]   ;;  %v10379_v46 = vld [vmem:[%s15331_s1 + $0x688] ss:$16 sps:$4 sm:$0xff]  }
  0x9c   :  { %6671 = vmatprep.subr.bf16.mxu0 %v10300_v47  ;;  %7519 = vmatprep.subr.bf16.mxu1 %v10303_v48  ;;  %v10384_v47 = vld [vmem:[%s15331_s1 + $0x6a4] ss:$16 sps:$4 sm:$0xff]   ;;  %v10387_v48 = vld [vmem:[%s15331_s1 + $0x6ac] ss:$16 sps:$4 sm:$0xff]  }
  0x9f   :  { %6672 = vmatpush1.bf16.msra.mxu0 %v10298_v49  ;;  %7520 = vmatpush1.bf16.msra.mxu1 %v10301_v50  ;;  %v10382_v49 = vld [vmem:[%s15331_s1 + $0x6a0] ss:$16 sps:$4 sm:$0xff]   ;;  %v10385_v50 = vld [vmem:[%s15331_s1 + $0x6a8] ss:$16 sps:$4 sm:$0xff]  }
  0xa0   :  { %6673 = vmatprep.subr.bf16.mxu0 %v10306_v51  ;;  %7521 = vmatprep.subr.bf16.mxu1 %v10309_v52  ;;  %v10390_v51 = vld [vmem:[%s15331_s1 + $0x6c4] ss:$16 sps:$4 sm:$0xff]   ;;  %v10393_v52 = vld [vmem:[%s15331_s1 + $0x6cc] ss:$16 sps:$4 sm:$0xff]  }
  0xa3   :  { %6674 = vmatpush1.bf16.msra.mxu0 %v10304_v53  ;;  %7522 = vmatpush1.bf16.msra.mxu1 %v10307_v54  ;;  %v10388_v53 = vld [vmem:[%s15331_s1 + $0x6c0] ss:$16 sps:$4 sm:$0xff]   ;;  %v10391_v54 = vld [vmem:[%s15331_s1 + $0x6c8] ss:$16 sps:$4 sm:$0xff]  }
  0xa4   :  { %6675 = vmatprep.subr.bf16.mxu0 %v10312_v55  ;;  %7523 = vmatprep.subr.bf16.mxu1 %v10315_v56  ;;  %v10396_v55 = vld [vmem:[%s15331_s1 + $0x6e4] ss:$16 sps:$4 sm:$0xff]   ;;  %v10399_v56 = vld [vmem:[%s15331_s1 + $0x6ec] ss:$16 sps:$4 sm:$0xff]  }
  0xa7   :  { %6676 = vmatpush1.bf16.msra.mxu0 %v10310_v57  ;;  %7524 = vmatpush1.bf16.msra.mxu1 %v10313_v58  ;;  %v10394_v57 = vld [vmem:[%s15331_s1 + $0x6e0] ss:$16 sps:$4 sm:$0xff]   ;;  %v10397_v58 = vld [vmem:[%s15331_s1 + $0x6e8] ss:$16 sps:$4 sm:$0xff]  }
  0xa8   :  { %6677 = vmatprep.subr.bf16.mxu0 %v10318_v59  ;;  %7525 = vmatprep.subr.bf16.mxu1 %v10321_v60  ;;  %v10402_v59 = vld [vmem:[%s15331_s1 + $0x704] ss:$16 sps:$4 sm:$0xff]   ;;  %v10405_v60 = vld [vmem:[%s15331_s1 + $0x70c] ss:$16 sps:$4 sm:$0xff]  }
  0xab   :  { %6678 = vmatpush1.bf16.msra.mxu0 %v10316_v61  ;;  %7526 = vmatpush1.bf16.msra.mxu1 %v10319_v62  ;;  %v10400_v61 = vld [vmem:[%s15331_s1 + $0x700] ss:$16 sps:$4 sm:$0xff]   ;;  %v10403_v62 = vld [vmem:[%s15331_s1 + $0x708] ss:$16 sps:$4 sm:$0xff]  }
  0xac   :  { %6679 = vmatprep.subr.bf16.mxu0 %v10324_v63  ;;  %7527 = vmatprep.subr.bf16.mxu1 %v10327_v0  ;;  %v10408_v63 = vld [vmem:[%s15331_s1 + $0x724] ss:$16 sps:$4 sm:$0xff]   ;;  %v10411_v0 = vld [vmem:[%s15331_s1 + $0x72c] ss:$16 sps:$4 sm:$0xff]  }
  0xaf   :  { %6680 = vmatpush1.bf16.msra.mxu0 %v10322_v1  ;;  %7528 = vmatpush1.bf16.msra.mxu1 %v10325_v2  ;;  %v10406_v1 = vld [vmem:[%s15331_s1 + $0x720] ss:$16 sps:$4 sm:$0xff]   ;;  %v10409_v2 = vld [vmem:[%s15331_s1 + $0x728] ss:$16 sps:$4 sm:$0xff]  }
  0xb0   :  { %6681 = vmatprep.subr.bf16.mxu0 %v10330_v3  ;;  %7529 = vmatprep.subr.bf16.mxu1 %v10333_v4  ;;  %v10414_v3 = vld [vmem:[%s15331_s1 + $0x744] ss:$16 sps:$4 sm:$0xff]   ;;  %v10417_v4 = vld [vmem:[%s15331_s1 + $0x74c] ss:$16 sps:$4 sm:$0xff]  }
  0xb3   :  { %6682 = vmatpush1.bf16.msra.mxu0 %v10328_v5  ;;  %7530 = vmatpush1.bf16.msra.mxu1 %v10331_v6  ;;  %v10412_v5 = vld [vmem:[%s15331_s1 + $0x740] ss:$16 sps:$4 sm:$0xff]   ;;  %v10415_v6 = vld [vmem:[%s15331_s1 + $0x748] ss:$16 sps:$4 sm:$0xff]  }
  0xb4   :  { %6683 = vmatprep.subr.bf16.mxu0 %v10336_v7  ;;  %7531 = vmatprep.subr.bf16.mxu1 %v10339_v8  ;;  %v10420_v7 = vld [vmem:[%s15331_s1 + $0x764] ss:$16 sps:$4 sm:$0xff]   ;;  %v10423_v8 = vld [vmem:[%s15331_s1 + $0x76c] ss:$16 sps:$4 sm:$0xff]  }
  0xb7   :  { %6684 = vmatpush1.bf16.msra.mxu0 %v10334_v9  ;;  %7532 = vmatpush1.bf16.msra.mxu1 %v10337_v10  ;;  %v10418_v9 = vld [vmem:[%s15331_s1 + $0x760] ss:$16 sps:$4 sm:$0xff]   ;;  %v10421_v10 = vld [vmem:[%s15331_s1 + $0x768] ss:$16 sps:$4 sm:$0xff]  }
  0xb8   :  { %6685 = vmatprep.subr.bf16.mxu0 %v10342_v11  ;;  %7533 = vmatprep.subr.bf16.mxu1 %v10345_v12  ;;  %v10426_v11 = vld [vmem:[%s15331_s1 + $0x784] ss:$16 sps:$4 sm:$0xff]   ;;  %v10429_v12 = vld [vmem:[%s15331_s1 + $0x78c] ss:$16 sps:$4 sm:$0xff]  }
  0xbb   :  { %6686 = vmatpush1.bf16.msra.mxu0 %v10340_v13  ;;  %7534 = vmatpush1.bf16.msra.mxu1 %v10343_v14  ;;  %v10424_v13 = vld [vmem:[%s15331_s1 + $0x780] ss:$16 sps:$4 sm:$0xff]   ;;  %v10427_v14 = vld [vmem:[%s15331_s1 + $0x788] ss:$16 sps:$4 sm:$0xff]  }
  0xbc   :  { %6687 = vmatprep.subr.bf16.mxu0 %v10348_v15  ;;  %7535 = vmatprep.subr.bf16.mxu1 %v10351_v16  ;;  %v10432_v15 = vld [vmem:[%s15331_s1 + $0x7a4] ss:$16 sps:$4 sm:$0xff]   ;;  %v10435_v16 = vld [vmem:[%s15331_s1 + $0x7ac] ss:$16 sps:$4 sm:$0xff]  }
  0xbf   :  { %6688 = vmatpush1.bf16.msra.mxu0 %v10346_v17  ;;  %7536 = vmatpush1.bf16.msra.mxu1 %v10349_v18  ;;  %v10430_v17 = vld [vmem:[%s15331_s1 + $0x7a0] ss:$16 sps:$4 sm:$0xff]   ;;  %v10433_v18 = vld [vmem:[%s15331_s1 + $0x7a8] ss:$16 sps:$4 sm:$0xff]  }
  0xc0   :  { %6710 = vmatprep.subr.bf16.mxu0 %v10354_v19  ;;  %7558 = vmatprep.subr.bf16.mxu1 %v10357_v20  ;;  %v10438_v19 = vld [vmem:[%s15331_s1 + $0x7c4] ss:$16 sps:$4 sm:$0xff]   ;;  %v10441_v20 = vld [vmem:[%s15331_s1 + $0x7cc] ss:$16 sps:$4 sm:$0xff]  }
  0xc2   :  { %6690 = vmatmul.mubr.bf16.vlgmr.msra.gmra.mrb[0].mxu0 %v8721_v22  ;;  %7538 = vmatmul.mubr.bf16.vlgmr.msra.gmra.mrb[0].mxu1 %v8721_v22  ;;  %v10439_v22 = vld [vmem:[%s15331_s1 + $0x7c8] ss:$16 sps:$4 sm:$0xff]  }
  0xc3   :  { %6711 = vmatpush1.bf16.msra.mxu0 %v10352_v24  ;;  %7559 = vmatpush1.bf16.msra.mxu1 %v10355_v26  ;;  %v10447_v24 = vld [vmem:[%s15331_s1 + $0x7ec] ss:$16 sps:$4 sm:$0xff]   ;;  %v10442_v26 = vld [vmem:[%s15331_s1 + $0x7e0] ss:$16 sps:$4 sm:$0xff]  }
  0xc4   :  { %6712 = vmatprep.subr.bf16.mxu0 %v10360_v25  ;;  %7560 = vmatprep.subr.bf16.mxu1 %v10363_v27  ;;  %v10445_v25 = vld [vmem:[%s15331_s1 + $0x7e8] ss:$16 sps:$4 sm:$0xff]   ;;  %v10450_v27 = vld [vmem:[%s15331_s1 + $0x804] ss:$16 sps:$4 sm:$0xff]  }
  0xc5   :  { %6699 = vmatprep.mubr.bf16.mxu0 %v8754_v28  ;;  %7547 = vmatprep.mubr.bf16.mxu1 %v8754_v28  ;;  %v10453_v28 = vld [vmem:[%s15331_s1 + $0x80c] ss:$16 sps:$4 sm:$0xff]  }
  0xc7   :  { %6713 = vmatpush1.bf16.msra.mxu0 %v10358_v29  ;;  %7561 = vmatpush1.bf16.msra.mxu1 %v10361_v30  ;;  %v58_v29 = vld [vmem:[%s15332_s0 + $0x118] sm:$0xff]  ;;  %v8723_v30 = vcombine.low %v12309_v33, %v12314_v35 }
  0xc8   :  { %6714 = vmatprep.subr.bf16.mxu0 %v10366_v31  ;;  %7562 = vmatprep.subr.bf16.mxu1 %v10369_v32  ;;  %v74_v31 = vld [vmem:[%s15332_s0 + $0x198] sm:$0xff]  ;;  %v10448_v32 = vld [vmem:[%s15331_s1 + $0x800] ss:$16 sps:$4 sm:$0xff]  }
  0xc9   :  { %v10459_v33 = vld [vmem:[%s15331_s1 + $0x82c] ss:$16 sps:$4 sm:$0xff]   ;;  %v8756_v35 = vcombine.high %v58_v29, %v74_v31 }
  0xca   :  { %6700 = vmatmul.mubr.bf16.gmra.mrb[4].mxu0 %v8753_v34  ;;  %7548 = vmatmul.mubr.bf16.gmra.mrb[4].mxu1 %v8753_v34  ;;  %v10451_v34 = vld [vmem:[%s15331_s1 + $0x808] ss:$16 sps:$4 sm:$0xff]  }
  0xcb   :  { %6715 = vmatpush1.bf16.msra.mxu0 %v10364_v36  ;;  %7563 = vmatpush1.bf16.msra.mxu1 %v10367_v37  ;;  %v10456_v36 = vld [vmem:[%s15331_s1 + $0x824] ss:$16 sps:$4 sm:$0xff]   ;;  %v10454_v37 = vld [vmem:[%s15331_s1 + $0x820] ss:$16 sps:$4 sm:$0xff]  }
  0xcc   :  { %6716 = vmatprep.subr.bf16.mxu0 %v10372_v38  ;;  %7564 = vmatprep.subr.bf16.mxu1 %v10375_v39  ;;  %v10457_v38 = vld [vmem:[%s15331_s1 + $0x828] ss:$16 sps:$4 sm:$0xff]   ;;  %v10462_v39 = vld [vmem:[%s15331_s1 + $0x844] ss:$16 sps:$4 sm:$0xff]  }
  0xcd   :  { %6742 = vmatprep.mubr.bf16.mxu0 %v8724_v40  ;;  %7590 = vmatprep.mubr.bf16.mxu1 %v8724_v40  ;;  %v10465_v40 = vld [vmem:[%s15331_s1 + $0x84c] ss:$16 sps:$4 sm:$0xff]  }
  0xcf   :  { %6717 = vmatpush1.bf16.msra.mxu0 %v10370_v41  ;;  %7565 = vmatpush1.bf16.msra.mxu1 %v10373_v42  ;;  %v12521_v41 = vld [vmem:[%s15332_s0 + $0x20] sm:$0xff]  ;;  %v8755_v42 = vcombine.low %v58_v29, %v74_v31 }
  0xd0   :  { %6718 = vmatprep.subr.bf16.mxu0 %v10378_v43  ;;  %7566 = vmatprep.subr.bf16.mxu1 %v10381_v44  ;;  %v12526_v43 = vld [vmem:[%s15332_s0 + $0xa0] sm:$0xff] }
  0xd1   :  { %v10460_v44 = vld [vmem:[%s15331_s1 + $0x840] ss:$16 sps:$4 sm:$0xff]   ;;  %v10540_v31 = vld [vmem:[%s15331_s1 + $0x9e4] ss:$16 sps:$4 sm:$0xff]  }
  0xd2   :  { %v10532_v29 = vld [vmem:[%s15331_s1 + $0x9c0] ss:$16 sps:$4 sm:$0xff]  }
  0xd3   :  { %6719 = vmatpush1.bf16.msra.mxu0 %v10376_v45  ;;  %7567 = vmatpush1.bf16.msra.mxu1 %v10379_v46  ;;  %v10463_v45 = vld [vmem:[%s15331_s1 + $0x848] ss:$16 sps:$4 sm:$0xff]   ;;  %v10468_v46 = vld [vmem:[%s15331_s1 + $0x864] ss:$16 sps:$4 sm:$0xff]  }
  0xd4   :  { %6720 = vmatprep.subr.bf16.mxu0 %v10384_v47  ;;  %7568 = vmatprep.subr.bf16.mxu1 %v10387_v48  ;;  %v10471_v47 = vld [vmem:[%s15331_s1 + $0x86c] ss:$16 sps:$4 sm:$0xff]   ;;  %v8726_v48 = vcombine.high %v12521_v41, %v12526_v43 }
  0xd7   :  { %6721 = vmatpush1.bf16.msra.mxu0 %v10382_v49  ;;  %7569 = vmatpush1.bf16.msra.mxu1 %v10385_v50  ;;  %v10466_v49 = vld [vmem:[%s15331_s1 + $0x860] ss:$16 sps:$4 sm:$0xff]   ;;  %v10469_v50 = vld [vmem:[%s15331_s1 + $0x868] ss:$16 sps:$4 sm:$0xff]  }
  0xd8   :  { %6722 = vmatprep.subr.bf16.mxu0 %v10390_v51  ;;  %7570 = vmatprep.subr.bf16.mxu1 %v10393_v52  ;;  %v10474_v51 = vld [vmem:[%s15331_s1 + $0x884] ss:$16 sps:$4 sm:$0xff]   ;;  %v10477_v52 = vld [vmem:[%s15331_s1 + $0x88c] ss:$16 sps:$4 sm:$0xff]  }
  0xdb   :  { %6723 = vmatpush1.bf16.msra.mxu0 %v10388_v53  ;;  %7571 = vmatpush1.bf16.msra.mxu1 %v10391_v54  ;;  %v10472_v53 = vld [vmem:[%s15331_s1 + $0x880] ss:$16 sps:$4 sm:$0xff]   ;;  %v10475_v54 = vld [vmem:[%s15331_s1 + $0x888] ss:$16 sps:$4 sm:$0xff]  }
  0xdc   :  { %6724 = vmatprep.subr.bf16.mxu0 %v10396_v55  ;;  %7572 = vmatprep.subr.bf16.mxu1 %v10399_v56  ;;  %v10480_v55 = vld [vmem:[%s15331_s1 + $0x8a4] ss:$16 sps:$4 sm:$0xff]   ;;  %v10483_v56 = vld [vmem:[%s15331_s1 + $0x8ac] ss:$16 sps:$4 sm:$0xff]  }
  0xdf   :  { %6725 = vmatpush1.bf16.msra.mxu0 %v10394_v57  ;;  %7573 = vmatpush1.bf16.msra.mxu1 %v10397_v58  ;;  %v10478_v57 = vld [vmem:[%s15331_s1 + $0x8a0] ss:$16 sps:$4 sm:$0xff]   ;;  %v10481_v58 = vld [vmem:[%s15331_s1 + $0x8a8] ss:$16 sps:$4 sm:$0xff]  }
  0xe0   :  { %6726 = vmatprep.subr.bf16.mxu0 %v10402_v59  ;;  %7574 = vmatprep.subr.bf16.mxu1 %v10405_v60  ;;  %v10486_v59 = vld [vmem:[%s15331_s1 + $0x8c4] ss:$16 sps:$4 sm:$0xff]   ;;  %v10489_v60 = vld [vmem:[%s15331_s1 + $0x8cc] ss:$16 sps:$4 sm:$0xff]  }
  0xe3   :  { %6727 = vmatpush1.bf16.msra.mxu0 %v10400_v61  ;;  %7575 = vmatpush1.bf16.msra.mxu1 %v10403_v62  ;;  %v10484_v61 = vld [vmem:[%s15331_s1 + $0x8c0] ss:$16 sps:$4 sm:$0xff]   ;;  %v10487_v62 = vld [vmem:[%s15331_s1 + $0x8c8] ss:$16 sps:$4 sm:$0xff]  }
  0xe4   :  { %6728 = vmatprep.subr.bf16.mxu0 %v10408_v63  ;;  %7576 = vmatprep.subr.bf16.mxu1 %v10411_v0  ;;  %v10492_v63 = vld [vmem:[%s15331_s1 + $0x8e4] ss:$16 sps:$4 sm:$0xff]   ;;  %v10495_v0 = vld [vmem:[%s15331_s1 + $0x8ec] ss:$16 sps:$4 sm:$0xff]  }
  0xe7   :  { %6729 = vmatpush1.bf16.msra.mxu0 %v10406_v1  ;;  %7577 = vmatpush1.bf16.msra.mxu1 %v10409_v2  ;;  %v10490_v1 = vld [vmem:[%s15331_s1 + $0x8e0] ss:$16 sps:$4 sm:$0xff]   ;;  %v10493_v2 = vld [vmem:[%s15331_s1 + $0x8e8] ss:$16 sps:$4 sm:$0xff]  }
  0xe8   :  { %6730 = vmatprep.subr.bf16.mxu0 %v10414_v3  ;;  %7578 = vmatprep.subr.bf16.mxu1 %v10417_v4  ;;  %v10498_v3 = vld [vmem:[%s15331_s1 + $0x904] ss:$16 sps:$4 sm:$0xff]   ;;  %v10501_v4 = vld [vmem:[%s15331_s1 + $0x90c] ss:$16 sps:$4 sm:$0xff]  }
  0xeb   :  { %6731 = vmatpush1.bf16.msra.mxu0 %v10412_v5  ;;  %7579 = vmatpush1.bf16.msra.mxu1 %v10415_v6  ;;  %v10496_v5 = vld [vmem:[%s15331_s1 + $0x900] ss:$16 sps:$4 sm:$0xff]   ;;  %v10499_v6 = vld [vmem:[%s15331_s1 + $0x908] ss:$16 sps:$4 sm:$0xff]  }
  0xec   :  { %6732 = vmatprep.subr.bf16.mxu0 %v10420_v7  ;;  %7580 = vmatprep.subr.bf16.mxu1 %v10423_v8  ;;  %v10504_v7 = vld [vmem:[%s15331_s1 + $0x924] ss:$16 sps:$4 sm:$0xff]   ;;  %v10507_v8 = vld [vmem:[%s15331_s1 + $0x92c] ss:$16 sps:$4 sm:$0xff]  }
  0xef   :  { %6733 = vmatpush1.bf16.msra.mxu0 %v10418_v9  ;;  %7581 = vmatpush1.bf16.msra.mxu1 %v10421_v10  ;;  %v10502_v9 = vld [vmem:[%s15331_s1 + $0x920] ss:$16 sps:$4 sm:$0xff]   ;;  %v10505_v10 = vld [vmem:[%s15331_s1 + $0x928] ss:$16 sps:$4 sm:$0xff]  }
  0xf0   :  { %6734 = vmatprep.subr.bf16.mxu0 %v10426_v11  ;;  %7582 = vmatprep.subr.bf16.mxu1 %v10429_v12  ;;  %v10510_v11 = vld [vmem:[%s15331_s1 + $0x944] ss:$16 sps:$4 sm:$0xff]   ;;  %v10513_v12 = vld [vmem:[%s15331_s1 + $0x94c] ss:$16 sps:$4 sm:$0xff]  }
  0xf3   :  { %6735 = vmatpush1.bf16.msra.mxu0 %v10424_v13  ;;  %7583 = vmatpush1.bf16.msra.mxu1 %v10427_v14  ;;  %v10508_v13 = vld [vmem:[%s15331_s1 + $0x940] ss:$16 sps:$4 sm:$0xff]   ;;  %v10511_v14 = vld [vmem:[%s15331_s1 + $0x948] ss:$16 sps:$4 sm:$0xff]  }
  0xf4   :  { %6736 = vmatprep.subr.bf16.mxu0 %v10432_v15  ;;  %7584 = vmatprep.subr.bf16.mxu1 %v10435_v16  ;;  %v10516_v15 = vld [vmem:[%s15331_s1 + $0x964] ss:$16 sps:$4 sm:$0xff]   ;;  %v10519_v16 = vld [vmem:[%s15331_s1 + $0x96c] ss:$16 sps:$4 sm:$0xff]  }
  0xf7   :  { %6737 = vmatpush1.bf16.msra.mxu0 %v10430_v17  ;;  %7585 = vmatpush1.bf16.msra.mxu1 %v10433_v18  ;;  %v10514_v17 = vld [vmem:[%s15331_s1 + $0x960] ss:$16 sps:$4 sm:$0xff]   ;;  %v10517_v18 = vld [vmem:[%s15331_s1 + $0x968] ss:$16 sps:$4 sm:$0xff]  }
  0xf8   :  { %6738 = vmatprep.subr.bf16.mxu0 %v10438_v19  ;;  %7586 = vmatprep.subr.bf16.mxu1 %v10441_v20  ;;  %v10522_v19 = vld [vmem:[%s15331_s1 + $0x984] ss:$16 sps:$4 sm:$0xff]   ;;  %v10525_v20 = vld [vmem:[%s15331_s1 + $0x98c] ss:$16 sps:$4 sm:$0xff]  }
  0xfb   :  { %6739 = vmatpush1.bf16.msra.mxu0 %v10436_v21  ;;  %7587 = vmatpush1.bf16.msra.mxu1 %v10439_v22  ;;  %v10520_v21 = vld [vmem:[%s15331_s1 + $0x980] ss:$16 sps:$4 sm:$0xff]   ;;  %v10523_v22 = vld [vmem:[%s15331_s1 + $0x988] ss:$16 sps:$4 sm:$0xff]  }
  0xfc   :  { %6740 = vmatprep.subr.bf16.mxu0 %v10444_v23  ;;  %7588 = vmatprep.subr.bf16.mxu1 %v10447_v24  ;;  %v10528_v23 = vld [vmem:[%s15331_s1 + $0x9a4] ss:$16 sps:$4 sm:$0xff]   ;;  %v10531_v24 = vld [vmem:[%s15331_s1 + $0x9ac] ss:$16 sps:$4 sm:$0xff]  }
  0xff   :  { %6741 = vmatpush1.bf16.msra.mxu0 %v10442_v26  ;;  %7589 = vmatpush1.bf16.msra.mxu1 %v10445_v25  ;;  %v10526_v26 = vld [vmem:[%s15331_s1 + $0x9a0] ss:$16 sps:$4 sm:$0xff]   ;;  %v10529_v25 = vld [vmem:[%s15331_s1 + $0x9a8] ss:$16 sps:$4 sm:$0xff]  }
 0x100   :  { %6763 = vmatprep.subr.bf16.mxu0 %v10450_v27  ;;  %7611 = vmatprep.subr.bf16.mxu1 %v10453_v28  ;;  %v10534_v27 = vld [vmem:[%s15331_s1 + $0x9c4] ss:$16 sps:$4 sm:$0xff]   ;;  %v10537_v28 = vld [vmem:[%s15331_s1 + $0x9cc] ss:$16 sps:$4 sm:$0xff]  }
 0x102   :  { %6743 = vmatmul.mubr.bf16.vlgmr.msra.gmra.mrb[0].mxu0 %v8723_v30  ;;  %7591 = vmatmul.mubr.bf16.vlgmr.msra.gmra.mrb[0].mxu1 %v8723_v30  ;;  %v10535_v30 = vld [vmem:[%s15331_s1 + $0x9c8] ss:$16 sps:$4 sm:$0xff]  }
 0x103   :  { %6764 = vmatpush1.bf16.msra.mxu0 %v10448_v32  ;;  %7612 = vmatpush1.bf16.msra.mxu1 %v10451_v34  ;;  %v10543_v32 = vld [vmem:[%s15331_s1 + $0x9ec] ss:$16 sps:$4 sm:$0xff]   ;;  %v10538_v34 = vld [vmem:[%s15331_s1 + $0x9e0] ss:$16 sps:$4 sm:$0xff]  }
 0x104   :  { %6765 = vmatprep.subr.bf16.mxu0 %v10456_v36  ;;  %7613 = vmatprep.subr.bf16.mxu1 %v10459_v33  ;;  %v10541_v36 = vld [vmem:[%s15331_s1 + $0x9e8] ss:$16 sps:$4 sm:$0xff]   ;;  %v10546_v33 = vld [vmem:[%s15331_s1 + $0xa04] ss:$16 sps:$4 sm:$0xff]  }
 0x105   :  { %6752 = vmatprep.mubr.bf16.mxu0 %v8756_v35  ;;  %7600 = vmatprep.mubr.bf16.mxu1 %v8756_v35  ;;  %v10549_v35 = vld [vmem:[%s15331_s1 + $0xa0c] ss:$16 sps:$4 sm:$0xff]  }
 0x107   :  { %6766 = vmatpush1.bf16.msra.mxu0 %v10454_v37  ;;  %7614 = vmatpush1.bf16.msra.mxu1 %v10457_v38  ;;  %v59_v37 = vld [vmem:[%s15332_s0 + $0x120] sm:$0xff] }
 0x108   :  { %6767 = vmatprep.subr.bf16.mxu0 %v10462_v39  ;;  %7615 = vmatprep.subr.bf16.mxu1 %v10465_v40  ;;  %v75_v38 = vld [vmem:[%s15332_s0 + $0x1a0] sm:$0xff]  ;;  %v8725_v39 = vcombine.low %v12521_v41, %v12526_v43  ;;  %v10555_v41 = vld [vmem:[%s15331_s1 + $0xa2c] ss:$16 sps:$4 sm:$0xff]  }
 0x109   :  { %v10544_v40 = vld [vmem:[%s15331_s1 + $0xa00] ss:$16 sps:$4 sm:$0xff]  }
 0x10a   :  { %6753 = vmatmul.mubr.bf16.gmra.mrb[4].mxu0 %v8755_v42  ;;  %7601 = vmatmul.mubr.bf16.gmra.mrb[4].mxu1 %v8755_v42  ;;  %v10547_v42 = vld [vmem:[%s15331_s1 + $0xa08] ss:$16 sps:$4 sm:$0xff]   ;;  %v10550_v43 = vld [vmem:[%s15331_s1 + $0xa20] ss:$16 sps:$4 sm:$0xff]  }
 0x10b   :  { %6768 = vmatpush1.bf16.msra.mxu0 %v10460_v44  ;;  %7616 = vmatpush1.bf16.msra.mxu1 %v10463_v45  ;;  %v10552_v44 = vld [vmem:[%s15331_s1 + $0xa24] ss:$16 sps:$4 sm:$0xff]   ;;  %v10553_v45 = vld [vmem:[%s15331_s1 + $0xa28] ss:$16 sps:$4 sm:$0xff]  }
 0x10c   :  { %6769 = vmatprep.subr.bf16.mxu0 %v10468_v46  ;;  %7617 = vmatprep.subr.bf16.mxu1 %v10471_v47  ;;  %v8758_v46 = vcombine.high %v59_v37, %v75_v38  ;;  %v10558_v47 = vld [vmem:[%s15331_s1 + $0xa44] ss:$16 sps:$4 sm:$0xff]  }
 0x10d   :  { %6795 = vmatprep.mubr.bf16.mxu0 %v8726_v48  ;;  %7643 = vmatprep.mubr.bf16.mxu1 %v8726_v48  ;;  %v10561_v48 = vld [vmem:[%s15331_s1 + $0xa4c] ss:$16 sps:$4 sm:$0xff]  }
 0x10f   :  { %6770 = vmatpush1.bf16.msra.mxu0 %v10466_v49  ;;  %7618 = vmatpush1.bf16.msra.mxu1 %v10469_v50  ;;  %v12733_v49 = vld [vmem:[%s15332_s0 + $0x28] sm:$0xff] }
 0x110   :  { %6771 = vmatprep.subr.bf16.mxu0 %v10474_v51  ;;  %7619 = vmatprep.subr.bf16.mxu1 %v10477_v52  ;;  %v12738_v50 = vld [vmem:[%s15332_s0 + $0xa8] sm:$0xff]  ;;  %v8757_v51 = vcombine.low %v59_v37, %v75_v38  ;;  %v10556_v52 = vld [vmem:[%s15331_s1 + $0xa40] ss:$16 sps:$4 sm:$0xff]  }
 0x111   :  { %v10628_v37 = vld [vmem:[%s15331_s1 + $0xbc0] ss:$16 sps:$4 sm:$0xff]   ;;  %v10631_v38 = vld [vmem:[%s15331_s1 + $0xbc8] ss:$16 sps:$4 sm:$0xff]  }
 0x113   :  { %6772 = vmatpush1.bf16.msra.mxu0 %v10472_v53  ;;  %7620 = vmatpush1.bf16.msra.mxu1 %v10475_v54  ;;  %v10559_v53 = vld [vmem:[%s15331_s1 + $0xa48] ss:$16 sps:$4 sm:$0xff]   ;;  %v10564_v54 = vld [vmem:[%s15331_s1 + $0xa64] ss:$16 sps:$4 sm:$0xff]  }
 0x114   :  { %6773 = vmatprep.subr.bf16.mxu0 %v10480_v55  ;;  %7621 = vmatprep.subr.bf16.mxu1 %v10483_v56  ;;  %v10567_v55 = vld [vmem:[%s15331_s1 + $0xa6c] ss:$16 sps:$4 sm:$0xff]   ;;  %v8728_v56 = vcombine.high %v12733_v49, %v12738_v50 }
 0x117   :  { %6774 = vmatpush1.bf16.msra.mxu0 %v10478_v57  ;;  %7622 = vmatpush1.bf16.msra.mxu1 %v10481_v58  ;;  %v10562_v57 = vld [vmem:[%s15331_s1 + $0xa60] ss:$16 sps:$4 sm:$0xff]   ;;  %v10565_v58 = vld [vmem:[%s15331_s1 + $0xa68] ss:$16 sps:$4 sm:$0xff]  }
 0x118   :  { %6775 = vmatprep.subr.bf16.mxu0 %v10486_v59  ;;  %7623 = vmatprep.subr.bf16.mxu1 %v10489_v60  ;;  %v10570_v59 = vld [vmem:[%s15331_s1 + $0xa84] ss:$16 sps:$4 sm:$0xff]   ;;  %v10573_v60 = vld [vmem:[%s15331_s1 + $0xa8c] ss:$16 sps:$4 sm:$0xff]  }
 0x11b   :  { %6776 = vmatpush1.bf16.msra.mxu0 %v10484_v61  ;;  %7624 = vmatpush1.bf16.msra.mxu1 %v10487_v62  ;;  %v10568_v61 = vld [vmem:[%s15331_s1 + $0xa80] ss:$16 sps:$4 sm:$0xff]   ;;  %v10571_v62 = vld [vmem:[%s15331_s1 + $0xa88] ss:$16 sps:$4 sm:$0xff]  }
 0x11c   :  { %6777 = vmatprep.subr.bf16.mxu0 %v10492_v63  ;;  %7625 = vmatprep.subr.bf16.mxu1 %v10495_v0  ;;  %v10576_v63 = vld [vmem:[%s15331_s1 + $0xaa4] ss:$16 sps:$4 sm:$0xff]   ;;  %v10579_v0 = vld [vmem:[%s15331_s1 + $0xaac] ss:$16 sps:$4 sm:$0xff]  }
 0x11f   :  { %6778 = vmatpush1.bf16.msra.mxu0 %v10490_v1  ;;  %7626 = vmatpush1.bf16.msra.mxu1 %v10493_v2  ;;  %v10574_v1 = vld [vmem:[%s15331_s1 + $0xaa0] ss:$16 sps:$4 sm:$0xff]   ;;  %v10577_v2 = vld [vmem:[%s15331_s1 + $0xaa8] ss:$16 sps:$4 sm:$0xff]  }
 0x120   :  { %6779 = vmatprep.subr.bf16.mxu0 %v10498_v3  ;;  %7627 = vmatprep.subr.bf16.mxu1 %v10501_v4  ;;  %v10582_v3 = vld [vmem:[%s15331_s1 + $0xac4] ss:$16 sps:$4 sm:$0xff]   ;;  %v10585_v4 = vld [vmem:[%s15331_s1 + $0xacc] ss:$16 sps:$4 sm:$0xff]  }
 0x123   :  { %6780 = vmatpush1.bf16.msra.mxu0 %v10496_v5  ;;  %7628 = vmatpush1.bf16.msra.mxu1 %v10499_v6  ;;  %v10580_v5 = vld [vmem:[%s15331_s1 + $0xac0] ss:$16 sps:$4 sm:$0xff]   ;;  %v10583_v6 = vld [vmem:[%s15331_s1 + $0xac8] ss:$16 sps:$4 sm:$0xff]  }
 0x124   :  { %6781 = vmatprep.subr.bf16.mxu0 %v10504_v7  ;;  %7629 = vmatprep.subr.bf16.mxu1 %v10507_v8  ;;  %v10588_v7 = vld [vmem:[%s15331_s1 + $0xae4] ss:$16 sps:$4 sm:$0xff]   ;;  %v10591_v8 = vld [vmem:[%s15331_s1 + $0xaec] ss:$16 sps:$4 sm:$0xff]  }
 0x127   :  { %6782 = vmatpush1.bf16.msra.mxu0 %v10502_v9  ;;  %7630 = vmatpush1.bf16.msra.mxu1 %v10505_v10  ;;  %v10586_v9 = vld [vmem:[%s15331_s1 + $0xae0] ss:$16 sps:$4 sm:$0xff]   ;;  %v10589_v10 = vld [vmem:[%s15331_s1 + $0xae8] ss:$16 sps:$4 sm:$0xff]  }
 0x128   :  { %6783 = vmatprep.subr.bf16.mxu0 %v10510_v11  ;;  %7631 = vmatprep.subr.bf16.mxu1 %v10513_v12  ;;  %v10594_v11 = vld [vmem:[%s15331_s1 + $0xb04] ss:$16 sps:$4 sm:$0xff]   ;;  %v10597_v12 = vld [vmem:[%s15331_s1 + $0xb0c] ss:$16 sps:$4 sm:$0xff]  }
 0x12b   :  { %6784 = vmatpush1.bf16.msra.mxu0 %v10508_v13  ;;  %7632 = vmatpush1.bf16.msra.mxu1 %v10511_v14  ;;  %v10592_v13 = vld [vmem:[%s15331_s1 + $0xb00] ss:$16 sps:$4 sm:$0xff]   ;;  %v10595_v14 = vld [vmem:[%s15331_s1 + $0xb08] ss:$16 sps:$4 sm:$0xff]  }
 0x12c   :  { %6785 = vmatprep.subr.bf16.mxu0 %v10516_v15  ;;  %7633 = vmatprep.subr.bf16.mxu1 %v10519_v16  ;;  %v10600_v15 = vld [vmem:[%s15331_s1 + $0xb24] ss:$16 sps:$4 sm:$0xff]   ;;  %v10603_v16 = vld [vmem:[%s15331_s1 + $0xb2c] ss:$16 sps:$4 sm:$0xff]  }
 0x12f   :  { %6786 = vmatpush1.bf16.msra.mxu0 %v10514_v17  ;;  %7634 = vmatpush1.bf16.msra.mxu1 %v10517_v18  ;;  %v10598_v17 = vld [vmem:[%s15331_s1 + $0xb20] ss:$16 sps:$4 sm:$0xff]   ;;  %v10601_v18 = vld [vmem:[%s15331_s1 + $0xb28] ss:$16 sps:$4 sm:$0xff]  }
 0x130   :  { %6787 = vmatprep.subr.bf16.mxu0 %v10522_v19  ;;  %7635 = vmatprep.subr.bf16.mxu1 %v10525_v20  ;;  %v10606_v19 = vld [vmem:[%s15331_s1 + $0xb44] ss:$16 sps:$4 sm:$0xff]   ;;  %v10609_v20 = vld [vmem:[%s15331_s1 + $0xb4c] ss:$16 sps:$4 sm:$0xff]  }
 0x133   :  { %6788 = vmatpush1.bf16.msra.mxu0 %v10520_v21  ;;  %7636 = vmatpush1.bf16.msra.mxu1 %v10523_v22  ;;  %v10604_v21 = vld [vmem:[%s15331_s1 + $0xb40] ss:$16 sps:$4 sm:$0xff]   ;;  %v10607_v22 = vld [vmem:[%s15331_s1 + $0xb48] ss:$16 sps:$4 sm:$0xff]  }
 0x134   :  { %6789 = vmatprep.subr.bf16.mxu0 %v10528_v23  ;;  %7637 = vmatprep.subr.bf16.mxu1 %v10531_v24  ;;  %v10612_v23 = vld [vmem:[%s15331_s1 + $0xb64] ss:$16 sps:$4 sm:$0xff]   ;;  %v10615_v24 = vld [vmem:[%s15331_s1 + $0xb6c] ss:$16 sps:$4 sm:$0xff]  }
 0x137   :  { %6790 = vmatpush1.bf16.msra.mxu0 %v10526_v26  ;;  %7638 = vmatpush1.bf16.msra.mxu1 %v10529_v25  ;;  %v10610_v26 = vld [vmem:[%s15331_s1 + $0xb60] ss:$16 sps:$4 sm:$0xff]   ;;  %v10613_v25 = vld [vmem:[%s15331_s1 + $0xb68] ss:$16 sps:$4 sm:$0xff]  }
 0x138   :  { %6791 = vmatprep.subr.bf16.mxu0 %v10534_v27  ;;  %7639 = vmatprep.subr.bf16.mxu1 %v10537_v28  ;;  %v10618_v27 = vld [vmem:[%s15331_s1 + $0xb84] ss:$16 sps:$4 sm:$0xff]   ;;  %v10621_v28 = vld [vmem:[%s15331_s1 + $0xb8c] ss:$16 sps:$4 sm:$0xff]  }
 0x13b   :  { %6792 = vmatpush1.bf16.msra.mxu0 %v10532_v29  ;;  %7640 = vmatpush1.bf16.msra.mxu1 %v10535_v30  ;;  %v10616_v29 = vld [vmem:[%s15331_s1 + $0xb80] ss:$16 sps:$4 sm:$0xff]   ;;  %v10619_v30 = vld [vmem:[%s15331_s1 + $0xb88] ss:$16 sps:$4 sm:$0xff]  }
 0x13c   :  { %6793 = vmatprep.subr.bf16.mxu0 %v10540_v31  ;;  %7641 = vmatprep.subr.bf16.mxu1 %v10543_v32  ;;  %v10624_v31 = vld [vmem:[%s15331_s1 + $0xba4] ss:$16 sps:$4 sm:$0xff]   ;;  %v10627_v32 = vld [vmem:[%s15331_s1 + $0xbac] ss:$16 sps:$4 sm:$0xff]  }
 0x13f   :  { %6794 = vmatpush1.bf16.msra.mxu0 %v10538_v34  ;;  %7642 = vmatpush1.bf16.msra.mxu1 %v10541_v36  ;;  %v10622_v34 = vld [vmem:[%s15331_s1 + $0xba0] ss:$16 sps:$4 sm:$0xff]   ;;  %v10625_v36 = vld [vmem:[%s15331_s1 + $0xba8] ss:$16 sps:$4 sm:$0xff]  }
 0x140   :  { %6816 = vmatprep.subr.bf16.mxu0 %v10546_v33  ;;  %7664 = vmatprep.subr.bf16.mxu1 %v10549_v35  ;;  %v10630_v33 = vld [vmem:[%s15331_s1 + $0xbc4] ss:$16 sps:$4 sm:$0xff]   ;;  %v10633_v35 = vld [vmem:[%s15331_s1 + $0xbcc] ss:$16 sps:$4 sm:$0xff]  }
 0x142   :  { %6796 = vmatmul.mubr.bf16.vlgmr.msra.gmra.mrb[0].mxu0 %v8725_v39  ;;  %7644 = vmatmul.mubr.bf16.vlgmr.msra.gmra.mrb[0].mxu1 %v8725_v39  ;;  %v10636_v39 = vld [vmem:[%s15331_s1 + $0xbe4] ss:$16 sps:$4 sm:$0xff]  }
 0x143   :  { %6817 = vmatpush1.bf16.msra.mxu0 %v10544_v40  ;;  %7665 = vmatpush1.bf16.msra.mxu1 %v10547_v42  ;;  %v10639_v40 = vld [vmem:[%s15331_s1 + $0xbec] ss:$16 sps:$4 sm:$0xff]   ;;  %v10634_v42 = vld [vmem:[%s15331_s1 + $0xbe0] ss:$16 sps:$4 sm:$0xff]  }
 0x144   :  { %6818 = vmatprep.subr.bf16.mxu0 %v10552_v44  ;;  %7666 = vmatprep.subr.bf16.mxu1 %v10555_v41  ;;  %v10637_v44 = vld [vmem:[%s15331_s1 + $0xbe8] ss:$16 sps:$4 sm:$0xff]   ;;  %v10642_v41 = vld [vmem:[%s15331_s1 + $0xc04] ss:$16 sps:$4 sm:$0xff]  }
 0x145   :  { %6805 = vmatprep.mubr.bf16.mxu0 %v8758_v46  ;;  %7653 = vmatprep.mubr.bf16.mxu1 %v8758_v46  ;;  %v76_v46 = vld [vmem:[%s15332_s0 + $0x1a8] sm:$0xff] }
 0x147   :  { %6819 = vmatpush1.bf16.msra.mxu0 %v10550_v43  ;;  %7667 = vmatpush1.bf16.msra.mxu1 %v10553_v45  ;;  %v10645_v43 = vld [vmem:[%s15331_s1 + $0xc0c] ss:$16 sps:$4 sm:$0xff]  }
 0x148   :  { %6820 = vmatprep.subr.bf16.mxu0 %v10558_v47  ;;  %7668 = vmatprep.subr.bf16.mxu1 %v10561_v48  ;;  %v60_v45 = vld [vmem:[%s15332_s0 + $0x128] sm:$0xff]  ;;  %v8727_v47 = vcombine.low %v12733_v49, %v12738_v50  ;;  %v10640_v48 = vld [vmem:[%s15331_s1 + $0xc00] ss:$16 sps:$4 sm:$0xff]  }
 0x149   :  { %v10651_v49 = vld [vmem:[%s15331_s1 + $0xc2c] ss:$16 sps:$4 sm:$0xff]   ;;  %v10646_v50 = vld [vmem:[%s15331_s1 + $0xc20] ss:$16 sps:$4 sm:$0xff]  }
 0x14a   :  { %6806 = vmatmul.mubr.bf16.gmra.mrb[4].mxu0 %v8757_v51  ;;  %7654 = vmatmul.mubr.bf16.gmra.mrb[4].mxu1 %v8757_v51  ;;  %v10643_v51 = vld [vmem:[%s15331_s1 + $0xc08] ss:$16 sps:$4 sm:$0xff]  }
 0x14b   :  { %6821 = vmatpush1.bf16.msra.mxu0 %v10556_v52  ;;  %7669 = vmatpush1.bf16.msra.mxu1 %v10559_v53  ;;  %v10648_v52 = vld [vmem:[%s15331_s1 + $0xc24] ss:$16 sps:$4 sm:$0xff]   ;;  %v10649_v53 = vld [vmem:[%s15331_s1 + $0xc28] ss:$16 sps:$4 sm:$0xff]  }
 0x14c   :  { %6822 = vmatprep.subr.bf16.mxu0 %v10564_v54  ;;  %7670 = vmatprep.subr.bf16.mxu1 %v10567_v55  ;;  %v8760_v54 = vcombine.high %v60_v45, %v76_v46  ;;  %v10654_v55 = vld [vmem:[%s15331_s1 + $0xc44] ss:$16 sps:$4 sm:$0xff]  }
 0x14d   :  { %6848 = vmatprep.mubr.bf16.mxu0 %v8728_v56  ;;  %7696 = vmatprep.mubr.bf16.mxu1 %v8728_v56  ;;  %v10657_v56 = vld [vmem:[%s15331_s1 + $0xc4c] ss:$16 sps:$4 sm:$0xff]  }
 0x14f   :  { %6823 = vmatpush1.bf16.msra.mxu0 %v10562_v57  ;;  %7671 = vmatpush1.bf16.msra.mxu1 %v10565_v58  ;;  %v12945_v57 = vld [vmem:[%s15332_s0 + $0x30] sm:$0xff] }
 0x150   :  { %6824 = vmatprep.subr.bf16.mxu0 %v10570_v59  ;;  %7672 = vmatprep.subr.bf16.mxu1 %v10573_v60  ;;  %v12950_v58 = vld [vmem:[%s15332_s0 + $0xb0] sm:$0xff]  ;;  %v8759_v59 = vcombine.low %v60_v45, %v76_v46  ;;  %v10727_v46 = vld [vmem:[%s15331_s1 + $0xdc8] ss:$16 sps:$4 sm:$0xff]  }
 0x151   :  { %v10652_v60 = vld [vmem:[%s15331_s1 + $0xc40] ss:$16 sps:$4 sm:$0xff]  }
 0x152   :  { %v10724_v45 = vld [vmem:[%s15331_s1 + $0xdc0] ss:$16 sps:$4 sm:$0xff]  }
 0x153   :  { %6825 = vmatpush1.bf16.msra.mxu0 %v10568_v61  ;;  %7673 = vmatpush1.bf16.msra.mxu1 %v10571_v62  ;;  %v10655_v61 = vld [vmem:[%s15331_s1 + $0xc48] ss:$16 sps:$4 sm:$0xff]   ;;  %v10660_v62 = vld [vmem:[%s15331_s1 + $0xc64] ss:$16 sps:$4 sm:$0xff]  }
 0x154   :  { %6826 = vmatprep.subr.bf16.mxu0 %v10576_v63  ;;  %7674 = vmatprep.subr.bf16.mxu1 %v10579_v0  ;;  %v10663_v63 = vld [vmem:[%s15331_s1 + $0xc6c] ss:$16 sps:$4 sm:$0xff]   ;;  %v8730_v0 = vcombine.high %v12945_v57, %v12950_v58 }
 0x157   :  { %6827 = vmatpush1.bf16.msra.mxu0 %v10574_v1  ;;  %7675 = vmatpush1.bf16.msra.mxu1 %v10577_v2  ;;  %v10658_v1 = vld [vmem:[%s15331_s1 + $0xc60] ss:$16 sps:$4 sm:$0xff]   ;;  %v10661_v2 = vld [vmem:[%s15331_s1 + $0xc68] ss:$16 sps:$4 sm:$0xff]  }
 0x158   :  { %6828 = vmatprep.subr.bf16.mxu0 %v10582_v3  ;;  %7676 = vmatprep.subr.bf16.mxu1 %v10585_v4  ;;  %v10666_v3 = vld [vmem:[%s15331_s1 + $0xc84] ss:$16 sps:$4 sm:$0xff]   ;;  %v10669_v4 = vld [vmem:[%s15331_s1 + $0xc8c] ss:$16 sps:$4 sm:$0xff]  }
 0x15b   :  { %6829 = vmatpush1.bf16.msra.mxu0 %v10580_v5  ;;  %7677 = vmatpush1.bf16.msra.mxu1 %v10583_v6  ;;  %v10664_v5 = vld [vmem:[%s15331_s1 + $0xc80] ss:$16 sps:$4 sm:$0xff]   ;;  %v10667_v6 = vld [vmem:[%s15331_s1 + $0xc88] ss:$16 sps:$4 sm:$0xff]  }
 0x15c   :  { %6830 = vmatprep.subr.bf16.mxu0 %v10588_v7  ;;  %7678 = vmatprep.subr.bf16.mxu1 %v10591_v8  ;;  %v10672_v7 = vld [vmem:[%s15331_s1 + $0xca4] ss:$16 sps:$4 sm:$0xff]   ;;  %v10675_v8 = vld [vmem:[%s15331_s1 + $0xcac] ss:$16 sps:$4 sm:$0xff]  }
 0x15f   :  { %6831 = vmatpush1.bf16.msra.mxu0 %v10586_v9  ;;  %7679 = vmatpush1.bf16.msra.mxu1 %v10589_v10  ;;  %v10670_v9 = vld [vmem:[%s15331_s1 + $0xca0] ss:$16 sps:$4 sm:$0xff]   ;;  %v10673_v10 = vld [vmem:[%s15331_s1 + $0xca8] ss:$16 sps:$4 sm:$0xff]  }
 0x160   :  { %6832 = vmatprep.subr.bf16.mxu0 %v10594_v11  ;;  %7680 = vmatprep.subr.bf16.mxu1 %v10597_v12  ;;  %v10678_v11 = vld [vmem:[%s15331_s1 + $0xcc4] ss:$16 sps:$4 sm:$0xff]   ;;  %v10681_v12 = vld [vmem:[%s15331_s1 + $0xccc] ss:$16 sps:$4 sm:$0xff]  }
 0x163   :  { %6833 = vmatpush1.bf16.msra.mxu0 %v10592_v13  ;;  %7681 = vmatpush1.bf16.msra.mxu1 %v10595_v14  ;;  %v10676_v13 = vld [vmem:[%s15331_s1 + $0xcc0] ss:$16 sps:$4 sm:$0xff]   ;;  %v10679_v14 = vld [vmem:[%s15331_s1 + $0xcc8] ss:$16 sps:$4 sm:$0xff]  }
 0x164   :  { %6834 = vmatprep.subr.bf16.mxu0 %v10600_v15  ;;  %7682 = vmatprep.subr.bf16.mxu1 %v10603_v16  ;;  %v10684_v15 = vld [vmem:[%s15331_s1 + $0xce4] ss:$16 sps:$4 sm:$0xff]   ;;  %v10687_v16 = vld [vmem:[%s15331_s1 + $0xcec] ss:$16 sps:$4 sm:$0xff]  }
 0x167   :  { %6835 = vmatpush1.bf16.msra.mxu0 %v10598_v17  ;;  %7683 = vmatpush1.bf16.msra.mxu1 %v10601_v18  ;;  %v10682_v17 = vld [vmem:[%s15331_s1 + $0xce0] ss:$16 sps:$4 sm:$0xff]   ;;  %v10685_v18 = vld [vmem:[%s15331_s1 + $0xce8] ss:$16 sps:$4 sm:$0xff]  }
 0x168   :  { %6836 = vmatprep.subr.bf16.mxu0 %v10606_v19  ;;  %7684 = vmatprep.subr.bf16.mxu1 %v10609_v20  ;;  %v10690_v19 = vld [vmem:[%s15331_s1 + $0xd04] ss:$16 sps:$4 sm:$0xff]   ;;  %v10693_v20 = vld [vmem:[%s15331_s1 + $0xd0c] ss:$16 sps:$4 sm:$0xff]  }
 0x16b   :  { %6837 = vmatpush1.bf16.msra.mxu0 %v10604_v21  ;;  %7685 = vmatpush1.bf16.msra.mxu1 %v10607_v22  ;;  %v10688_v21 = vld [vmem:[%s15331_s1 + $0xd00] ss:$16 sps:$4 sm:$0xff]   ;;  %v10691_v22 = vld [vmem:[%s15331_s1 + $0xd08] ss:$16 sps:$4 sm:$0xff]  }
 0x16c   :  { %6838 = vmatprep.subr.bf16.mxu0 %v10612_v23  ;;  %7686 = vmatprep.subr.bf16.mxu1 %v10615_v24  ;;  %v10696_v23 = vld [vmem:[%s15331_s1 + $0xd24] ss:$16 sps:$4 sm:$0xff]   ;;  %v10699_v24 = vld [vmem:[%s15331_s1 + $0xd2c] ss:$16 sps:$4 sm:$0xff]  }
 0x16f   :  { %6839 = vmatpush1.bf16.msra.mxu0 %v10610_v26  ;;  %7687 = vmatpush1.bf16.msra.mxu1 %v10613_v25  ;;  %v10694_v26 = vld [vmem:[%s15331_s1 + $0xd20] ss:$16 sps:$4 sm:$0xff]   ;;  %v10697_v25 = vld [vmem:[%s15331_s1 + $0xd28] ss:$16 sps:$4 sm:$0xff]  }
 0x170   :  { %6840 = vmatprep.subr.bf16.mxu0 %v10618_v27  ;;  %7688 = vmatprep.subr.bf16.mxu1 %v10621_v28  ;;  %v10702_v27 = vld [vmem:[%s15331_s1 + $0xd44] ss:$16 sps:$4 sm:$0xff]   ;;  %v10705_v28 = vld [vmem:[%s15331_s1 + $0xd4c] ss:$16 sps:$4 sm:$0xff]  }
 0x173   :  { %6841 = vmatpush1.bf16.msra.mxu0 %v10616_v29  ;;  %7689 = vmatpush1.bf16.msra.mxu1 %v10619_v30  ;;  %v10700_v29 = vld [vmem:[%s15331_s1 + $0xd40] ss:$16 sps:$4 sm:$0xff]   ;;  %v10703_v30 = vld [vmem:[%s15331_s1 + $0xd48] ss:$16 sps:$4 sm:$0xff]  }
 0x174   :  { %6842 = vmatprep.subr.bf16.mxu0 %v10624_v31  ;;  %7690 = vmatprep.subr.bf16.mxu1 %v10627_v32  ;;  %v10708_v31 = vld [vmem:[%s15331_s1 + $0xd64] ss:$16 sps:$4 sm:$0xff]   ;;  %v10711_v32 = vld [vmem:[%s15331_s1 + $0xd6c] ss:$16 sps:$4 sm:$0xff]  }
 0x177   :  { %6843 = vmatpush1.bf16.msra.mxu0 %v10622_v34  ;;  %7691 = vmatpush1.bf16.msra.mxu1 %v10625_v36  ;;  %v10706_v34 = vld [vmem:[%s15331_s1 + $0xd60] ss:$16 sps:$4 sm:$0xff]   ;;  %v10709_v36 = vld [vmem:[%s15331_s1 + $0xd68] ss:$16 sps:$4 sm:$0xff]  }
 0x178   :  { %6844 = vmatprep.subr.bf16.mxu0 %v10630_v33  ;;  %7692 = vmatprep.subr.bf16.mxu1 %v10633_v35  ;;  %v10714_v33 = vld [vmem:[%s15331_s1 + $0xd84] ss:$16 sps:$4 sm:$0xff]   ;;  %v10717_v35 = vld [vmem:[%s15331_s1 + $0xd8c] ss:$16 sps:$4 sm:$0xff]  }
 0x17b   :  { %6845 = vmatpush1.bf16.msra.mxu0 %v10628_v37  ;;  %7693 = vmatpush1.bf16.msra.mxu1 %v10631_v38  ;;  %v10712_v37 = vld [vmem:[%s15331_s1 + $0xd80] ss:$16 sps:$4 sm:$0xff]   ;;  %v10715_v38 = vld [vmem:[%s15331_s1 + $0xd88] ss:$16 sps:$4 sm:$0xff]  }
 0x17c   :  { %6846 = vmatprep.subr.bf16.mxu0 %v10636_v39  ;;  %7694 = vmatprep.subr.bf16.mxu1 %v10639_v40  ;;  %v10720_v39 = vld [vmem:[%s15331_s1 + $0xda4] ss:$16 sps:$4 sm:$0xff]   ;;  %v10723_v40 = vld [vmem:[%s15331_s1 + $0xdac] ss:$16 sps:$4 sm:$0xff]  }
 0x17f   :  { %6847 = vmatpush1.bf16.msra.mxu0 %v10634_v42  ;;  %7695 = vmatpush1.bf16.msra.mxu1 %v10637_v44  ;;  %v10718_v42 = vld [vmem:[%s15331_s1 + $0xda0] ss:$16 sps:$4 sm:$0xff]   ;;  %v10721_v44 = vld [vmem:[%s15331_s1 + $0xda8] ss:$16 sps:$4 sm:$0xff]  }
 0x180   :  { %6869 = vmatprep.subr.bf16.mxu0 %v10642_v41  ;;  %7717 = vmatprep.subr.bf16.mxu1 %v10645_v43  ;;  %v10726_v41 = vld [vmem:[%s15331_s1 + $0xdc4] ss:$16 sps:$4 sm:$0xff]   ;;  %v10729_v43 = vld [vmem:[%s15331_s1 + $0xdcc] ss:$16 sps:$4 sm:$0xff]  }
 0x182   :  { %6849 = vmatmul.mubr.bf16.vlgmr.msra.gmra.mrb[0].mxu0 %v8727_v47  ;;  %7697 = vmatmul.mubr.bf16.vlgmr.msra.gmra.mrb[0].mxu1 %v8727_v47  ;;  %v10732_v47 = vld [vmem:[%s15331_s1 + $0xde4] ss:$16 sps:$4 sm:$0xff]  }
 0x183   :  { %6870 = vmatpush1.bf16.msra.mxu0 %v10640_v48  ;;  %7718 = vmatpush1.bf16.msra.mxu1 %v10643_v51  ;;  %v10735_v48 = vld [vmem:[%s15331_s1 + $0xdec] ss:$16 sps:$4 sm:$0xff]   ;;  %v10730_v51 = vld [vmem:[%s15331_s1 + $0xde0] ss:$16 sps:$4 sm:$0xff]  }
 0x184   :  { %6871 = vmatprep.subr.bf16.mxu0 %v10648_v52  ;;  %7719 = vmatprep.subr.bf16.mxu1 %v10651_v49  ;;  %v10733_v52 = vld [vmem:[%s15331_s1 + $0xde8] ss:$16 sps:$4 sm:$0xff]   ;;  %v10738_v49 = vld [vmem:[%s15331_s1 + $0xe04] ss:$16 sps:$4 sm:$0xff]  }
 0x185   :  { %6858 = vmatprep.mubr.bf16.mxu0 %v8760_v54  ;;  %7706 = vmatprep.mubr.bf16.mxu1 %v8760_v54  ;;  %v77_v54 = vld [vmem:[%s15332_s0 + $0x1b0] sm:$0xff] }
 0x187   :  { %6872 = vmatpush1.bf16.msra.mxu0 %v10646_v50  ;;  %7720 = vmatpush1.bf16.msra.mxu1 %v10649_v53  ;;  %v10741_v50 = vld [vmem:[%s15331_s1 + $0xe0c] ss:$16 sps:$4 sm:$0xff]   ;;  %v61_v53 = vld [vmem:[%s15332_s0 + $0x130] sm:$0xff] }
 0x188   :  { %6873 = vmatprep.subr.bf16.mxu0 %v10654_v55  ;;  %7721 = vmatprep.subr.bf16.mxu1 %v10657_v56  ;;  %v8729_v55 = vcombine.low %v12945_v57, %v12950_v58  ;;  %v10736_v56 = vld [vmem:[%s15331_s1 + $0xe00] ss:$16 sps:$4 sm:$0xff]   ;;  %v10747_v57 = vld [vmem:[%s15331_s1 + $0xe2c] ss:$16 sps:$4 sm:$0xff]  }
 0x189   :  { %v10742_v58 = vld [vmem:[%s15331_s1 + $0xe20] ss:$16 sps:$4 sm:$0xff]  }
 0x18a   :  { %6859 = vmatmul.mubr.bf16.gmra.mrb[4].mxu0 %v8759_v59  ;;  %7707 = vmatmul.mubr.bf16.gmra.mrb[4].mxu1 %v8759_v59  ;;  %v10739_v59 = vld [vmem:[%s15331_s1 + $0xe08] ss:$16 sps:$4 sm:$0xff]  }
 0x18b   :  { %6874 = vmatpush1.bf16.msra.mxu0 %v10652_v60  ;;  %7722 = vmatpush1.bf16.msra.mxu1 %v10655_v61  ;;  %v10744_v60 = vld [vmem:[%s15331_s1 + $0xe24] ss:$16 sps:$4 sm:$0xff]   ;;  %v10745_v61 = vld [vmem:[%s15331_s1 + $0xe28] ss:$16 sps:$4 sm:$0xff]  }
 0x18c   :  { %6875 = vmatprep.subr.bf16.mxu0 %v10660_v62  ;;  %7723 = vmatprep.subr.bf16.mxu1 %v10663_v63  ;;  %v8762_v62 = vcombine.high %v61_v53, %v77_v54  ;;  %v10750_v63 = vld [vmem:[%s15331_s1 + $0xe44] ss:$16 sps:$4 sm:$0xff]  }
 0x18d   :  { %6901 = vmatprep.mubr.bf16.mxu0 %v8730_v0  ;;  %7749 = vmatprep.mubr.bf16.mxu1 %v8730_v0  ;;  %v10753_v0 = vld [vmem:[%s15331_s1 + $0xe4c] ss:$16 sps:$4 sm:$0xff]  }
 0x18f   :  { %6876 = vmatpush1.bf16.msra.mxu0 %v10658_v1  ;;  %7724 = vmatpush1.bf16.msra.mxu1 %v10661_v2  ;;  %v13157_v1 = vld [vmem:[%s15332_s0 + $0x38] sm:$0xff] }
 0x190   :  { %6877 = vmatprep.subr.bf16.mxu0 %v10666_v3  ;;  %7725 = vmatprep.subr.bf16.mxu1 %v10669_v4  ;;  %v13162_v2 = vld [vmem:[%s15332_s0 + $0xb8] sm:$0xff]  ;;  %v8761_v3 = vcombine.low %v61_v53, %v77_v54  ;;  %v10748_v4 = vld [vmem:[%s15331_s1 + $0xe40] ss:$16 sps:$4 sm:$0xff]  }
 0x191   :  { %v10820_v53 = vld [vmem:[%s15331_s1 + $0xfc0] ss:$16 sps:$4 sm:$0xff]   ;;  %v10823_v54 = vld [vmem:[%s15331_s1 + $0xfc8] ss:$16 sps:$4 sm:$0xff]  }
 0x193   :  { %6878 = vmatpush1.bf16.msra.mxu0 %v10664_v5  ;;  %7726 = vmatpush1.bf16.msra.mxu1 %v10667_v6  ;;  %v10751_v5 = vld [vmem:[%s15331_s1 + $0xe48] ss:$16 sps:$4 sm:$0xff]   ;;  %v10756_v6 = vld [vmem:[%s15331_s1 + $0xe64] ss:$16 sps:$4 sm:$0xff]  }
 0x194   :  { %6879 = vmatprep.subr.bf16.mxu0 %v10672_v7  ;;  %7727 = vmatprep.subr.bf16.mxu1 %v10675_v8  ;;  %v10759_v7 = vld [vmem:[%s15331_s1 + $0xe6c] ss:$16 sps:$4 sm:$0xff]   ;;  %v8732_v8 = vcombine.high %v13157_v1, %v13162_v2 }
 0x197   :  { %6880 = vmatpush1.bf16.msra.mxu0 %v10670_v9  ;;  %7728 = vmatpush1.bf16.msra.mxu1 %v10673_v10  ;;  %v10754_v9 = vld [vmem:[%s15331_s1 + $0xe60] ss:$16 sps:$4 sm:$0xff]   ;;  %v10757_v10 = vld [vmem:[%s15331_s1 + $0xe68] ss:$16 sps:$4 sm:$0xff]  }
 0x198   :  { %6881 = vmatprep.subr.bf16.mxu0 %v10678_v11  ;;  %7729 = vmatprep.subr.bf16.mxu1 %v10681_v12  ;;  %v10762_v11 = vld [vmem:[%s15331_s1 + $0xe84] ss:$16 sps:$4 sm:$0xff]   ;;  %v10765_v12 = vld [vmem:[%s15331_s1 + $0xe8c] ss:$16 sps:$4 sm:$0xff]  }
 0x19b   :  { %6882 = vmatpush1.bf16.msra.mxu0 %v10676_v13  ;;  %7730 = vmatpush1.bf16.msra.mxu1 %v10679_v14  ;;  %v10760_v13 = vld [vmem:[%s15331_s1 + $0xe80] ss:$16 sps:$4 sm:$0xff]   ;;  %v10763_v14 = vld [vmem:[%s15331_s1 + $0xe88] ss:$16 sps:$4 sm:$0xff]  }
 0x19c   :  { %6883 = vmatprep.subr.bf16.mxu0 %v10684_v15  ;;  %7731 = vmatprep.subr.bf16.mxu1 %v10687_v16  ;;  %v10768_v15 = vld [vmem:[%s15331_s1 + $0xea4] ss:$16 sps:$4 sm:$0xff]   ;;  %v10771_v16 = vld [vmem:[%s15331_s1 + $0xeac] ss:$16 sps:$4 sm:$0xff]  }
 0x19f   :  { %6884 = vmatpush1.bf16.msra.mxu0 %v10682_v17  ;;  %7732 = vmatpush1.bf16.msra.mxu1 %v10685_v18  ;;  %v10766_v17 = vld [vmem:[%s15331_s1 + $0xea0] ss:$16 sps:$4 sm:$0xff]   ;;  %v10769_v18 = vld [vmem:[%s15331_s1 + $0xea8] ss:$16 sps:$4 sm:$0xff]  }
 0x1a0   :  { %6885 = vmatprep.subr.bf16.mxu0 %v10690_v19  ;;  %7733 = vmatprep.subr.bf16.mxu1 %v10693_v20  ;;  %v10774_v19 = vld [vmem:[%s15331_s1 + $0xec4] ss:$16 sps:$4 sm:$0xff]   ;;  %v10777_v20 = vld [vmem:[%s15331_s1 + $0xecc] ss:$16 sps:$4 sm:$0xff]  }
 0x1a3   :  { %6886 = vmatpush1.bf16.msra.mxu0 %v10688_v21  ;;  %7734 = vmatpush1.bf16.msra.mxu1 %v10691_v22  ;;  %v10772_v21 = vld [vmem:[%s15331_s1 + $0xec0] ss:$16 sps:$4 sm:$0xff]   ;;  %v10775_v22 = vld [vmem:[%s15331_s1 + $0xec8] ss:$16 sps:$4 sm:$0xff]  }
 0x1a4   :  { %6887 = vmatprep.subr.bf16.mxu0 %v10696_v23  ;;  %7735 = vmatprep.subr.bf16.mxu1 %v10699_v24  ;;  %v10780_v23 = vld [vmem:[%s15331_s1 + $0xee4] ss:$16 sps:$4 sm:$0xff]   ;;  %v10783_v24 = vld [vmem:[%s15331_s1 + $0xeec] ss:$16 sps:$4 sm:$0xff]  }
 0x1a7   :  { %6888 = vmatpush1.bf16.msra.mxu0 %v10694_v26  ;;  %7736 = vmatpush1.bf16.msra.mxu1 %v10697_v25  ;;  %v10778_v26 = vld [vmem:[%s15331_s1 + $0xee0] ss:$16 sps:$4 sm:$0xff]   ;;  %v10781_v25 = vld [vmem:[%s15331_s1 + $0xee8] ss:$16 sps:$4 sm:$0xff]  }
 0x1a8   :  { %6889 = vmatprep.subr.bf16.mxu0 %v10702_v27  ;;  %7737 = vmatprep.subr.bf16.mxu1 %v10705_v28  ;;  %v10786_v27 = vld [vmem:[%s15331_s1 + $0xf04] ss:$16 sps:$4 sm:$0xff]   ;;  %v10789_v28 = vld [vmem:[%s15331_s1 + $0xf0c] ss:$16 sps:$4 sm:$0xff]  }
 0x1ab   :  { %6890 = vmatpush1.bf16.msra.mxu0 %v10700_v29  ;;  %7738 = vmatpush1.bf16.msra.mxu1 %v10703_v30  ;;  %v10784_v29 = vld [vmem:[%s15331_s1 + $0xf00] ss:$16 sps:$4 sm:$0xff]   ;;  %v10787_v30 = vld [vmem:[%s15331_s1 + $0xf08] ss:$16 sps:$4 sm:$0xff]  }
 0x1ac   :  { %6891 = vmatprep.subr.bf16.mxu0 %v10708_v31  ;;  %7739 = vmatprep.subr.bf16.mxu1 %v10711_v32  ;;  %v10792_v31 = vld [vmem:[%s15331_s1 + $0xf24] ss:$16 sps:$4 sm:$0xff]   ;;  %v10795_v32 = vld [vmem:[%s15331_s1 + $0xf2c] ss:$16 sps:$4 sm:$0xff]  }
 0x1af   :  { %6892 = vmatpush1.bf16.msra.mxu0 %v10706_v34  ;;  %7740 = vmatpush1.bf16.msra.mxu1 %v10709_v36  ;;  %v10790_v34 = vld [vmem:[%s15331_s1 + $0xf20] ss:$16 sps:$4 sm:$0xff]   ;;  %v10793_v36 = vld [vmem:[%s15331_s1 + $0xf28] ss:$16 sps:$4 sm:$0xff]  }
 0x1b0   :  { %6893 = vmatprep.subr.bf16.mxu0 %v10714_v33  ;;  %7741 = vmatprep.subr.bf16.mxu1 %v10717_v35  ;;  %v10798_v33 = vld [vmem:[%s15331_s1 + $0xf44] ss:$16 sps:$4 sm:$0xff]   ;;  %v10801_v35 = vld [vmem:[%s15331_s1 + $0xf4c] ss:$16 sps:$4 sm:$0xff]  }
 0x1b3   :  { %6894 = vmatpush1.bf16.msra.mxu0 %v10712_v37  ;;  %7742 = vmatpush1.bf16.msra.mxu1 %v10715_v38  ;;  %v10796_v37 = vld [vmem:[%s15331_s1 + $0xf40] ss:$16 sps:$4 sm:$0xff]   ;;  %v10799_v38 = vld [vmem:[%s15331_s1 + $0xf48] ss:$16 sps:$4 sm:$0xff]  }
 0x1b4   :  { %6895 = vmatprep.subr.bf16.mxu0 %v10720_v39  ;;  %7743 = vmatprep.subr.bf16.mxu1 %v10723_v40  ;;  %v10804_v39 = vld [vmem:[%s15331_s1 + $0xf64] ss:$16 sps:$4 sm:$0xff]   ;;  %v10807_v40 = vld [vmem:[%s15331_s1 + $0xf6c] ss:$16 sps:$4 sm:$0xff]  }
 0x1b7   :  { %6896 = vmatpush1.bf16.msra.mxu0 %v10718_v42  ;;  %7744 = vmatpush1.bf16.msra.mxu1 %v10721_v44  ;;  %v10802_v42 = vld [vmem:[%s15331_s1 + $0xf60] ss:$16 sps:$4 sm:$0xff]   ;;  %v10805_v44 = vld [vmem:[%s15331_s1 + $0xf68] ss:$16 sps:$4 sm:$0xff]  }
 0x1b8   :  { %6897 = vmatprep.subr.bf16.mxu0 %v10726_v41  ;;  %7745 = vmatprep.subr.bf16.mxu1 %v10729_v43  ;;  %v10810_v41 = vld [vmem:[%s15331_s1 + $0xf84] ss:$16 sps:$4 sm:$0xff]   ;;  %v10813_v43 = vld [vmem:[%s15331_s1 + $0xf8c] ss:$16 sps:$4 sm:$0xff]  }
 0x1bb   :  { %6898 = vmatpush1.bf16.msra.mxu0 %v10724_v45  ;;  %7746 = vmatpush1.bf16.msra.mxu1 %v10727_v46  ;;  %v10808_v45 = vld [vmem:[%s15331_s1 + $0xf80] ss:$16 sps:$4 sm:$0xff]   ;;  %v10811_v46 = vld [vmem:[%s15331_s1 + $0xf88] ss:$16 sps:$4 sm:$0xff]  }
 0x1bc   :  { %6899 = vmatprep.subr.bf16.mxu0 %v10732_v47  ;;  %7747 = vmatprep.subr.bf16.mxu1 %v10735_v48  ;;  %v10816_v47 = vld [vmem:[%s15331_s1 + $0xfa4] ss:$16 sps:$4 sm:$0xff]   ;;  %v10819_v48 = vld [vmem:[%s15331_s1 + $0xfac] ss:$16 sps:$4 sm:$0xff]  }
 0x1bf   :  { %6900 = vmatpush1.bf16.msra.mxu0 %v10730_v51  ;;  %7748 = vmatpush1.bf16.msra.mxu1 %v10733_v52  ;;  %v10814_v51 = vld [vmem:[%s15331_s1 + $0xfa0] ss:$16 sps:$4 sm:$0xff]   ;;  %v10817_v52 = vld [vmem:[%s15331_s1 + $0xfa8] ss:$16 sps:$4 sm:$0xff]  }
 0x1c0   :  { %6922 = vmatprep.subr.bf16.mxu0 %v10738_v49  ;;  %7770 = vmatprep.subr.bf16.mxu1 %v10741_v50  ;;  %v10822_v49 = vld [vmem:[%s15331_s1 + $0xfc4] ss:$16 sps:$4 sm:$0xff]   ;;  %v10825_v50 = vld [vmem:[%s15331_s1 + $0xfcc] ss:$16 sps:$4 sm:$0xff]  }
 0x1c2   :  { %6902 = vmatmul.mubr.bf16.vlgmr.msra.gmra.mrb[0].mxu0 %v8729_v55  ;;  %7750 = vmatmul.mubr.bf16.vlgmr.msra.gmra.mrb[0].mxu1 %v8729_v55  ;;  %v10828_v55 = vld [vmem:[%s15331_s1 + $0xfe4] ss:$16 sps:$4 sm:$0xff]  }
 0x1c3   :  { %6923 = vmatpush1.bf16.msra.mxu0 %v10736_v56  ;;  %7771 = vmatpush1.bf16.msra.mxu1 %v10739_v59  ;;  %v10831_v56 = vld [vmem:[%s15331_s1 + $0xfec] ss:$16 sps:$4 sm:$0xff]   ;;  %v10826_v59 = vld [vmem:[%s15331_s1 + $0xfe0] ss:$16 sps:$4 sm:$0xff]  }
 0x1c4   :  { %6924 = vmatprep.subr.bf16.mxu0 %v10744_v60  ;;  %7772 = vmatprep.subr.bf16.mxu1 %v10747_v57  ;;  %v10829_v60 = vld [vmem:[%s15331_s1 + $0xfe8] ss:$16 sps:$4 sm:$0xff]   ;;  %v10834_v57 = vld [vmem:[%s15331_s1 + $0x1004] ss:$16 sps:$4 sm:$0xff]  }
 0x1c5   :  { %6911 = vmatprep.mubr.bf16.mxu0 %v8762_v62  ;;  %7759 = vmatprep.mubr.bf16.mxu1 %v8762_v62  ;;  %v78_v62 = vld [vmem:[%s15332_s0 + $0x1b8] sm:$0xff] }
 0x1c7   :  { %6925 = vmatpush1.bf16.msra.mxu0 %v10742_v58  ;;  %7773 = vmatpush1.bf16.msra.mxu1 %v10745_v61  ;;  %v10837_v58 = vld [vmem:[%s15331_s1 + $0x100c] ss:$16 sps:$4 sm:$0xff]  }
 0x1c8   :  { %6926 = vmatprep.subr.bf16.mxu0 %v10750_v63  ;;  %7774 = vmatprep.subr.bf16.mxu1 %v10753_v0  ;;  %v62_v61 = vld [vmem:[%s15332_s0 + $0x138] sm:$0xff]  ;;  %v8731_v63 = vcombine.low %v13157_v1, %v13162_v2  ;;  %v10832_v0 = vld [vmem:[%s15331_s1 + $0x1000] ss:$16 sps:$4 sm:$0xff]  }
 0x1c9   :  { %v10843_v1 = vld [vmem:[%s15331_s1 + $0x102c] ss:$16 sps:$4 sm:$0xff]   ;;  %v10838_v2 = vld [vmem:[%s15331_s1 + $0x1020] ss:$16 sps:$4 sm:$0xff]  }
 0x1ca   :  { %6912 = vmatmul.mubr.bf16.gmra.mrb[4].mxu0 %v8761_v3  ;;  %7760 = vmatmul.mubr.bf16.gmra.mrb[4].mxu1 %v8761_v3  ;;  %v10835_v3 = vld [vmem:[%s15331_s1 + $0x1008] ss:$16 sps:$4 sm:$0xff]  }
 0x1cb   :  { %6927 = vmatpush1.bf16.msra.mxu0 %v10748_v4  ;;  %7775 = vmatpush1.bf16.msra.mxu1 %v10751_v5  ;;  %v10840_v4 = vld [vmem:[%s15331_s1 + $0x1024] ss:$16 sps:$4 sm:$0xff]   ;;  %v10841_v5 = vld [vmem:[%s15331_s1 + $0x1028] ss:$16 sps:$4 sm:$0xff]  }
 0x1cc   :  { %6928 = vmatprep.subr.bf16.mxu0 %v10756_v6  ;;  %7776 = vmatprep.subr.bf16.mxu1 %v10759_v7  ;;  %v8764_v6 = vcombine.high %v62_v61, %v78_v62  ;;  %v10846_v7 = vld [vmem:[%s15331_s1 + $0x1044] ss:$16 sps:$4 sm:$0xff]  }
 0x1cd   :  { %6954 = vmatprep.mubr.bf16.mxu0 %v8732_v8  ;;  %7802 = vmatprep.mubr.bf16.mxu1 %v8732_v8  ;;  %v10849_v8 = vld [vmem:[%s15331_s1 + $0x104c] ss:$16 sps:$4 sm:$0xff]  }
 0x1cf   :  { %6929 = vmatpush1.bf16.msra.mxu0 %v10754_v9  ;;  %7777 = vmatpush1.bf16.msra.mxu1 %v10757_v10  ;;  %v13369_v9 = vld [vmem:[%s15332_s0 + $0x40] sm:$0xff] }
 0x1d0   :  { %6930 = vmatprep.subr.bf16.mxu0 %v10762_v11  ;;  %7778 = vmatprep.subr.bf16.mxu1 %v10765_v12  ;;  %v13374_v10 = vld [vmem:[%s15332_s0 + $0xc0] sm:$0xff]  ;;  %v8763_v11 = vcombine.low %v62_v61, %v78_v62  ;;  %v10919_v62 = vld [vmem:[%s15331_s1 + $0x11c8] ss:$16 sps:$4 sm:$0xff]  }
 0x1d1   :  { %v10844_v12 = vld [vmem:[%s15331_s1 + $0x1040] ss:$16 sps:$4 sm:$0xff]  }
 0x1d2   :  { %v10916_v61 = vld [vmem:[%s15331_s1 + $0x11c0] ss:$16 sps:$4 sm:$0xff]  }
 0x1d3   :  { %6931 = vmatpush1.bf16.msra.mxu0 %v10760_v13  ;;  %7779 = vmatpush1.bf16.msra.mxu1 %v10763_v14  ;;  %v10847_v13 = vld [vmem:[%s15331_s1 + $0x1048] ss:$16 sps:$4 sm:$0xff]   ;;  %v10852_v14 = vld [vmem:[%s15331_s1 + $0x1064] ss:$16 sps:$4 sm:$0xff]  }
 0x1d4   :  { %6932 = vmatprep.subr.bf16.mxu0 %v10768_v15  ;;  %7780 = vmatprep.subr.bf16.mxu1 %v10771_v16  ;;  %v10855_v15 = vld [vmem:[%s15331_s1 + $0x106c] ss:$16 sps:$4 sm:$0xff]   ;;  %v8734_v16 = vcombine.high %v13369_v9, %v13374_v10 }
 0x1d7   :  { %6933 = vmatpush1.bf16.msra.mxu0 %v10766_v17  ;;  %7781 = vmatpush1.bf16.msra.mxu1 %v10769_v18  ;;  %v10850_v17 = vld [vmem:[%s15331_s1 + $0x1060] ss:$16 sps:$4 sm:$0xff]   ;;  %v10853_v18 = vld [vmem:[%s15331_s1 + $0x1068] ss:$16 sps:$4 sm:$0xff]  }
 0x1d8   :  { %6934 = vmatprep.subr.bf16.mxu0 %v10774_v19  ;;  %7782 = vmatprep.subr.bf16.mxu1 %v10777_v20  ;;  %v10858_v19 = vld [vmem:[%s15331_s1 + $0x1084] ss:$16 sps:$4 sm:$0xff]   ;;  %v10861_v20 = vld [vmem:[%s15331_s1 + $0x108c] ss:$16 sps:$4 sm:$0xff]  }
 0x1db   :  { %6935 = vmatpush1.bf16.msra.mxu0 %v10772_v21  ;;  %7783 = vmatpush1.bf16.msra.mxu1 %v10775_v22  ;;  %v10856_v21 = vld [vmem:[%s15331_s1 + $0x1080] ss:$16 sps:$4 sm:$0xff]   ;;  %v10859_v22 = vld [vmem:[%s15331_s1 + $0x1088] ss:$16 sps:$4 sm:$0xff]  }
 0x1dc   :  { %6936 = vmatprep.subr.bf16.mxu0 %v10780_v23  ;;  %7784 = vmatprep.subr.bf16.mxu1 %v10783_v24  ;;  %v10864_v23 = vld [vmem:[%s15331_s1 + $0x10a4] ss:$16 sps:$4 sm:$0xff]   ;;  %v10867_v24 = vld [vmem:[%s15331_s1 + $0x10ac] ss:$16 sps:$4 sm:$0xff]  }
 0x1df   :  { %6937 = vmatpush1.bf16.msra.mxu0 %v10778_v26  ;;  %7785 = vmatpush1.bf16.msra.mxu1 %v10781_v25  ;;  %v10862_v26 = vld [vmem:[%s15331_s1 + $0x10a0] ss:$16 sps:$4 sm:$0xff]   ;;  %v10865_v25 = vld [vmem:[%s15331_s1 + $0x10a8] ss:$16 sps:$4 sm:$0xff]  }
 0x1e0   :  { %6938 = vmatprep.subr.bf16.mxu0 %v10786_v27  ;;  %7786 = vmatprep.subr.bf16.mxu1 %v10789_v28  ;;  %v10870_v27 = vld [vmem:[%s15331_s1 + $0x10c4] ss:$16 sps:$4 sm:$0xff]   ;;  %v10873_v28 = vld [vmem:[%s15331_s1 + $0x10cc] ss:$16 sps:$4 sm:$0xff]  }
 0x1e3   :  { %6939 = vmatpush1.bf16.msra.mxu0 %v10784_v29  ;;  %7787 = vmatpush1.bf16.msra.mxu1 %v10787_v30  ;;  %v10868_v29 = vld [vmem:[%s15331_s1 + $0x10c0] ss:$16 sps:$4 sm:$0xff]   ;;  %v10871_v30 = vld [vmem:[%s15331_s1 + $0x10c8] ss:$16 sps:$4 sm:$0xff]  }
 0x1e4   :  { %6940 = vmatprep.subr.bf16.mxu0 %v10792_v31  ;;  %7788 = vmatprep.subr.bf16.mxu1 %v10795_v32  ;;  %v10876_v31 = vld [vmem:[%s15331_s1 + $0x10e4] ss:$16 sps:$4 sm:$0xff]   ;;  %v10879_v32 = vld [vmem:[%s15331_s1 + $0x10ec] ss:$16 sps:$4 sm:$0xff]  }
 0x1e7   :  { %6941 = vmatpush1.bf16.msra.mxu0 %v10790_v34  ;;  %7789 = vmatpush1.bf16.msra.mxu1 %v10793_v36  ;;  %v10874_v34 = vld [vmem:[%s15331_s1 + $0x10e0] ss:$16 sps:$4 sm:$0xff]   ;;  %v10877_v36 = vld [vmem:[%s15331_s1 + $0x10e8] ss:$16 sps:$4 sm:$0xff]  }
 0x1e8   :  { %6942 = vmatprep.subr.bf16.mxu0 %v10798_v33  ;;  %7790 = vmatprep.subr.bf16.mxu1 %v10801_v35  ;;  %v10882_v33 = vld [vmem:[%s15331_s1 + $0x1104] ss:$16 sps:$4 sm:$0xff]   ;;  %v10885_v35 = vld [vmem:[%s15331_s1 + $0x110c] ss:$16 sps:$4 sm:$0xff]  }
 0x1eb   :  { %6943 = vmatpush1.bf16.msra.mxu0 %v10796_v37  ;;  %7791 = vmatpush1.bf16.msra.mxu1 %v10799_v38  ;;  %v10880_v37 = vld [vmem:[%s15331_s1 + $0x1100] ss:$16 sps:$4 sm:$0xff]   ;;  %v10883_v38 = vld [vmem:[%s15331_s1 + $0x1108] ss:$16 sps:$4 sm:$0xff]  }
 0x1ec   :  { %6944 = vmatprep.subr.bf16.mxu0 %v10804_v39  ;;  %7792 = vmatprep.subr.bf16.mxu1 %v10807_v40  ;;  %v10888_v39 = vld [vmem:[%s15331_s1 + $0x1124] ss:$16 sps:$4 sm:$0xff]   ;;  %v10891_v40 = vld [vmem:[%s15331_s1 + $0x112c] ss:$16 sps:$4 sm:$0xff]  }
 0x1ef   :  { %6945 = vmatpush1.bf16.msra.mxu0 %v10802_v42  ;;  %7793 = vmatpush1.bf16.msra.mxu1 %v10805_v44  ;;  %v10886_v42 = vld [vmem:[%s15331_s1 + $0x1120] ss:$16 sps:$4 sm:$0xff]   ;;  %v10889_v44 = vld [vmem:[%s15331_s1 + $0x1128] ss:$16 sps:$4 sm:$0xff]  }
 0x1f0   :  { %6946 = vmatprep.subr.bf16.mxu0 %v10810_v41  ;;  %7794 = vmatprep.subr.bf16.mxu1 %v10813_v43  ;;  %v10894_v41 = vld [vmem:[%s15331_s1 + $0x1144] ss:$16 sps:$4 sm:$0xff]   ;;  %v10897_v43 = vld [vmem:[%s15331_s1 + $0x114c] ss:$16 sps:$4 sm:$0xff]  }
 0x1f3   :  { %6947 = vmatpush1.bf16.msra.mxu0 %v10808_v45  ;;  %7795 = vmatpush1.bf16.msra.mxu1 %v10811_v46  ;;  %v10892_v45 = vld [vmem:[%s15331_s1 + $0x1140] ss:$16 sps:$4 sm:$0xff]   ;;  %v10895_v46 = vld [vmem:[%s15331_s1 + $0x1148] ss:$16 sps:$4 sm:$0xff]  }
 0x1f4   :  { %6948 = vmatprep.subr.bf16.mxu0 %v10816_v47  ;;  %7796 = vmatprep.subr.bf16.mxu1 %v10819_v48  ;;  %v10900_v47 = vld [vmem:[%s15331_s1 + $0x1164] ss:$16 sps:$4 sm:$0xff]   ;;  %v10903_v48 = vld [vmem:[%s15331_s1 + $0x116c] ss:$16 sps:$4 sm:$0xff]  }
 0x1f7   :  { %6949 = vmatpush1.bf16.msra.mxu0 %v10814_v51  ;;  %7797 = vmatpush1.bf16.msra.mxu1 %v10817_v52  ;;  %v10898_v51 = vld [vmem:[%s15331_s1 + $0x1160] ss:$16 sps:$4 sm:$0xff]   ;;  %v10901_v52 = vld [vmem:[%s15331_s1 + $0x1168] ss:$16 sps:$4 sm:$0xff]  }
 0x1f8   :  { %6950 = vmatprep.subr.bf16.mxu0 %v10822_v49  ;;  %7798 = vmatprep.subr.bf16.mxu1 %v10825_v50  ;;  %v10906_v49 = vld [vmem:[%s15331_s1 + $0x1184] ss:$16 sps:$4 sm:$0xff]   ;;  %v10909_v50 = vld [vmem:[%s15331_s1 + $0x118c] ss:$16 sps:$4 sm:$0xff]  }
 0x1fb   :  { %6951 = vmatpush1.bf16.msra.mxu0 %v10820_v53  ;;  %7799 = vmatpush1.bf16.msra.mxu1 %v10823_v54  ;;  %v10904_v53 = vld [vmem:[%s15331_s1 + $0x1180] ss:$16 sps:$4 sm:$0xff]   ;;  %v10907_v54 = vld [vmem:[%s15331_s1 + $0x1188] ss:$16 sps:$4 sm:$0xff]  }
 0x1fc   :  { %6952 = vmatprep.subr.bf16.mxu0 %v10828_v55  ;;  %7800 = vmatprep.subr.bf16.mxu1 %v10831_v56  ;;  %v10912_v55 = vld [vmem:[%s15331_s1 + $0x11a4] ss:$16 sps:$4 sm:$0xff]   ;;  %v10915_v56 = vld [vmem:[%s15331_s1 + $0x11ac] ss:$16 sps:$4 sm:$0xff]  }
 0x1ff   :  { %6953 = vmatpush1.bf16.msra.mxu0 %v10826_v59  ;;  %7801 = vmatpush1.bf16.msra.mxu1 %v10829_v60  ;;  %v10910_v59 = vld [vmem:[%s15331_s1 + $0x11a0] ss:$16 sps:$4 sm:$0xff]   ;;  %v10913_v60 = vld [vmem:[%s15331_s1 + $0x11a8] ss:$16 sps:$4 sm:$0xff]  }
 0x200   :  { %6975 = vmatprep.subr.bf16.mxu0 %v10834_v57  ;;  %7823 = vmatprep.subr.bf16.mxu1 %v10837_v58  ;;  %v10918_v57 = vld [vmem:[%s15331_s1 + $0x11c4] ss:$16 sps:$4 sm:$0xff]   ;;  %v10921_v58 = vld [vmem:[%s15331_s1 + $0x11cc] ss:$16 sps:$4 sm:$0xff]  }
 0x202   :  { %6955 = vmatmul.mubr.bf16.vlgmr.msra.gmra.mrb[0].mxu0 %v8731_v63  ;;  %7803 = vmatmul.mubr.bf16.vlgmr.msra.gmra.mrb[0].mxu1 %v8731_v63  ;;  %v10924_v63 = vld [vmem:[%s15331_s1 + $0x11e4] ss:$16 sps:$4 sm:$0xff]  }
 0x203   :  { %6976 = vmatpush1.bf16.msra.mxu0 %v10832_v0  ;;  %7824 = vmatpush1.bf16.msra.mxu1 %v10835_v3  ;;  %v10927_v0 = vld [vmem:[%s15331_s1 + $0x11ec] ss:$16 sps:$4 sm:$0xff]   ;;  %v10922_v3 = vld [vmem:[%s15331_s1 + $0x11e0] ss:$16 sps:$4 sm:$0xff]  }
 0x204   :  { %6977 = vmatprep.subr.bf16.mxu0 %v10840_v4  ;;  %7825 = vmatprep.subr.bf16.mxu1 %v10843_v1  ;;  %v10925_v4 = vld [vmem:[%s15331_s1 + $0x11e8] ss:$16 sps:$4 sm:$0xff]   ;;  %v10930_v1 = vld [vmem:[%s15331_s1 + $0x1204] ss:$16 sps:$4 sm:$0xff]  }
 0x205   :  { %6964 = vmatprep.mubr.bf16.mxu0 %v8764_v6  ;;  %7812 = vmatprep.mubr.bf16.mxu1 %v8764_v6  ;;  %v79_v6 = vld [vmem:[%s15332_s0 + $0x1c0] sm:$0xff] }
 0x207   :  { %6978 = vmatpush1.bf16.msra.mxu0 %v10838_v2  ;;  %7826 = vmatpush1.bf16.msra.mxu1 %v10841_v5  ;;  %v10933_v2 = vld [vmem:[%s15331_s1 + $0x120c] ss:$16 sps:$4 sm:$0xff]   ;;  %v63_v5 = vld [vmem:[%s15332_s0 + $0x140] sm:$0xff] }
 0x208   :  { %6979 = vmatprep.subr.bf16.mxu0 %v10846_v7  ;;  %7827 = vmatprep.subr.bf16.mxu1 %v10849_v8  ;;  %v8733_v7 = vcombine.low %v13369_v9, %v13374_v10  ;;  %v10928_v8 = vld [vmem:[%s15331_s1 + $0x1200] ss:$16 sps:$4 sm:$0xff]   ;;  %v10939_v9 = vld [vmem:[%s15331_s1 + $0x122c] ss:$16 sps:$4 sm:$0xff]  }
 0x209   :  { %v10934_v10 = vld [vmem:[%s15331_s1 + $0x1220] ss:$16 sps:$4 sm:$0xff]  }
 0x20a   :  { %6965 = vmatmul.mubr.bf16.gmra.mrb[4].mxu0 %v8763_v11  ;;  %7813 = vmatmul.mubr.bf16.gmra.mrb[4].mxu1 %v8763_v11  ;;  %v10931_v11 = vld [vmem:[%s15331_s1 + $0x1208] ss:$16 sps:$4 sm:$0xff]  }
 0x20b   :  { %6980 = vmatpush1.bf16.msra.mxu0 %v10844_v12  ;;  %7828 = vmatpush1.bf16.msra.mxu1 %v10847_v13  ;;  %v10936_v12 = vld [vmem:[%s15331_s1 + $0x1224] ss:$16 sps:$4 sm:$0xff]   ;;  %v10937_v13 = vld [vmem:[%s15331_s1 + $0x1228] ss:$16 sps:$4 sm:$0xff]  }
 0x20c   :  { %6981 = vmatprep.subr.bf16.mxu0 %v10852_v14  ;;  %7829 = vmatprep.subr.bf16.mxu1 %v10855_v15  ;;  %v8766_v14 = vcombine.high %v63_v5, %v79_v6  ;;  %v10942_v15 = vld [vmem:[%s15331_s1 + $0x1244] ss:$16 sps:$4 sm:$0xff]  }
 0x20d   :  { %7007 = vmatprep.mubr.bf16.mxu0 %v8734_v16  ;;  %7855 = vmatprep.mubr.bf16.mxu1 %v8734_v16  ;;  %v10945_v16 = vld [vmem:[%s15331_s1 + $0x124c] ss:$16 sps:$4 sm:$0xff]  }
 0x20f   :  { %6982 = vmatpush1.bf16.msra.mxu0 %v10850_v17  ;;  %7830 = vmatpush1.bf16.msra.mxu1 %v10853_v18  ;;  %v13581_v17 = vld [vmem:[%s15332_s0 + $0x48] sm:$0xff] }
 0x210   :  { %6983 = vmatprep.subr.bf16.mxu0 %v10858_v19  ;;  %7831 = vmatprep.subr.bf16.mxu1 %v10861_v20  ;;  %v13586_v18 = vld [vmem:[%s15332_s0 + $0xc8] sm:$0xff]  ;;  %v8765_v19 = vcombine.low %v63_v5, %v79_v6  ;;  %v10940_v20 = vld [vmem:[%s15331_s1 + $0x1240] ss:$16 sps:$4 sm:$0xff]  }
 0x211   :  { %v11012_v5 = vld [vmem:[%s15331_s1 + $0x13c0] ss:$16 sps:$4 sm:$0xff]   ;;  %v11015_v6 = vld [vmem:[%s15331_s1 + $0x13c8] ss:$16 sps:$4 sm:$0xff]  }
 0x213   :  { %6984 = vmatpush1.bf16.msra.mxu0 %v10856_v21  ;;  %7832 = vmatpush1.bf16.msra.mxu1 %v10859_v22  ;;  %v10943_v21 = vld [vmem:[%s15331_s1 + $0x1248] ss:$16 sps:$4 sm:$0xff]   ;;  %v10948_v22 = vld [vmem:[%s15331_s1 + $0x1264] ss:$16 sps:$4 sm:$0xff]  }
 0x214   :  { %6985 = vmatprep.subr.bf16.mxu0 %v10864_v23  ;;  %7833 = vmatprep.subr.bf16.mxu1 %v10867_v24  ;;  %v10951_v23 = vld [vmem:[%s15331_s1 + $0x126c] ss:$16 sps:$4 sm:$0xff]   ;;  %v8736_v24 = vcombine.high %v13581_v17, %v13586_v18 }
 0x217   :  { %6986 = vmatpush1.bf16.msra.mxu0 %v10862_v26  ;;  %7834 = vmatpush1.bf16.msra.mxu1 %v10865_v25  ;;  %v10946_v26 = vld [vmem:[%s15331_s1 + $0x1260] ss:$16 sps:$4 sm:$0xff]   ;;  %v10949_v25 = vld [vmem:[%s15331_s1 + $0x1268] ss:$16 sps:$4 sm:$0xff]  }
 0x218   :  { %6987 = vmatprep.subr.bf16.mxu0 %v10870_v27  ;;  %7835 = vmatprep.subr.bf16.mxu1 %v10873_v28  ;;  %v10954_v27 = vld [vmem:[%s15331_s1 + $0x1284] ss:$16 sps:$4 sm:$0xff]   ;;  %v10957_v28 = vld [vmem:[%s15331_s1 + $0x128c] ss:$16 sps:$4 sm:$0xff]  }
 0x21b   :  { %6988 = vmatpush1.bf16.msra.mxu0 %v10868_v29  ;;  %7836 = vmatpush1.bf16.msra.mxu1 %v10871_v30  ;;  %v10952_v29 = vld [vmem:[%s15331_s1 + $0x1280] ss:$16 sps:$4 sm:$0xff]   ;;  %v10955_v30 = vld [vmem:[%s15331_s1 + $0x1288] ss:$16 sps:$4 sm:$0xff]  }
 0x21c   :  { %6989 = vmatprep.subr.bf16.mxu0 %v10876_v31  ;;  %7837 = vmatprep.subr.bf16.mxu1 %v10879_v32  ;;  %v10960_v31 = vld [vmem:[%s15331_s1 + $0x12a4] ss:$16 sps:$4 sm:$0xff]   ;;  %v10963_v32 = vld [vmem:[%s15331_s1 + $0x12ac] ss:$16 sps:$4 sm:$0xff]  }
 0x21f   :  { %6990 = vmatpush1.bf16.msra.mxu0 %v10874_v34  ;;  %7838 = vmatpush1.bf16.msra.mxu1 %v10877_v36  ;;  %v10958_v34 = vld [vmem:[%s15331_s1 + $0x12a0] ss:$16 sps:$4 sm:$0xff]   ;;  %v10961_v36 = vld [vmem:[%s15331_s1 + $0x12a8] ss:$16 sps:$4 sm:$0xff]  }
 0x220   :  { %6991 = vmatprep.subr.bf16.mxu0 %v10882_v33  ;;  %7839 = vmatprep.subr.bf16.mxu1 %v10885_v35  ;;  %v10966_v33 = vld [vmem:[%s15331_s1 + $0x12c4] ss:$16 sps:$4 sm:$0xff]   ;;  %v10969_v35 = vld [vmem:[%s15331_s1 + $0x12cc] ss:$16 sps:$4 sm:$0xff]  }
 0x223   :  { %6992 = vmatpush1.bf16.msra.mxu0 %v10880_v37  ;;  %7840 = vmatpush1.bf16.msra.mxu1 %v10883_v38  ;;  %v10964_v37 = vld [vmem:[%s15331_s1 + $0x12c0] ss:$16 sps:$4 sm:$0xff]   ;;  %v10967_v38 = vld [vmem:[%s15331_s1 + $0x12c8] ss:$16 sps:$4 sm:$0xff]  }
 0x224   :  { %6993 = vmatprep.subr.bf16.mxu0 %v10888_v39  ;;  %7841 = vmatprep.subr.bf16.mxu1 %v10891_v40  ;;  %v10972_v39 = vld [vmem:[%s15331_s1 + $0x12e4] ss:$16 sps:$4 sm:$0xff]   ;;  %v10975_v40 = vld [vmem:[%s15331_s1 + $0x12ec] ss:$16 sps:$4 sm:$0xff]  }
 0x227   :  { %6994 = vmatpush1.bf16.msra.mxu0 %v10886_v42  ;;  %7842 = vmatpush1.bf16.msra.mxu1 %v10889_v44  ;;  %v10970_v42 = vld [vmem:[%s15331_s1 + $0x12e0] ss:$16 sps:$4 sm:$0xff]   ;;  %v10973_v44 = vld [vmem:[%s15331_s1 + $0x12e8] ss:$16 sps:$4 sm:$0xff]  }
 0x228   :  { %6995 = vmatprep.subr.bf16.mxu0 %v10894_v41  ;;  %7843 = vmatprep.subr.bf16.mxu1 %v10897_v43  ;;  %v10978_v41 = vld [vmem:[%s15331_s1 + $0x1304] ss:$16 sps:$4 sm:$0xff]   ;;  %v10981_v43 = vld [vmem:[%s15331_s1 + $0x130c] ss:$16 sps:$4 sm:$0xff]  }
 0x22b   :  { %6996 = vmatpush1.bf16.msra.mxu0 %v10892_v45  ;;  %7844 = vmatpush1.bf16.msra.mxu1 %v10895_v46  ;;  %v10976_v45 = vld [vmem:[%s15331_s1 + $0x1300] ss:$16 sps:$4 sm:$0xff]   ;;  %v10979_v46 = vld [vmem:[%s15331_s1 + $0x1308] ss:$16 sps:$4 sm:$0xff]  }
 0x22c   :  { %6997 = vmatprep.subr.bf16.mxu0 %v10900_v47  ;;  %7845 = vmatprep.subr.bf16.mxu1 %v10903_v48  ;;  %v10984_v47 = vld [vmem:[%s15331_s1 + $0x1324] ss:$16 sps:$4 sm:$0xff]   ;;  %v10987_v48 = vld [vmem:[%s15331_s1 + $0x132c] ss:$16 sps:$4 sm:$0xff]  }
 0x22f   :  { %6998 = vmatpush1.bf16.msra.mxu0 %v10898_v51  ;;  %7846 = vmatpush1.bf16.msra.mxu1 %v10901_v52  ;;  %v10982_v51 = vld [vmem:[%s15331_s1 + $0x1320] ss:$16 sps:$4 sm:$0xff]   ;;  %v10985_v52 = vld [vmem:[%s15331_s1 + $0x1328] ss:$16 sps:$4 sm:$0xff]  }
 0x230   :  { %6999 = vmatprep.subr.bf16.mxu0 %v10906_v49  ;;  %7847 = vmatprep.subr.bf16.mxu1 %v10909_v50  ;;  %v10990_v49 = vld [vmem:[%s15331_s1 + $0x1344] ss:$16 sps:$4 sm:$0xff]   ;;  %v10993_v50 = vld [vmem:[%s15331_s1 + $0x134c] ss:$16 sps:$4 sm:$0xff]  }
 0x233   :  { %7000 = vmatpush1.bf16.msra.mxu0 %v10904_v53  ;;  %7848 = vmatpush1.bf16.msra.mxu1 %v10907_v54  ;;  %v10988_v53 = vld [vmem:[%s15331_s1 + $0x1340] ss:$16 sps:$4 sm:$0xff]   ;;  %v10991_v54 = vld [vmem:[%s15331_s1 + $0x1348] ss:$16 sps:$4 sm:$0xff]  }
 0x234   :  { %7001 = vmatprep.subr.bf16.mxu0 %v10912_v55  ;;  %7849 = vmatprep.subr.bf16.mxu1 %v10915_v56  ;;  %v10996_v55 = vld [vmem:[%s15331_s1 + $0x1364] ss:$16 sps:$4 sm:$0xff]   ;;  %v10999_v56 = vld [vmem:[%s15331_s1 + $0x136c] ss:$16 sps:$4 sm:$0xff]  }
 0x237   :  { %7002 = vmatpush1.bf16.msra.mxu0 %v10910_v59  ;;  %7850 = vmatpush1.bf16.msra.mxu1 %v10913_v60  ;;  %v10994_v59 = vld [vmem:[%s15331_s1 + $0x1360] ss:$16 sps:$4 sm:$0xff]   ;;  %v10997_v60 = vld [vmem:[%s15331_s1 + $0x1368] ss:$16 sps:$4 sm:$0xff]  }
 0x238   :  { %7003 = vmatprep.subr.bf16.mxu0 %v10918_v57  ;;  %7851 = vmatprep.subr.bf16.mxu1 %v10921_v58  ;;  %v11002_v57 = vld [vmem:[%s15331_s1 + $0x1384] ss:$16 sps:$4 sm:$0xff]   ;;  %v11005_v58 = vld [vmem:[%s15331_s1 + $0x138c] ss:$16 sps:$4 sm:$0xff]  }
 0x23b   :  { %7004 = vmatpush1.bf16.msra.mxu0 %v10916_v61  ;;  %7852 = vmatpush1.bf16.msra.mxu1 %v10919_v62  ;;  %v11000_v61 = vld [vmem:[%s15331_s1 + $0x1380] ss:$16 sps:$4 sm:$0xff]   ;;  %v11003_v62 = vld [vmem:[%s15331_s1 + $0x1388] ss:$16 sps:$4 sm:$0xff]  }
 0x23c   :  { %7005 = vmatprep.subr.bf16.mxu0 %v10924_v63  ;;  %7853 = vmatprep.subr.bf16.mxu1 %v10927_v0  ;;  %v11008_v63 = vld [vmem:[%s15331_s1 + $0x13a4] ss:$16 sps:$4 sm:$0xff]   ;;  %v11011_v0 = vld [vmem:[%s15331_s1 + $0x13ac] ss:$16 sps:$4 sm:$0xff]  }
 0x23f   :  { %7006 = vmatpush1.bf16.msra.mxu0 %v10922_v3  ;;  %7854 = vmatpush1.bf16.msra.mxu1 %v10925_v4  ;;  %v11006_v3 = vld [vmem:[%s15331_s1 + $0x13a0] ss:$16 sps:$4 sm:$0xff]   ;;  %v11009_v4 = vld [vmem:[%s15331_s1 + $0x13a8] ss:$16 sps:$4 sm:$0xff]  }
 0x240   :  { %7028 = vmatprep.subr.bf16.mxu0 %v10930_v1  ;;  %7876 = vmatprep.subr.bf16.mxu1 %v10933_v2  ;;  %v11014_v1 = vld [vmem:[%s15331_s1 + $0x13c4] ss:$16 sps:$4 sm:$0xff]   ;;  %v11017_v2 = vld [vmem:[%s15331_s1 + $0x13cc] ss:$16 sps:$4 sm:$0xff]  }
 0x242   :  { %7008 = vmatmul.mubr.bf16.vlgmr.msra.gmra.mrb[0].mxu0 %v8733_v7  ;;  %7856 = vmatmul.mubr.bf16.vlgmr.msra.gmra.mrb[0].mxu1 %v8733_v7  ;;  %v11020_v7 = vld [vmem:[%s15331_s1 + $0x13e4] ss:$16 sps:$4 sm:$0xff]  }
 0x243   :  { %7029 = vmatpush1.bf16.msra.mxu0 %v10928_v8  ;;  %7877 = vmatpush1.bf16.msra.mxu1 %v10931_v11  ;;  %v11023_v8 = vld [vmem:[%s15331_s1 + $0x13ec] ss:$16 sps:$4 sm:$0xff]   ;;  %v11018_v11 = vld [vmem:[%s15331_s1 + $0x13e0] ss:$16 sps:$4 sm:$0xff]  }
 0x244   :  { %7030 = vmatprep.subr.bf16.mxu0 %v10936_v12  ;;  %7878 = vmatprep.subr.bf16.mxu1 %v10939_v9  ;;  %v11021_v12 = vld [vmem:[%s15331_s1 + $0x13e8] ss:$16 sps:$4 sm:$0xff]   ;;  %v11026_v9 = vld [vmem:[%s15331_s1 + $0x1404] ss:$16 sps:$4 sm:$0xff]  }
 0x245   :  { %7017 = vmatprep.mubr.bf16.mxu0 %v8766_v14  ;;  %7865 = vmatprep.mubr.bf16.mxu1 %v8766_v14  ;;  %v64_v14 = vld [vmem:[%s15332_s0 + $0x148] sm:$0xff] }
 0x247   :  { %7031 = vmatpush1.bf16.msra.mxu0 %v10934_v10  ;;  %7879 = vmatpush1.bf16.msra.mxu1 %v10937_v13  ;;  %v11029_v10 = vld [vmem:[%s15331_s1 + $0x140c] ss:$16 sps:$4 sm:$0xff]   ;;  %v8735_v13 = vcombine.low %v13581_v17, %v13586_v18  ;;  %v11032_v17 = vld [vmem:[%s15331_s1 + $0x1424] ss:$16 sps:$4 sm:$0xff]  }
 0x248   :  { %7032 = vmatprep.subr.bf16.mxu0 %v10942_v15  ;;  %7880 = vmatprep.subr.bf16.mxu1 %v10945_v16  ;;  %v80_v15 = vld [vmem:[%s15332_s0 + $0x1c8] sm:$0xff]  ;;  %v11024_v16 = vld [vmem:[%s15331_s1 + $0x1400] ss:$16 sps:$4 sm:$0xff]  }
 0x249   :  { %v11035_v18 = vld [vmem:[%s15331_s1 + $0x142c] ss:$16 sps:$4 sm:$0xff]  }
 0x24a   :  { %7018 = vmatmul.mubr.bf16.gmra.mrb[4].mxu0 %v8765_v19  ;;  %7866 = vmatmul.mubr.bf16.gmra.mrb[4].mxu1 %v8765_v19  ;;  %v11027_v19 = vld [vmem:[%s15331_s1 + $0x1408] ss:$16 sps:$4 sm:$0xff]  }
 0x24b   :  { %7033 = vmatpush1.bf16.msra.mxu0 %v10940_v20  ;;  %7881 = vmatpush1.bf16.msra.mxu1 %v10943_v21  ;;  %v8768_v20 = vcombine.high %v64_v14, %v80_v15  ;;  %v11030_v21 = vld [vmem:[%s15331_s1 + $0x1420] ss:$16 sps:$4 sm:$0xff]  }
 0x24c   :  { %7034 = vmatprep.subr.bf16.mxu0 %v10948_v22  ;;  %7882 = vmatprep.subr.bf16.mxu1 %v10951_v23  ;;  %v11033_v22 = vld [vmem:[%s15331_s1 + $0x1428] ss:$16 sps:$4 sm:$0xff]   ;;  %v11038_v23 = vld [vmem:[%s15331_s1 + $0x1444] ss:$16 sps:$4 sm:$0xff]  }
 0x24d   :  { %7060 = vmatprep.mubr.bf16.mxu0 %v8736_v24  ;;  %7908 = vmatprep.mubr.bf16.mxu1 %v8736_v24  ;;  %v11041_v24 = vld [vmem:[%s15331_s1 + $0x144c] ss:$16 sps:$4 sm:$0xff]  }
 0x24f   :  { %7035 = vmatpush1.bf16.msra.mxu0 %v10946_v26  ;;  %7883 = vmatpush1.bf16.msra.mxu1 %v10949_v25  ;;  %v8767_v26 = vcombine.low %v64_v14, %v80_v15  ;;  %v13793_v25 = vld [vmem:[%s15332_s0 + $0x50] sm:$0xff]  ;;  %v11111_v14 = vld [vmem:[%s15331_s1 + $0x15c8] ss:$16 sps:$4 sm:$0xff]  }
 0x250   :  { %7036 = vmatprep.subr.bf16.mxu0 %v10954_v27  ;;  %7884 = vmatprep.subr.bf16.mxu1 %v10957_v28  ;;  %v13798_v27 = vld [vmem:[%s15332_s0 + $0xd0] sm:$0xff] }
 0x251   :  { %v11036_v28 = vld [vmem:[%s15331_s1 + $0x1440] ss:$16 sps:$4 sm:$0xff]   ;;  %v11116_v15 = vld [vmem:[%s15331_s1 + $0x15e4] ss:$16 sps:$4 sm:$0xff]  }
 0x253   :  { %7037 = vmatpush1.bf16.msra.mxu0 %v10952_v29  ;;  %7885 = vmatpush1.bf16.msra.mxu1 %v10955_v30  ;;  %v11039_v29 = vld [vmem:[%s15331_s1 + $0x1448] ss:$16 sps:$4 sm:$0xff]   ;;  %v11044_v30 = vld [vmem:[%s15331_s1 + $0x1464] ss:$16 sps:$4 sm:$0xff]  }
 0x254   :  { %7038 = vmatprep.subr.bf16.mxu0 %v10960_v31  ;;  %7886 = vmatprep.subr.bf16.mxu1 %v10963_v32  ;;  %v11047_v31 = vld [vmem:[%s15331_s1 + $0x146c] ss:$16 sps:$4 sm:$0xff]   ;;  %v8738_v32 = vcombine.high %v13793_v25, %v13798_v27 }
 0x257   :  { %7039 = vmatpush1.bf16.msra.mxu0 %v10958_v34  ;;  %7887 = vmatpush1.bf16.msra.mxu1 %v10961_v36  ;;  %v11042_v34 = vld [vmem:[%s15331_s1 + $0x1460] ss:$16 sps:$4 sm:$0xff]   ;;  %v11045_v36 = vld [vmem:[%s15331_s1 + $0x1468] ss:$16 sps:$4 sm:$0xff]  }
 0x258   :  { %7040 = vmatprep.subr.bf16.mxu0 %v10966_v33  ;;  %7888 = vmatprep.subr.bf16.mxu1 %v10969_v35  ;;  %v11050_v33 = vld [vmem:[%s15331_s1 + $0x1484] ss:$16 sps:$4 sm:$0xff]   ;;  %v11053_v35 = vld [vmem:[%s15331_s1 + $0x148c] ss:$16 sps:$4 sm:$0xff]  }
 0x25b   :  { %7041 = vmatpush1.bf16.msra.mxu0 %v10964_v37  ;;  %7889 = vmatpush1.bf16.msra.mxu1 %v10967_v38  ;;  %v11048_v37 = vld [vmem:[%s15331_s1 + $0x1480] ss:$16 sps:$4 sm:$0xff]   ;;  %v11051_v38 = vld [vmem:[%s15331_s1 + $0x1488] ss:$16 sps:$4 sm:$0xff]  }
 0x25c   :  { %7042 = vmatprep.subr.bf16.mxu0 %v10972_v39  ;;  %7890 = vmatprep.subr.bf16.mxu1 %v10975_v40  ;;  %v11056_v39 = vld [vmem:[%s15331_s1 + $0x14a4] ss:$16 sps:$4 sm:$0xff]   ;;  %v11059_v40 = vld [vmem:[%s15331_s1 + $0x14ac] ss:$16 sps:$4 sm:$0xff]  }
 0x25f   :  { %7043 = vmatpush1.bf16.msra.mxu0 %v10970_v42  ;;  %7891 = vmatpush1.bf16.msra.mxu1 %v10973_v44  ;;  %v11054_v42 = vld [vmem:[%s15331_s1 + $0x14a0] ss:$16 sps:$4 sm:$0xff]   ;;  %v11057_v44 = vld [vmem:[%s15331_s1 + $0x14a8] ss:$16 sps:$4 sm:$0xff]  }
 0x260   :  { %7044 = vmatprep.subr.bf16.mxu0 %v10978_v41  ;;  %7892 = vmatprep.subr.bf16.mxu1 %v10981_v43  ;;  %v11062_v41 = vld [vmem:[%s15331_s1 + $0x14c4] ss:$16 sps:$4 sm:$0xff]   ;;  %v11065_v43 = vld [vmem:[%s15331_s1 + $0x14cc] ss:$16 sps:$4 sm:$0xff]  }
 0x263   :  { %7045 = vmatpush1.bf16.msra.mxu0 %v10976_v45  ;;  %7893 = vmatpush1.bf16.msra.mxu1 %v10979_v46  ;;  %v11060_v45 = vld [vmem:[%s15331_s1 + $0x14c0] ss:$16 sps:$4 sm:$0xff]   ;;  %v11063_v46 = vld [vmem:[%s15331_s1 + $0x14c8] ss:$16 sps:$4 sm:$0xff]  }
 0x264   :  { %7046 = vmatprep.subr.bf16.mxu0 %v10984_v47  ;;  %7894 = vmatprep.subr.bf16.mxu1 %v10987_v48  ;;  %v11068_v47 = vld [vmem:[%s15331_s1 + $0x14e4] ss:$16 sps:$4 sm:$0xff]   ;;  %v11071_v48 = vld [vmem:[%s15331_s1 + $0x14ec] ss:$16 sps:$4 sm:$0xff]  }
 0x267   :  { %7047 = vmatpush1.bf16.msra.mxu0 %v10982_v51  ;;  %7895 = vmatpush1.bf16.msra.mxu1 %v10985_v52  ;;  %v11066_v51 = vld [vmem:[%s15331_s1 + $0x14e0] ss:$16 sps:$4 sm:$0xff]   ;;  %v11069_v52 = vld [vmem:[%s15331_s1 + $0x14e8] ss:$16 sps:$4 sm:$0xff]  }
 0x268   :  { %7048 = vmatprep.subr.bf16.mxu0 %v10990_v49  ;;  %7896 = vmatprep.subr.bf16.mxu1 %v10993_v50  ;;  %v11074_v49 = vld [vmem:[%s15331_s1 + $0x1504] ss:$16 sps:$4 sm:$0xff]   ;;  %v11077_v50 = vld [vmem:[%s15331_s1 + $0x150c] ss:$16 sps:$4 sm:$0xff]  }
 0x26b   :  { %7049 = vmatpush1.bf16.msra.mxu0 %v10988_v53  ;;  %7897 = vmatpush1.bf16.msra.mxu1 %v10991_v54  ;;  %v11072_v53 = vld [vmem:[%s15331_s1 + $0x1500] ss:$16 sps:$4 sm:$0xff]   ;;  %v11075_v54 = vld [vmem:[%s15331_s1 + $0x1508] ss:$16 sps:$4 sm:$0xff]  }
 0x26c   :  { %7050 = vmatprep.subr.bf16.mxu0 %v10996_v55  ;;  %7898 = vmatprep.subr.bf16.mxu1 %v10999_v56  ;;  %v11080_v55 = vld [vmem:[%s15331_s1 + $0x1524] ss:$16 sps:$4 sm:$0xff]   ;;  %v11083_v56 = vld [vmem:[%s15331_s1 + $0x152c] ss:$16 sps:$4 sm:$0xff]  }
 0x26f   :  { %7051 = vmatpush1.bf16.msra.mxu0 %v10994_v59  ;;  %7899 = vmatpush1.bf16.msra.mxu1 %v10997_v60  ;;  %v11078_v59 = vld [vmem:[%s15331_s1 + $0x1520] ss:$16 sps:$4 sm:$0xff]   ;;  %v11081_v60 = vld [vmem:[%s15331_s1 + $0x1528] ss:$16 sps:$4 sm:$0xff]  }
 0x270   :  { %7052 = vmatprep.subr.bf16.mxu0 %v11002_v57  ;;  %7900 = vmatprep.subr.bf16.mxu1 %v11005_v58  ;;  %v11086_v57 = vld [vmem:[%s15331_s1 + $0x1544] ss:$16 sps:$4 sm:$0xff]   ;;  %v11089_v58 = vld [vmem:[%s15331_s1 + $0x154c] ss:$16 sps:$4 sm:$0xff]  }
 0x273   :  { %7053 = vmatpush1.bf16.msra.mxu0 %v11000_v61  ;;  %7901 = vmatpush1.bf16.msra.mxu1 %v11003_v62  ;;  %v11084_v61 = vld [vmem:[%s15331_s1 + $0x1540] ss:$16 sps:$4 sm:$0xff]   ;;  %v11087_v62 = vld [vmem:[%s15331_s1 + $0x1548] ss:$16 sps:$4 sm:$0xff]  }
 0x274   :  { %7054 = vmatprep.subr.bf16.mxu0 %v11008_v63  ;;  %7902 = vmatprep.subr.bf16.mxu1 %v11011_v0  ;;  %v11092_v63 = vld [vmem:[%s15331_s1 + $0x1564] ss:$16 sps:$4 sm:$0xff]   ;;  %v11095_v0 = vld [vmem:[%s15331_s1 + $0x156c] ss:$16 sps:$4 sm:$0xff]  }
 0x277   :  { %7055 = vmatpush1.bf16.msra.mxu0 %v11006_v3  ;;  %7903 = vmatpush1.bf16.msra.mxu1 %v11009_v4  ;;  %v11090_v3 = vld [vmem:[%s15331_s1 + $0x1560] ss:$16 sps:$4 sm:$0xff]   ;;  %v11093_v4 = vld [vmem:[%s15331_s1 + $0x1568] ss:$16 sps:$4 sm:$0xff]  }
 0x278   :  { %7056 = vmatprep.subr.bf16.mxu0 %v11014_v1  ;;  %7904 = vmatprep.subr.bf16.mxu1 %v11017_v2  ;;  %v11098_v1 = vld [vmem:[%s15331_s1 + $0x1584] ss:$16 sps:$4 sm:$0xff]   ;;  %v11101_v2 = vld [vmem:[%s15331_s1 + $0x158c] ss:$16 sps:$4 sm:$0xff]  }
 0x27b   :  { %7057 = vmatpush1.bf16.msra.mxu0 %v11012_v5  ;;  %7905 = vmatpush1.bf16.msra.mxu1 %v11015_v6  ;;  %v11096_v5 = vld [vmem:[%s15331_s1 + $0x1580] ss:$16 sps:$4 sm:$0xff]   ;;  %v11099_v6 = vld [vmem:[%s15331_s1 + $0x1588] ss:$16 sps:$4 sm:$0xff]  }
 0x27c   :  { %7058 = vmatprep.subr.bf16.mxu0 %v11020_v7  ;;  %7906 = vmatprep.subr.bf16.mxu1 %v11023_v8  ;;  %v11104_v7 = vld [vmem:[%s15331_s1 + $0x15a4] ss:$16 sps:$4 sm:$0xff]   ;;  %v11107_v8 = vld [vmem:[%s15331_s1 + $0x15ac] ss:$16 sps:$4 sm:$0xff]  }
 0x27f   :  { %7059 = vmatpush1.bf16.msra.mxu0 %v11018_v11  ;;  %7907 = vmatpush1.bf16.msra.mxu1 %v11021_v12  ;;  %v11102_v11 = vld [vmem:[%s15331_s1 + $0x15a0] ss:$16 sps:$4 sm:$0xff]   ;;  %v11105_v12 = vld [vmem:[%s15331_s1 + $0x15a8] ss:$16 sps:$4 sm:$0xff]  }
 0x280   :  { %7081 = vmatprep.subr.bf16.mxu0 %v11026_v9  ;;  %7929 = vmatprep.subr.bf16.mxu1 %v11029_v10  ;;  %v11110_v9 = vld [vmem:[%s15331_s1 + $0x15c4] ss:$16 sps:$4 sm:$0xff]   ;;  %v11113_v10 = vld [vmem:[%s15331_s1 + $0x15cc] ss:$16 sps:$4 sm:$0xff]  }
 0x282   :  { %7061 = vmatmul.mubr.bf16.vlgmr.msra.gmra.mrb[0].mxu0 %v8735_v13  ;;  %7909 = vmatmul.mubr.bf16.vlgmr.msra.gmra.mrb[0].mxu1 %v8735_v13  ;;  %v11108_v13 = vld [vmem:[%s15331_s1 + $0x15c0] ss:$16 sps:$4 sm:$0xff]  }
 0x283   :  { %7082 = vmatpush1.bf16.msra.mxu0 %v11024_v16  ;;  %7930 = vmatpush1.bf16.msra.mxu1 %v11027_v19  ;;  %v11119_v16 = vld [vmem:[%s15331_s1 + $0x15ec] ss:$16 sps:$4 sm:$0xff]   ;;  %v11114_v19 = vld [vmem:[%s15331_s1 + $0x15e0] ss:$16 sps:$4 sm:$0xff]  }
 0x284   :  { %7083 = vmatprep.subr.bf16.mxu0 %v11032_v17  ;;  %7931 = vmatprep.subr.bf16.mxu1 %v11035_v18  ;;  %v11117_v17 = vld [vmem:[%s15331_s1 + $0x15e8] ss:$16 sps:$4 sm:$0xff]   ;;  %v11122_v18 = vld [vmem:[%s15331_s1 + $0x1604] ss:$16 sps:$4 sm:$0xff]  }
 0x285   :  { %7070 = vmatprep.mubr.bf16.mxu0 %v8768_v20  ;;  %7918 = vmatprep.mubr.bf16.mxu1 %v8768_v20  ;;  %v11125_v20 = vld [vmem:[%s15331_s1 + $0x160c] ss:$16 sps:$4 sm:$0xff]  }
 0x287   :  { %7084 = vmatpush1.bf16.msra.mxu0 %v11030_v21  ;;  %7932 = vmatpush1.bf16.msra.mxu1 %v11033_v22  ;;  %v8737_v21 = vcombine.low %v13793_v25, %v13798_v27  ;;  %v65_v22 = vld [vmem:[%s15332_s0 + $0x150] sm:$0xff]  ;;  %v11131_v27 = vld [vmem:[%s15331_s1 + $0x162c] ss:$16 sps:$4 sm:$0xff]  }
 0x288   :  { %7085 = vmatprep.subr.bf16.mxu0 %v11038_v23  ;;  %7933 = vmatprep.subr.bf16.mxu1 %v11041_v24  ;;  %v81_v23 = vld [vmem:[%s15332_s0 + $0x1d0] sm:$0xff] }
 0x289   :  { %v11120_v24 = vld [vmem:[%s15331_s1 + $0x1600] ss:$16 sps:$4 sm:$0xff]   ;;  %v11128_v25 = vld [vmem:[%s15331_s1 + $0x1624] ss:$16 sps:$4 sm:$0xff]  }
 0x28a   :  { %7071 = vmatmul.mubr.bf16.gmra.mrb[4].mxu0 %v8767_v26  ;;  %7919 = vmatmul.mubr.bf16.gmra.mrb[4].mxu1 %v8767_v26  ;;  %v11123_v26 = vld [vmem:[%s15331_s1 + $0x1608] ss:$16 sps:$4 sm:$0xff]  }
 0x28b   :  { %7086 = vmatpush1.bf16.msra.mxu0 %v11036_v28  ;;  %7934 = vmatpush1.bf16.msra.mxu1 %v11039_v29  ;;  %v8770_v28 = vcombine.high %v65_v22, %v81_v23  ;;  %v11126_v29 = vld [vmem:[%s15331_s1 + $0x1620] ss:$16 sps:$4 sm:$0xff]  }
 0x28c   :  { %7087 = vmatprep.subr.bf16.mxu0 %v11044_v30  ;;  %7935 = vmatprep.subr.bf16.mxu1 %v11047_v31  ;;  %v11129_v30 = vld [vmem:[%s15331_s1 + $0x1628] ss:$16 sps:$4 sm:$0xff]   ;;  %v11134_v31 = vld [vmem:[%s15331_s1 + $0x1644] ss:$16 sps:$4 sm:$0xff]  }
 0x28d   :  { %7113 = vmatprep.mubr.bf16.mxu0 %v8738_v32  ;;  %7961 = vmatprep.mubr.bf16.mxu1 %v8738_v32  ;;  %v11137_v32 = vld [vmem:[%s15331_s1 + $0x164c] ss:$16 sps:$4 sm:$0xff]  }
 0x28f   :  { %7088 = vmatpush1.bf16.msra.mxu0 %v11042_v34  ;;  %7936 = vmatpush1.bf16.msra.mxu1 %v11045_v36  ;;  %v8769_v34 = vcombine.low %v65_v22, %v81_v23  ;;  %v14005_v36 = vld [vmem:[%s15332_s0 + $0x58] sm:$0xff]  ;;  %v11212_v23 = vld [vmem:[%s15331_s1 + $0x17e4] ss:$16 sps:$4 sm:$0xff]  }
 0x290   :  { %7089 = vmatprep.subr.bf16.mxu0 %v11050_v33  ;;  %7937 = vmatprep.subr.bf16.mxu1 %v11053_v35  ;;  %v14010_v33 = vld [vmem:[%s15332_s0 + $0xd8] sm:$0xff]  ;;  %v11132_v35 = vld [vmem:[%s15331_s1 + $0x1640] ss:$16 sps:$4 sm:$0xff]  }
 0x291   :  { %v11207_v22 = vld [vmem:[%s15331_s1 + $0x17c8] ss:$16 sps:$4 sm:$0xff]  }
 0x293   :  { %7090 = vmatpush1.bf16.msra.mxu0 %v11048_v37  ;;  %7938 = vmatpush1.bf16.msra.mxu1 %v11051_v38  ;;  %v11135_v37 = vld [vmem:[%s15331_s1 + $0x1648] ss:$16 sps:$4 sm:$0xff]   ;;  %v11140_v38 = vld [vmem:[%s15331_s1 + $0x1664] ss:$16 sps:$4 sm:$0xff]  }
 0x294   :  { %7091 = vmatprep.subr.bf16.mxu0 %v11056_v39  ;;  %7939 = vmatprep.subr.bf16.mxu1 %v11059_v40  ;;  %v11143_v39 = vld [vmem:[%s15331_s1 + $0x166c] ss:$16 sps:$4 sm:$0xff]   ;;  %v8740_v40 = vcombine.high %v14005_v36, %v14010_v33 }
 0x297   :  { %7092 = vmatpush1.bf16.msra.mxu0 %v11054_v42  ;;  %7940 = vmatpush1.bf16.msra.mxu1 %v11057_v44  ;;  %v11138_v42 = vld [vmem:[%s15331_s1 + $0x1660] ss:$16 sps:$4 sm:$0xff]   ;;  %v11141_v44 = vld [vmem:[%s15331_s1 + $0x1668] ss:$16 sps:$4 sm:$0xff]  }
 0x298   :  { %7093 = vmatprep.subr.bf16.mxu0 %v11062_v41  ;;  %7941 = vmatprep.subr.bf16.mxu1 %v11065_v43  ;;  %v11146_v41 = vld [vmem:[%s15331_s1 + $0x1684] ss:$16 sps:$4 sm:$0xff]   ;;  %v11149_v43 = vld [vmem:[%s15331_s1 + $0x168c] ss:$16 sps:$4 sm:$0xff]  }
 0x29b   :  { %7094 = vmatpush1.bf16.msra.mxu0 %v11060_v45  ;;  %7942 = vmatpush1.bf16.msra.mxu1 %v11063_v46  ;;  %v11144_v45 = vld [vmem:[%s15331_s1 + $0x1680] ss:$16 sps:$4 sm:$0xff]   ;;  %v11147_v46 = vld [vmem:[%s15331_s1 + $0x1688] ss:$16 sps:$4 sm:$0xff]  }
 0x29c   :  { %7095 = vmatprep.subr.bf16.mxu0 %v11068_v47  ;;  %7943 = vmatprep.subr.bf16.mxu1 %v11071_v48  ;;  %v11152_v47 = vld [vmem:[%s15331_s1 + $0x16a4] ss:$16 sps:$4 sm:$0xff]   ;;  %v11155_v48 = vld [vmem:[%s15331_s1 + $0x16ac] ss:$16 sps:$4 sm:$0xff]  }
 0x29f   :  { %7096 = vmatpush1.bf16.msra.mxu0 %v11066_v51  ;;  %7944 = vmatpush1.bf16.msra.mxu1 %v11069_v52  ;;  %v11150_v51 = vld [vmem:[%s15331_s1 + $0x16a0] ss:$16 sps:$4 sm:$0xff]   ;;  %v11153_v52 = vld [vmem:[%s15331_s1 + $0x16a8] ss:$16 sps:$4 sm:$0xff]  }
 0x2a0   :  { %7097 = vmatprep.subr.bf16.mxu0 %v11074_v49  ;;  %7945 = vmatprep.subr.bf16.mxu1 %v11077_v50  ;;  %v11158_v49 = vld [vmem:[%s15331_s1 + $0x16c4] ss:$16 sps:$4 sm:$0xff]   ;;  %v11161_v50 = vld [vmem:[%s15331_s1 + $0x16cc] ss:$16 sps:$4 sm:$0xff]  }
 0x2a3   :  { %7098 = vmatpush1.bf16.msra.mxu0 %v11072_v53  ;;  %7946 = vmatpush1.bf16.msra.mxu1 %v11075_v54  ;;  %v11156_v53 = vld [vmem:[%s15331_s1 + $0x16c0] ss:$16 sps:$4 sm:$0xff]   ;;  %v11159_v54 = vld [vmem:[%s15331_s1 + $0x16c8] ss:$16 sps:$4 sm:$0xff]  }
 0x2a4   :  { %7099 = vmatprep.subr.bf16.mxu0 %v11080_v55  ;;  %7947 = vmatprep.subr.bf16.mxu1 %v11083_v56  ;;  %v11164_v55 = vld [vmem:[%s15331_s1 + $0x16e4] ss:$16 sps:$4 sm:$0xff]   ;;  %v11167_v56 = vld [vmem:[%s15331_s1 + $0x16ec] ss:$16 sps:$4 sm:$0xff]  }
 0x2a7   :  { %7100 = vmatpush1.bf16.msra.mxu0 %v11078_v59  ;;  %7948 = vmatpush1.bf16.msra.mxu1 %v11081_v60  ;;  %v11162_v59 = vld [vmem:[%s15331_s1 + $0x16e0] ss:$16 sps:$4 sm:$0xff]   ;;  %v11165_v60 = vld [vmem:[%s15331_s1 + $0x16e8] ss:$16 sps:$4 sm:$0xff]  }
 0x2a8   :  { %7101 = vmatprep.subr.bf16.mxu0 %v11086_v57  ;;  %7949 = vmatprep.subr.bf16.mxu1 %v11089_v58  ;;  %v11170_v57 = vld [vmem:[%s15331_s1 + $0x1704] ss:$16 sps:$4 sm:$0xff]   ;;  %v11173_v58 = vld [vmem:[%s15331_s1 + $0x170c] ss:$16 sps:$4 sm:$0xff]  }
 0x2ab   :  { %7102 = vmatpush1.bf16.msra.mxu0 %v11084_v61  ;;  %7950 = vmatpush1.bf16.msra.mxu1 %v11087_v62  ;;  %v11168_v61 = vld [vmem:[%s15331_s1 + $0x1700] ss:$16 sps:$4 sm:$0xff]   ;;  %v11171_v62 = vld [vmem:[%s15331_s1 + $0x1708] ss:$16 sps:$4 sm:$0xff]  }
 0x2ac   :  { %7103 = vmatprep.subr.bf16.mxu0 %v11092_v63  ;;  %7951 = vmatprep.subr.bf16.mxu1 %v11095_v0  ;;  %v11176_v63 = vld [vmem:[%s15331_s1 + $0x1724] ss:$16 sps:$4 sm:$0xff]   ;;  %v11179_v0 = vld [vmem:[%s15331_s1 + $0x172c] ss:$16 sps:$4 sm:$0xff]  }
 0x2af   :  { %7104 = vmatpush1.bf16.msra.mxu0 %v11090_v3  ;;  %7952 = vmatpush1.bf16.msra.mxu1 %v11093_v4  ;;  %v11174_v3 = vld [vmem:[%s15331_s1 + $0x1720] ss:$16 sps:$4 sm:$0xff]   ;;  %v11177_v4 = vld [vmem:[%s15331_s1 + $0x1728] ss:$16 sps:$4 sm:$0xff]  }
 0x2b0   :  { %7105 = vmatprep.subr.bf16.mxu0 %v11098_v1  ;;  %7953 = vmatprep.subr.bf16.mxu1 %v11101_v2  ;;  %v11182_v1 = vld [vmem:[%s15331_s1 + $0x1744] ss:$16 sps:$4 sm:$0xff]   ;;  %v11185_v2 = vld [vmem:[%s15331_s1 + $0x174c] ss:$16 sps:$4 sm:$0xff]  }
 0x2b3   :  { %7106 = vmatpush1.bf16.msra.mxu0 %v11096_v5  ;;  %7954 = vmatpush1.bf16.msra.mxu1 %v11099_v6  ;;  %v11180_v5 = vld [vmem:[%s15331_s1 + $0x1740] ss:$16 sps:$4 sm:$0xff]   ;;  %v11183_v6 = vld [vmem:[%s15331_s1 + $0x1748] ss:$16 sps:$4 sm:$0xff]  }
 0x2b4   :  { %7107 = vmatprep.subr.bf16.mxu0 %v11104_v7  ;;  %7955 = vmatprep.subr.bf16.mxu1 %v11107_v8  ;;  %v11188_v7 = vld [vmem:[%s15331_s1 + $0x1764] ss:$16 sps:$4 sm:$0xff]   ;;  %v11191_v8 = vld [vmem:[%s15331_s1 + $0x176c] ss:$16 sps:$4 sm:$0xff]  }
 0x2b7   :  { %7108 = vmatpush1.bf16.msra.mxu0 %v11102_v11  ;;  %7956 = vmatpush1.bf16.msra.mxu1 %v11105_v12  ;;  %v11186_v11 = vld [vmem:[%s15331_s1 + $0x1760] ss:$16 sps:$4 sm:$0xff]   ;;  %v11189_v12 = vld [vmem:[%s15331_s1 + $0x1768] ss:$16 sps:$4 sm:$0xff]  }
 0x2b8   :  { %7109 = vmatprep.subr.bf16.mxu0 %v11110_v9  ;;  %7957 = vmatprep.subr.bf16.mxu1 %v11113_v10  ;;  %v11194_v9 = vld [vmem:[%s15331_s1 + $0x1784] ss:$16 sps:$4 sm:$0xff]   ;;  %v11197_v10 = vld [vmem:[%s15331_s1 + $0x178c] ss:$16 sps:$4 sm:$0xff]  }
 0x2bb   :  { %7110 = vmatpush1.bf16.msra.mxu0 %v11108_v13  ;;  %7958 = vmatpush1.bf16.msra.mxu1 %v11111_v14  ;;  %v11192_v13 = vld [vmem:[%s15331_s1 + $0x1780] ss:$16 sps:$4 sm:$0xff]   ;;  %v11195_v14 = vld [vmem:[%s15331_s1 + $0x1788] ss:$16 sps:$4 sm:$0xff]  }
 0x2bc   :  { %7111 = vmatprep.subr.bf16.mxu0 %v11116_v15  ;;  %7959 = vmatprep.subr.bf16.mxu1 %v11119_v16  ;;  %v11200_v15 = vld [vmem:[%s15331_s1 + $0x17a4] ss:$16 sps:$4 sm:$0xff]   ;;  %v11203_v16 = vld [vmem:[%s15331_s1 + $0x17ac] ss:$16 sps:$4 sm:$0xff]  }
 0x2bf   :  { %7112 = vmatpush1.bf16.msra.mxu0 %v11114_v19  ;;  %7960 = vmatpush1.bf16.msra.mxu1 %v11117_v17  ;;  %v11198_v19 = vld [vmem:[%s15331_s1 + $0x17a0] ss:$16 sps:$4 sm:$0xff]   ;;  %v11201_v17 = vld [vmem:[%s15331_s1 + $0x17a8] ss:$16 sps:$4 sm:$0xff]  }
 0x2c0   :  { %7134 = vmatprep.subr.bf16.mxu0 %v11122_v18  ;;  %7982 = vmatprep.subr.bf16.mxu1 %v11125_v20  ;;  %v11206_v18 = vld [vmem:[%s15331_s1 + $0x17c4] ss:$16 sps:$4 sm:$0xff]   ;;  %v11209_v20 = vld [vmem:[%s15331_s1 + $0x17cc] ss:$16 sps:$4 sm:$0xff]  }
 0x2c2   :  { %7114 = vmatmul.mubr.bf16.vlgmr.msra.gmra.mrb[0].mxu0 %v8737_v21  ;;  %7962 = vmatmul.mubr.bf16.vlgmr.msra.gmra.mrb[0].mxu1 %v8737_v21  ;;  %v11204_v21 = vld [vmem:[%s15331_s1 + $0x17c0] ss:$16 sps:$4 sm:$0xff]  }
 0x2c3   :  { %7135 = vmatpush1.bf16.msra.mxu0 %v11120_v24  ;;  %7983 = vmatpush1.bf16.msra.mxu1 %v11123_v26  ;;  %v11215_v24 = vld [vmem:[%s15331_s1 + $0x17ec] ss:$16 sps:$4 sm:$0xff]   ;;  %v11210_v26 = vld [vmem:[%s15331_s1 + $0x17e0] ss:$16 sps:$4 sm:$0xff]  }
 0x2c4   :  { %7136 = vmatprep.subr.bf16.mxu0 %v11128_v25  ;;  %7984 = vmatprep.subr.bf16.mxu1 %v11131_v27  ;;  %v11213_v25 = vld [vmem:[%s15331_s1 + $0x17e8] ss:$16 sps:$4 sm:$0xff]   ;;  %v11218_v27 = vld [vmem:[%s15331_s1 + $0x1804] ss:$16 sps:$4 sm:$0xff]  }
 0x2c5   :  { %7123 = vmatprep.mubr.bf16.mxu0 %v8770_v28  ;;  %7971 = vmatprep.mubr.bf16.mxu1 %v8770_v28  ;;  %v11221_v28 = vld [vmem:[%s15331_s1 + $0x180c] ss:$16 sps:$4 sm:$0xff]  }
 0x2c7   :  { %7137 = vmatpush1.bf16.msra.mxu0 %v11126_v29  ;;  %7985 = vmatpush1.bf16.msra.mxu1 %v11129_v30  ;;  %v8739_v29 = vcombine.low %v14005_v36, %v14010_v33  ;;  %v66_v30 = vld [vmem:[%s15332_s0 + $0x158] sm:$0xff]  ;;  %v11224_v36 = vld [vmem:[%s15331_s1 + $0x1824] ss:$16 sps:$4 sm:$0xff]  }
 0x2c8   :  { %7138 = vmatprep.subr.bf16.mxu0 %v11134_v31  ;;  %7986 = vmatprep.subr.bf16.mxu1 %v11137_v32  ;;  %v82_v31 = vld [vmem:[%s15332_s0 + $0x1d8] sm:$0xff]  ;;  %v11216_v32 = vld [vmem:[%s15331_s1 + $0x1800] ss:$16 sps:$4 sm:$0xff]  }
 0x2c9   :  { %v11227_v33 = vld [vmem:[%s15331_s1 + $0x182c] ss:$16 sps:$4 sm:$0xff]  }
 0x2ca   :  { %7124 = vmatmul.mubr.bf16.gmra.mrb[4].mxu0 %v8769_v34  ;;  %7972 = vmatmul.mubr.bf16.gmra.mrb[4].mxu1 %v8769_v34  ;;  %v11219_v34 = vld [vmem:[%s15331_s1 + $0x1808] ss:$16 sps:$4 sm:$0xff]  }
 0x2cb   :  { %7139 = vmatpush1.bf16.msra.mxu0 %v11132_v35  ;;  %7987 = vmatpush1.bf16.msra.mxu1 %v11135_v37  ;;  %v8772_v35 = vcombine.high %v66_v30, %v82_v31  ;;  %v11222_v37 = vld [vmem:[%s15331_s1 + $0x1820] ss:$16 sps:$4 sm:$0xff]  }
 0x2cc   :  { %7140 = vmatprep.subr.bf16.mxu0 %v11140_v38  ;;  %7988 = vmatprep.subr.bf16.mxu1 %v11143_v39  ;;  %v11225_v38 = vld [vmem:[%s15331_s1 + $0x1828] ss:$16 sps:$4 sm:$0xff]   ;;  %v11230_v39 = vld [vmem:[%s15331_s1 + $0x1844] ss:$16 sps:$4 sm:$0xff]  }
 0x2cd   :  { %7166 = vmatprep.mubr.bf16.mxu0 %v8740_v40  ;;  %8014 = vmatprep.mubr.bf16.mxu1 %v8740_v40  ;;  %v11233_v40 = vld [vmem:[%s15331_s1 + $0x184c] ss:$16 sps:$4 sm:$0xff]  }
 0x2cf   :  { %7141 = vmatpush1.bf16.msra.mxu0 %v11138_v42  ;;  %7989 = vmatpush1.bf16.msra.mxu1 %v11141_v44  ;;  %v8771_v42 = vcombine.low %v66_v30, %v82_v31  ;;  %v14217_v44 = vld [vmem:[%s15332_s0 + $0x60] sm:$0xff]  ;;  %v11303_v30 = vld [vmem:[%s15331_s1 + $0x19c8] ss:$16 sps:$4 sm:$0xff]  }
 0x2d0   :  { %7142 = vmatprep.subr.bf16.mxu0 %v11146_v41  ;;  %7990 = vmatprep.subr.bf16.mxu1 %v11149_v43  ;;  %v14222_v41 = vld [vmem:[%s15332_s0 + $0xe0] sm:$0xff] }
 0x2d1   :  { %v11228_v43 = vld [vmem:[%s15331_s1 + $0x1840] ss:$16 sps:$4 sm:$0xff]   ;;  %v11308_v31 = vld [vmem:[%s15331_s1 + $0x19e4] ss:$16 sps:$4 sm:$0xff]  }
 0x2d3   :  { %7143 = vmatpush1.bf16.msra.mxu0 %v11144_v45  ;;  %7991 = vmatpush1.bf16.msra.mxu1 %v11147_v46  ;;  %v11231_v45 = vld [vmem:[%s15331_s1 + $0x1848] ss:$16 sps:$4 sm:$0xff]   ;;  %v11236_v46 = vld [vmem:[%s15331_s1 + $0x1864] ss:$16 sps:$4 sm:$0xff]  }
 0x2d4   :  { %7144 = vmatprep.subr.bf16.mxu0 %v11152_v47  ;;  %7992 = vmatprep.subr.bf16.mxu1 %v11155_v48  ;;  %v11239_v47 = vld [vmem:[%s15331_s1 + $0x186c] ss:$16 sps:$4 sm:$0xff]   ;;  %v8742_v48 = vcombine.high %v14217_v44, %v14222_v41 }
 0x2d7   :  { %7145 = vmatpush1.bf16.msra.mxu0 %v11150_v51  ;;  %7993 = vmatpush1.bf16.msra.mxu1 %v11153_v52  ;;  %v11234_v51 = vld [vmem:[%s15331_s1 + $0x1860] ss:$16 sps:$4 sm:$0xff]   ;;  %v11237_v52 = vld [vmem:[%s15331_s1 + $0x1868] ss:$16 sps:$4 sm:$0xff]  }
 0x2d8   :  { %7146 = vmatprep.subr.bf16.mxu0 %v11158_v49  ;;  %7994 = vmatprep.subr.bf16.mxu1 %v11161_v50  ;;  %v11242_v49 = vld [vmem:[%s15331_s1 + $0x1884] ss:$16 sps:$4 sm:$0xff]   ;;  %v11245_v50 = vld [vmem:[%s15331_s1 + $0x188c] ss:$16 sps:$4 sm:$0xff]  }
 0x2db   :  { %7147 = vmatpush1.bf16.msra.mxu0 %v11156_v53  ;;  %7995 = vmatpush1.bf16.msra.mxu1 %v11159_v54  ;;  %v11240_v53 = vld [vmem:[%s15331_s1 + $0x1880] ss:$16 sps:$4 sm:$0xff]   ;;  %v11243_v54 = vld [vmem:[%s15331_s1 + $0x1888] ss:$16 sps:$4 sm:$0xff]  }
 0x2dc   :  { %7148 = vmatprep.subr.bf16.mxu0 %v11164_v55  ;;  %7996 = vmatprep.subr.bf16.mxu1 %v11167_v56  ;;  %v11248_v55 = vld [vmem:[%s15331_s1 + $0x18a4] ss:$16 sps:$4 sm:$0xff]   ;;  %v11251_v56 = vld [vmem:[%s15331_s1 + $0x18ac] ss:$16 sps:$4 sm:$0xff]  }
 0x2df   :  { %7149 = vmatpush1.bf16.msra.mxu0 %v11162_v59  ;;  %7997 = vmatpush1.bf16.msra.mxu1 %v11165_v60  ;;  %v11246_v59 = vld [vmem:[%s15331_s1 + $0x18a0] ss:$16 sps:$4 sm:$0xff]   ;;  %v11249_v60 = vld [vmem:[%s15331_s1 + $0x18a8] ss:$16 sps:$4 sm:$0xff]  }
 0x2e0   :  { %7150 = vmatprep.subr.bf16.mxu0 %v11170_v57  ;;  %7998 = vmatprep.subr.bf16.mxu1 %v11173_v58  ;;  %v11254_v57 = vld [vmem:[%s15331_s1 + $0x18c4] ss:$16 sps:$4 sm:$0xff]   ;;  %v11257_v58 = vld [vmem:[%s15331_s1 + $0x18cc] ss:$16 sps:$4 sm:$0xff]  }
 0x2e3   :  { %7151 = vmatpush1.bf16.msra.mxu0 %v11168_v61  ;;  %7999 = vmatpush1.bf16.msra.mxu1 %v11171_v62  ;;  %v11252_v61 = vld [vmem:[%s15331_s1 + $0x18c0] ss:$16 sps:$4 sm:$0xff]   ;;  %v11255_v62 = vld [vmem:[%s15331_s1 + $0x18c8] ss:$16 sps:$4 sm:$0xff]  }
 0x2e4   :  { %7152 = vmatprep.subr.bf16.mxu0 %v11176_v63  ;;  %8000 = vmatprep.subr.bf16.mxu1 %v11179_v0  ;;  %v11260_v63 = vld [vmem:[%s15331_s1 + $0x18e4] ss:$16 sps:$4 sm:$0xff]   ;;  %v11263_v0 = vld [vmem:[%s15331_s1 + $0x18ec] ss:$16 sps:$4 sm:$0xff]  }
 0x2e7   :  { %7153 = vmatpush1.bf16.msra.mxu0 %v11174_v3  ;;  %8001 = vmatpush1.bf16.msra.mxu1 %v11177_v4  ;;  %v11258_v3 = vld [vmem:[%s15331_s1 + $0x18e0] ss:$16 sps:$4 sm:$0xff]   ;;  %v11261_v4 = vld [vmem:[%s15331_s1 + $0x18e8] ss:$16 sps:$4 sm:$0xff]  }
 0x2e8   :  { %7154 = vmatprep.subr.bf16.mxu0 %v11182_v1  ;;  %8002 = vmatprep.subr.bf16.mxu1 %v11185_v2  ;;  %v11266_v1 = vld [vmem:[%s15331_s1 + $0x1904] ss:$16 sps:$4 sm:$0xff]   ;;  %v11269_v2 = vld [vmem:[%s15331_s1 + $0x190c] ss:$16 sps:$4 sm:$0xff]  }
 0x2eb   :  { %7155 = vmatpush1.bf16.msra.mxu0 %v11180_v5  ;;  %8003 = vmatpush1.bf16.msra.mxu1 %v11183_v6  ;;  %v11264_v5 = vld [vmem:[%s15331_s1 + $0x1900] ss:$16 sps:$4 sm:$0xff]   ;;  %v11267_v6 = vld [vmem:[%s15331_s1 + $0x1908] ss:$16 sps:$4 sm:$0xff]  }
 0x2ec   :  { %7156 = vmatprep.subr.bf16.mxu0 %v11188_v7  ;;  %8004 = vmatprep.subr.bf16.mxu1 %v11191_v8  ;;  %v11272_v7 = vld [vmem:[%s15331_s1 + $0x1924] ss:$16 sps:$4 sm:$0xff]   ;;  %v11275_v8 = vld [vmem:[%s15331_s1 + $0x192c] ss:$16 sps:$4 sm:$0xff]  }
 0x2ef   :  { %7157 = vmatpush1.bf16.msra.mxu0 %v11186_v11  ;;  %8005 = vmatpush1.bf16.msra.mxu1 %v11189_v12  ;;  %v11270_v11 = vld [vmem:[%s15331_s1 + $0x1920] ss:$16 sps:$4 sm:$0xff]   ;;  %v11273_v12 = vld [vmem:[%s15331_s1 + $0x1928] ss:$16 sps:$4 sm:$0xff]  }
 0x2f0   :  { %7158 = vmatprep.subr.bf16.mxu0 %v11194_v9  ;;  %8006 = vmatprep.subr.bf16.mxu1 %v11197_v10  ;;  %v11278_v9 = vld [vmem:[%s15331_s1 + $0x1944] ss:$16 sps:$4 sm:$0xff]   ;;  %v11281_v10 = vld [vmem:[%s15331_s1 + $0x194c] ss:$16 sps:$4 sm:$0xff]  }
 0x2f3   :  { %7159 = vmatpush1.bf16.msra.mxu0 %v11192_v13  ;;  %8007 = vmatpush1.bf16.msra.mxu1 %v11195_v14  ;;  %v11276_v13 = vld [vmem:[%s15331_s1 + $0x1940] ss:$16 sps:$4 sm:$0xff]   ;;  %v11279_v14 = vld [vmem:[%s15331_s1 + $0x1948] ss:$16 sps:$4 sm:$0xff]  }
 0x2f4   :  { %7160 = vmatprep.subr.bf16.mxu0 %v11200_v15  ;;  %8008 = vmatprep.subr.bf16.mxu1 %v11203_v16  ;;  %v11284_v15 = vld [vmem:[%s15331_s1 + $0x1964] ss:$16 sps:$4 sm:$0xff]   ;;  %v11287_v16 = vld [vmem:[%s15331_s1 + $0x196c] ss:$16 sps:$4 sm:$0xff]  }
 0x2f7   :  { %7161 = vmatpush1.bf16.msra.mxu0 %v11198_v19  ;;  %8009 = vmatpush1.bf16.msra.mxu1 %v11201_v17  ;;  %v11282_v19 = vld [vmem:[%s15331_s1 + $0x1960] ss:$16 sps:$4 sm:$0xff]   ;;  %v11285_v17 = vld [vmem:[%s15331_s1 + $0x1968] ss:$16 sps:$4 sm:$0xff]  }
 0x2f8   :  { %7162 = vmatprep.subr.bf16.mxu0 %v11206_v18  ;;  %8010 = vmatprep.subr.bf16.mxu1 %v11209_v20  ;;  %v11290_v18 = vld [vmem:[%s15331_s1 + $0x1984] ss:$16 sps:$4 sm:$0xff]   ;;  %v11293_v20 = vld [vmem:[%s15331_s1 + $0x198c] ss:$16 sps:$4 sm:$0xff]  }
 0x2fb   :  { %7163 = vmatpush1.bf16.msra.mxu0 %v11204_v21  ;;  %8011 = vmatpush1.bf16.msra.mxu1 %v11207_v22  ;;  %v11288_v21 = vld [vmem:[%s15331_s1 + $0x1980] ss:$16 sps:$4 sm:$0xff]   ;;  %v11291_v22 = vld [vmem:[%s15331_s1 + $0x1988] ss:$16 sps:$4 sm:$0xff]  }
 0x2fc   :  { %7164 = vmatprep.subr.bf16.mxu0 %v11212_v23  ;;  %8012 = vmatprep.subr.bf16.mxu1 %v11215_v24  ;;  %v11296_v23 = vld [vmem:[%s15331_s1 + $0x19a4] ss:$16 sps:$4 sm:$0xff]   ;;  %v11299_v24 = vld [vmem:[%s15331_s1 + $0x19ac] ss:$16 sps:$4 sm:$0xff]  }
 0x2ff   :  { %7165 = vmatpush1.bf16.msra.mxu0 %v11210_v26  ;;  %8013 = vmatpush1.bf16.msra.mxu1 %v11213_v25  ;;  %v11294_v26 = vld [vmem:[%s15331_s1 + $0x19a0] ss:$16 sps:$4 sm:$0xff]   ;;  %v11297_v25 = vld [vmem:[%s15331_s1 + $0x19a8] ss:$16 sps:$4 sm:$0xff]  }
 0x300   :  { %7187 = vmatprep.subr.bf16.mxu0 %v11218_v27  ;;  %8035 = vmatprep.subr.bf16.mxu1 %v11221_v28  ;;  %v11302_v27 = vld [vmem:[%s15331_s1 + $0x19c4] ss:$16 sps:$4 sm:$0xff]   ;;  %v11305_v28 = vld [vmem:[%s15331_s1 + $0x19cc] ss:$16 sps:$4 sm:$0xff]  }
 0x302   :  { %7167 = vmatmul.mubr.bf16.vlgmr.msra.gmra.mrb[0].mxu0 %v8739_v29  ;;  %8015 = vmatmul.mubr.bf16.vlgmr.msra.gmra.mrb[0].mxu1 %v8739_v29  ;;  %v11300_v29 = vld [vmem:[%s15331_s1 + $0x19c0] ss:$16 sps:$4 sm:$0xff]  }
 0x303   :  { %7188 = vmatpush1.bf16.msra.mxu0 %v11216_v32  ;;  %8036 = vmatpush1.bf16.msra.mxu1 %v11219_v34  ;;  %v11311_v32 = vld [vmem:[%s15331_s1 + $0x19ec] ss:$16 sps:$4 sm:$0xff]   ;;  %v11306_v34 = vld [vmem:[%s15331_s1 + $0x19e0] ss:$16 sps:$4 sm:$0xff]  }
 0x304   :  { %7189 = vmatprep.subr.bf16.mxu0 %v11224_v36  ;;  %8037 = vmatprep.subr.bf16.mxu1 %v11227_v33  ;;  %v11309_v36 = vld [vmem:[%s15331_s1 + $0x19e8] ss:$16 sps:$4 sm:$0xff]   ;;  %v11314_v33 = vld [vmem:[%s15331_s1 + $0x1a04] ss:$16 sps:$4 sm:$0xff]  }
 0x305   :  { %7176 = vmatprep.mubr.bf16.mxu0 %v8772_v35  ;;  %8024 = vmatprep.mubr.bf16.mxu1 %v8772_v35  ;;  %v11317_v35 = vld [vmem:[%s15331_s1 + $0x1a0c] ss:$16 sps:$4 sm:$0xff]  }
 0x307   :  { %7190 = vmatpush1.bf16.msra.mxu0 %v11222_v37  ;;  %8038 = vmatpush1.bf16.msra.mxu1 %v11225_v38  ;;  %v8741_v37 = vcombine.low %v14217_v44, %v14222_v41  ;;  %v67_v38 = vld [vmem:[%s15332_s0 + $0x160] sm:$0xff]  ;;  %v11323_v41 = vld [vmem:[%s15331_s1 + $0x1a2c] ss:$16 sps:$4 sm:$0xff]  }
 0x308   :  { %7191 = vmatprep.subr.bf16.mxu0 %v11230_v39  ;;  %8039 = vmatprep.subr.bf16.mxu1 %v11233_v40  ;;  %v83_v39 = vld [vmem:[%s15332_s0 + $0x1e0] sm:$0xff] }
 0x309   :  { %v11312_v40 = vld [vmem:[%s15331_s1 + $0x1a00] ss:$16 sps:$4 sm:$0xff]   ;;  %v11320_v44 = vld [vmem:[%s15331_s1 + $0x1a24] ss:$16 sps:$4 sm:$0xff]  }
 0x30a   :  { %7177 = vmatmul.mubr.bf16.gmra.mrb[4].mxu0 %v8771_v42  ;;  %8025 = vmatmul.mubr.bf16.gmra.mrb[4].mxu1 %v8771_v42  ;;  %v11315_v42 = vld [vmem:[%s15331_s1 + $0x1a08] ss:$16 sps:$4 sm:$0xff]  }
 0x30b   :  { %7192 = vmatpush1.bf16.msra.mxu0 %v11228_v43  ;;  %8040 = vmatpush1.bf16.msra.mxu1 %v11231_v45  ;;  %v8774_v43 = vcombine.high %v67_v38, %v83_v39  ;;  %v11318_v45 = vld [vmem:[%s15331_s1 + $0x1a20] ss:$16 sps:$4 sm:$0xff]  }
 0x30c   :  { %7193 = vmatprep.subr.bf16.mxu0 %v11236_v46  ;;  %8041 = vmatprep.subr.bf16.mxu1 %v11239_v47  ;;  %v11321_v46 = vld [vmem:[%s15331_s1 + $0x1a28] ss:$16 sps:$4 sm:$0xff]   ;;  %v11326_v47 = vld [vmem:[%s15331_s1 + $0x1a44] ss:$16 sps:$4 sm:$0xff]  }
 0x30d   :  { %7219 = vmatprep.mubr.bf16.mxu0 %v8742_v48  ;;  %8067 = vmatprep.mubr.bf16.mxu1 %v8742_v48  ;;  %v11329_v48 = vld [vmem:[%s15331_s1 + $0x1a4c] ss:$16 sps:$4 sm:$0xff]  }
 0x30f   :  { %7194 = vmatpush1.bf16.msra.mxu0 %v11234_v51  ;;  %8042 = vmatpush1.bf16.msra.mxu1 %v11237_v52  ;;  %v8773_v51 = vcombine.low %v67_v38, %v83_v39  ;;  %v14429_v52 = vld [vmem:[%s15332_s0 + $0x68] sm:$0xff]  ;;  %v11404_v39 = vld [vmem:[%s15331_s1 + $0x1be4] ss:$16 sps:$4 sm:$0xff]  }
 0x310   :  { %7195 = vmatprep.subr.bf16.mxu0 %v11242_v49  ;;  %8043 = vmatprep.subr.bf16.mxu1 %v11245_v50  ;;  %v14434_v49 = vld [vmem:[%s15332_s0 + $0xe8] sm:$0xff]  ;;  %v11324_v50 = vld [vmem:[%s15331_s1 + $0x1a40] ss:$16 sps:$4 sm:$0xff]  }
 0x311   :  { %v11399_v38 = vld [vmem:[%s15331_s1 + $0x1bc8] ss:$16 sps:$4 sm:$0xff]  }
 0x313   :  { %7196 = vmatpush1.bf16.msra.mxu0 %v11240_v53  ;;  %8044 = vmatpush1.bf16.msra.mxu1 %v11243_v54  ;;  %v11327_v53 = vld [vmem:[%s15331_s1 + $0x1a48] ss:$16 sps:$4 sm:$0xff]   ;;  %v11332_v54 = vld [vmem:[%s15331_s1 + $0x1a64] ss:$16 sps:$4 sm:$0xff]  }
 0x314   :  { %7197 = vmatprep.subr.bf16.mxu0 %v11248_v55  ;;  %8045 = vmatprep.subr.bf16.mxu1 %v11251_v56  ;;  %v11335_v55 = vld [vmem:[%s15331_s1 + $0x1a6c] ss:$16 sps:$4 sm:$0xff]   ;;  %v8744_v56 = vcombine.high %v14429_v52, %v14434_v49 }
 0x317   :  { %7198 = vmatpush1.bf16.msra.mxu0 %v11246_v59  ;;  %8046 = vmatpush1.bf16.msra.mxu1 %v11249_v60  ;;  %v11330_v59 = vld [vmem:[%s15331_s1 + $0x1a60] ss:$16 sps:$4 sm:$0xff]   ;;  %v11333_v60 = vld [vmem:[%s15331_s1 + $0x1a68] ss:$16 sps:$4 sm:$0xff]  }
 0x318   :  { %7199 = vmatprep.subr.bf16.mxu0 %v11254_v57  ;;  %8047 = vmatprep.subr.bf16.mxu1 %v11257_v58  ;;  %v11338_v57 = vld [vmem:[%s15331_s1 + $0x1a84] ss:$16 sps:$4 sm:$0xff]   ;;  %v11341_v58 = vld [vmem:[%s15331_s1 + $0x1a8c] ss:$16 sps:$4 sm:$0xff]  }
 0x31b   :  { %7200 = vmatpush1.bf16.msra.mxu0 %v11252_v61  ;;  %8048 = vmatpush1.bf16.msra.mxu1 %v11255_v62  ;;  %v11336_v61 = vld [vmem:[%s15331_s1 + $0x1a80] ss:$16 sps:$4 sm:$0xff]   ;;  %v11339_v62 = vld [vmem:[%s15331_s1 + $0x1a88] ss:$16 sps:$4 sm:$0xff]  }
 0x31c   :  { %7201 = vmatprep.subr.bf16.mxu0 %v11260_v63  ;;  %8049 = vmatprep.subr.bf16.mxu1 %v11263_v0  ;;  %v11344_v63 = vld [vmem:[%s15331_s1 + $0x1aa4] ss:$16 sps:$4 sm:$0xff]   ;;  %v11347_v0 = vld [vmem:[%s15331_s1 + $0x1aac] ss:$16 sps:$4 sm:$0xff]  }
 0x31f   :  { %7202 = vmatpush1.bf16.msra.mxu0 %v11258_v3  ;;  %8050 = vmatpush1.bf16.msra.mxu1 %v11261_v4  ;;  %v11342_v3 = vld [vmem:[%s15331_s1 + $0x1aa0] ss:$16 sps:$4 sm:$0xff]   ;;  %v11345_v4 = vld [vmem:[%s15331_s1 + $0x1aa8] ss:$16 sps:$4 sm:$0xff]  }
 0x320   :  { %7203 = vmatprep.subr.bf16.mxu0 %v11266_v1  ;;  %8051 = vmatprep.subr.bf16.mxu1 %v11269_v2  ;;  %v11350_v1 = vld [vmem:[%s15331_s1 + $0x1ac4] ss:$16 sps:$4 sm:$0xff]   ;;  %v11353_v2 = vld [vmem:[%s15331_s1 + $0x1acc] ss:$16 sps:$4 sm:$0xff]  }
 0x323   :  { %7204 = vmatpush1.bf16.msra.mxu0 %v11264_v5  ;;  %8052 = vmatpush1.bf16.msra.mxu1 %v11267_v6  ;;  %v11348_v5 = vld [vmem:[%s15331_s1 + $0x1ac0] ss:$16 sps:$4 sm:$0xff]   ;;  %v11351_v6 = vld [vmem:[%s15331_s1 + $0x1ac8] ss:$16 sps:$4 sm:$0xff]  }
 0x324   :  { %7205 = vmatprep.subr.bf16.mxu0 %v11272_v7  ;;  %8053 = vmatprep.subr.bf16.mxu1 %v11275_v8  ;;  %v11356_v7 = vld [vmem:[%s15331_s1 + $0x1ae4] ss:$16 sps:$4 sm:$0xff]   ;;  %v11359_v8 = vld [vmem:[%s15331_s1 + $0x1aec] ss:$16 sps:$4 sm:$0xff]  }
 0x327   :  { %7206 = vmatpush1.bf16.msra.mxu0 %v11270_v11  ;;  %8054 = vmatpush1.bf16.msra.mxu1 %v11273_v12  ;;  %v11354_v11 = vld [vmem:[%s15331_s1 + $0x1ae0] ss:$16 sps:$4 sm:$0xff]   ;;  %v11357_v12 = vld [vmem:[%s15331_s1 + $0x1ae8] ss:$16 sps:$4 sm:$0xff]  }
 0x328   :  { %7207 = vmatprep.subr.bf16.mxu0 %v11278_v9  ;;  %8055 = vmatprep.subr.bf16.mxu1 %v11281_v10  ;;  %v11362_v9 = vld [vmem:[%s15331_s1 + $0x1b04] ss:$16 sps:$4 sm:$0xff]   ;;  %v11365_v10 = vld [vmem:[%s15331_s1 + $0x1b0c] ss:$16 sps:$4 sm:$0xff]  }
 0x32b   :  { %7208 = vmatpush1.bf16.msra.mxu0 %v11276_v13  ;;  %8056 = vmatpush1.bf16.msra.mxu1 %v11279_v14  ;;  %v11360_v13 = vld [vmem:[%s15331_s1 + $0x1b00] ss:$16 sps:$4 sm:$0xff]   ;;  %v11363_v14 = vld [vmem:[%s15331_s1 + $0x1b08] ss:$16 sps:$4 sm:$0xff]  }
 0x32c   :  { %7209 = vmatprep.subr.bf16.mxu0 %v11284_v15  ;;  %8057 = vmatprep.subr.bf16.mxu1 %v11287_v16  ;;  %v11368_v15 = vld [vmem:[%s15331_s1 + $0x1b24] ss:$16 sps:$4 sm:$0xff]   ;;  %v11371_v16 = vld [vmem:[%s15331_s1 + $0x1b2c] ss:$16 sps:$4 sm:$0xff]  }
 0x32f   :  { %7210 = vmatpush1.bf16.msra.mxu0 %v11282_v19  ;;  %8058 = vmatpush1.bf16.msra.mxu1 %v11285_v17  ;;  %v11366_v19 = vld [vmem:[%s15331_s1 + $0x1b20] ss:$16 sps:$4 sm:$0xff]   ;;  %v11369_v17 = vld [vmem:[%s15331_s1 + $0x1b28] ss:$16 sps:$4 sm:$0xff]  }
 0x330   :  { %7211 = vmatprep.subr.bf16.mxu0 %v11290_v18  ;;  %8059 = vmatprep.subr.bf16.mxu1 %v11293_v20  ;;  %v11374_v18 = vld [vmem:[%s15331_s1 + $0x1b44] ss:$16 sps:$4 sm:$0xff]   ;;  %v11377_v20 = vld [vmem:[%s15331_s1 + $0x1b4c] ss:$16 sps:$4 sm:$0xff]  }
 0x333   :  { %7212 = vmatpush1.bf16.msra.mxu0 %v11288_v21  ;;  %8060 = vmatpush1.bf16.msra.mxu1 %v11291_v22  ;;  %v11372_v21 = vld [vmem:[%s15331_s1 + $0x1b40] ss:$16 sps:$4 sm:$0xff]   ;;  %v11375_v22 = vld [vmem:[%s15331_s1 + $0x1b48] ss:$16 sps:$4 sm:$0xff]  }
 0x334   :  { %7213 = vmatprep.subr.bf16.mxu0 %v11296_v23  ;;  %8061 = vmatprep.subr.bf16.mxu1 %v11299_v24  ;;  %v11380_v23 = vld [vmem:[%s15331_s1 + $0x1b64] ss:$16 sps:$4 sm:$0xff]   ;;  %v11383_v24 = vld [vmem:[%s15331_s1 + $0x1b6c] ss:$16 sps:$4 sm:$0xff]  }
 0x337   :  { %7214 = vmatpush1.bf16.msra.mxu0 %v11294_v26  ;;  %8062 = vmatpush1.bf16.msra.mxu1 %v11297_v25  ;;  %v11378_v26 = vld [vmem:[%s15331_s1 + $0x1b60] ss:$16 sps:$4 sm:$0xff]   ;;  %v11381_v25 = vld [vmem:[%s15331_s1 + $0x1b68] ss:$16 sps:$4 sm:$0xff]  }
 0x338   :  { %7215 = vmatprep.subr.bf16.mxu0 %v11302_v27  ;;  %8063 = vmatprep.subr.bf16.mxu1 %v11305_v28  ;;  %v11386_v27 = vld [vmem:[%s15331_s1 + $0x1b84] ss:$16 sps:$4 sm:$0xff]   ;;  %v11389_v28 = vld [vmem:[%s15331_s1 + $0x1b8c] ss:$16 sps:$4 sm:$0xff]  }
 0x33b   :  { %7216 = vmatpush1.bf16.msra.mxu0 %v11300_v29  ;;  %8064 = vmatpush1.bf16.msra.mxu1 %v11303_v30  ;;  %v11384_v29 = vld [vmem:[%s15331_s1 + $0x1b80] ss:$16 sps:$4 sm:$0xff]   ;;  %v11387_v30 = vld [vmem:[%s15331_s1 + $0x1b88] ss:$16 sps:$4 sm:$0xff]  }
 0x33c   :  { %7217 = vmatprep.subr.bf16.mxu0 %v11308_v31  ;;  %8065 = vmatprep.subr.bf16.mxu1 %v11311_v32  ;;  %v11392_v31 = vld [vmem:[%s15331_s1 + $0x1ba4] ss:$16 sps:$4 sm:$0xff]   ;;  %v11395_v32 = vld [vmem:[%s15331_s1 + $0x1bac] ss:$16 sps:$4 sm:$0xff]  }
 0x33f   :  { %7218 = vmatpush1.bf16.msra.mxu0 %v11306_v34  ;;  %8066 = vmatpush1.bf16.msra.mxu1 %v11309_v36  ;;  %v11390_v34 = vld [vmem:[%s15331_s1 + $0x1ba0] ss:$16 sps:$4 sm:$0xff]   ;;  %v11393_v36 = vld [vmem:[%s15331_s1 + $0x1ba8] ss:$16 sps:$4 sm:$0xff]  }
 0x340   :  { %7240 = vmatprep.subr.bf16.mxu0 %v11314_v33  ;;  %8088 = vmatprep.subr.bf16.mxu1 %v11317_v35  ;;  %v11398_v33 = vld [vmem:[%s15331_s1 + $0x1bc4] ss:$16 sps:$4 sm:$0xff]   ;;  %v11401_v35 = vld [vmem:[%s15331_s1 + $0x1bcc] ss:$16 sps:$4 sm:$0xff]  }
 0x342   :  { %7220 = vmatmul.mubr.bf16.vlgmr.msra.gmra.mrb[0].mxu0 %v8741_v37  ;;  %8068 = vmatmul.mubr.bf16.vlgmr.msra.gmra.mrb[0].mxu1 %v8741_v37  ;;  %v11396_v37 = vld [vmem:[%s15331_s1 + $0x1bc0] ss:$16 sps:$4 sm:$0xff]  }
 0x343   :  { %7241 = vmatpush1.bf16.msra.mxu0 %v11312_v40  ;;  %8089 = vmatpush1.bf16.msra.mxu1 %v11315_v42  ;;  %v11407_v40 = vld [vmem:[%s15331_s1 + $0x1bec] ss:$16 sps:$4 sm:$0xff]   ;;  %v11402_v42 = vld [vmem:[%s15331_s1 + $0x1be0] ss:$16 sps:$4 sm:$0xff]  }
 0x344   :  { %7242 = vmatprep.subr.bf16.mxu0 %v11320_v44  ;;  %8090 = vmatprep.subr.bf16.mxu1 %v11323_v41  ;;  %v11405_v44 = vld [vmem:[%s15331_s1 + $0x1be8] ss:$16 sps:$4 sm:$0xff]   ;;  %v11410_v41 = vld [vmem:[%s15331_s1 + $0x1c04] ss:$16 sps:$4 sm:$0xff]  }
 0x345   :  { %7229 = vmatprep.mubr.bf16.mxu0 %v8774_v43  ;;  %8077 = vmatprep.mubr.bf16.mxu1 %v8774_v43  ;;  %v11413_v43 = vld [vmem:[%s15331_s1 + $0x1c0c] ss:$16 sps:$4 sm:$0xff]  }
 0x347   :  { %7243 = vmatpush1.bf16.msra.mxu0 %v11318_v45  ;;  %8091 = vmatpush1.bf16.msra.mxu1 %v11321_v46  ;;  %v8743_v45 = vcombine.low %v14429_v52, %v14434_v49  ;;  %v68_v46 = vld [vmem:[%s15332_s0 + $0x168] sm:$0xff]  ;;  %v11416_v52 = vld [vmem:[%s15331_s1 + $0x1c24] ss:$16 sps:$4 sm:$0xff]  }
 0x348   :  { %7244 = vmatprep.subr.bf16.mxu0 %v11326_v47  ;;  %8092 = vmatprep.subr.bf16.mxu1 %v11329_v48  ;;  %v84_v47 = vld [vmem:[%s15332_s0 + $0x1e8] sm:$0xff]  ;;  %v11408_v48 = vld [vmem:[%s15331_s1 + $0x1c00] ss:$16 sps:$4 sm:$0xff]  }
 0x349   :  { %v11419_v49 = vld [vmem:[%s15331_s1 + $0x1c2c] ss:$16 sps:$4 sm:$0xff]  }
 0x34a   :  { %7230 = vmatmul.mubr.bf16.gmra.mrb[4].mxu0 %v8773_v51  ;;  %8078 = vmatmul.mubr.bf16.gmra.mrb[4].mxu1 %v8773_v51  ;;  %v11411_v51 = vld [vmem:[%s15331_s1 + $0x1c08] ss:$16 sps:$4 sm:$0xff]  }
 0x34b   :  { %7245 = vmatpush1.bf16.msra.mxu0 %v11324_v50  ;;  %8093 = vmatpush1.bf16.msra.mxu1 %v11327_v53  ;;  %v8776_v50 = vcombine.high %v68_v46, %v84_v47  ;;  %v11414_v53 = vld [vmem:[%s15331_s1 + $0x1c20] ss:$16 sps:$4 sm:$0xff]  }
 0x34c   :  { %7246 = vmatprep.subr.bf16.mxu0 %v11332_v54  ;;  %8094 = vmatprep.subr.bf16.mxu1 %v11335_v55  ;;  %v11417_v54 = vld [vmem:[%s15331_s1 + $0x1c28] ss:$16 sps:$4 sm:$0xff]   ;;  %v11422_v55 = vld [vmem:[%s15331_s1 + $0x1c44] ss:$16 sps:$4 sm:$0xff]  }
 0x34d   :  { %7272 = vmatprep.mubr.bf16.mxu0 %v8744_v56  ;;  %8120 = vmatprep.mubr.bf16.mxu1 %v8744_v56  ;;  %v11425_v56 = vld [vmem:[%s15331_s1 + $0x1c4c] ss:$16 sps:$4 sm:$0xff]  }
 0x34f   :  { %7247 = vmatpush1.bf16.msra.mxu0 %v11330_v59  ;;  %8095 = vmatpush1.bf16.msra.mxu1 %v11333_v60  ;;  %v8775_v59 = vcombine.low %v68_v46, %v84_v47  ;;  %v14641_v60 = vld [vmem:[%s15332_s0 + $0x70] sm:$0xff]  ;;  %v11495_v46 = vld [vmem:[%s15331_s1 + $0x1dc8] ss:$16 sps:$4 sm:$0xff]  }
 0x350   :  { %7248 = vmatprep.subr.bf16.mxu0 %v11338_v57  ;;  %8096 = vmatprep.subr.bf16.mxu1 %v11341_v58  ;;  %v14646_v57 = vld [vmem:[%s15332_s0 + $0xf0] sm:$0xff] }
 0x351   :  { %v11420_v58 = vld [vmem:[%s15331_s1 + $0x1c40] ss:$16 sps:$4 sm:$0xff]   ;;  %v11500_v47 = vld [vmem:[%s15331_s1 + $0x1de4] ss:$16 sps:$4 sm:$0xff]  }
 0x353   :  { %7249 = vmatpush1.bf16.msra.mxu0 %v11336_v61  ;;  %8097 = vmatpush1.bf16.msra.mxu1 %v11339_v62  ;;  %v11423_v61 = vld [vmem:[%s15331_s1 + $0x1c48] ss:$16 sps:$4 sm:$0xff]   ;;  %v11428_v62 = vld [vmem:[%s15331_s1 + $0x1c64] ss:$16 sps:$4 sm:$0xff]  }
 0x354   :  { %7250 = vmatprep.subr.bf16.mxu0 %v11344_v63  ;;  %8098 = vmatprep.subr.bf16.mxu1 %v11347_v0  ;;  %v11431_v63 = vld [vmem:[%s15331_s1 + $0x1c6c] ss:$16 sps:$4 sm:$0xff]   ;;  %v8746_v0 = vcombine.high %v14641_v60, %v14646_v57 }
 0x357   :  { %7251 = vmatpush1.bf16.msra.mxu0 %v11342_v3  ;;  %8099 = vmatpush1.bf16.msra.mxu1 %v11345_v4  ;;  %v11426_v3 = vld [vmem:[%s15331_s1 + $0x1c60] ss:$16 sps:$4 sm:$0xff]   ;;  %v11429_v4 = vld [vmem:[%s15331_s1 + $0x1c68] ss:$16 sps:$4 sm:$0xff]  }
 0x358   :  { %7252 = vmatprep.subr.bf16.mxu0 %v11350_v1  ;;  %8100 = vmatprep.subr.bf16.mxu1 %v11353_v2  ;;  %v11434_v1 = vld [vmem:[%s15331_s1 + $0x1c84] ss:$16 sps:$4 sm:$0xff]   ;;  %v11437_v2 = vld [vmem:[%s15331_s1 + $0x1c8c] ss:$16 sps:$4 sm:$0xff]  }
 0x35b   :  { %7253 = vmatpush1.bf16.msra.mxu0 %v11348_v5  ;;  %8101 = vmatpush1.bf16.msra.mxu1 %v11351_v6  ;;  %v11432_v5 = vld [vmem:[%s15331_s1 + $0x1c80] ss:$16 sps:$4 sm:$0xff]   ;;  %v11435_v6 = vld [vmem:[%s15331_s1 + $0x1c88] ss:$16 sps:$4 sm:$0xff]  }
 0x35c   :  { %7254 = vmatprep.subr.bf16.mxu0 %v11356_v7  ;;  %8102 = vmatprep.subr.bf16.mxu1 %v11359_v8  ;;  %v11440_v7 = vld [vmem:[%s15331_s1 + $0x1ca4] ss:$16 sps:$4 sm:$0xff]   ;;  %v11443_v8 = vld [vmem:[%s15331_s1 + $0x1cac] ss:$16 sps:$4 sm:$0xff]  }
 0x35f   :  { %7255 = vmatpush1.bf16.msra.mxu0 %v11354_v11  ;;  %8103 = vmatpush1.bf16.msra.mxu1 %v11357_v12  ;;  %v11438_v11 = vld [vmem:[%s15331_s1 + $0x1ca0] ss:$16 sps:$4 sm:$0xff]   ;;  %v11441_v12 = vld [vmem:[%s15331_s1 + $0x1ca8] ss:$16 sps:$4 sm:$0xff]  }
 0x360   :  { %7256 = vmatprep.subr.bf16.mxu0 %v11362_v9  ;;  %8104 = vmatprep.subr.bf16.mxu1 %v11365_v10  ;;  %v11446_v9 = vld [vmem:[%s15331_s1 + $0x1cc4] ss:$16 sps:$4 sm:$0xff]   ;;  %v11449_v10 = vld [vmem:[%s15331_s1 + $0x1ccc] ss:$16 sps:$4 sm:$0xff]  }
 0x363   :  { %7257 = vmatpush1.bf16.msra.mxu0 %v11360_v13  ;;  %8105 = vmatpush1.bf16.msra.mxu1 %v11363_v14  ;;  %v11444_v13 = vld [vmem:[%s15331_s1 + $0x1cc0] ss:$16 sps:$4 sm:$0xff]   ;;  %v11447_v14 = vld [vmem:[%s15331_s1 + $0x1cc8] ss:$16 sps:$4 sm:$0xff]  }
 0x364   :  { %7258 = vmatprep.subr.bf16.mxu0 %v11368_v15  ;;  %8106 = vmatprep.subr.bf16.mxu1 %v11371_v16  ;;  %v11452_v15 = vld [vmem:[%s15331_s1 + $0x1ce4] ss:$16 sps:$4 sm:$0xff]   ;;  %v11455_v16 = vld [vmem:[%s15331_s1 + $0x1cec] ss:$16 sps:$4 sm:$0xff]  }
 0x367   :  { %7259 = vmatpush1.bf16.msra.mxu0 %v11366_v19  ;;  %8107 = vmatpush1.bf16.msra.mxu1 %v11369_v17  ;;  %v11450_v19 = vld [vmem:[%s15331_s1 + $0x1ce0] ss:$16 sps:$4 sm:$0xff]   ;;  %v11453_v17 = vld [vmem:[%s15331_s1 + $0x1ce8] ss:$16 sps:$4 sm:$0xff]  }
 0x368   :  { %7260 = vmatprep.subr.bf16.mxu0 %v11374_v18  ;;  %8108 = vmatprep.subr.bf16.mxu1 %v11377_v20  ;;  %v11458_v18 = vld [vmem:[%s15331_s1 + $0x1d04] ss:$16 sps:$4 sm:$0xff]   ;;  %v11461_v20 = vld [vmem:[%s15331_s1 + $0x1d0c] ss:$16 sps:$4 sm:$0xff]  }
 0x36b   :  { %7261 = vmatpush1.bf16.msra.mxu0 %v11372_v21  ;;  %8109 = vmatpush1.bf16.msra.mxu1 %v11375_v22  ;;  %v11456_v21 = vld [vmem:[%s15331_s1 + $0x1d00] ss:$16 sps:$4 sm:$0xff]   ;;  %v11459_v22 = vld [vmem:[%s15331_s1 + $0x1d08] ss:$16 sps:$4 sm:$0xff]  }
 0x36c   :  { %7262 = vmatprep.subr.bf16.mxu0 %v11380_v23  ;;  %8110 = vmatprep.subr.bf16.mxu1 %v11383_v24  ;;  %v11464_v23 = vld [vmem:[%s15331_s1 + $0x1d24] ss:$16 sps:$4 sm:$0xff]   ;;  %v11467_v24 = vld [vmem:[%s15331_s1 + $0x1d2c] ss:$16 sps:$4 sm:$0xff]  }
 0x36f   :  { %7263 = vmatpush1.bf16.msra.mxu0 %v11378_v26  ;;  %8111 = vmatpush1.bf16.msra.mxu1 %v11381_v25  ;;  %v11462_v26 = vld [vmem:[%s15331_s1 + $0x1d20] ss:$16 sps:$4 sm:$0xff]   ;;  %v11465_v25 = vld [vmem:[%s15331_s1 + $0x1d28] ss:$16 sps:$4 sm:$0xff]  }
 0x370   :  { %7264 = vmatprep.subr.bf16.mxu0 %v11386_v27  ;;  %8112 = vmatprep.subr.bf16.mxu1 %v11389_v28  ;;  %v11470_v27 = vld [vmem:[%s15331_s1 + $0x1d44] ss:$16 sps:$4 sm:$0xff]   ;;  %v11473_v28 = vld [vmem:[%s15331_s1 + $0x1d4c] ss:$16 sps:$4 sm:$0xff]  }
 0x373   :  { %7265 = vmatpush1.bf16.msra.mxu0 %v11384_v29  ;;  %8113 = vmatpush1.bf16.msra.mxu1 %v11387_v30  ;;  %v11468_v29 = vld [vmem:[%s15331_s1 + $0x1d40] ss:$16 sps:$4 sm:$0xff]   ;;  %v11471_v30 = vld [vmem:[%s15331_s1 + $0x1d48] ss:$16 sps:$4 sm:$0xff]  }
 0x374   :  { %7266 = vmatprep.subr.bf16.mxu0 %v11392_v31  ;;  %8114 = vmatprep.subr.bf16.mxu1 %v11395_v32  ;;  %v11476_v31 = vld [vmem:[%s15331_s1 + $0x1d64] ss:$16 sps:$4 sm:$0xff]   ;;  %v11479_v32 = vld [vmem:[%s15331_s1 + $0x1d6c] ss:$16 sps:$4 sm:$0xff]  }
 0x377   :  { %7267 = vmatpush1.bf16.msra.mxu0 %v11390_v34  ;;  %8115 = vmatpush1.bf16.msra.mxu1 %v11393_v36  ;;  %v11474_v34 = vld [vmem:[%s15331_s1 + $0x1d60] ss:$16 sps:$4 sm:$0xff]   ;;  %v11477_v36 = vld [vmem:[%s15331_s1 + $0x1d68] ss:$16 sps:$4 sm:$0xff]  }
 0x378   :  { %7268 = vmatprep.subr.bf16.mxu0 %v11398_v33  ;;  %8116 = vmatprep.subr.bf16.mxu1 %v11401_v35  ;;  %v11482_v33 = vld [vmem:[%s15331_s1 + $0x1d84] ss:$16 sps:$4 sm:$0xff]   ;;  %v11485_v35 = vld [vmem:[%s15331_s1 + $0x1d8c] ss:$16 sps:$4 sm:$0xff]  }
 0x37b   :  { %7269 = vmatpush1.bf16.msra.mxu0 %v11396_v37  ;;  %8117 = vmatpush1.bf16.msra.mxu1 %v11399_v38  ;;  %v11480_v37 = vld [vmem:[%s15331_s1 + $0x1d80] ss:$16 sps:$4 sm:$0xff]   ;;  %v11483_v38 = vld [vmem:[%s15331_s1 + $0x1d88] ss:$16 sps:$4 sm:$0xff]  }
 0x37c   :  { %7270 = vmatprep.subr.bf16.mxu0 %v11404_v39  ;;  %8118 = vmatprep.subr.bf16.mxu1 %v11407_v40  ;;  %v11488_v39 = vld [vmem:[%s15331_s1 + $0x1da4] ss:$16 sps:$4 sm:$0xff]   ;;  %v11491_v40 = vld [vmem:[%s15331_s1 + $0x1dac] ss:$16 sps:$4 sm:$0xff]  }
 0x37f   :  { %7271 = vmatpush1.bf16.msra.mxu0 %v11402_v42  ;;  %8119 = vmatpush1.bf16.msra.mxu1 %v11405_v44  ;;  %v11486_v42 = vld [vmem:[%s15331_s1 + $0x1da0] ss:$16 sps:$4 sm:$0xff]   ;;  %v11489_v44 = vld [vmem:[%s15331_s1 + $0x1da8] ss:$16 sps:$4 sm:$0xff]  }
 0x380   :  { %7293 = vmatprep.subr.bf16.mxu0 %v11410_v41  ;;  %8141 = vmatprep.subr.bf16.mxu1 %v11413_v43  ;;  %v11494_v41 = vld [vmem:[%s15331_s1 + $0x1dc4] ss:$16 sps:$4 sm:$0xff]   ;;  %v11497_v43 = vld [vmem:[%s15331_s1 + $0x1dcc] ss:$16 sps:$4 sm:$0xff]  }
 0x382   :  { %7273 = vmatmul.mubr.bf16.vlgmr.msra.gmra.mrb[0].mxu0 %v8743_v45  ;;  %8121 = vmatmul.mubr.bf16.vlgmr.msra.gmra.mrb[0].mxu1 %v8743_v45  ;;  %v11492_v45 = vld [vmem:[%s15331_s1 + $0x1dc0] ss:$16 sps:$4 sm:$0xff]  }
 0x383   :  { %7294 = vmatpush1.bf16.msra.mxu0 %v11408_v48  ;;  %8142 = vmatpush1.bf16.msra.mxu1 %v11411_v51  ;;  %v11503_v48 = vld [vmem:[%s15331_s1 + $0x1dec] ss:$16 sps:$4 sm:$0xff]   ;;  %v11498_v51 = vld [vmem:[%s15331_s1 + $0x1de0] ss:$16 sps:$4 sm:$0xff]  }
 0x384   :  { %7295 = vmatprep.subr.bf16.mxu0 %v11416_v52  ;;  %8143 = vmatprep.subr.bf16.mxu1 %v11419_v49  ;;  %v11501_v52 = vld [vmem:[%s15331_s1 + $0x1de8] ss:$16 sps:$4 sm:$0xff]   ;;  %v11506_v49 = vld [vmem:[%s15331_s1 + $0x1e04] ss:$16 sps:$4 sm:$0xff]  }
 0x385   :  { %7282 = vmatprep.mubr.bf16.mxu0 %v8776_v50  ;;  %8130 = vmatprep.mubr.bf16.mxu1 %v8776_v50  ;;  %v11509_v50 = vld [vmem:[%s15331_s1 + $0x1e0c] ss:$16 sps:$4 sm:$0xff]  }
 0x387   :  { %7296 = vmatpush1.bf16.msra.mxu0 %v11414_v53  ;;  %8144 = vmatpush1.bf16.msra.mxu1 %v11417_v54  ;;  %v8745_v53 = vcombine.low %v14641_v60, %v14646_v57  ;;  %v69_v54 = vld [vmem:[%s15332_s0 + $0x170] sm:$0xff]  ;;  %v11515_v57 = vld [vmem:[%s15331_s1 + $0x1e2c] ss:$16 sps:$4 sm:$0xff]  }
 0x388   :  { %7297 = vmatprep.subr.bf16.mxu0 %v11422_v55  ;;  %8145 = vmatprep.subr.bf16.mxu1 %v11425_v56  ;;  %v85_v55 = vld [vmem:[%s15332_s0 + $0x1f0] sm:$0xff] }
 0x389   :  { %v11504_v56 = vld [vmem:[%s15331_s1 + $0x1e00] ss:$16 sps:$4 sm:$0xff]   ;;  %v11512_v60 = vld [vmem:[%s15331_s1 + $0x1e24] ss:$16 sps:$4 sm:$0xff]  }
 0x38a   :  { %7283 = vmatmul.mubr.bf16.gmra.mrb[4].mxu0 %v8775_v59  ;;  %8131 = vmatmul.mubr.bf16.gmra.mrb[4].mxu1 %v8775_v59  ;;  %v11507_v59 = vld [vmem:[%s15331_s1 + $0x1e08] ss:$16 sps:$4 sm:$0xff]  }
 0x38b   :  { %7298 = vmatpush1.bf16.msra.mxu0 %v11420_v58  ;;  %8146 = vmatpush1.bf16.msra.mxu1 %v11423_v61  ;;  %v8778_v58 = vcombine.high %v69_v54, %v85_v55  ;;  %v11510_v61 = vld [vmem:[%s15331_s1 + $0x1e20] ss:$16 sps:$4 sm:$0xff]  }
 0x38c   :  { %7299 = vmatprep.subr.bf16.mxu0 %v11428_v62  ;;  %8147 = vmatprep.subr.bf16.mxu1 %v11431_v63  ;;  %v11513_v62 = vld [vmem:[%s15331_s1 + $0x1e28] ss:$16 sps:$4 sm:$0xff]   ;;  %v11518_v63 = vld [vmem:[%s15331_s1 + $0x1e44] ss:$16 sps:$4 sm:$0xff]  }
 0x38d   :  { %7325 = vmatprep.mubr.bf16.mxu0 %v8746_v0  ;;  %8173 = vmatprep.mubr.bf16.mxu1 %v8746_v0  ;;  %v11521_v0 = vld [vmem:[%s15331_s1 + $0x1e4c] ss:$16 sps:$4 sm:$0xff]  }
 0x38f   :  { %7300 = vmatpush1.bf16.msra.mxu0 %v11426_v3  ;;  %8148 = vmatpush1.bf16.msra.mxu1 %v11429_v4  ;;  %v8777_v3 = vcombine.low %v69_v54, %v85_v55  ;;  %v14853_v4 = vld [vmem:[%s15332_s0 + $0x78] sm:$0xff]  ;;  %v11596_v55 = vld [vmem:[%s15331_s1 + $0x1fe4] ss:$16 sps:$4 sm:$0xff]  }
 0x390   :  { %7301 = vmatprep.subr.bf16.mxu0 %v11434_v1  ;;  %8149 = vmatprep.subr.bf16.mxu1 %v11437_v2  ;;  %v14858_v1 = vld [vmem:[%s15332_s0 + $0xf8] sm:$0xff]  ;;  %v11516_v2 = vld [vmem:[%s15331_s1 + $0x1e40] ss:$16 sps:$4 sm:$0xff]  }
 0x391   :  { %v11591_v54 = vld [vmem:[%s15331_s1 + $0x1fc8] ss:$16 sps:$4 sm:$0xff]  }
 0x393   :  { %7302 = vmatpush1.bf16.msra.mxu0 %v11432_v5  ;;  %8150 = vmatpush1.bf16.msra.mxu1 %v11435_v6  ;;  %v11519_v5 = vld [vmem:[%s15331_s1 + $0x1e48] ss:$16 sps:$4 sm:$0xff]   ;;  %v11524_v6 = vld [vmem:[%s15331_s1 + $0x1e64] ss:$16 sps:$4 sm:$0xff]  }
 0x394   :  { %7303 = vmatprep.subr.bf16.mxu0 %v11440_v7  ;;  %8151 = vmatprep.subr.bf16.mxu1 %v11443_v8  ;;  %v11527_v7 = vld [vmem:[%s15331_s1 + $0x1e6c] ss:$16 sps:$4 sm:$0xff]   ;;  %v8748_v8 = vcombine.high %v14853_v4, %v14858_v1 }
 0x397   :  { %7304 = vmatpush1.bf16.msra.mxu0 %v11438_v11  ;;  %8152 = vmatpush1.bf16.msra.mxu1 %v11441_v12  ;;  %v11522_v11 = vld [vmem:[%s15331_s1 + $0x1e60] ss:$16 sps:$4 sm:$0xff]   ;;  %v11525_v12 = vld [vmem:[%s15331_s1 + $0x1e68] ss:$16 sps:$4 sm:$0xff]  }
 0x398   :  { %7305 = vmatprep.subr.bf16.mxu0 %v11446_v9  ;;  %8153 = vmatprep.subr.bf16.mxu1 %v11449_v10  ;;  %v11530_v9 = vld [vmem:[%s15331_s1 + $0x1e84] ss:$16 sps:$4 sm:$0xff]   ;;  %v11533_v10 = vld [vmem:[%s15331_s1 + $0x1e8c] ss:$16 sps:$4 sm:$0xff]  }
 0x39b   :  { %7306 = vmatpush1.bf16.msra.mxu0 %v11444_v13  ;;  %8154 = vmatpush1.bf16.msra.mxu1 %v11447_v14  ;;  %v11528_v13 = vld [vmem:[%s15331_s1 + $0x1e80] ss:$16 sps:$4 sm:$0xff]   ;;  %v11531_v14 = vld [vmem:[%s15331_s1 + $0x1e88] ss:$16 sps:$4 sm:$0xff]  }
 0x39c   :  { %7307 = vmatprep.subr.bf16.mxu0 %v11452_v15  ;;  %8155 = vmatprep.subr.bf16.mxu1 %v11455_v16  ;;  %v11536_v15 = vld [vmem:[%s15331_s1 + $0x1ea4] ss:$16 sps:$4 sm:$0xff]   ;;  %v11539_v16 = vld [vmem:[%s15331_s1 + $0x1eac] ss:$16 sps:$4 sm:$0xff]  }
 0x39f   :  { %7308 = vmatpush1.bf16.msra.mxu0 %v11450_v19  ;;  %8156 = vmatpush1.bf16.msra.mxu1 %v11453_v17  ;;  %v11534_v19 = vld [vmem:[%s15331_s1 + $0x1ea0] ss:$16 sps:$4 sm:$0xff]   ;;  %v11537_v17 = vld [vmem:[%s15331_s1 + $0x1ea8] ss:$16 sps:$4 sm:$0xff]  }
 0x3a0   :  { %7309 = vmatprep.subr.bf16.mxu0 %v11458_v18  ;;  %8157 = vmatprep.subr.bf16.mxu1 %v11461_v20  ;;  %v11542_v18 = vld [vmem:[%s15331_s1 + $0x1ec4] ss:$16 sps:$4 sm:$0xff]   ;;  %v11545_v20 = vld [vmem:[%s15331_s1 + $0x1ecc] ss:$16 sps:$4 sm:$0xff]  }
 0x3a3   :  { %7310 = vmatpush1.bf16.msra.mxu0 %v11456_v21  ;;  %8158 = vmatpush1.bf16.msra.mxu1 %v11459_v22  ;;  %v11540_v21 = vld [vmem:[%s15331_s1 + $0x1ec0] ss:$16 sps:$4 sm:$0xff]   ;;  %v11543_v22 = vld [vmem:[%s15331_s1 + $0x1ec8] ss:$16 sps:$4 sm:$0xff]  }
 0x3a4   :  { %7311 = vmatprep.subr.bf16.mxu0 %v11464_v23  ;;  %8159 = vmatprep.subr.bf16.mxu1 %v11467_v24  ;;  %v11548_v23 = vld [vmem:[%s15331_s1 + $0x1ee4] ss:$16 sps:$4 sm:$0xff]   ;;  %v11551_v24 = vld [vmem:[%s15331_s1 + $0x1eec] ss:$16 sps:$4 sm:$0xff]  }
 0x3a7   :  { %7312 = vmatpush1.bf16.msra.mxu0 %v11462_v26  ;;  %8160 = vmatpush1.bf16.msra.mxu1 %v11465_v25  ;;  %v11546_v26 = vld [vmem:[%s15331_s1 + $0x1ee0] ss:$16 sps:$4 sm:$0xff]   ;;  %v11549_v25 = vld [vmem:[%s15331_s1 + $0x1ee8] ss:$16 sps:$4 sm:$0xff]  }
 0x3a8   :  { %7313 = vmatprep.subr.bf16.mxu0 %v11470_v27  ;;  %8161 = vmatprep.subr.bf16.mxu1 %v11473_v28  ;;  %v11554_v27 = vld [vmem:[%s15331_s1 + $0x1f04] ss:$16 sps:$4 sm:$0xff]   ;;  %v11557_v28 = vld [vmem:[%s15331_s1 + $0x1f0c] ss:$16 sps:$4 sm:$0xff]  }
 0x3ab   :  { %7314 = vmatpush1.bf16.msra.mxu0 %v11468_v29  ;;  %8162 = vmatpush1.bf16.msra.mxu1 %v11471_v30  ;;  %v11552_v29 = vld [vmem:[%s15331_s1 + $0x1f00] ss:$16 sps:$4 sm:$0xff]   ;;  %v11555_v30 = vld [vmem:[%s15331_s1 + $0x1f08] ss:$16 sps:$4 sm:$0xff]  }
 0x3ac   :  { %7315 = vmatprep.subr.bf16.mxu0 %v11476_v31  ;;  %8163 = vmatprep.subr.bf16.mxu1 %v11479_v32  ;;  %v11560_v31 = vld [vmem:[%s15331_s1 + $0x1f24] ss:$16 sps:$4 sm:$0xff]   ;;  %v11563_v32 = vld [vmem:[%s15331_s1 + $0x1f2c] ss:$16 sps:$4 sm:$0xff]  }
 0x3af   :  { %7316 = vmatpush1.bf16.msra.mxu0 %v11474_v34  ;;  %8164 = vmatpush1.bf16.msra.mxu1 %v11477_v36  ;;  %v11558_v34 = vld [vmem:[%s15331_s1 + $0x1f20] ss:$16 sps:$4 sm:$0xff]   ;;  %v11561_v36 = vld [vmem:[%s15331_s1 + $0x1f28] ss:$16 sps:$4 sm:$0xff]  }
 0x3b0   :  { %7317 = vmatprep.subr.bf16.mxu0 %v11482_v33  ;;  %8165 = vmatprep.subr.bf16.mxu1 %v11485_v35  ;;  %v11566_v33 = vld [vmem:[%s15331_s1 + $0x1f44] ss:$16 sps:$4 sm:$0xff]   ;;  %v11569_v35 = vld [vmem:[%s15331_s1 + $0x1f4c] ss:$16 sps:$4 sm:$0xff]  }
 0x3b3   :  { %7318 = vmatpush1.bf16.msra.mxu0 %v11480_v37  ;;  %8166 = vmatpush1.bf16.msra.mxu1 %v11483_v38  ;;  %v11564_v37 = vld [vmem:[%s15331_s1 + $0x1f40] ss:$16 sps:$4 sm:$0xff]   ;;  %v11567_v38 = vld [vmem:[%s15331_s1 + $0x1f48] ss:$16 sps:$4 sm:$0xff]  }
 0x3b4   :  { %7319 = vmatprep.subr.bf16.mxu0 %v11488_v39  ;;  %8167 = vmatprep.subr.bf16.mxu1 %v11491_v40  ;;  %v11572_v39 = vld [vmem:[%s15331_s1 + $0x1f64] ss:$16 sps:$4 sm:$0xff]   ;;  %v11575_v40 = vld [vmem:[%s15331_s1 + $0x1f6c] ss:$16 sps:$4 sm:$0xff]  }
 0x3b7   :  { %7320 = vmatpush1.bf16.msra.mxu0 %v11486_v42  ;;  %8168 = vmatpush1.bf16.msra.mxu1 %v11489_v44  ;;  %v11570_v42 = vld [vmem:[%s15331_s1 + $0x1f60] ss:$16 sps:$4 sm:$0xff]   ;;  %v11573_v44 = vld [vmem:[%s15331_s1 + $0x1f68] ss:$16 sps:$4 sm:$0xff]  }
 0x3b8   :  { %7321 = vmatprep.subr.bf16.mxu0 %v11494_v41  ;;  %8169 = vmatprep.subr.bf16.mxu1 %v11497_v43  ;;  %v11578_v41 = vld [vmem:[%s15331_s1 + $0x1f84] ss:$16 sps:$4 sm:$0xff]   ;;  %v11581_v43 = vld [vmem:[%s15331_s1 + $0x1f8c] ss:$16 sps:$4 sm:$0xff]  }
 0x3bb   :  { %7322 = vmatpush1.bf16.msra.mxu0 %v11492_v45  ;;  %8170 = vmatpush1.bf16.msra.mxu1 %v11495_v46  ;;  %v11576_v45 = vld [vmem:[%s15331_s1 + $0x1f80] ss:$16 sps:$4 sm:$0xff]   ;;  %v11579_v46 = vld [vmem:[%s15331_s1 + $0x1f88] ss:$16 sps:$4 sm:$0xff]  }
 0x3bc   :  { %7323 = vmatprep.subr.bf16.mxu0 %v11500_v47  ;;  %8171 = vmatprep.subr.bf16.mxu1 %v11503_v48  ;;  %v11584_v47 = vld [vmem:[%s15331_s1 + $0x1fa4] ss:$16 sps:$4 sm:$0xff]   ;;  %v11587_v48 = vld [vmem:[%s15331_s1 + $0x1fac] ss:$16 sps:$4 sm:$0xff]  }
 0x3bf   :  { %7324 = vmatpush1.bf16.msra.mxu0 %v11498_v51  ;;  %8172 = vmatpush1.bf16.msra.mxu1 %v11501_v52  ;;  %v11582_v51 = vld [vmem:[%s15331_s1 + $0x1fa0] ss:$16 sps:$4 sm:$0xff]   ;;  %v11585_v52 = vld [vmem:[%s15331_s1 + $0x1fa8] ss:$16 sps:$4 sm:$0xff]  }
 0x3c0   :  { %7346 = vmatprep.subr.bf16.mxu0 %v11506_v49  ;;  %8194 = vmatprep.subr.bf16.mxu1 %v11509_v50  ;;  %v11590_v49 = vld [vmem:[%s15331_s1 + $0x1fc4] ss:$16 sps:$4 sm:$0xff]   ;;  %v11593_v50 = vld [vmem:[%s15331_s1 + $0x1fcc] ss:$16 sps:$4 sm:$0xff]  }
 0x3c2   :  { %7326 = vmatmul.mubr.bf16.vlgmr.msra.gmra.mrb[0].mxu0 %v8745_v53  ;;  %8174 = vmatmul.mubr.bf16.vlgmr.msra.gmra.mrb[0].mxu1 %v8745_v53  ;;  %v11588_v53 = vld [vmem:[%s15331_s1 + $0x1fc0] ss:$16 sps:$4 sm:$0xff]  }
 0x3c3   :  { %7347 = vmatpush1.bf16.msra.mxu0 %v11504_v56  ;;  %8195 = vmatpush1.bf16.msra.mxu1 %v11507_v59  ;;  %v11599_v56 = vld [vmem:[%s15331_s1 + $0x1fec] ss:$16 sps:$4 sm:$0xff]   ;;  %v11594_v59 = vld [vmem:[%s15331_s1 + $0x1fe0] ss:$16 sps:$4 sm:$0xff]  }
 0x3c4   :  { %7348 = vmatprep.subr.bf16.mxu0 %v11512_v60  ;;  %8196 = vmatprep.subr.bf16.mxu1 %v11515_v57  ;;  %v11597_v60 = vld [vmem:[%s15331_s1 + $0x1fe8] ss:$16 sps:$4 sm:$0xff]  }
 0x3c5   :  { %7335 = vmatprep.mubr.bf16.mxu0 %v8778_v58  ;;  %8183 = vmatprep.mubr.bf16.mxu1 %v8778_v58  ;;  %v70_v57 = vld [vmem:[%s15332_s0 + $0x178] sm:$0xff] }
 0x3c6   :  { %v86_v58 = vld [vmem:[%s15332_s0 + $0x1f8] sm:$0xff] }
 0x3c7   :  { %7349 = vmatpush1.bf16.msra.mxu0 %v11510_v61  ;;  %8197 = vmatpush1.bf16.msra.mxu1 %v11513_v62  ;;  %v8747_v61 = vcombine.low %v14853_v4, %v14858_v1  ;;  %v8780_v62 = vcombine.high %v70_v57, %v86_v58  ;;  %v8393_v1 = vlaneseq }
 0x3c8   :  { %7350 = vmatprep.subr.bf16.mxu0 %v11518_v63  ;;  %8198 = vmatprep.subr.bf16.mxu1 %v11521_v0  ;;  %v8779_v63 = vcombine.low %v70_v57, %v86_v58  ;;  %v11612_v0 = vmov 0.0  }
 0x3ca   :  { %7336 = vmatmul.mubr.bf16.gmra.mrb[4].mxu0 %v8777_v3  ;;  %8184 = vmatmul.mubr.bf16.gmra.mrb[4].mxu1 %v8777_v3 }
 0x3cb   :  { %7351 = vmatpush1.bf16.msra.mxu0 %v11516_v2  ;;  %8199 = vmatpush1.bf16.msra.mxu1 %v11519_v5 }
 0x3cc   :  { %7352 = vmatprep.subr.bf16.mxu0 %v11524_v6  ;;  %8200 = vmatprep.subr.bf16.mxu1 %v11527_v7 }
 0x3cd   :  { %7378 = vmatprep.mubr.bf16.mxu0 %v8748_v8  ;;  %8226 = vmatprep.mubr.bf16.mxu1 %v8748_v8 }
 0x3cf   :  { %7353 = vmatpush1.bf16.msra.mxu0 %v11522_v11  ;;  %8201 = vmatpush1.bf16.msra.mxu1 %v11525_v12 }
 0x3d0   :  { %7354 = vmatprep.subr.bf16.mxu0 %v11530_v9  ;;  %8202 = vmatprep.subr.bf16.mxu1 %v11533_v10 }
 0x3d3   :  { %7355 = vmatpush1.bf16.msra.mxu0 %v11528_v13  ;;  %8203 = vmatpush1.bf16.msra.mxu1 %v11531_v14 }
 0x3d4   :  { %7356 = vmatprep.subr.bf16.mxu0 %v11536_v15  ;;  %8204 = vmatprep.subr.bf16.mxu1 %v11539_v16 }
 0x3d7   :  { %7357 = vmatpush1.bf16.msra.mxu0 %v11534_v19  ;;  %8205 = vmatpush1.bf16.msra.mxu1 %v11537_v17 }
 0x3d8   :  { %7358 = vmatprep.subr.bf16.mxu0 %v11542_v18  ;;  %8206 = vmatprep.subr.bf16.mxu1 %v11545_v20 }
 0x3db   :  { %7359 = vmatpush1.bf16.msra.mxu0 %v11540_v21  ;;  %8207 = vmatpush1.bf16.msra.mxu1 %v11543_v22 }
 0x3dc   :  { %7360 = vmatprep.subr.bf16.mxu0 %v11548_v23  ;;  %8208 = vmatprep.subr.bf16.mxu1 %v11551_v24 }
 0x3df   :  { %7361 = vmatpush1.bf16.msra.mxu0 %v11546_v26  ;;  %8209 = vmatpush1.bf16.msra.mxu1 %v11549_v25 }
 0x3e0   :  { %7362 = vmatprep.subr.bf16.mxu0 %v11554_v27  ;;  %8210 = vmatprep.subr.bf16.mxu1 %v11557_v28  ;;  %v15076_v28 = vshrl.u32 %v8393_v1, 7 }
 0x3e3   :  { %7363 = vmatpush1.bf16.msra.mxu0 %v11552_v29  ;;  %8211 = vmatpush1.bf16.msra.mxu1 %v11555_v30 }
 0x3e4   :  { %7364 = vmatprep.subr.bf16.mxu0 %v11560_v31  ;;  %8212 = vmatprep.subr.bf16.mxu1 %v11563_v32 }
 0x3e7   :  { %7365 = vmatpush1.bf16.msra.mxu0 %v11558_v34  ;;  %8213 = vmatpush1.bf16.msra.mxu1 %v11561_v36 }
 0x3e8   :  { %7366 = vmatprep.subr.bf16.mxu0 %v11566_v33  ;;  %8214 = vmatprep.subr.bf16.mxu1 %v11569_v35 }
 0x3eb   :  { %7367 = vmatpush1.bf16.msra.mxu0 %v11564_v37  ;;  %8215 = vmatpush1.bf16.msra.mxu1 %v11567_v38 }
 0x3ec   :  { %7368 = vmatprep.subr.bf16.mxu0 %v11572_v39  ;;  %8216 = vmatprep.subr.bf16.mxu1 %v11575_v40 }
 0x3ef   :  { %7369 = vmatpush1.bf16.msra.mxu0 %v11570_v42  ;;  %8217 = vmatpush1.bf16.msra.mxu1 %v11573_v44 }
 0x3f0   :  { %7370 = vmatprep.subr.bf16.mxu0 %v11578_v41  ;;  %8218 = vmatprep.subr.bf16.mxu1 %v11581_v43 }
 0x3f3   :  { %7371 = vmatpush1.bf16.msra.mxu0 %v11576_v45  ;;  %8219 = vmatpush1.bf16.msra.mxu1 %v11579_v46 }
 0x3f4   :  { %7372 = vmatprep.subr.bf16.mxu0 %v11584_v47  ;;  %8220 = vmatprep.subr.bf16.mxu1 %v11587_v48 }
 0x3f7   :  { %7373 = vmatpush1.bf16.msra.mxu0 %v11582_v51  ;;  %8221 = vmatpush1.bf16.msra.mxu1 %v11585_v52 }
 0x3f8   :  { %7374 = vmatprep.subr.bf16.mxu0 %v11590_v49  ;;  %8222 = vmatprep.subr.bf16.mxu1 %v11593_v50 }
 0x3fb   :  { %7375 = vmatpush1.bf16.msra.mxu0 %v11588_v53  ;;  %8223 = vmatpush1.bf16.msra.mxu1 %v11591_v54 }
 0x3fc   :  { %7376 = vmatprep.subr.bf16.mxu0 %v11596_v55  ;;  %8224 = vmatprep.subr.bf16.mxu1 %v11599_v56 }
 0x3ff   :  { %7377 = vmatpush1.bf16.msra.mxu0 %v11594_v59  ;;  %8225 = vmatpush1.bf16.msra.mxu1 %v11597_v60 }
 0x402   :  { %7379 = vmatmul.mubr.bf16.vlgmr.msra.gmra.mrb[0].mxu0 %v8747_v61  ;;  %8227 = vmatmul.mubr.bf16.vlgmr.msra.gmra.mrb[0].mxu1 %v8747_v61 }
 0x403   :  { %7388 = vmatprep.mubr.bf16.mxu0 %v8780_v62  ;;  %8236 = vmatprep.mubr.bf16.mxu1 %v8780_v62 }
 0x40a   :  { %7389 = vmatmul.mubr.bf16.gmra.mrb[4].mxu0 %v8779_v63  ;;  %8237 = vmatmul.mubr.bf16.gmra.mrb[4].mxu1 %v8779_v63 }
 0x40b   :  { %8616 = vmatprep.mubr.f32.mxu0 %v11612_v0  ;;  %8687 = vmatprep.mubr.f32.mxu1 %v11612_v0 }
 0x4d5   :  { %v15032_v3 = vpop.f32.mrb[0].mxu0  ;;  %v15034_v2 = vpop.f32.mrb[0].mxu1 }
 0x4d6   :  { %v15036_v5 = vpop.f32.mrb[1].mxu0  ;;  %v15038_v4 = vpop.f32.mrb[1].mxu1  ;;  %v8287_v6 = vmul.f32 %v15032_v3, %v15032_v3  ;;  %v8289_v7 = vmul.f32 %v15034_v2, %v15034_v2 }
 0x4d7   :  { %v8288_v8 = vmul.f32 %v15036_v5, %v15036_v5  ;;  %v8290_v11 = vmul.f32 %v15038_v4, %v15038_v4  ;;  %v15048_v12 = vpop.f32.mrb[2].mxu0  ;;  %v15050_v9 = vpop.f32.mrb[2].mxu1 }
 0x4d8   :  { %v8247_v10 = vadd.f32 %v15048_v12, %v15032_v3  ;;  %v8291_v13 = vmul.f32 %v15048_v12, %v15048_v12  ;;  %v8265_v14 = vadd.f32 %v15050_v9, %v15034_v2  ;;  %v8293_v15 = vmul.f32 %v15050_v9, %v15050_v9  ;;  %v15060_v16 = vpop.f32.mrb[3].mxu0  ;;  %v15062_v19 = vpop.f32.mrb[3].mxu1 }
 0x4d9   :  { %v8256_v17 = vadd.f32 %v15060_v16, %v15036_v5  ;;  %v8292_v18 = vmul.f32 %v15060_v16, %v15060_v16  ;;  %v8274_v20 = vadd.f32 %v15062_v19, %v15038_v4  ;;  %v8294_v21 = vmul.f32 %v15062_v19, %v15062_v19 }
 0x4da   :  { %v8303_v22 = vadd.f32 %v8291_v13, %v8287_v6  ;;  %v8321_v23 = vadd.f32 %v8293_v15, %v8289_v7 }
 0x4db   :  { %v8312_v24 = vadd.f32 %v8292_v18, %v8288_v8  ;;  %v8330_v26 = vadd.f32 %v8294_v21, %v8290_v11 }
 0x4dd   :  { %v15072_v25 = vpop.f32.mrb[4].mxu0  ;;  %v15074_v27 = vpop.f32.mrb[4].mxu1 }
 0x4de   :  { %v8248_v29 = vadd.f32 %v8247_v10, %v15072_v25  ;;  %v8295_v30 = vmul.f32 %v15072_v25, %v15072_v25  ;;  %v8266_v31 = vadd.f32 %v8265_v14, %v15074_v27  ;;  %v8297_v32 = vmul.f32 %v15074_v27, %v15074_v27  ;;  %v15084_v34 = vpop.f32.mrb[5].mxu0  ;;  %v15086_v36 = vpop.f32.mrb[5].mxu1 }
 0x4df   :  { %v8257_v33 = vadd.f32 %v8256_v17, %v15084_v34  ;;  %v8296_v35 = vmul.f32 %v15084_v34, %v15084_v34  ;;  %v8275_v37 = vadd.f32 %v8274_v20, %v15086_v36  ;;  %v8298_v38 = vmul.f32 %v15086_v36, %v15086_v36  ;;  %v15094_v39 = vpop.f32.mrb[6].mxu0  ;;  %v15096_v40 = vpop.f32.mrb[6].mxu1 }
 0x4e0   :  { %v8304_v42 = vadd.f32 %v8303_v22, %v8295_v30  ;;  %v8322_v44 = vadd.f32 %v8321_v23, %v8297_v32  ;;  %v8249_v41 = vadd.f32 %v8248_v29, %v15094_v39  ;;  %v8299_v43 = vmul.f32 %v15094_v39, %v15094_v39  ;;  %v15101_v45 = vpop.f32.mrb[7].mxu0  ;;  %v15103_v46 = vpop.f32.mrb[7].mxu1 }
 0x4e1   :  { %v8313_v47 = vadd.f32 %v8312_v24, %v8296_v35  ;;  %v8331_v48 = vadd.f32 %v8330_v26, %v8298_v38  ;;  %v8267_v51 = vadd.f32 %v8266_v31, %v15096_v40  ;;  %v8301_v52 = vmul.f32 %v15096_v40, %v15096_v40 }
 0x4e2   :  { %v8250_v49 = vrot.slane %v8249_v41, 4  ;;  %v8305_v50 = vadd.f32 %v8304_v42, %v8299_v43  ;;  %v8258_v53 = vadd.f32 %v8257_v33, %v15101_v45  ;;  %v8300_v54 = vmul.f32 %v15101_v45, %v15101_v45 }
 0x4e3   :  { %v8268_v55 = vrot.slane %v8267_v51, 4  ;;  %v8323_v56 = vadd.f32 %v8322_v44, %v8301_v52  ;;  %v8276_v59 = vadd.f32 %v8275_v37, %v15103_v46  ;;  %v8302_v60 = vmul.f32 %v15103_v46, %v15103_v46 }
 0x4e4   :  { %v8251_v57 = vadd.f32 %v8250_v49, %v8249_v41  ;;  %v8306_v58 = vrot.slane %v8305_v50, 4  ;;  %v8259_v61 = vrot.slane %v8258_v53, 4  ;;  %v8314_v62 = vadd.f32 %v8313_v47, %v8300_v54 }
 0x4e5   :  { %v8269_v63 = vadd.f32 %v8268_v55, %v8267_v51  ;;  %v8324_v0 = vrot.slane %v8323_v56, 4  ;;  %v8277_v1 = vrot.slane %v8276_v59, 4  ;;  %v8332_v6 = vadd.f32 %v8331_v48, %v8302_v60 }
 0x4e6   :  { %v8252_v7 = vrot.slane %v8251_v57, 2  ;;  %v8307_v8 = vadd.f32 %v8306_v58, %v8305_v50  ;;  %v8260_v11 = vadd.f32 %v8259_v61, %v8258_v53  ;;  %v8315_v10 = vrot.slane %v8314_v62, 4 }
 0x4e7   :  { %v8270_v13 = vrot.slane %v8269_v63, 2  ;;  %v8325_v14 = vadd.f32 %v8324_v0, %v8323_v56  ;;  %v8278_v15 = vadd.f32 %v8277_v1, %v8276_v59  ;;  %v8333_v17 = vrot.slane %v8332_v6, 4 }
 0x4e8   :  { %v8253_v18 = vadd.f32 %v8252_v7, %v8251_v57  ;;  %v8308_v20 = vrot.slane %v8307_v8, 2  ;;  %v8261_v21 = vrot.slane %v8260_v11, 2  ;;  %v8316_v22 = vadd.f32 %v8315_v10, %v8314_v62 }
 0x4e9   :  { %v8271_v23 = vadd.f32 %v8270_v13, %v8269_v63  ;;  %v8326_v24 = vrot.slane %v8325_v14, 2  ;;  %v8279_v26 = vrot.slane %v8278_v15, 2  ;;  %v8334_v29 = vadd.f32 %v8333_v17, %v8332_v6 }
 0x4ea   :  { %v8254_v30 = vrot.slane %v8253_v18, 1  ;;  %v8309_v31 = vadd.f32 %v8308_v20, %v8307_v8  ;;  %v8262_v32 = vadd.f32 %v8261_v21, %v8260_v11  ;;  %v8317_v33 = vrot.slane %v8316_v22, 2 }
 0x4eb   :  { %v8272_v35 = vrot.slane %v8271_v23, 1  ;;  %v8327_v37 = vadd.f32 %v8326_v24, %v8325_v14  ;;  %v8280_v38 = vadd.f32 %v8279_v26, %v8278_v15  ;;  %v8335_v42 = vrot.slane %v8334_v29, 2 }
 0x4ec   :  { %v8255_v44 = vadd.f32 %v8254_v30, %v8253_v18  ;;  %v8310_v41 = vrot.slane %v8309_v31, 1  ;;  %v8263_v43 = vrot.slane %v8262_v32, 1  ;;  %v8318_v47 = vadd.f32 %v8317_v33, %v8316_v22 }
 0x4ed   :  { %v8273_v48 = vadd.f32 %v8272_v35, %v8271_v23  ;;  %v8328_v51 = vrot.slane %v8327_v37, 1  ;;  %v8281_v52 = vrot.slane %v8280_v38, 1  ;;  %v8336_v49 = vadd.f32 %v8335_v42, %v8334_v29  ;;  %v8429_v42 = vld [vmem:[%s15334_s3] sm:$0xf] }
 0x4ee   :  { %v15114_v50 = vmul.f32 0.03125, %v8255_v44  ;;  %v8311_v53 = vadd.f32 %v8310_v41, %v8309_v31  ;;  %v8264_v54 = vadd.f32 %v8263_v43, %v8262_v32  ;;  %v8319_v55 = vrot.slane %v8318_v47, 1 }
 0x4ef   :  { %v15116_v56 = vmul.f32 0.03125, %v8273_v48  ;;  %v8329_v59 = vadd.f32 %v8328_v51, %v8327_v37  ;;  %v8282_v60 = vadd.f32 %v8281_v52, %v8280_v38  ;;  %v8337_v57 = vrot.slane %v8336_v49, 1 }
 0x4f0   :  { %v8339_v58 = vmul.f32 0.03125, %v8311_v53  ;;  %v8343_v61 = vmul.f32 %v15114_v50, %v15114_v50  ;;  %v8363_v62 = vsub.f32 %v15094_v39, %v15114_v50  ;;  %v15122_v63 = vmul.f32 0.03125, %v8264_v54 }
 0x4f1   :  { %v8341_v0 = vmul.f32 0.03125, %v8329_v59  ;;  %v8345_v1 = vmul.f32 %v15116_v56, %v15116_v56  ;;  %v8365_v6 = vsub.f32 %v15096_v40, %v15116_v56  ;;  %v8320_v7 = vadd.f32 %v8319_v55, %v8318_v47 }
 0x4f2   :  { %v8347_v8 = vsub.f32 %v8339_v58, %v8343_v61  ;;  %v8344_v11 = vmul.f32 %v15122_v63, %v15122_v63  ;;  %v8364_v10 = vsub.f32 %v15101_v45, %v15122_v63  ;;  %v15132_v13 = vmul.f32 0.03125, %v8282_v60 }
 0x4f3   :  { %v8349_v39 = vsub.f32 %v8341_v0, %v8345_v1  ;;  %v8340_v14 = vmul.f32 0.03125, %v8320_v7  ;;  %v8338_v15 = vadd.f32 %v8337_v57, %v8336_v49  ;;  %v8352_v17 = vsub.f32 %v15036_v5, %v15122_v63 }
 0x4f4   :  { %v8367_v18 = vadd.f32 1e-05, %v8347_v8  ;;  %v8346_v40 = vmul.f32 %v15132_v13, %v15132_v13  ;;  %v8366_v20 = vsub.f32 %v15103_v46, %v15132_v13  ;;  %v8356_v21 = vsub.f32 %v15060_v16, %v15122_v63 }
 0x4f5   :  { %v8369_v22 = vadd.f32 1e-05, %v8349_v39  ;;  %v8348_v45 = vsub.f32 %v8340_v14, %v8344_v11  ;;  %v8342_v23 = vmul.f32 0.03125, %v8338_v15  ;;  %v8354_v24 = vsub.f32 %v15038_v4, %v15132_v13 }
 0x4f6   :  { %11600 = vrsqrt.f32 %v8367_v18  ;;  %v8358_v5 = vsub.f32 %v15062_v19, %v15132_v13  ;;  %v8351_v26 = vsub.f32 %v15032_v3, %v15114_v50  ;;  %v8355_v29 = vsub.f32 %v15048_v12, %v15114_v50 }
 0x4f7   :  { %11602 = vrsqrt.f32 %v8369_v22  ;;  %v8368_v30 = vadd.f32 1e-05, %v8348_v45  ;;  %v8350_v31 = vsub.f32 %v8342_v23, %v8346_v40  ;;  %v8353_v16 = vsub.f32 %v15034_v2, %v15116_v56 }
 0x4f8   :  { %v8357_v32 = vsub.f32 %v15050_v9, %v15116_v56  ;;  %v8360_v33 = vsub.f32 %v15084_v34, %v15122_v63  ;;  %v8362_v35 = vsub.f32 %v15086_v36, %v15132_v13  ;;  %v8359_v3 = vsub.f32 %v15072_v25, %v15114_v50  ;;  %v8391_v9 = vld [vmem:[%s15333_s2] sm:$0xf]  ;;  %v8530_v13 = vld [vmem:[%s15335_s4 + $0x78] sm:$0xff] }
 0x4f9   :  { %11604 = vrsqrt.f32 %v8368_v30  ;;  %v8370_v12 = vadd.f32 1e-05, %v8350_v31  ;;  %v8361_v37 = vsub.f32 %v15074_v27, %v15116_v56  ;;  %v8395_v38 = vsub.s32 0, %v15076_v28 }
 0x4fa   :  { %v8403_v2 = vsub.s32 2, %v15076_v28  ;;  %v8399_v25 = vsub.s32 1, %v15076_v28  ;;  %v8407_v44 = vsub.s32 3, %v15076_v28 }
 0x4fb   :  { %11606 = vrsqrt.f32 %v8370_v12  ;;  %v8396_v41 = vrot.slane %v8391_v9, %v8395_v38  ;;  %v15172_v43 = vrot.slane %v8429_v42, %v8395_v38 }
 0x4fc   :  { %v15174_v27 = vrot.slane %v8391_v9, %v8403_v2  ;;  %v15176_v47 = vrot.slane %v8429_v42, %v8403_v2  ;;  %v15178_v51 = vrot.slane %v8391_v9, %v8399_v25  ;;  %v15180_v52 = vrot.slane %v8429_v42, %v8399_v25 }
 0x4fd   :  { %v15182_v49 = vrot.slane %v8391_v9, %v8407_v44  ;;  %v15184_v50 = vrot.slane %v8429_v42, %v8407_v44  ;;  %v8515_v44 = vld [vmem:[%s15335_s4] sm:$0xff] }
 0x500   :  { %v11601_v48 = vpop.eup %11600 }
 0x501   :  { %v11603_v53 = vpop.eup %11602  ;;  %v8387_v54 = vmul.f32 %v11601_v48, %v8363_v62  ;;  %v8375_v55 = vmul.f32 %v11601_v48, %v8351_v26  ;;  %v8379_v28 = vmul.f32 %v11601_v48, %v8355_v29  ;;  %v8383_v56 = vmul.f32 %v11601_v48, %v8359_v3  ;;  %v8516_v3 = vld [vmem:[%s15335_s4 + $0x8] sm:$0xff] }
 0x502   :  { %v8389_v59 = vmul.f32 %v11603_v53, %v8365_v6  ;;  %v8377_v60 = vmul.f32 %v11603_v53, %v8353_v16  ;;  %v8381_v57 = vmul.f32 %v11603_v53, %v8357_v32  ;;  %v15186_v58 = vmul.f32 %v11603_v53, %v8361_v37  ;;  %v8520_v37 = vld [vmem:[%s15335_s4 + $0x28] sm:$0xff] }
 0x503   :  { %v15188_v61 = vpop.eup %11604  ;;  %v8425_v0 = vmul.f32 %v8396_v41, %v8387_v54  ;;  %v8413_v1 = vmul.f32 %v8396_v41, %v8375_v55  ;;  %v8417_v7 = vmul.f32 %v8396_v41, %v8379_v28  ;;  %v15190_v8 = vmul.f32 %v8396_v41, %v8383_v56  ;;  %v8519_v54 = vld [vmem:[%s15335_s4 + $0x20] sm:$0xff] }
 0x504   :  { %v8427_v11 = vmul.f32 %v15174_v27, %v8389_v59  ;;  %v8388_v39 = vmul.f32 %v15188_v61, %v8364_v10  ;;  %v8376_v62 = vmul.f32 %v15188_v61, %v8352_v17  ;;  %v8380_v14 = vmul.f32 %v15188_v61, %v8356_v21  ;;  %v8518_v59 = vld [vmem:[%s15335_s4 + $0x18] sm:$0xff] }
 0x505   :  { %v15196_v6 = vpop.eup %11606  ;;  %v15199_v15 = vadd.f32 %v15172_v43, %v8425_v0  ;;  %v8451_v18 = vadd.f32 %v15172_v43, %v8413_v1  ;;  %v8455_v40 = vadd.f32 %v15172_v43, %v8417_v7  ;;  %v8415_v22 = vmul.f32 %v15174_v27, %v8377_v60  ;;  %v8522_v60 = vld [vmem:[%s15335_s4 + $0x38] sm:$0xff] }
 0x506   :  { %v15205_v45 = vadd.f32 %v15176_v47, %v8427_v11  ;;  %v8426_v10 = vmul.f32 %v15178_v51, %v8388_v39  ;;  %v8390_v17 = vmul.f32 %v15196_v6, %v8366_v20  ;;  %v8414_v21 = vmul.f32 %v15178_v51, %v8376_v62 }
 0x507   :  { %v15214_v23 = vmul.f32 0.2, %v15199_v15  ;;  %v8418_v26 = vmul.f32 %v15178_v51, %v8380_v14  ;;  %v8378_v29 = vmul.f32 %v15196_v6, %v8354_v24  ;;  %v8382_v30 = vmul.f32 %v15196_v6, %v8358_v5 }
 0x508   :  { %v15226_v46 = vmul.f32 0.2, %v15205_v45  ;;  %v15229_v20 = vadd.f32 %v15180_v52, %v8426_v10  ;;  %v8428_v31 = vmul.f32 %v15182_v49, %v8390_v17  ;;  %v8452_v16 = vadd.f32 %v15180_v52, %v8414_v21 }
 0x509   :  { %v8456_v32 = vadd.f32 %v15180_v52, %v8418_v26  ;;  %v8416_v4 = vmul.f32 %v15182_v49, %v8378_v29  ;;  %v8420_v24 = vmul.f32 %v15182_v49, %v8382_v30  ;;  %vm8467_vm0 = vcmp.gt.f32.partialorder %v8451_v18, 0.0 }
 0x50a   :  { %v15237_v19 = vadd.f32 %v15184_v50, %v8428_v31  ;;  %vm8468_vm1 = vcmp.gt.f32.partialorder %v8452_v16, 0.0  ;;  %v8484_v5 = vmul.f32 0.2, %v8452_v16  ;;  %vm8471_vm2 = vcmp.gt.f32.partialorder %v8455_v40, 0.0 }
 0x50b   :  { %vm8472_vm3 = vcmp.gt.f32.partialorder %v8456_v32, 0.0  ;;  %v8488_v12 = vmul.f32 0.2, %v8456_v32  ;;  %v8454_v38 = vadd.f32 %v15184_v50, %v8416_v4  ;;  %v8458_v2 = vadd.f32 %v15184_v50, %v8420_v24 }
 0x50c   :  { %v8500_v9 = vsel %vm8468_vm1, %v8452_v16, %v8484_v5  ;;  %v8483_v42 = vmul.f32 0.2, %v8451_v18  ;;  %v8487_v25 = vmul.f32 0.2, %v8455_v40  ;;  %v8419_v41 = vmul.f32 %v15174_v27, %v8381_v57 }
 0x50d   :  { %v8504_v48 = vsel %vm8472_vm3, %v8456_v32, %v8488_v12  ;;  %v8532_v53 = vmul.f32 %v8516_v3, %v8500_v9  ;;  %vm8470_vm4 = vcmp.gt.f32.partialorder %v8454_v38, 0.0  ;;  %vm8474_vm5 = vcmp.gt.f32.partialorder %v8458_v2, 0.0  ;;  %v8528_v32 = vld [vmem:[%s15335_s4 + $0x68] sm:$0xff] }
 0x50e   :  { %v8536_v55 = vmul.f32 %v8520_v37, %v8504_v48  ;;  %v8486_v28 = vmul.f32 0.2, %v8454_v38  ;;  %v8490_v56 = vmul.f32 0.2, %v8458_v2  ;;  %v8499_v57 = vsel %vm8467_vm0, %v8451_v18, %v8483_v42  ;;  %v8517_v18 = vld [vmem:[%s15335_s4 + $0x10] sm:$0xff] }
 0x50f   :  { %v8503_v0 = vsel %vm8471_vm2, %v8455_v40, %v8487_v25  ;;  %v8531_v1 = vmul.f32 %v8515_v44, %v8499_v57  ;;  %v8453_v7 = vadd.f32 %v15176_v47, %v8415_v22  ;;  %v8457_v11 = vadd.f32 %v15176_v47, %v8419_v41  ;;  %v8521_v40 = vld [vmem:[%s15335_s4 + $0x30] sm:$0xff] }
 0x510   :  { %v9807_v39 = vpack.c.bf16 %v8536_v55, %v8532_v53  ;;  %v8502_v62 = vsel %vm8470_vm4, %v8454_v38, %v8486_v28  ;;  %v8506_v14 = vsel %vm8474_vm5, %v8458_v2, %v8490_v56  ;;  %v8535_v10 = vmul.f32 %v8519_v54, %v8503_v0  ;;  %v8529_v53 = vld [vmem:[%s15335_s4 + $0x70] sm:$0xff] }
 0x511   :  { %v8534_v17 = vmul.f32 %v8518_v59, %v8502_v62  ;;  %v8538_v21 = vmul.f32 %v8522_v60, %v8506_v14  ;;  %vm8469_vm6 = vcmp.gt.f32.partialorder %v8453_v7, 0.0  ;;  %vm8473_vm7 = vcmp.gt.f32.partialorder %v8457_v11, 0.0 }
 0x512   :  { %9808 = vmatprep.subr.bf16.mxu0 %v9807_v39  ;;  %v9809_v26 = vpack.c.bf16 %v8535_v10, %v8531_v1  ;;  %v8485_v29 = vmul.f32 0.2, %v8453_v7  ;;  %v8489_v30 = vmul.f32 0.2, %v8457_v11  ;;  %v8384_v22 = vmul.f32 %v15188_v61, %v8360_v33  ;;  %v8547_v1 = vld [vmem:[%s15336_s5] sm:$0x3] }
 0x513   :  { %v9815_v31 = vpack.c.bf16 %v8538_v21, %v8534_v17  ;;  %vm8480_vm8 = vcmp.gt.f32.partialorder %v15229_v20, 0.0  ;;  %v8496_v16 = vmul.f32 0.2, %v15229_v20  ;;  %v8386_v4 = vmul.f32 %v15196_v6, %v8362_v35  ;;  %v8524_v6 = vld [vmem:[%s15335_s4 + $0x48] sm:$0xff] }
 0x514   :  { %9810 = vmatpush1.bf16.msra.mxu0 %v9809_v26  ;;  %v8501_v24 = vsel %vm8469_vm6, %v8453_v7, %v8485_v29  ;;  %v8505_v5 = vsel %vm8473_vm7, %v8457_v11, %v8489_v30  ;;  %v8422_v34 = vmul.f32 %v15178_v51, %v8384_v22  ;;  %vm8482_vm9 = vcmp.gt.f32.partialorder %v15237_v19, 0.0 }
 0x515   :  { %9816 = vmatprep.subr.bf16.mxu1 %v9815_v31  ;;  %v8533_v63 = vmul.f32 %v8517_v18, %v8501_v24  ;;  %v8537_v33 = vmul.f32 %v8521_v40, %v8505_v5  ;;  %v8512_v61 = vsel %vm8480_vm8, %v15229_v20, %v8496_v16  ;;  %v8424_v3 = vmul.f32 %v15182_v49, %v8386_v4 }
 0x516   :  { %v8460_v12 = vadd.f32 %v15180_v52, %v8422_v34  ;;  %v8544_v37 = vmul.f32 %v8528_v32, %v8512_v61  ;;  %v8498_v36 = vmul.f32 0.2, %v15237_v19  ;;  %v8459_v35 = vadd.f32 %v15172_v43, %v15190_v8  ;;  %v8526_v43 = vld [vmem:[%s15335_s4 + $0x58] sm:$0xff] }
 0x517   :  { %v9817_v51 = vpack.c.bf16 %v8537_v33, %v8533_v63  ;;  %v8462_v20 = vadd.f32 %v15184_v50, %v8424_v3  ;;  %vm8479_vm10 = vcmp.gt.f32.partialorder %v15199_v15, 0.0  ;;  %v8423_v52 = vmul.f32 %v15174_v27, %v15186_v58  ;;  %v8527_v50 = vld [vmem:[%s15335_s4 + $0x60] sm:$0xff] }
 0x518   :  { %vm8476_vm11 = vcmp.gt.f32.partialorder %v8460_v12, 0.0  ;;  %v8492_v49 = vmul.f32 0.2, %v8460_v12  ;;  %v8514_v38 = vsel %vm8482_vm9, %v15237_v19, %v8498_v36  ;;  %vm8475_vm12 = vcmp.gt.f32.partialorder %v8459_v35, 0.0  ;;  %v8523_v58 = vld [vmem:[%s15335_s4 + $0x40] sm:$0xff] }
 0x519   :  { %9818 = vmatpush1.bf16.msra.mxu1 %v9817_v51  ;;  %vm8478_vm13 = vcmp.gt.f32.partialorder %v8462_v20, 0.0  ;;  %v8494_v8 = vmul.f32 0.2, %v8462_v20  ;;  %v8546_v2 = vmul.f32 %v8530_v13, %v8514_v38  ;;  %v8491_v27 = vmul.f32 0.2, %v8459_v35 }
 0x51a   :  { %v8508_v9 = vsel %vm8476_vm11, %v8460_v12, %v8492_v49  ;;  %v8511_v19 = vsel %vm8479_vm10, %v15199_v15, %v15214_v23  ;;  %v8461_v42 = vadd.f32 %v15176_v47, %v8423_v52  ;;  %vm8481_vm14 = vcmp.gt.f32.partialorder %v15205_v45, 0.0  ;;  %v8525_v15 = vld [vmem:[%s15335_s4 + $0x50] sm:$0xff] }
 0x51b   :  { %v8540_v25 = vmul.f32 %v8524_v6, %v8508_v9  ;;  %v8510_v44 = vsel %vm8478_vm13, %v8462_v20, %v8494_v8  ;;  %v8507_v41 = vsel %vm8475_vm12, %v8459_v35, %v8491_v27  ;;  %v8543_v48 = vmul.f32 %v8527_v50, %v8511_v19 }
 0x51c   :  { %v8542_v54 = vmul.f32 %v8526_v43, %v8510_v44  ;;  %v8539_v55 = vmul.f32 %v8523_v58, %v8507_v41  ;;  %vm8477_vm15 = vcmp.gt.f32.partialorder %v8461_v42, 0.0  ;;  %v8493_v28 = vmul.f32 0.2, %v8461_v42 }
 0x51d   :  { %v9811_v23 = vpack.c.bf16 %v8544_v37, %v8540_v25  ;;  %v8513_v47 = vsel %vm8481_vm14, %v15205_v45, %v15226_v46  ;;  %vm8548_vm0 = vcmask 261120   ;;  %vm8694_vm1 = vcmask 1041408  }
 0x51e   :  { %v9819_v56 = vpack.c.bf16 %v8546_v2, %v8542_v54  ;;  %v9813_v59 = vpack.c.bf16 %v8543_v48, %v8539_v55  ;;  %v8509_v60 = vsel %vm8477_vm15, %v8461_v42, %v8493_v28  ;;  %v8545_v57 = vmul.f32 %v8529_v53, %v8513_v47 }
 0x51f   :  { %9812 = vmatprep.subr.bf16.mxu0 %v9811_v23  ;;  %v8541_v0 = vmul.f32 %v8525_v15, %v8509_v60  ;;  %vm8711_vm2 = vcmask 1024  }
 0x520   :  { %9820 = vmatprep.subr.bf16.mxu1 %v9819_v56  ;;  %9814 = vmatpush1.bf16.msra.mxu0 %v9813_v59 }
 0x521   :  { %v9821_v7 = vpack.c.bf16 %v8545_v57, %v8541_v0 }
 0x523   :  { %9822 = vmatpush1.bf16.msra.mxu1 %v9821_v7  ;;  %9805 = vmatmul.mubr.msk.f32.vlgmr.msra.gmra.mrb[8].mxu0 %vm8548_vm0, %v8547_v1 }
 0x526   :  { %9806 = vmatmul.mubr.msk.f32.vlgmr.msra.gmra.mrb[8].mxu1 %vm8548_vm0, %v8547_v1 }
 0x5f6   :  { %v8618_v11 = vpop.f32.mrb[8].mxu0 }
 0x5f7   :  { %v8695_v45 = vsel %vm8694_vm1, %v8618_v11, 0.0  ;;  %v8620_v46 = vpop.f32.mrb[9].mxu0 }
 0x5f8   :  { %v8696_v39 = vsel %vm8694_vm1, %v8620_v46, 0.0 }
 0x5f9   :  { %v8697_v62 = vadd.f32 %v8696_v39, %v8695_v45  ;;  %v8689_v14 = vpop.f32.mrb[8].mxu1 }
 0x5fa   :  { %v8698_v10 = vsel %vm8694_vm1, %v8689_v14, 0.0  ;;  %v8691_v17 = vpop.f32.mrb[9].mxu1 }
 0x5fb   :  { %v8699_v21 = vadd.f32 %v8698_v10, %v8697_v62  ;;  %v8700_v26 = vsel %vm8694_vm1, %v8691_v17, 0.0 }
 0x5fd   :  { %v8701_v29 = vadd.f32 %v8700_v26, %v8699_v21 }
 0x5ff   :  { %8702 = vadd.xlane.f32.xlu0 %v8701_v29 }
 0x68c   :  { %v8703_v30 = vpop.xlane.xlu0 %8702 }
 0x68d   :  { %v8704_v18 = vsub.f32 0.0, %v8703_v30 }
 0x68f   :  { %v8705_v40 = vmul.f32 1.442695, %v8704_v18 }
 0x691   :  { %11608 = vpow2.f32 %v8705_v40 }
 0x69b   :  { %v11609_v22 = vpop.eup %11608 }
 0x69c   :  { %v8707_v31 = vadd.f32 1.0, %v11609_v22 }
 0x69e   :  { %11610 = vrcp.f32 %v8707_v31 }
 0x6a8   :  { %v11611_v16 = vpop.eup %11610 }
 0x6a9   :  { %v8709_v32 = vmax.f32 %v11611_v16, 0.0 }
 0x6ab   :  { %v8710_v4 = vmin.f32 %v8709_v32, 1.0 }
 0x6ad   :  { %8712 = vst.msk [vmem:[%s15337_s6] sm:$0x3] %vm8711_vm2, %v8710_v4 }

</bundles_post_ra>
